<compile_context>
chip_gen: v5e
topology: v5e:2x2
jax: 0.10.0
libtpu: 0.0.40
codegen_flags: <defaults>
</compile_context>

<pallas_src>
import math

import jax
import jax.numpy as jnp
from jax import lax
from jax.experimental import pallas as pl
from jax.experimental.pallas import tpu as pltpu

LATENT = 32          # small latent_dims for the example
BATCH = 8
H1, H2, H3 = 256, 512, 1024
OUT = 28 * 28        # 784
OUT_PAD = 896        # 7 * 128 -> lane-dense output / W4 tile
TILE_B = 256         # default batch rows per grid step (resident-weight tile)


def _round_up(n, m):
    return ((n + m - 1) // m) * m


def _gelu_exact(x):
    # F.gelu(approximate='none'): x * 0.5 * (1 + erf(x / sqrt(2)))
    return 0.5 * x * (1.0 + lax.erf(x * (1.0 / math.sqrt(2.0))))


def decoder_kernel(x_ref,
                   w1_ref, b1_ref,
                   w2_ref, b2_ref,
                   w3_ref, b3_ref,
                   w4_ref, b4_ref,
                   o_ref):
    """Fused 4-layer MLP decoder for one batch tile.

    Weight/bias BlockSpecs use a constant index_map, so Pallas DMAs them into
    VMEM once and keeps them resident across all batch-tile grid steps; only
    the x / output tiles stream per step.
    """
    def linear(h_f32, w_ref, b_ref):
        acc = jnp.dot(h_f32.astype(jnp.bfloat16), w_ref[...],
                      preferred_element_type=jnp.float32)
        return acc + b_ref[...].astype(jnp.float32)

    h = x_ref[...].astype(jnp.float32)
    h = _gelu_exact(linear(h, w1_ref, b1_ref))   # dropout(p=0) -> identity
    h = _gelu_exact(linear(h, w2_ref, b2_ref))
    h = _gelu_exact(linear(h, w3_ref, b3_ref))
    logits = linear(h, w4_ref, b4_ref)
    o_ref[...] = jax.nn.sigmoid(logits).astype(o_ref.dtype)


def decoder_forward(x, params, *, tile_b=TILE_B):
    """x: (B, LATENT) float32 -> (B, 1, 28, 28) float32."""
    B, L = x.shape
    (w1, b1, w2, b2, w3, b3, w4, b4) = params   # bf16; w4/b4 padded to OUT_PAD

    tb = min(tile_b, _round_up(B, 8))           # batch rows per grid step
    b_pad = _round_up(B, tb)
    if b_pad != B:
        x = jnp.pad(x, ((0, b_pad - B), (0, 0)))
    grid = (b_pad // tb,)

    resident = lambda shape: pl.BlockSpec(shape, lambda i: (0, 0))  # fetched once
    streamed = lambda shape: pl.BlockSpec(shape, lambda i: (i, 0))  # per batch tile

    out_flat = pl.pallas_call(
        decoder_kernel,
        out_shape=jax.ShapeDtypeStruct((b_pad, OUT_PAD), jnp.float32),
        grid=grid,
        in_specs=[
            streamed((tb, L)),
            resident((L, H1)),  resident((1, H1)),
            resident((H1, H2)), resident((1, H2)),
            resident((H2, H3)), resident((1, H3)),
            resident((H3, OUT_PAD)), resident((1, OUT_PAD)),
        ],
        out_specs=streamed((tb, OUT_PAD)),
        compiler_params=pltpu.CompilerParams(
            # Batch tiles are fully independent -> megacore-shardable on v7x.
            dimension_semantics=("parallel",),
            vmem_limit_bytes=32 << 20,
        ),
    )(x, w1, b1, w2, b2, w3, b3, w4, b4)

    # Drop padded rows/lanes, then reshape like PyTorch: x.reshape(-1, 1, 28, 28)
    return out_flat[:B, :OUT].reshape(-1, 1, 28, 28)


def init_params(key, latent_dims):
    """nn.Linear-style init: U(-1/sqrt(fan_in), 1/sqrt(fan_in)), stored bf16.

    Weights are (in, out) so the kernel computes x @ W + b, numerically equal
    to PyTorch's x @ W_pt.T + b.  W4 / b4 are zero-padded 784 -> 896 columns.
    """
    dims = [(latent_dims, H1), (H1, H2), (H2, H3), (H3, OUT)]
    params = []
    for i, (fan_in, fan_out) in enumerate(dims):
        kw, kb = jax.random.split(jax.random.fold_in(key, i))
        bound = 1.0 / math.sqrt(fan_in)
        w = jax.random.uniform(kw, (fan_in, fan_out), jnp.float32, -bound, bound)
        b = jax.random.uniform(kb, (1, fan_out), jnp.float32, -bound, bound)
        if fan_out == OUT:   # lane-pad the last layer to a multiple of 128
            w = jnp.pad(w, ((0, 0), (0, OUT_PAD - OUT)))
            b = jnp.pad(b, ((0, 0), (0, OUT_PAD - OUT)))
        params += [w.astype(jnp.bfloat16), b.astype(jnp.bfloat16)]
    return tuple(params)


def reference_forward(x, params):
    """Pure-JAX reference using the same bf16 params / f32 accumulation."""
    (w1, b1, w2, b2, w3, b3, w4, b4) = params

    def lin(h, w, b):
        return (jnp.dot(h.astype(jnp.bfloat16), w,
                        preferred_element_type=jnp.float32)
                + b.astype(jnp.float32))

    h = x.astype(jnp.float32)
    h = _gelu_exact(lin(h, w1, b1))
    h = _gelu_exact(lin(h, w2, b2))
    h = _gelu_exact(lin(h, w3, b3))
    out = jax.nn.sigmoid(lin(h, w4, b4))
    return out[:, :OUT].reshape(-1, 1, 28, 28)


if __name__ == "__main__":
    key = jax.random.PRNGKey(0)
    kx, kp = jax.random.split(key)

    params = init_params(kp, LATENT)

    # Small demo batch: single grid step, weights fetched once.
    x = jax.random.normal(kx, (BATCH, LATENT), jnp.float32)
    out = jax.block_until_ready(decoder_forward(x, params))
    ref = reference_forward(x, params)
    assert out.shape == (BATCH, 1, 28, 28), out.shape
    assert jnp.allclose(out, ref, atol=1e-3, rtol=1e-3), "mismatch vs reference"

    # Exercise the multi-tile batch grid (weights stay VMEM-resident across
    # grid steps) with a small forced tile size.
    x2 = jax.random.normal(jax.random.fold_in(kx, 1), (3 * BATCH, LATENT),
                           jnp.float32)
    out2 = jax.block_until_ready(decoder_forward(x2, params, tile_b=BATCH))
    ref2 = reference_forward(x2, params)
    assert out2.shape == (3 * BATCH, 1, 28, 28), out2.shape
    assert jnp.allclose(out2, ref2, atol=1e-3, rtol=1e-3), "mismatch (tiled)"

    print("KERNEL_OK")
</pallas_src>

<mosaic_0001>
module attributes {stable_mosaic.version = 11 : i64} {
  func.func @decoder_kernel(%arg0: i32, %arg1: memref<8x32xf32, #tpu.memory_space<vmem>>, %arg2: memref<32x256xbf16, #tpu.memory_space<vmem>>, %arg3: memref<1x256xbf16, #tpu.memory_space<vmem>>, %arg4: memref<256x512xbf16, #tpu.memory_space<vmem>>, %arg5: memref<1x512xbf16, #tpu.memory_space<vmem>>, %arg6: memref<512x1024xbf16, #tpu.memory_space<vmem>>, %arg7: memref<1x1024xbf16, #tpu.memory_space<vmem>>, %arg8: memref<1024x896xbf16, #tpu.memory_space<vmem>>, %arg9: memref<1x896xbf16, #tpu.memory_space<vmem>>, %arg10: memref<8x896xf32, #tpu.memory_space<vmem>>) attributes {dimension_semantics = [#tpu.dimension_semantics<parallel>], iteration_bounds = array<i64: 1>, scalar_prefetch = 0 : i64, scratch_operands = 0 : i64, tpu.core_type = #tpu.core_type<tc>, window_params = [{transform_indices = @transform_0, window_bounds = array<i64: 8, 32>}, {pipeline_mode = #tpu.pipeline_mode<synchronous>, transform_indices = @transform_1, window_bounds = array<i64: 32, 256>}, {pipeline_mode = #tpu.pipeline_mode<synchronous>, transform_indices = @transform_2, window_bounds = array<i64: 1, 256>}, {pipeline_mode = #tpu.pipeline_mode<synchronous>, transform_indices = @transform_3, window_bounds = array<i64: 256, 512>}, {pipeline_mode = #tpu.pipeline_mode<synchronous>, transform_indices = @transform_4, window_bounds = array<i64: 1, 512>}, {pipeline_mode = #tpu.pipeline_mode<synchronous>, transform_indices = @transform_5, window_bounds = array<i64: 512, 1024>}, {pipeline_mode = #tpu.pipeline_mode<synchronous>, transform_indices = @transform_6, window_bounds = array<i64: 1, 1024>}, {pipeline_mode = #tpu.pipeline_mode<synchronous>, transform_indices = @transform_7, window_bounds = array<i64: 1024, 896>}, {pipeline_mode = #tpu.pipeline_mode<synchronous>, transform_indices = @transform_8, window_bounds = array<i64: 1, 896>}, {transform_indices = @transform_9, window_bounds = array<i64: 8, 896>}]} {
    %c0 = arith.constant 0 : index
    %c0_0 = arith.constant 0 : index
    %0 = vector.load %arg1[%c0, %c0_0] : memref<8x32xf32, #tpu.memory_space<vmem>>, vector<8x32xf32>
    %1 = arith.truncf %0 : vector<8x32xf32> to vector<8x32xbf16>
    %c0_1 = arith.constant 0 : index
    %c0_2 = arith.constant 0 : index
    %2 = vector.load %arg2[%c0_1, %c0_2] : memref<32x256xbf16, #tpu.memory_space<vmem>>, vector<32x256xbf16>
    %cst = arith.constant dense<0.000000e+00> : vector<8x256xf32>
    %3 = tpu.matmul %1, %2, %cst {dimension_numbers = #tpu.dot_dimension_numbers<[1], [0], [0], [1], [0, 0, 1, 1], [], []>} : vector<8x32xbf16>, vector<32x256xbf16>, vector<8x256xf32> -> vector<8x256xf32>
    %c0_3 = arith.constant 0 : index
    %c0_4 = arith.constant 0 : index
    %4 = vector.load %arg3[%c0_3, %c0_4] : memref<1x256xbf16, #tpu.memory_space<vmem>>, vector<1x256xbf16>
    %5 = arith.extf %4 : vector<1x256xbf16> to vector<1x256xf32>
    %6 = vector.broadcast %5 : vector<1x256xf32> to vector<8x256xf32>
    %7 = arith.addf %3, %6 : vector<8x256xf32>
    %cst_5 = arith.constant 5.000000e-01 : f32
    %8 = vector.broadcast %cst_5 : f32 to vector<8x256xf32>
    %9 = arith.mulf %8, %7 : vector<8x256xf32>
    %cst_6 = arith.constant 0.707106769 : f32
    %10 = vector.broadcast %cst_6 : f32 to vector<8x256xf32>
    %11 = arith.mulf %7, %10 : vector<8x256xf32>
    %12 = math.erf %11 : vector<8x256xf32>
    %cst_7 = arith.constant 1.000000e+00 : f32
    %13 = vector.broadcast %cst_7 : f32 to vector<8x256xf32>
    %14 = arith.addf %13, %12 : vector<8x256xf32>
    %15 = arith.mulf %9, %14 : vector<8x256xf32>
    %16 = arith.truncf %15 : vector<8x256xf32> to vector<8x256xbf16>
    %c0_8 = arith.constant 0 : index
    %c0_9 = arith.constant 0 : index
    %17 = vector.load %arg4[%c0_8, %c0_9] : memref<256x512xbf16, #tpu.memory_space<vmem>>, vector<256x512xbf16>
    %cst_10 = arith.constant dense<0.000000e+00> : vector<8x512xf32>
    %18 = tpu.matmul %16, %17, %cst_10 {dimension_numbers = #tpu.dot_dimension_numbers<[1], [0], [0], [1], [0, 0, 1, 1], [], []>} : vector<8x256xbf16>, vector<256x512xbf16>, vector<8x512xf32> -> vector<8x512xf32>
    %c0_11 = arith.constant 0 : index
    %c0_12 = arith.constant 0 : index
    %19 = vector.load %arg5[%c0_11, %c0_12] : memref<1x512xbf16, #tpu.memory_space<vmem>>, vector<1x512xbf16>
    %20 = arith.extf %19 : vector<1x512xbf16> to vector<1x512xf32>
    %21 = vector.broadcast %20 : vector<1x512xf32> to vector<8x512xf32>
    %22 = arith.addf %18, %21 : vector<8x512xf32>
    %cst_13 = arith.constant 5.000000e-01 : f32
    %23 = vector.broadcast %cst_13 : f32 to vector<8x512xf32>
    %24 = arith.mulf %23, %22 : vector<8x512xf32>
    %cst_14 = arith.constant 0.707106769 : f32
    %25 = vector.broadcast %cst_14 : f32 to vector<8x512xf32>
    %26 = arith.mulf %22, %25 : vector<8x512xf32>
    %27 = math.erf %26 : vector<8x512xf32>
    %cst_15 = arith.constant 1.000000e+00 : f32
    %28 = vector.broadcast %cst_15 : f32 to vector<8x512xf32>
    %29 = arith.addf %28, %27 : vector<8x512xf32>
    %30 = arith.mulf %24, %29 : vector<8x512xf32>
    %31 = arith.truncf %30 : vector<8x512xf32> to vector<8x512xbf16>
    %c0_16 = arith.constant 0 : index
    %c0_17 = arith.constant 0 : index
    %32 = vector.load %arg6[%c0_16, %c0_17] : memref<512x1024xbf16, #tpu.memory_space<vmem>>, vector<512x1024xbf16>
    %cst_18 = arith.constant dense<0.000000e+00> : vector<8x1024xf32>
    %33 = tpu.matmul %31, %32, %cst_18 {dimension_numbers = #tpu.dot_dimension_numbers<[1], [0], [0], [1], [0, 0, 1, 1], [], []>} : vector<8x512xbf16>, vector<512x1024xbf16>, vector<8x1024xf32> -> vector<8x1024xf32>
    %c0_19 = arith.constant 0 : index
    %c0_20 = arith.constant 0 : index
    %34 = vector.load %arg7[%c0_19, %c0_20] : memref<1x1024xbf16, #tpu.memory_space<vmem>>, vector<1x1024xbf16>
    %35 = arith.extf %34 : vector<1x1024xbf16> to vector<1x1024xf32>
    %36 = vector.broadcast %35 : vector<1x1024xf32> to vector<8x1024xf32>
    %37 = arith.addf %33, %36 : vector<8x1024xf32>
    %cst_21 = arith.constant 5.000000e-01 : f32
    %38 = vector.broadcast %cst_21 : f32 to vector<8x1024xf32>
    %39 = arith.mulf %38, %37 : vector<8x1024xf32>
    %cst_22 = arith.constant 0.707106769 : f32
    %40 = vector.broadcast %cst_22 : f32 to vector<8x1024xf32>
    %41 = arith.mulf %37, %40 : vector<8x1024xf32>
    %42 = math.erf %41 : vector<8x1024xf32>
    %cst_23 = arith.constant 1.000000e+00 : f32
    %43 = vector.broadcast %cst_23 : f32 to vector<8x1024xf32>
    %44 = arith.addf %43, %42 : vector<8x1024xf32>
    %45 = arith.mulf %39, %44 : vector<8x1024xf32>
    %46 = arith.truncf %45 : vector<8x1024xf32> to vector<8x1024xbf16>
    %c0_24 = arith.constant 0 : index
    %c0_25 = arith.constant 0 : index
    %47 = vector.load %arg8[%c0_24, %c0_25] : memref<1024x896xbf16, #tpu.memory_space<vmem>>, vector<1024x896xbf16>
    %cst_26 = arith.constant dense<0.000000e+00> : vector<8x896xf32>
    %48 = tpu.matmul %46, %47, %cst_26 {dimension_numbers = #tpu.dot_dimension_numbers<[1], [0], [0], [1], [0, 0, 1, 1], [], []>} : vector<8x1024xbf16>, vector<1024x896xbf16>, vector<8x896xf32> -> vector<8x896xf32>
    %c0_27 = arith.constant 0 : index
    %c0_28 = arith.constant 0 : index
    %49 = vector.load %arg9[%c0_27, %c0_28] : memref<1x896xbf16, #tpu.memory_space<vmem>>, vector<1x896xbf16>
    %50 = arith.extf %49 : vector<1x896xbf16> to vector<1x896xf32>
    %51 = vector.broadcast %50 : vector<1x896xf32> to vector<8x896xf32>
    %52 = arith.addf %48, %51 : vector<8x896xf32>
    %53 = arith.negf %52 : vector<8x896xf32>
    %54 = math.exp %53 : vector<8x896xf32>
    %cst_29 = arith.constant 1.000000e+00 : f32
    %55 = vector.broadcast %cst_29 : f32 to vector<8x896xf32>
    %56 = arith.addf %55, %54 : vector<8x896xf32>
    %57 = arith.divf %55, %56 : vector<8x896xf32>
    %c0_30 = arith.constant 0 : index
    %c0_31 = arith.constant 0 : index
    %58 = vector.load %arg10[%c0_30, %c0_31] : memref<8x896xf32, #tpu.memory_space<vmem>>, vector<8x896xf32>
    tpu.vector_store %arg10[%c0_30, %c0_31], %57 {strides = array<i32>} : memref<8x896xf32, #tpu.memory_space<vmem>>, vector<8x896xf32>,
    return
  }
  func.func @transform_0(%arg0: i32) -> (i32, i32) {
    %c0_i32 = arith.constant 0 : i32
    %c0_i32_0 = arith.constant 0 : i32
    return %arg0, %c0_i32 : i32, i32
  }
  func.func @transform_1(%arg0: i32) -> (i32, i32) {
    %c0_i32 = arith.constant 0 : i32
    %c0_i32_0 = arith.constant 0 : i32
    %c0_i32_1 = arith.constant 0 : i32
    return %c0_i32, %c0_i32_0 : i32, i32
  }
  func.func @transform_2(%arg0: i32) -> (i32, i32) {
    %c0_i32 = arith.constant 0 : i32
    %c0_i32_0 = arith.constant 0 : i32
    %c0_i32_1 = arith.constant 0 : i32
    return %c0_i32, %c0_i32_0 : i32, i32
  }
  func.func @transform_3(%arg0: i32) -> (i32, i32) {
    %c0_i32 = arith.constant 0 : i32
    %c0_i32_0 = arith.constant 0 : i32
    %c0_i32_1 = arith.constant 0 : i32
    return %c0_i32, %c0_i32_0 : i32, i32
  }
  func.func @transform_4(%arg0: i32) -> (i32, i32) {
    %c0_i32 = arith.constant 0 : i32
    %c0_i32_0 = arith.constant 0 : i32
    %c0_i32_1 = arith.constant 0 : i32
    return %c0_i32, %c0_i32_0 : i32, i32
  }
  func.func @transform_5(%arg0: i32) -> (i32, i32) {
    %c0_i32 = arith.constant 0 : i32
    %c0_i32_0 = arith.constant 0 : i32
    %c0_i32_1 = arith.constant 0 : i32
    return %c0_i32, %c0_i32_0 : i32, i32
  }
  func.func @transform_6(%arg0: i32) -> (i32, i32) {
    %c0_i32 = arith.constant 0 : i32
    %c0_i32_0 = arith.constant 0 : i32
    %c0_i32_1 = arith.constant 0 : i32
    return %c0_i32, %c0_i32_0 : i32, i32
  }
  func.func @transform_7(%arg0: i32) -> (i32, i32) {
    %c0_i32 = arith.constant 0 : i32
    %c0_i32_0 = arith.constant 0 : i32
    %c0_i32_1 = arith.constant 0 : i32
    return %c0_i32, %c0_i32_0 : i32, i32
  }
  func.func @transform_8(%arg0: i32) -> (i32, i32) {
    %c0_i32 = arith.constant 0 : i32
    %c0_i32_0 = arith.constant 0 : i32
    %c0_i32_1 = arith.constant 0 : i32
    return %c0_i32, %c0_i32_0 : i32, i32
  }
  func.func @transform_9(%arg0: i32) -> (i32, i32) {
    %c0_i32 = arith.constant 0 : i32
    %c0_i32_0 = arith.constant 0 : i32
    return %arg0, %c0_i32 : i32, i32
  }
}

</mosaic_0001>

<bundles_post_ra>
// kernel: tpu_custom_call.1
= control target key start
LH: loop header
LB: loop body
LE: loop exit
PB: predicated region body
PF: predicated region fallthrough
CT: control target
= control target key end

     0   :  { %14 = vsyncpa [#allocation3], 0  ;;  %s12227_s0 = inlined_call_operand.hbm [shape: f32[8,32], index: 0, kind: input, shape index: {}]   ;;  %s12228_s1 = inlined_call_operand.hbm [shape: bf16[32,256], index: 1, kind: input, shape index: {}]   ;;  %s12229_s2 = inlined_call_operand.hbm [shape: bf16[1,256], index: 2, kind: input, shape index: {}]   ;;  %s12230_s3 = inlined_call_operand.hbm [shape: bf16[256,512], index: 3, kind: input, shape index: {}]   ;;  %s12231_s4 = inlined_call_operand.hbm [shape: bf16[1,512], index: 4, kind: input, shape index: {}]   ;;  %s12232_s5 = inlined_call_operand.hbm [shape: bf16[512,1024], index: 5, kind: input, shape index: {}]   ;;  %s12233_s6 = inlined_call_operand.hbm [shape: bf16[1,1024], index: 6, kind: input, shape index: {}]   ;;  %s12234_s7 = inlined_call_operand.hbm [shape: bf16[1024,896], index: 7, kind: input, shape index: {}]   ;;  %s12235_s8 = inlined_call_operand.hbm [shape: bf16[1,896], index: 8, kind: input, shape index: {}]   ;;  %s12236_s9 = inlined_call_operand.hbm [shape: f32[8,896], index: 9, kind: output, shape index: {}]  }
   0x1   :  { %15 = vsyncpa [#allocation6], 0 }
   0x2   :  { %16 = vsyncpa [#allocation9], 0 }
   0x3   :  { %17 = vsyncpa [#allocation12], 0 }
   0x4   :  { %18 = vsyncpa [#allocation15], 0  ;;  %s35_s11 = sshll.u32 %s12228_s1, 4  ;;  %s36_s11 = int_to_ptr.hbm [resolvable:$true] %s35_s11 }
   0x5   :  { %19 = vsyncpa [#allocation4], 0  ;;  %s11285_s12 = smov [#allocation5]   ;;  %s59_s16 = sshll.u32 %s12230_s3, 4  ;;  %s60_s16 = int_to_ptr.hbm [resolvable:$true] %s59_s16 }
   0x6   :  { %s37_s13 = sshll.u32 %s11285_s12, 4  ;;  %s11286_s17 = smov 128   ;;  %s38_s13 = int_to_ptr.vmem [resolvable:$true] %s37_s13 }
   0x7   :  { %s11287_s18 = smov 8   ;;  %s11288_s19 = smov [#allocation8]  }
   0x8   :  { %43 = dma.hbm_to_vmem [thread:$0]  %s36_s11, 512, %s38_s13, [#allocation6], %s11286_s17, %s11286_s17, %s11287_s18  }
   0x9   :  { %s61_s20 = sshll.u32 %s11288_s19, 4  ;;  %s11289_s21 = smov 256   ;;  %s62_s20 = int_to_ptr.vmem [resolvable:$true] %s61_s20 }
   0xa   :  { %s11290_s22 = smov 16   ;;  %s83_s24 = sshll.u32 %s12232_s5, 4  ;;  %s84_s24 = int_to_ptr.hbm [resolvable:$true] %s83_s24 }
   0xb   :  { %67 = dma.hbm_to_vmem [thread:$0]  %s60_s16, 8192, %s62_s20, [#allocation9], %s11289_s21, %s11289_s21, %s11290_s22  }
   0xc   :  { %s11291_s25 = smov [#allocation11]   ;;  %s107_s28 = sshll.u32 %s12234_s7, 4  ;;  %s108_s28 = int_to_ptr.hbm [resolvable:$true] %s107_s28 }
   0xd   :  { %s85_s26 = sshll.u32 %s11291_s25, 4  ;;  %s11292_s29 = smov 512   ;;  %s86_s26 = int_to_ptr.vmem [resolvable:$true] %s85_s26 }
   0xe   :  { %s11293_s30 = smov 32   ;;  %s11294_s10 = smov [#allocation14]  }
   0xf   :  { %91 = dma.hbm_to_vmem [thread:$0]  %s84_s24, 32768, %s86_s26, [#allocation12], %s11292_s29, %s11292_s29, %s11293_s30  }
  0x10   :  { %s109_s11 = sshll.u32 %s11294_s10, 4  ;;  %s11295_s12 = smov 448   ;;  %s110_s11 = int_to_ptr.vmem [resolvable:$true] %s109_s11 }
  0x11   :  { %s11296_s13 = smov 28   ;;  %s25_s15 = sshll.u32 %s12227_s0, 4  ;;  %s26_s15 = int_to_ptr.hbm [resolvable:$true] %s25_s15 }
  0x12   :  { %115 = dma.hbm_to_vmem [thread:$0]  %s108_s28, 57344, %s110_s11, [#allocation15], %s11295_s12, %s11295_s12, %s11296_s13  }
  0x13   :  { %s11297_s16 = smov [#allocation2]   ;;  %s49_s19 = sshll.u32 %s12229_s2, 4  ;;  %s50_s19 = int_to_ptr.hbm [resolvable:$true] %s49_s19 }
  0x14   :  { %s27_s17 = sshll.u32 %s11297_s16, 4  ;;  %s11298_s20 = smov [#allocation7]   ;;  %s28_s17 = int_to_ptr.vmem [resolvable:$true] %s27_s17 }
  0x15   :  { %30 = dma.hbm_to_vmem [thread:$0]  %s26_s15, 128, %s28_s17, [#allocation3]  }
  0x16   :  { %s51_s21 = sshll.u32 %s11298_s20, 4  ;;  %s73_s23 = sshll.u32 %s12231_s4, 4  ;;  %s52_s21 = int_to_ptr.vmem [resolvable:$true] %s51_s21  ;;  %s74_s23 = int_to_ptr.hbm [resolvable:$true] %s73_s23 }
  0x17   :  { %54 = dma.hbm_to_vmem [thread:$0]  %s50_s19, 32, %s52_s21, [#allocation6]  }
  0x18   :  { %s97_s25 = sshll.u32 %s12233_s6, 4  ;;  %s11299_s26 = smov [#allocation10]   ;;  %s98_s25 = int_to_ptr.hbm [resolvable:$true] %s97_s25 }
  0x19   :  { %s75_s27 = sshll.u32 %s11299_s26, 4  ;;  %s11300_s2 = smov [#allocation13]   ;;  %s76_s27 = int_to_ptr.vmem [resolvable:$true] %s75_s27 }
  0x1a   :  { %78 = dma.hbm_to_vmem [thread:$0]  %s74_s23, 64, %s76_s27, [#allocation9]  }
  0x1b   :  { %s99_s3 = sshll.u32 %s11300_s2, 4  ;;  %s121_s30 = sshll.u32 %s12235_s8, 4  ;;  %s100_s3 = int_to_ptr.vmem [resolvable:$true] %s99_s3  ;;  %s122_s30 = int_to_ptr.hbm [resolvable:$true] %s121_s30 }
  0x1c   :  { %102 = dma.hbm_to_vmem [thread:$0]  %s98_s25, 128, %s100_s3, [#allocation12]  }
  0x1d   :  { %s11301_s4 = smov [#allocation16]  }
  0x1e   :  { %s123_s10 = sshll.u32 %s11301_s4, 4  ;;  %s124_s10 = int_to_ptr.vmem [resolvable:$true] %s123_s10 }
  0x1f   :  { %126 = dma.hbm_to_vmem [thread:$0]  %s122_s30, 112, %s124_s10, [#allocation15]  }
  0x20   :  { %11273 = dma.done.wait [#allocation3], 128  }
  0x21   :  { %11274 = vsyncadd [#allocation3], 4294967168 }
  0x22   :  { %11275 = dma.done.wait [#allocation6], 544  }
  0x23   :  { %11276 = vsyncadd [#allocation6], 4294966752 }
  0x24   :  { %11277 = dma.done.wait [#allocation9], 8256  }
  0x25   :  { %11278 = vsyncadd [#allocation9], 4294959040 }
  0x26   :  { %11279 = dma.done.wait [#allocation12], 32896  }
  0x27   :  { %11280 = vsyncadd [#allocation12], 4294934400 }
  0x28   :  { %11281 = dma.done.wait [#allocation15], 57456  }
  0x29   :  { %11282 = vsyncadd [#allocation15], 4294909840  ;;  %v7084_v0 = vld [vmem:[#allocation5 + $0x10] sm:$0xf]  ;;  %v10188_v1 = vld [vmem:[#allocation5 + $0x14] sm:$0xf0] }
  0x2a   :  { %v10187_v2 = vld [vmem:[#allocation5 + $0x14] sm:$0xf]  ;;  %v7085_v3 = vor.u32 %v10188_v1, %v7084_v0  ;;  %v7086_v4 = vld [vmem:[#allocation5 + $0x18] sm:$0xf0]  ;;  %v7076_v5 = vld [vmem:[#allocation5] sm:$0xf] }
  0x2b   :  { %v10186_v6 = vld [vmem:[#allocation5 + $0x4] sm:$0xf0]  ;;  %v7089_v7 = vor.u32 %v10187_v2, %v7086_v4  ;;  %v10185_v8 = vld [vmem:[#allocation5 + $0x4] sm:$0xf]  ;;  %v7078_v9 = vld [vmem:[#allocation5 + $0x8] sm:$0xf0] }
  0x2c   :  { %209 = vmatpush.bf16.msra.mxu0 %v7085_v3  ;;  %v7077_v10 = vor.u32 %v10186_v6, %v7076_v5  ;;  %v164_v11 = vld [vmem:[#allocation2] sm:$0xff]  ;;  %v7081_v12 = vor.u32 %v10185_v8, %v7078_v9  ;;  %vm199_vm0 = vcmask 261120   ;;  %v7208_v14 = vld [vmem:[#allocation8 + $0xe0] sm:$0xf]  ;;  %v10219_v15 = vld [vmem:[#allocation8 + $0xec] sm:$0xf0] }
  0x2d   :  { %222 = vmatpush.bf16.msra.mxu1 %v7089_v7  ;;  %v165_v13 = vpack.c.bf16 %v164_v11, %v164_v11  ;;  %v7336_v16 = vld [vmem:[#allocation8 + $0x1e0] sm:$0xf]  ;;  %v7209_v17 = vor.u32 %v10219_v15, %v7208_v14  ;;  %v10251_v18 = vld [vmem:[#allocation8 + $0x1ec] sm:$0xf0]  ;;  %v10217_v19 = vld [vmem:[#allocation8 + $0xe4] sm:$0xf] }
  0x2e   :  { %v7210_v20 = vld [vmem:[#allocation8 + $0xf0] sm:$0xf0]  ;;  %v7337_v21 = vor.u32 %v10251_v18, %v7336_v16  ;;  %v10249_v23 = vld [vmem:[#allocation8 + $0x1e4] sm:$0xf]  ;;  %v7192_v26 = vld [vmem:[#allocation8 + $0xc0] sm:$0xf] }
  0x2f   :  { %v7213_v22 = vor.u32 %v10217_v19, %v7210_v20  ;;  %v7338_v24 = vld [vmem:[#allocation8 + $0x1f0] sm:$0xf0]  ;;  %718 = vmatpush.bf16.msra.mxu2 %v7209_v17  ;;  %v10215_v27 = vld [vmem:[#allocation8 + $0xcc] sm:$0xf0]  ;;  %v7320_v28 = vld [vmem:[#allocation8 + $0x1c0] sm:$0xf] }
  0x30   :  { %210 = vmatpush.bf16.msra.mxu0 %v7077_v10  ;;  %v7341_v25 = vor.u32 %v10249_v23, %v7338_v24  ;;  %731 = vmatpush.bf16.msra.mxu3 %v7337_v21  ;;  %v7193_v29 = vor.u32 %v10215_v27, %v7192_v26  ;;  %v10247_v30 = vld [vmem:[#allocation8 + $0x1cc] sm:$0xf0]  ;;  %v10213_v31 = vld [vmem:[#allocation8 + $0xc4] sm:$0xf]  ;;  %v7194_v32 = vld [vmem:[#allocation8 + $0xd0] sm:$0xf0] }
  0x31   :  { %223 = vmatpush.bf16.msra.mxu1 %v7081_v12  ;;  %v7321_v33 = vor.u32 %v10247_v30, %v7320_v28  ;;  %v7197_v34 = vor.u32 %v10213_v31, %v7194_v32  ;;  %v10245_v35 = vld [vmem:[#allocation8 + $0x1c4] sm:$0xf]  ;;  %v7322_v36 = vld [vmem:[#allocation8 + $0x1d0] sm:$0xf0]  ;;  %v170_v37 = vld [vmem:[#allocation7] sm:$0x3] }
  0x32   :  { %v7325_v38 = vor.u32 %v10245_v35, %v7322_v36  ;;  %v7176_v39 = vld [vmem:[#allocation8 + $0xa0] sm:$0xf]  ;;  %v10211_v40 = vld [vmem:[#allocation8 + $0xac] sm:$0xf0]  ;;  %v10209_v44 = vld [vmem:[#allocation8 + $0xa4] sm:$0xf]  ;;  %v171_v46 = vunpack.c.l.bf16 %v170_v37 }
  0x33   :  { %7090 = vmatmul.msk.bf16.vlgmr.msra.gmra.mxu0 %vm199_vm0, %v165_v13  ;;  %719 = vmatpush.bf16.msra.mxu2 %v7193_v29  ;;  %v7304_v41 = vld [vmem:[#allocation8 + $0x1a0] sm:$0xf]  ;;  %v7177_v42 = vor.u32 %v10211_v40, %v7176_v39  ;;  %v10243_v43 = vld [vmem:[#allocation8 + $0x1ac] sm:$0xf0]  ;;  %v7178_v45 = vld [vmem:[#allocation8 + $0xb0] sm:$0xf0] }
  0x34   :  { %7091 = vmatmul.msk.bf16.vlgmr.msra.gmra.mxu1 %vm199_vm0, %v165_v13  ;;  %744 = vmatpush.bf16.msrb.mxu0 %v7213_v22  ;;  %v7305_v47 = vor.u32 %v10243_v43, %v7304_v41  ;;  %v7181_v48 = vor.u32 %v10209_v44, %v7178_v45  ;;  %v10241_v49 = vld [vmem:[#allocation8 + $0x1a4] sm:$0xf]  ;;  %v7306_v50 = vld [vmem:[#allocation8 + $0x1b0] sm:$0xf0]  ;;  %v7160_v52 = vld [vmem:[#allocation8 + $0x80] sm:$0xf] }
  0x35   :  { %757 = vmatpush.bf16.msrb.mxu1 %v7341_v25  ;;  %732 = vmatpush.bf16.msra.mxu3 %v7321_v33  ;;  %v7309_v51 = vor.u32 %v10241_v49, %v7306_v50  ;;  %v10207_v53 = vld [vmem:[#allocation8 + $0x8c] sm:$0xf0]  ;;  %v7288_v54 = vld [vmem:[#allocation8 + $0x180] sm:$0xf]  ;;  %v10205_v57 = vld [vmem:[#allocation8 + $0x84] sm:$0xf] }
  0x36   :  { %v7161_v55 = vor.u32 %v10207_v53, %v7160_v52  ;;  %v10239_v56 = vld [vmem:[#allocation8 + $0x18c] sm:$0xf0]  ;;  %v7162_v58 = vld [vmem:[#allocation8 + $0x90] sm:$0xf0]  ;;  %v173_v59 = vperm.slane %v171_v46, 0  ;;  %v174_v0 = vperm.slane %v171_v46, 2 }
  0x37   :  { %720 = vmatpush.bf16.msra.mxu2 %v7177_v42  ;;  %v7289_v60 = vor.u32 %v10239_v56, %v7288_v54  ;;  %v7165_v61 = vor.u32 %v10205_v57, %v7162_v58  ;;  %v10237_v62 = vld [vmem:[#allocation8 + $0x184] sm:$0xf]  ;;  %v7290_v63 = vld [vmem:[#allocation8 + $0x190] sm:$0xf0]  ;;  %v7144_v2 = vld [vmem:[#allocation8 + $0x60] sm:$0xf] }
  0x38   :  { %745 = vmatpush.bf16.msrb.mxu0 %v7197_v34  ;;  %v7293_v1 = vor.u32 %v10237_v62, %v7290_v63  ;;  %v10203_v3 = vld [vmem:[#allocation8 + $0x6c] sm:$0xf0]  ;;  %v7272_v4 = vld [vmem:[#allocation8 + $0x160] sm:$0xf]  ;;  %v10201_v7 = vld [vmem:[#allocation8 + $0x64] sm:$0xf] }
  0x39   :  { %758 = vmatpush.bf16.msrb.mxu1 %v7325_v38  ;;  %733 = vmatpush.bf16.msra.mxu3 %v7305_v47  ;;  %v7145_v5 = vor.u32 %v10203_v3, %v7144_v2  ;;  %v10235_v6 = vld [vmem:[#allocation8 + $0x16c] sm:$0xf0]  ;;  %v7146_v8 = vld [vmem:[#allocation8 + $0x70] sm:$0xf0]  ;;  %v177_v9 = vperm.slane %v173_v59, 0  ;;  %v178_v14 = vperm.slane %v174_v0, 0 }
  0x3a   :  { %v7273_v10 = vor.u32 %v10235_v6, %v7272_v4  ;;  %v7149_v11 = vor.u32 %v10201_v7, %v7146_v8  ;;  %v10233_v12 = vld [vmem:[#allocation8 + $0x164] sm:$0xf]  ;;  %v7274_v13 = vld [vmem:[#allocation8 + $0x170] sm:$0xf0]  ;;  %v7128_v16 = vld [vmem:[#allocation8 + $0x40] sm:$0xf] }
  0x3b   :  { %721 = vmatpush.bf16.msra.mxu2 %v7161_v55  ;;  %v7277_v15 = vor.u32 %v10233_v12, %v7274_v13  ;;  %v10199_v17 = vld [vmem:[#allocation8 + $0x4c] sm:$0xf0]  ;;  %v7256_v18 = vld [vmem:[#allocation8 + $0x140] sm:$0xf]  ;;  %v10197_v22 = vld [vmem:[#allocation8 + $0x44] sm:$0xf] }
  0x3c   :  { %746 = vmatpush.bf16.msrb.mxu0 %v7181_v48  ;;  %v7129_v20 = vor.u32 %v10199_v17, %v7128_v16  ;;  %v10231_v21 = vld [vmem:[#allocation8 + $0x14c] sm:$0xf0]  ;;  %v7130_v23 = vld [vmem:[#allocation8 + $0x50] sm:$0xf0]  ;;  %v10229_v28 = vld [vmem:[#allocation8 + $0x144] sm:$0xf] }
  0x3d   :  { %759 = vmatpush.bf16.msrb.mxu1 %v7309_v51  ;;  %734 = vmatpush.bf16.msra.mxu3 %v7289_v60  ;;  %v7257_v26 = vor.u32 %v10231_v21, %v7256_v18  ;;  %v7133_v27 = vor.u32 %v10197_v22, %v7130_v23  ;;  %v7258_v29 = vld [vmem:[#allocation8 + $0x150] sm:$0xf0]  ;;  %v7112_v33 = vld [vmem:[#allocation8 + $0x20] sm:$0xf]  ;;  %v10195_v35 = vld [vmem:[#allocation8 + $0x2c] sm:$0xf0] }
  0x3e   :  { %v7261_v31 = vor.u32 %v10229_v28, %v7258_v29  ;;  %v7113_v37 = vor.u32 %v10195_v35, %v7112_v33  ;;  %v7240_v38 = vld [vmem:[#allocation8 + $0x120] sm:$0xf]  ;;  %v10227_v39 = vld [vmem:[#allocation8 + $0x12c] sm:$0xf0]  ;;  %v10193_v40 = vld [vmem:[#allocation8 + $0x24] sm:$0xf] }
  0x3f   :  { %722 = vmatpush.bf16.msra.mxu2 %v7145_v5  ;;  %v7241_v42 = vor.u32 %v10227_v39, %v7240_v38  ;;  %v7114_v43 = vld [vmem:[#allocation8 + $0x30] sm:$0xf0]  ;;  %v10225_v44 = vld [vmem:[#allocation8 + $0x124] sm:$0xf]  ;;  %v7096_v49 = vld [vmem:[#allocation8] sm:$0xf] }
  0x40   :  { %747 = vmatpush.bf16.msrb.mxu0 %v7165_v61  ;;  %v7242_v45 = vld [vmem:[#allocation8 + $0x130] sm:$0xf0]  ;;  %v7117_v47 = vor.u32 %v10193_v40, %v7114_v43  ;;  %v10191_v50 = vld [vmem:[#allocation8 + $0xc] sm:$0xf0]  ;;  %v7224_v54 = vld [vmem:[#allocation8 + $0x100] sm:$0xf] }
  0x41   :  { %760 = vmatpush.bf16.msrb.mxu1 %v7293_v1  ;;  %735 = vmatpush.bf16.msra.mxu3 %v7273_v10  ;;  %v7245_v48 = vor.u32 %v10225_v44, %v7242_v45  ;;  %v7097_v53 = vor.u32 %v10191_v50, %v7096_v49  ;;  %v10223_v55 = vld [vmem:[#allocation8 + $0x10c] sm:$0xf0]  ;;  %v10189_v60 = vld [vmem:[#allocation8 + $0x4] sm:$0xf]  ;;  %v7098_v63 = vld [vmem:[#allocation8 + $0x10] sm:$0xf0] }
  0x42   :  { %v7225_v59 = vor.u32 %v10223_v55, %v7224_v54  ;;  %v7101_v2 = vor.u32 %v10189_v60, %v7098_v63  ;;  %v10221_v3 = vld [vmem:[#allocation8 + $0x104] sm:$0xf]  ;;  %v7226_v6 = vld [vmem:[#allocation8 + $0x110] sm:$0xf0]  ;;  %v7216_v10 = vld [vmem:[#allocation8 + $0xe8] sm:$0xf] }
  0x43   :  { %723 = vmatpush.bf16.msra.mxu2 %v7129_v20  ;;  %v7344_v12 = vld [vmem:[#allocation8 + $0x1e8] sm:$0xf]  ;;  %v10252_v16 = vld [vmem:[#allocation8 + $0x1f4] sm:$0xf0]  ;;  %v10218_v17 = vld [vmem:[#allocation8 + $0xec] sm:$0xf] }
  0x44   :  { %748 = vmatpush.bf16.msrb.mxu0 %v7149_v11  ;;  %v10220_v11 = vld [vmem:[#allocation8 + $0xf4] sm:$0xf0]  ;;  %v7218_v18 = vld [vmem:[#allocation8 + $0xf8] sm:$0xf0]  ;;  %v7345_v21 = vor.u32 %v10252_v16, %v7344_v12  ;;  %v10250_v23 = vld [vmem:[#allocation8 + $0x1ec] sm:$0xf] }
  0x45   :  { %761 = vmatpush.bf16.msrb.mxu1 %v7277_v15  ;;  %736 = vmatpush.bf16.msra.mxu3 %v7257_v26  ;;  %v7217_v15 = vor.u32 %v10220_v11, %v7216_v10  ;;  %v7221_v22 = vor.u32 %v10218_v17, %v7218_v18  ;;  %v7200_v33 = vld [vmem:[#allocation8 + $0xc8] sm:$0xf]  ;;  %v10216_v35 = vld [vmem:[#allocation8 + $0xd4] sm:$0xf0]  ;;  %v10210_v63 = vld [vmem:[#allocation8 + $0xac] sm:$0xf] }
  0x46   :  { %v7201_v39 = vor.u32 %v10216_v35, %v7200_v33  ;;  %v10248_v40 = vld [vmem:[#allocation8 + $0x1d4] sm:$0xf0]  ;;  %v7168_v11 = vld [vmem:[#allocation8 + $0x88] sm:$0xf]  ;;  %v10206_v17 = vld [vmem:[#allocation8 + $0x8c] sm:$0xf] }
  0x47   :  { %724 = vmatpush.bf16.msra.mxu2 %v7113_v37  ;;  %v10208_v12 = vld [vmem:[#allocation8 + $0x94] sm:$0xf0]  ;;  %v7170_v18 = vld [vmem:[#allocation8 + $0x98] sm:$0xf0]  ;;  %s11302_s6 = smov [#allocation17]   ;;  %s7060_s13 = sshll.u32 %s12236_s9, 4  ;;  %s7061_s13 = int_to_ptr.hbm [resolvable:$true] %s7060_s13 }
  0x48   :  { %749 = vmatpush.bf16.msrb.mxu0 %v7133_v27  ;;  %v7346_v27 = vld [vmem:[#allocation8 + $0x1f8] sm:$0xf0]  ;;  %v10240_v16 = vld [vmem:[#allocation8 + $0x194] sm:$0xf0]  ;;  %s7058_s8 = sshll.u32 %s11302_s6, 4  ;;  %s7059_s8 = int_to_ptr.vmem [resolvable:$true] %s7058_s8 }
  0x49   :  { %762 = vmatpush.bf16.msrb.mxu1 %v7261_v31  ;;  %737 = vmatpush.bf16.msra.mxu3 %v7241_v42  ;;  %v7349_v31 = vor.u32 %v10250_v23, %v7346_v27  ;;  %v7202_v42 = vld [vmem:[#allocation8 + $0xd8] sm:$0xf0] }
  0x4a   :  { %v7298_v27 = vld [vmem:[#allocation8 + $0x198] sm:$0xf0] }
  0x4b   :  { %725 = vmatpush.bf16.msra.mxu2 %v7097_v53 }
  0x4c   :  { %750 = vmatpush.bf16.msrb.mxu0 %v7117_v47 }
  0x4d   :  { %763 = vmatpush.bf16.msrb.mxu1 %v7245_v48  ;;  %738 = vmatpush.bf16.msra.mxu3 %v7225_v59  ;;  %v10246_v48 = vld [vmem:[#allocation8 + $0x1cc] sm:$0xf] }
  0x4f   :  { %770 = vmatpush.bf16.msrb.mxu2 %v7217_v15  ;;  %v7169_v15 = vor.u32 %v10208_v12, %v7168_v11 }
  0x50   :  { %751 = vmatpush.bf16.msrb.mxu0 %v7101_v2 }
  0x51   :  { %783 = vmatpush.bf16.msrb.mxu3 %v7345_v21 }
  0x53   :  { %771 = vmatpush.bf16.msrb.mxu2 %v7201_v39  ;;  %v7154_v39 = vld [vmem:[#allocation8 + $0x78] sm:$0xf0] }
  0x54   :  { %796 = vmatpush.bf16.msra.mxu0 %v7221_v22  ;;  %v7173_v22 = vor.u32 %v10206_v17, %v7170_v18  ;;  %v10192_v17 = vld [vmem:[#allocation8 + $0x14] sm:$0xf0]  ;;  %v7232_v18 = vld [vmem:[#allocation8 + $0x108] sm:$0xf] }
  0xb0   :  { %v212_v19 = vpop.f32.mrf.mxu0 }
  0xb1   :  { %v11380_v24 = vadd.f32 %v212_v19, %v177_v9  ;;  %v225_v25 = vpop.f32.mrf.mxu1  ;;  %v7229_v9 = vor.u32 %v10221_v3, %v7226_v6 }
  0xb2   :  { %v11382_v30 = vadd.f32 %v225_v25, %v178_v14 }
  0xb3   :  { %v11385_v32 = vmul.f32 0.70710677, %v11380_v24  ;;  %764 = vmatpush.bf16.msrb.mxu1 %v7229_v9 }
  0xb4   :  { %v11388_v34 = vmul.f32 0.70710677, %v11382_v30 }
  0xb5   :  { %v233_v36 = vmul.f32 %v11385_v32, %v11385_v32 }
  0xb6   :  { %v273_v41 = vmul.f32 %v11388_v34, %v11388_v34 }
  0xb7   :  { %v11394_v46 = vmin.f32 %v233_v36, 16.0  ;;  %v7328_v36 = vld [vmem:[#allocation8 + $0x1c8] sm:$0xf]  ;;  %809 = vmatpush.bf16.msra.mxu1 %v7349_v31  ;;  %v10236_v31 = vld [vmem:[#allocation8 + $0x174] sm:$0xf0] }
  0xb8   :  { %v11396_v51 = vmin.f32 %v273_v41, 16.0  ;;  %v214_v52 = vpop.f32.mrf.mxu0  ;;  %v10214_v41 = vld [vmem:[#allocation8 + $0xcc] sm:$0xf]  ;;  %v7329_v45 = vor.u32 %v10248_v40, %v7328_v36 }
  0xb9   :  { %v235_v56 = vmul.f32 2.1237322e-06, %v11394_v46  ;;  %v246_v57 = vmul.f32 3.8918573e-05, %v11394_v46  ;;  %v227_v58 = vpop.f32.mrf.mxu1  ;;  %v7205_v47 = vor.u32 %v10214_v41, %v7202_v42  ;;  %v7330_v52 = vld [vmem:[#allocation8 + $0x1d8] sm:$0xf0] }
  0xba   :  { %v275_v61 = vmul.f32 2.1237322e-06, %v11396_v51  ;;  %v286_v62 = vmul.f32 3.8918573e-05, %v11396_v51  ;;  %784 = vmatpush.bf16.msrb.mxu3 %v7329_v45  ;;  %v7333_v55 = vor.u32 %v10246_v48, %v7330_v52  ;;  %v7312_v58 = vld [vmem:[#allocation8 + $0x1a8] sm:$0xf] }
  0xbb   :  { %v236_v0 = vadd.f32 0.00028619796, %v235_v56  ;;  %v247_v1 = vadd.f32 0.001143296, %v246_v57  ;;  %797 = vmatpush.bf16.msra.mxu0 %v7205_v47  ;;  %v7184_v56 = vld [vmem:[#allocation8 + $0xa8] sm:$0xf] }
  0xbc   :  { %v276_v4 = vadd.f32 0.00028619796, %v275_v61  ;;  %v287_v5 = vadd.f32 0.001143296, %v286_v62  ;;  %v10212_v57 = vld [vmem:[#allocation8 + $0xb4] sm:$0xf0]  ;;  %810 = vmatpush.bf16.msra.mxu1 %v7333_v55 }
  0xbd   :  { %v237_v7 = vmul.f32 %v236_v0, %v11394_v46  ;;  %v248_v8 = vmul.f32 %v247_v1, %v11394_v46  ;;  %v7185_v61 = vor.u32 %v10212_v57, %v7184_v56  ;;  %v10244_v62 = vld [vmem:[#allocation8 + $0x1b4] sm:$0xf0]  ;;  %v7186_v0 = vld [vmem:[#allocation8 + $0xb8] sm:$0xf0]  ;;  %v10202_v36 = vld [vmem:[#allocation8 + $0x6c] sm:$0xf] }
  0xbe   :  { %v277_v13 = vmul.f32 %v276_v4, %v11396_v51  ;;  %v288_v14 = vmul.f32 %v287_v5, %v11396_v51  ;;  %v7313_v3 = vor.u32 %v10244_v62, %v7312_v58  ;;  %v7189_v4 = vor.u32 %v10210_v63, %v7186_v0  ;;  %v10242_v5 = vld [vmem:[#allocation8 + $0x1ac] sm:$0xf]  ;;  %v10200_v47 = vld [vmem:[#allocation8 + $0x54] sm:$0xf0]  ;;  %v7264_v48 = vld [vmem:[#allocation8 + $0x148] sm:$0xf] }
  0xbf   :  { %v238_v19 = vadd.f32 0.0036580483, %v237_v7  ;;  %v249_v20 = vadd.f32 0.014752088, %v248_v8  ;;  %772 = vmatpush.bf16.msrb.mxu2 %v7185_v61  ;;  %v7314_v8 = vld [vmem:[#allocation8 + $0x1b8] sm:$0xf0]  ;;  %v7157_v42 = vor.u32 %v10202_v36, %v7154_v39 }
  0xc0   :  { %v278_v25 = vadd.f32 0.0036580483, %v277_v13  ;;  %v289_v26 = vadd.f32 0.014752088, %v288_v14  ;;  %785 = vmatpush.bf16.msrb.mxu3 %v7313_v3  ;;  %798 = vmatpush.bf16.msra.mxu0 %v7189_v4  ;;  %v7317_v10 = vor.u32 %v10242_v5, %v7314_v8  ;;  %v7296_v13 = vld [vmem:[#allocation8 + $0x188] sm:$0xf] }
  0xc1   :  { %v239_v28 = vmul.f32 %v238_v19, %v11394_v46  ;;  %v250_v29 = vmul.f32 %v249_v20, %v11394_v46  ;;  %v7297_v21 = vor.u32 %v10240_v16, %v7296_v13  ;;  %v10234_v40 = vld [vmem:[#allocation8 + $0x16c] sm:$0xf]  ;;  %v7138_v55 = vld [vmem:[#allocation8 + $0x58] sm:$0xf0]  ;;  %v7120_v61 = vld [vmem:[#allocation8 + $0x28] sm:$0xf] }
  0xc2   :  { %v279_v37 = vmul.f32 %v278_v25, %v11396_v51  ;;  %v290_v38 = vmul.f32 %v289_v26, %v11396_v51  ;;  %811 = vmatpush.bf16.msra.mxu1 %v7317_v10  ;;  %v10238_v26 = vld [vmem:[#allocation8 + $0x18c] sm:$0xf]  ;;  %v10196_v62 = vld [vmem:[#allocation8 + $0x34] sm:$0xf0]  ;;  %v7104_v16 = vld [vmem:[#allocation8 + $0x8] sm:$0xf] }
  0xc3   :  { %v240_v43 = vadd.f32 0.05243302, %v239_v28  ;;  %v251_v44 = vadd.f32 0.112945676, %v250_v29  ;;  %773 = vmatpush.bf16.msrb.mxu2 %v7169_v15  ;;  %v7152_v28 = vld [vmem:[#allocation8 + $0x68] sm:$0xf]  ;;  %v7301_v35 = vor.u32 %v10238_v26, %v7298_v27 }
  0xc4   :  { %v280_v49 = vadd.f32 0.05243302, %v279_v37  ;;  %v291_v50 = vadd.f32 0.112945676, %v290_v38  ;;  %786 = vmatpush.bf16.msrb.mxu3 %v7297_v21  ;;  %799 = vmatpush.bf16.msra.mxu0 %v7173_v22  ;;  %v10204_v29 = vld [vmem:[#allocation8 + $0x74] sm:$0xf0] }
  0xc5   :  { %v241_v53 = vmul.f32 %v240_v43, %v11394_v46  ;;  %v252_v54 = vmul.f32 %v251_v44, %v11394_v46  ;;  %v7282_v43 = vld [vmem:[#allocation8 + $0x178] sm:$0xf0]  ;;  %v7136_v44 = vld [vmem:[#allocation8 + $0x48] sm:$0xf]  ;;  %v10230_v56 = vld [vmem:[#allocation8 + $0x14c] sm:$0xf] }
  0xc6   :  { %v281_v59 = vmul.f32 %v280_v49, %v11396_v51  ;;  %v292_v60 = vmul.f32 %v291_v50, %v11396_v51  ;;  %812 = vmatpush.bf16.msra.mxu1 %v7301_v35  ;;  %v7285_v45 = vor.u32 %v10234_v40, %v7282_v43  ;;  %v10232_v49 = vld [vmem:[#allocation8 + $0x154] sm:$0xf0]  ;;  %v7137_v52 = vor.u32 %v10200_v47, %v7136_v44  ;;  %v10194_v8 = vld [vmem:[#allocation8 + $0x2c] sm:$0xf]  ;;  %v7106_v27 = vld [vmem:[#allocation8 + $0x18] sm:$0xf0] }
  0xc7   :  { %v242_v1 = vadd.f32 0.18741608, %v241_v53  ;;  %v253_v2 = vadd.f32 0.4994258, %v252_v54  ;;  %v7265_v53 = vor.u32 %v10232_v49, %v7264_v48  ;;  %v10198_v54 = vld [vmem:[#allocation8 + $0x4c] sm:$0xf] }
  0xc8   :  { %v282_v6 = vadd.f32 0.18741608, %v281_v59  ;;  %v293_v7 = vadd.f32 0.4994258, %v292_v60  ;;  %800 = vmatpush.bf16.msra.mxu0 %v7157_v42  ;;  %v7141_v59 = vor.u32 %v10198_v54, %v7138_v55  ;;  %v7266_v60 = vld [vmem:[#allocation8 + $0x158] sm:$0xf0] }
  0xc9   :  { %v254_v9 = vmul.f32 %v253_v2, %v11394_v46  ;;  %v243_v19 = vmul.f32 %v242_v1, %v11394_v46  ;;  %v7280_v46 = vld [vmem:[#allocation8 + $0x168] sm:$0xf]  ;;  %v7269_v1 = vor.u32 %v10230_v56, %v7266_v60  ;;  %v10228_v3 = vld [vmem:[#allocation8 + $0x134] sm:$0xf0]  ;;  %v10226_v13 = vld [vmem:[#allocation8 + $0x12c] sm:$0xf] }
  0xca   :  { %v294_v14 = vmul.f32 %v293_v7, %v11396_v51  ;;  %v283_v23 = vmul.f32 %v282_v6, %v11396_v51  ;;  %v7153_v51 = vor.u32 %v10204_v29, %v7152_v28  ;;  %v7281_v38 = vor.u32 %v10236_v31, %v7280_v46  ;;  %813 = vmatpush.bf16.msra.mxu1 %v7285_v45  ;;  %v7248_v2 = vld [vmem:[#allocation8 + $0x128] sm:$0xf]  ;;  %v10190_v26 = vld [vmem:[#allocation8 + $0xc] sm:$0xf]  ;;  %v7234_v35 = vld [vmem:[#allocation8 + $0x118] sm:$0xf0] }
  0xcb   :  { %v11417_v20 = vadd.f32 1.0, %v254_v9  ;;  %v244_v33 = vadd.f32 1.1283791, %v243_v19  ;;  %v7121_v6 = vor.u32 %v10196_v62, %v7120_v61  ;;  %v7249_v7 = vor.u32 %v10228_v3, %v7248_v2  ;;  %v7122_v9 = vld [vmem:[#allocation8 + $0x38] sm:$0xf0] }
  0xcc   :  { %v11420_v25 = vadd.f32 1.0, %v294_v14  ;;  %v11424_v37 = vadd.f32 1.1283791, %v283_v23  ;;  %774 = vmatpush.bf16.msrb.mxu2 %v7153_v51  ;;  %787 = vmatpush.bf16.msrb.mxu3 %v7281_v38  ;;  %v7125_v12 = vor.u32 %v10194_v8, %v7122_v9  ;;  %v7250_v14 = vld [vmem:[#allocation8 + $0x138] sm:$0xf0]  ;;  %v7105_v29 = vor.u32 %v10192_v17, %v7104_v16 }
  0xcd   :  { %10975 = vrcp.f32 %v11417_v20  ;;  %v265_v41 = vand.u32 2147483647, %v11417_v20  ;;  %v267_v5 = vand.u32 2147483648, %v11417_v20  ;;  %801 = vmatpush.bf16.msra.mxu0 %v7141_v59  ;;  %v245_v19 = vmul.f32 %v244_v33, %v11385_v32  ;;  %v10224_v23 = vld [vmem:[#allocation8 + $0x114] sm:$0xf0] }
  0xce   :  { %10977 = vrcp.f32 %v11420_v25  ;;  %v305_v0 = vand.u32 2147483647, %v11420_v25  ;;  %v307_v11 = vand.u32 2147483648, %v11420_v25  ;;  %814 = vmatpush.bf16.msra.mxu1 %v7269_v1  ;;  %v7253_v22 = vor.u32 %v10226_v13, %v7250_v14  ;;  %v10222_v31 = vld [vmem:[#allocation8 + $0x10c] sm:$0xf] }
  0xcf   :  { %vm261_vm3 = vweird.f32 %v11417_v20  ;;  %v7233_v46 = vor.u32 %v10224_v23, %v7232_v18  ;;  %v268_v32 = vor.u32 1.1754944e-38, %v267_v5  ;;  %vm301_vm5 = vweird.f32 %v11420_v25  ;;  %v7836_v54 = vld [vmem:[#allocation11 + $0x3c0] sm:$0xf]  ;;  %v383_v9 = vld [vmem:[#allocation10] sm:$0xf] }
  0xd0   :  { %775 = vmatpush.bf16.msrb.mxu2 %v7137_v52  ;;  %788 = vmatpush.bf16.msrb.mxu3 %v7265_v53  ;;  %v7109_v36 = vor.u32 %v10190_v26, %v7106_v27  ;;  %vm266_vm6 = vcmp.eq.f32.partialorder %v265_v41, 8.507059e+37  ;;  %v285_v38 = vmul.f32 %v11424_v37, %v11388_v34  ;;  %v308_v39 = vor.u32 1.1754944e-38, %v307_v11  ;;  %v10377_v55 = vld [vmem:[#allocation11 + $0x3dc] sm:$0xf0] }
  0xd1   :  { %802 = vmatpush.bf16.msra.mxu0 %v7125_v12  ;;  %vm306_vm8 = vcmp.eq.f32.partialorder %v305_v0, 8.507059e+37  ;;  %v229_v34 = vmul.f32 0.5, %v11380_v24  ;;  %v230_v47 = vmul.f32 0.5, %v11382_v30  ;;  %v7837_v56 = vor.u32 %v10377_v55, %v7836_v54  ;;  %v7804_v24 = vld [vmem:[#allocation11 + $0x380] sm:$0xf] }
  0xd2   :  { %815 = vmatpush.bf16.msra.mxu1 %v7253_v22  ;;  %v10313_v59 = vld [vmem:[#allocation11 + $0x1dc] sm:$0xf0]  ;;  %v11459_v13 = vunpack.c.l.bf16 %v383_v9  ;;  %v10373_v55 = vld [vmem:[#allocation11 + $0x3c4] sm:$0xf] }
  0xd3   :  { %v11427_v50 = vpop.eup %10975  ;;  %v7772_v61 = vld [vmem:[#allocation11 + $0x340] sm:$0xf] }
  0xd4   :  { %v11429_v57 = vpop.eup %10977  ;;  %v257_v58 = vmul.f32 %v11427_v50, %v11417_v20  ;;  %vm262_vm1 = vweird.f32 %v11427_v50  ;;  %776 = vmatpush.bf16.msrb.mxu2 %v7121_v6  ;;  %789 = vmatpush.bf16.msrb.mxu3 %v7249_v7  ;;  %v10361_v62 = vld [vmem:[#allocation11 + $0x35c] sm:$0xf0]  ;;  %v387_v26 = vperm.slane %v11459_v13, 2  ;;  %v389_v9 = vperm.slane %v11459_v13, 6 }
  0xd5   :  { %v297_v63 = vmul.f32 %v11429_v57, %v11420_v25  ;;  %vm302_vm2 = vweird.f32 %v11429_v57  ;;  %vm263_vm4 = vmor %vm261_vm3, %vm262_vm1  ;;  %v7237_v25 = vor.u32 %v10222_v31, %v7234_v35  ;;  %803 = vmatpush.bf16.msra.mxu0 %v7109_v36  ;;  %v7548_v0 = vld [vmem:[#allocation11 + $0x180] sm:$0xf] }
  0xd6   :  { %v258_v4 = vsub.f32 1.0, %v257_v58  ;;  %vm303_vm7 = vmor %vm301_vm5, %vm302_vm2  ;;  %v7580_v58 = vld [vmem:[#allocation11 + $0x1c0] sm:$0xf] }
  0xd7   :  { %v298_v10 = vsub.f32 1.0, %v297_v63  ;;  %816 = vmatpush.bf16.msra.mxu1 %v7237_v25  ;;  %v7581_v60 = vor.u32 %v10313_v59, %v7580_v58  ;;  %v7773_v63 = vor.u32 %v10361_v62, %v7772_v61  ;;  %v10305_v1 = vld [vmem:[#allocation11 + $0x19c] sm:$0xf0] }
  0xd8   :  { %v259_v15 = vmul.f32 %v11427_v50, %v258_v4  ;;  %777 = vmatpush.bf16.msrb.mxu2 %v7105_v29  ;;  %790 = vmatpush.bf16.msrb.mxu3 %v7233_v46  ;;  %v7549_v2 = vor.u32 %v10305_v1, %v7548_v0  ;;  %v7740_v3 = vld [vmem:[#allocation11 + $0x300] sm:$0xf] }
  0xd9   :  { %v299_v21 = vmul.f32 %v11429_v57, %v298_v10  ;;  %v10353_v4 = vld [vmem:[#allocation11 + $0x31c] sm:$0xf0] }
  0xda   :  { %v260_v28 = vadd.f32 %v11427_v50, %v259_v15  ;;  %v7741_v5 = vor.u32 %v10353_v4, %v7740_v3  ;;  %v7516_v6 = vld [vmem:[#allocation11 + $0x140] sm:$0xf] }
  0xdb   :  { %v300_v33 = vadd.f32 %v11429_v57, %v299_v21  ;;  %v10297_v7 = vld [vmem:[#allocation11 + $0x15c] sm:$0xf0] }
  0xdc   :  { %v264_v51 = vsel %vm263_vm4, %v11427_v50, %v260_v28  ;;  %v7517_v8 = vor.u32 %v10297_v7, %v7516_v6  ;;  %v7708_v10 = vld [vmem:[#allocation11 + $0x2c0] sm:$0xf]  ;;  %v10365_v6 = vld [vmem:[#allocation11 + $0x384] sm:$0xf] }
  0xdd   :  { %v269_v40 = vsel %vm266_vm6, %v268_v32, %v264_v51  ;;  %v304_v42 = vsel %vm303_vm7, %v11429_v57, %v300_v33  ;;  %v10369_v57 = vld [vmem:[#allocation11 + $0x39c] sm:$0xf0]  ;;  %v7806_v7 = vld [vmem:[#allocation11 + $0x3a0] sm:$0xf0] }
  0xde   :  { %v270_v43 = vmul.f32 %v269_v40, %v245_v19  ;;  %v309_v44 = vsel %vm306_vm8, %v308_v39, %v304_v42  ;;  %v7805_v30 = vor.u32 %v10369_v57, %v7804_v24  ;;  %v10345_v11 = vld [vmem:[#allocation11 + $0x2dc] sm:$0xf0]  ;;  %v395_v39 = vperm.slane %v387_v26, 0 }
  0xdf   :  { %v310_v45 = vmul.f32 %v309_v44, %v285_v38  ;;  %v8348_v12 = vld [vmem:[#allocation11 + $0x7c0] sm:$0xf]  ;;  %v7709_v14 = vor.u32 %v10345_v11, %v7708_v10  ;;  %v7809_v10 = vor.u32 %v10365_v6, %v7806_v7  ;;  %v10341_v6 = vld [vmem:[#allocation11 + $0x2c4] sm:$0xf] }
  0xe0   :  { %v7092_v20 = vclamps-f32 %v270_v43, 1.0  ;;  %v10505_v15 = vld [vmem:[#allocation11 + $0x7dc] sm:$0xf0] }
  0xe1   :  { %v7093_v41 = vclamps-f32 %v310_v45, 1.0  ;;  %v8349_v16 = vor.u32 %v10505_v15, %v8348_v12  ;;  %v7484_v17 = vld [vmem:[#allocation11 + $0x100] sm:$0xf] }
  0xe2   :  { %v313_v37 = vadd.f32 1.0, %v7092_v20  ;;  %v10289_v18 = vld [vmem:[#allocation11 + $0x11c] sm:$0xf0] }
  0xe3   :  { %v314_v48 = vadd.f32 1.0, %v7093_v41  ;;  %v7485_v19 = vor.u32 %v10289_v18, %v7484_v17  ;;  %v7676_v21 = vld [vmem:[#allocation11 + $0x280] sm:$0xf]  ;;  %v386_v41 = vperm.slane %v11459_v13, 0 }
  0xe4   :  { %v315_v49 = vmul.f32 %v313_v37, %v229_v34  ;;  %v10337_v22 = vld [vmem:[#allocation11 + $0x29c] sm:$0xf0] }
  0xe5   :  { %v316_v50 = vmul.f32 %v314_v48, %v230_v47  ;;  %v8316_v23 = vld [vmem:[#allocation11 + $0x780] sm:$0xf]  ;;  %v7677_v27 = vor.u32 %v10337_v22, %v7676_v21  ;;  %v394_v1 = vperm.slane %v386_v41, 0  ;;  %v10309_v22 = vld [vmem:[#allocation11 + $0x1c4] sm:$0xf]  ;;  %v388_v41 = vperm.slane %v11459_v13, 4 }
  0xe6   :  { %v317_v52 = vpack.c.bf16 %v315_v49, %v315_v49  ;;  %v10497_v28 = vld [vmem:[#allocation11 + $0x79c] sm:$0xf0] }
  0xe7   :  { %v318_v53 = vpack.c.bf16 %v316_v50, %v316_v50  ;;  %v8317_v29 = vor.u32 %v10497_v28, %v8316_v23  ;;  %v7452_v46 = vld [vmem:[#allocation11 + $0xc0] sm:$0xf]  ;;  %v7582_v23 = vld [vmem:[#allocation11 + $0x1e0] sm:$0xf0] }
  0xe8   :  { %726 = vmatmul.bf16.vlgmr.msra.gmra.mxu2 %v317_v52  ;;  %752 = vmatmul.bf16.vlgmr.msrb.gmra.mxu0 %v317_v52  ;;  %v10281_v31 = vld [vmem:[#allocation11 + $0xdc] sm:$0xf0] }
  0xe9   :  { %739 = vmatmul.bf16.vlgmr.msra.gmra.mxu3 %v318_v53  ;;  %765 = vmatmul.bf16.vlgmr.msrb.gmra.mxu1 %v318_v53  ;;  %v7453_v35 = vor.u32 %v10281_v31, %v7452_v46  ;;  %v8092_v32 = vld [vmem:[#allocation11 + $0x5c0] sm:$0xf]  ;;  %v10357_v31 = vld [vmem:[#allocation11 + $0x344] sm:$0xf] }
  0xea   :  { %2580 = vmatpush.bf16.msra.mxu3 %v7837_v56  ;;  %2567 = vmatpush.bf16.msra.mxu2 %v7581_v60  ;;  %v10441_v33 = vld [vmem:[#allocation11 + $0x5dc] sm:$0xf0]  ;;  %v7838_v56 = vld [vmem:[#allocation11 + $0x3e0] sm:$0xf0] }
  0xeb   :  { %2606 = vmatpush.bf16.msrb.mxu1 %v8349_v16  ;;  %v8093_v36 = vor.u32 %v10441_v33, %v8092_v32  ;;  %v7644_v51 = vld [vmem:[#allocation11 + $0x240] sm:$0xf]  ;;  %v7841_v58 = vor.u32 %v10373_v55, %v7838_v56  ;;  %v7742_v56 = vld [vmem:[#allocation11 + $0x320] sm:$0xf0] }
  0xec   :  { %v10329_v38 = vld [vmem:[#allocation11 + $0x25c] sm:$0xf0] }
  0xed   :  { %v7645_v40 = vor.u32 %v10329_v38, %v7644_v51  ;;  %v8284_v42 = vld [vmem:[#allocation11 + $0x740] sm:$0xf]  ;;  %2593 = vmatpush.bf16.msrb.mxu0 %v8093_v36 }
  0xee   :  { %2581 = vmatpush.bf16.msra.mxu3 %v7805_v30  ;;  %2568 = vmatpush.bf16.msra.mxu2 %v7549_v2  ;;  %v10489_v25 = vld [vmem:[#allocation11 + $0x75c] sm:$0xf0] }
  0xef   :  { %2607 = vmatpush.bf16.msrb.mxu1 %v8317_v29  ;;  %v8285_v43 = vor.u32 %v10489_v25, %v8284_v42  ;;  %v7420_v44 = vld [vmem:[#allocation11 + $0x80] sm:$0xf]  ;;  %v7585_v29 = vor.u32 %v10309_v22, %v7582_v23  ;;  %v397_v42 = vperm.slane %v389_v9, 0  ;;  %v8350_v23 = vld [vmem:[#allocation11 + $0x7e0] sm:$0xf0] }
  0xf0   :  { %v10273_v45 = vld [vmem:[#allocation11 + $0x9c] sm:$0xf0] }
  0xf1   :  { %v8060_v20 = vld [vmem:[#allocation11 + $0x580] sm:$0xf]  ;;  %v7421_v34 = vor.u32 %v10273_v45, %v7420_v44  ;;  %v7550_v44 = vld [vmem:[#allocation11 + $0x1a0] sm:$0xf0] }
  0xf2   :  { %2582 = vmatpush.bf16.msra.mxu3 %v7773_v63  ;;  %2569 = vmatpush.bf16.msra.mxu2 %v7517_v8  ;;  %v10433_v37 = vld [vmem:[#allocation11 + $0x59c] sm:$0xf0] }
  0xf3   :  { %2608 = vmatpush.bf16.msrb.mxu1 %v8285_v43  ;;  %v8061_v47 = vor.u32 %v10433_v37, %v8060_v20  ;;  %v7612_v48 = vld [vmem:[#allocation11 + $0x200] sm:$0xf]  ;;  %v10301_v43 = vld [vmem:[#allocation11 + $0x184] sm:$0xf] }
  0xf4   :  { %v10321_v49 = vld [vmem:[#allocation11 + $0x21c] sm:$0xf0] }
  0xf5   :  { %v8252_v50 = vld [vmem:[#allocation11 + $0x700] sm:$0xf]  ;;  %2594 = vmatpush.bf16.msrb.mxu0 %v8061_v47 }
  0xf6   :  { %2583 = vmatpush.bf16.msra.mxu3 %v7741_v5  ;;  %2570 = vmatpush.bf16.msra.mxu2 %v7485_v19  ;;  %v10481_v54 = vld [vmem:[#allocation11 + $0x71c] sm:$0xf0] }
  0xf7   :  { %v8253_v30 = vor.u32 %v10481_v54, %v8252_v50  ;;  %v7388_v59 = vld [vmem:[#allocation11 + $0x40] sm:$0xf] }
  0xf8   :  { %778 = vmatmul.bf16.vlgmr.msrb.gmra.mxu2 %v317_v52  ;;  %804 = vmatmul.bf16.vlgmr.msra.gmra.mxu0 %v317_v52  ;;  %v10265_v60 = vld [vmem:[#allocation11 + $0x5c] sm:$0xf0] }
  0xf9   :  { %791 = vmatmul.bf16.vlgmr.msrb.gmra.mxu3 %v318_v53  ;;  %817 = vmatmul.bf16.vlgmr.msra.gmra.mxu1 %v318_v53  ;;  %v7613_v53 = vor.u32 %v10321_v49, %v7612_v48  ;;  %v8028_v61 = vld [vmem:[#allocation11 + $0x540] sm:$0xf]  ;;  %v7389_v62 = vor.u32 %v10265_v60, %v7388_v59 }
  0xfa   :  { %2584 = vmatpush.bf16.msra.mxu3 %v7709_v14  ;;  %2571 = vmatpush.bf16.msra.mxu2 %v7453_v35  ;;  %v10425_v63 = vld [vmem:[#allocation11 + $0x55c] sm:$0xf0]  ;;  %v7774_v35 = vld [vmem:[#allocation11 + $0x360] sm:$0xf0] }
  0xfb   :  { %2609 = vmatpush.bf16.msrb.mxu1 %v8253_v30  ;;  %v8029_v2 = vor.u32 %v10425_v63, %v8028_v61  ;;  %v8220_v3 = vld [vmem:[#allocation11 + $0x6c0] sm:$0xf]  ;;  %v7777_v38 = vor.u32 %v10357_v31, %v7774_v35  ;;  %v10293_v61 = vld [vmem:[#allocation11 + $0x144] sm:$0xf] }
  0xfc   :  { %v10473_v4 = vld [vmem:[#allocation11 + $0x6dc] sm:$0xf0]  ;;  %v10285_v35 = vld [vmem:[#allocation11 + $0x104] sm:$0xf] }
  0xfd   :  { %v8221_v5 = vor.u32 %v10473_v4, %v8220_v3  ;;  %2595 = vmatpush.bf16.msrb.mxu0 %v8029_v2  ;;  %v7356_v11 = vld [vmem:[#allocation11] sm:$0xf]  ;;  %v396_v3 = vperm.slane %v388_v41, 0 }
  0xfe   :  { %2585 = vmatpush.bf16.msra.mxu3 %v7677_v27  ;;  %2572 = vmatpush.bf16.msra.mxu2 %v7421_v34  ;;  %v10257_v14 = vld [vmem:[#allocation11 + $0x1c] sm:$0xf0]  ;;  %v7553_v34 = vor.u32 %v10301_v43, %v7550_v44  ;;  %v10333_v43 = vld [vmem:[#allocation11 + $0x284] sm:$0xf] }
  0xff   :  { %v7996_v15 = vld [vmem:[#allocation11 + $0x500] sm:$0xf]  ;;  %2610 = vmatpush.bf16.msrb.mxu1 %v8221_v5  ;;  %v7357_v21 = vor.u32 %v10257_v14, %v7356_v11  ;;  %v7710_v14 = vld [vmem:[#allocation11 + $0x2e0] sm:$0xf0] }
 0x100   :  { %v10417_v16 = vld [vmem:[#allocation11 + $0x51c] sm:$0xf0] }
 0x101   :  { %v8188_v26 = vld [vmem:[#allocation11 + $0x680] sm:$0xf]  ;;  %v7997_v28 = vor.u32 %v10417_v16, %v7996_v15 }
 0x102   :  { %2586 = vmatpush.bf16.msra.mxu3 %v7645_v40  ;;  %2573 = vmatpush.bf16.msra.mxu2 %v7389_v62  ;;  %v10465_v46 = vld [vmem:[#allocation11 + $0x69c] sm:$0xf0]  ;;  %v7518_v62 = vld [vmem:[#allocation11 + $0x160] sm:$0xf0] }
 0x103   :  { %v8189_v51 = vor.u32 %v10465_v46, %v8188_v26  ;;  %v10409_v40 = vld [vmem:[#allocation11 + $0x4dc] sm:$0xf0]  ;;  %2596 = vmatpush.bf16.msrb.mxu0 %v7997_v28  ;;  %v7521_v4 = vor.u32 %v10293_v61, %v7518_v62 }
 0x104   :  { %v8156_v47 = vld [vmem:[#allocation11 + $0x640] sm:$0xf] }
 0x105   :  { %2611 = vmatpush.bf16.msrb.mxu1 %v8189_v51  ;;  %v10457_v48 = vld [vmem:[#allocation11 + $0x65c] sm:$0xf0] }
 0x106   :  { %2587 = vmatpush.bf16.msra.mxu3 %v7613_v53  ;;  %2574 = vmatpush.bf16.msra.mxu2 %v7357_v21  ;;  %v10349_v53 = vld [vmem:[#allocation11 + $0x304] sm:$0xf]  ;;  %v7932_v13 = vld [vmem:[#allocation11 + $0x480] sm:$0xf] }
 0x107   :  { %v7745_v59 = vor.u32 %v10349_v53, %v7742_v56  ;;  %v8124_v63 = vld [vmem:[#allocation11 + $0x600] sm:$0xf] }
 0x108   :  { %v10449_v5 = vld [vmem:[#allocation11 + $0x61c] sm:$0xf0] }
 0x109   :  { %v7900_v26 = vld [vmem:[#allocation11 + $0x440] sm:$0xf] }
 0x10a   :  { %2632 = vmatpush.bf16.msrb.mxu3 %v7841_v58  ;;  %2619 = vmatpush.bf16.msrb.mxu2 %v7585_v29  ;;  %v7868_v56 = vld [vmem:[#allocation11 + $0x400] sm:$0xf] }
 0x10e   :  { %2633 = vmatpush.bf16.msrb.mxu3 %v7809_v10  ;;  %2620 = vmatpush.bf16.msrb.mxu2 %v7553_v34 }
 0x112   :  { %2634 = vmatpush.bf16.msrb.mxu3 %v7777_v38  ;;  %2621 = vmatpush.bf16.msrb.mxu2 %v7521_v4 }
 0x116   :  { %2635 = vmatpush.bf16.msrb.mxu3 %v7745_v59  ;;  %v10385_v59 = vld [vmem:[#allocation11 + $0x41c] sm:$0xf0] }
 0x165   :  { %v753_v52 = vpop.f32.mrf.mxu0 }
 0x166   :  { %v754_v24 = vadd.f32 %v753_v52, %v395_v39  ;;  %v766_v57 = vpop.f32.mrf.mxu1  ;;  %v7964_v39 = vld [vmem:[#allocation11 + $0x4c0] sm:$0xf]  ;;  %v8157_v52 = vor.u32 %v10457_v48, %v8156_v47  ;;  %v7678_v47 = vld [vmem:[#allocation11 + $0x2a0] sm:$0xf0] }
 0x167   :  { %v7965_v25 = vor.u32 %v10409_v40, %v7964_v39  ;;  %v10493_v48 = vld [vmem:[#allocation11 + $0x784] sm:$0xf] }
 0x168   :  { %v11463_v0 = vadd.f32 %v766_v57, %v754_v24  ;;  %v10401_v24 = vld [vmem:[#allocation11 + $0x49c] sm:$0xf0]  ;;  %2612 = vmatpush.bf16.msrb.mxu1 %v8157_v52 }
 0x169   :  { %2597 = vmatpush.bf16.msrb.mxu0 %v7965_v25  ;;  %v7933_v60 = vor.u32 %v10401_v24, %v7932_v13  ;;  %v7486_v25 = vld [vmem:[#allocation11 + $0x120] sm:$0xf0] }
 0x16a   :  { %v11466_v8 = vmul.f32 0.70710677, %v11463_v0  ;;  %v7489_v34 = vor.u32 %v10285_v35, %v7486_v25  ;;  %v10269_v25 = vld [vmem:[#allocation11 + $0x84] sm:$0xf] }
 0x16b   :  { %v727_v12 = vpop.f32.mrf.mxu2 }
 0x16c   :  { %v870_v17 = vmul.f32 %v11466_v8, %v11466_v8  ;;  %v728_v18 = vadd.f32 %v727_v12, %v394_v1  ;;  %v740_v19 = vpop.f32.mrf.mxu3  ;;  %v8125_v12 = vor.u32 %v10449_v5, %v8124_v63  ;;  %2622 = vmatpush.bf16.msrb.mxu2 %v7489_v34  ;;  %v7869_v63 = vor.u32 %v10385_v59, %v7868_v56 }
 0x16d   :  { %v755_v27 = vpop.f32.mrf.mxu0  ;;  %2598 = vmatpush.bf16.msrb.mxu0 %v7933_v60 }
 0x16e   :  { %v11471_v32 = vmin.f32 %v870_v17, 16.0  ;;  %v11473_v33 = vadd.f32 %v740_v19, %v728_v18  ;;  %v768_v36 = vpop.f32.mrf.mxu1  ;;  %v7713_v17 = vor.u32 %v10341_v6, %v7710_v14  ;;  %v10501_v18 = vld [vmem:[#allocation11 + $0x7c4] sm:$0xf]  ;;  %2613 = vmatpush.bf16.msrb.mxu1 %v8125_v12  ;;  %v10393_v27 = vld [vmem:[#allocation11 + $0x45c] sm:$0xf0] }
 0x16f   :  { %v8353_v46 = vor.u32 %v10501_v18, %v8350_v23  ;;  %v7901_v31 = vor.u32 %v10393_v27, %v7900_v26  ;;  %v8094_v23 = vld [vmem:[#allocation11 + $0x5e0] sm:$0xf0] }
 0x170   :  { %v872_v45 = vmul.f32 2.1237322e-06, %v11471_v32  ;;  %v883_v20 = vmul.f32 3.8918573e-05, %v11471_v32  ;;  %v11479_v37 = vmul.f32 0.70710677, %v11473_v33  ;;  %2636 = vmatpush.bf16.msrb.mxu3 %v7713_v17 }
 0x171   :  { %2599 = vmatpush.bf16.msrb.mxu0 %v7901_v31  ;;  %v10325_v27 = vld [vmem:[#allocation11 + $0x244] sm:$0xf] }
 0x172   :  { %v873_v49 = vadd.f32 0.00028619796, %v872_v45  ;;  %v884_v50 = vadd.f32 0.001143296, %v883_v20  ;;  %v830_v54 = vmul.f32 %v11479_v37, %v11479_v37  ;;  %2658 = vmatpush.bf16.msra.mxu1 %v8353_v46  ;;  %v7646_v46 = vld [vmem:[#allocation11 + $0x260] sm:$0xf0] }
 0x173   :  { %v729_v55 = vpop.f32.mrf.mxu2  ;;  %v10485_v31 = vld [vmem:[#allocation11 + $0x744] sm:$0xf] }
 0x174   :  { %v874_v57 = vmul.f32 %v873_v49, %v11471_v32  ;;  %v885_v30 = vmul.f32 %v884_v50, %v11471_v32  ;;  %v742_v58 = vpop.f32.mrf.mxu3  ;;  %v11485_v1 = vmin.f32 %v830_v54, 16.0  ;;  %v8318_v49 = vld [vmem:[#allocation11 + $0x7a0] sm:$0xf0]  ;;  %v7681_v55 = vor.u32 %v10333_v43, %v7678_v47 }
 0x175   :  { %v805_v2 = vpop.f32.mrf.mxu0  ;;  %v8321_v58 = vor.u32 %v10493_v48, %v8318_v49  ;;  %2600 = vmatpush.bf16.msrb.mxu0 %v7869_v63  ;;  %v7614_v63 = vld [vmem:[#allocation11 + $0x220] sm:$0xf0] }
 0x176   :  { %v875_v7 = vadd.f32 0.0036580483, %v874_v57  ;;  %v886_v9 = vadd.f32 0.014752088, %v885_v30  ;;  %v806_v10 = vadd.f32 %v805_v2, %v397_v42  ;;  %v818_v11 = vpop.f32.mrf.mxu1  ;;  %v832_v15 = vmul.f32 2.1237322e-06, %v11485_v1  ;;  %2637 = vmatpush.bf16.msrb.mxu3 %v7681_v55 }
 0x177   :  { %v843_v16 = vmul.f32 3.8918573e-05, %v11485_v1  ;;  %v10277_v2 = vld [vmem:[#allocation11 + $0xc4] sm:$0xf]  ;;  %2659 = vmatpush.bf16.msra.mxu1 %v8321_v58 }
 0x178   :  { %v876_v19 = vmul.f32 %v875_v7, %v11471_v32  ;;  %v887_v21 = vmul.f32 %v886_v9, %v11471_v32  ;;  %v11491_v22 = vadd.f32 %v818_v11, %v806_v10  ;;  %v833_v28 = vadd.f32 0.00028619796, %v832_v15 }
 0x179   :  { %v844_v29 = vadd.f32 0.001143296, %v843_v16 }
 0x17a   :  { %v877_v36 = vadd.f32 0.05243302, %v876_v19  ;;  %v888_v51 = vadd.f32 0.112945676, %v887_v21  ;;  %v834_v38 = vmul.f32 %v833_v28, %v11485_v1  ;;  %v11496_v40 = vmul.f32 0.70710677, %v11491_v22 }
 0x17b   :  { %v845_v39 = vmul.f32 %v844_v29, %v11485_v1  ;;  %v779_v42 = vpop.f32.mrf.mxu2  ;;  %v10437_v21 = vld [vmem:[#allocation11 + $0x5c4] sm:$0xf] }
 0x17c   :  { %v878_v44 = vmul.f32 %v877_v36, %v11471_v32  ;;  %v889_v45 = vmul.f32 %v888_v51, %v11471_v32  ;;  %v780_v20 = vadd.f32 %v779_v42, %v396_v3  ;;  %v792_v41 = vpop.f32.mrf.mxu3  ;;  %v835_v50 = vadd.f32 0.0036580483, %v834_v38  ;;  %v7454_v3 = vld [vmem:[#allocation11 + $0xe0] sm:$0xf0] }
 0x17d   :  { %v846_v52 = vadd.f32 0.014752088, %v845_v39  ;;  %v950_v53 = vmul.f32 %v11496_v40, %v11496_v40  ;;  %v807_v54 = vpop.f32.mrf.mxu0  ;;  %v7457_v10 = vor.u32 %v10277_v2, %v7454_v3  ;;  %v8097_v36 = vor.u32 %v10437_v21, %v8094_v23  ;;  %v8286_v51 = vld [vmem:[#allocation11 + $0x760] sm:$0xf0] }
 0x17e   :  { %v879_v13 = vadd.f32 0.18741608, %v878_v44  ;;  %v890_v24 = vadd.f32 0.4994258, %v889_v45  ;;  %v11502_v57 = vadd.f32 %v792_v41, %v780_v20  ;;  %v820_v30 = vpop.f32.mrf.mxu1  ;;  %v836_v60 = vmul.f32 %v835_v50, %v11485_v1  ;;  %v7422_v41 = vld [vmem:[#allocation11 + $0xa0] sm:$0xf0] }
 0x17f   :  { %v847_v61 = vmul.f32 %v846_v52, %v11485_v1  ;;  %v11506_v62 = vmin.f32 %v950_v53, 16.0  ;;  %2623 = vmatpush.bf16.msrb.mxu2 %v7457_v10  ;;  %2645 = vmatpush.bf16.msra.mxu0 %v8097_v36  ;;  %v7649_v20 = vor.u32 %v10325_v27, %v7646_v46  ;;  %v8289_v48 = vor.u32 %v10485_v31, %v8286_v51  ;;  %v7390_v21 = vld [vmem:[#allocation11 + $0x60] sm:$0xf0] }
 0x180   :  { %v891_v4 = vmul.f32 %v890_v24, %v11471_v32  ;;  %v11510_v5 = vmul.f32 0.70710677, %v11502_v57  ;;  %v837_v6 = vadd.f32 0.05243302, %v836_v60  ;;  %v880_v15 = vmul.f32 %v879_v13, %v11471_v32  ;;  %v10429_v13 = vld [vmem:[#allocation11 + $0x584] sm:$0xf] }
 0x181   :  { %v848_v7 = vadd.f32 0.112945676, %v847_v61  ;;  %v952_v9 = vmul.f32 2.1237322e-06, %v11506_v62  ;;  %v963_v12 = vmul.f32 3.8918573e-05, %v11506_v62  ;;  %2638 = vmatpush.bf16.msrb.mxu3 %v7649_v20  ;;  %v7425_v54 = vor.u32 %v10269_v25, %v7422_v41  ;;  %2660 = vmatpush.bf16.msra.mxu1 %v8289_v48 }
 0x182   :  { %v11513_v11 = vadd.f32 1.0, %v891_v4  ;;  %v910_v14 = vmul.f32 %v11510_v5, %v11510_v5  ;;  %v838_v16 = vmul.f32 %v837_v6, %v11485_v1  ;;  %v881_v38 = vadd.f32 1.1283791, %v880_v15  ;;  %v8062_v24 = vld [vmem:[#allocation11 + $0x5a0] sm:$0xf0] }
 0x183   :  { %v849_v17 = vmul.f32 %v848_v7, %v11485_v1  ;;  %v953_v18 = vadd.f32 0.00028619796, %v952_v9  ;;  %v781_v19 = vpop.f32.mrf.mxu2  ;;  %v964_v35 = vadd.f32 0.001143296, %v963_v12  ;;  %v11535_v30 = vmul.f32 0.5, %v11463_v0  ;;  %2624 = vmatpush.bf16.msrb.mxu2 %v7425_v54 }
 0x184   :  { %10979 = vrcp.f32 %v11513_v11  ;;  %v794_v26 = vpop.f32.mrf.mxu3  ;;  %v11523_v32 = vmin.f32 %v910_v14, 16.0  ;;  %v839_v39 = vadd.f32 0.18741608, %v838_v16  ;;  %v902_v56 = vand.u32 2147483647, %v11513_v11 }
 0x185   :  { %v850_v28 = vadd.f32 0.4994258, %v849_v17  ;;  %v954_v29 = vmul.f32 %v953_v18, %v11506_v62  ;;  %v965_v43 = vmul.f32 %v964_v35, %v11506_v62  ;;  %v882_v58 = vmul.f32 %v881_v38, %v11466_v8  ;;  %v10317_v61 = vld [vmem:[#allocation11 + $0x204] sm:$0xf] }
 0x186   :  { %v912_v44 = vmul.f32 2.1237322e-06, %v11523_v32  ;;  %v923_v45 = vmul.f32 3.8918573e-05, %v11523_v32  ;;  %v904_v59 = vand.u32 2147483648, %v11513_v11  ;;  %v840_v60 = vmul.f32 %v839_v39, %v11485_v1 }
 0x187   :  { %v851_v42 = vmul.f32 %v850_v28, %v11485_v1  ;;  %v955_v47 = vadd.f32 0.0036580483, %v954_v29  ;;  %v966_v50 = vadd.f32 0.014752088, %v965_v43  ;;  %v10477_v7 = vld [vmem:[#allocation11 + $0x704] sm:$0xf]  ;;  %vm898_vm9 = vweird.f32 %v11513_v11 }
 0x188   :  { %v913_v52 = vadd.f32 0.00028619796, %v912_v44  ;;  %v924_v53 = vadd.f32 0.001143296, %v923_v45  ;;  %v8254_v9 = vld [vmem:[#allocation11 + $0x720] sm:$0xf0]  ;;  %v8065_v8 = vor.u32 %v10429_v13, %v8062_v24  ;;  %v7617_v17 = vor.u32 %v10317_v61, %v7614_v63 }
 0x189   :  { %v11529_v34 = vadd.f32 1.0, %v851_v42  ;;  %v967_v3 = vmul.f32 %v966_v50, %v11506_v62  ;;  %v956_v0 = vmul.f32 %v955_v47, %v11506_v62  ;;  %vm11545_vm11 = vcmp.eq.f32.partialorder %v902_v56, 8.507059e+37  ;;  %v10261_v19 = vld [vmem:[#allocation11 + $0x44] sm:$0xf] }
 0x18a   :  { %v10980_v49 = vpop.eup %10979  ;;  %v914_v4 = vmul.f32 %v913_v52, %v11523_v32  ;;  %v925_v6 = vmul.f32 %v924_v53, %v11523_v32  ;;  %v905_v16 = vor.u32 1.1754944e-38, %v904_v59  ;;  %2646 = vmatpush.bf16.msra.mxu0 %v8065_v8  ;;  %v8257_v18 = vor.u32 %v10477_v7, %v8254_v9  ;;  %v10421_v46 = vld [vmem:[#allocation11 + $0x544] sm:$0xf]  ;;  %2639 = vmatpush.bf16.msrb.mxu3 %v7617_v17  ;;  %v7844_v8 = vld [vmem:[#allocation11 + $0x3c8] sm:$0xf] }
 0x18b   :  { %v894_v55 = vmul.f32 %v10980_v49, %v11513_v11  ;;  %10981 = vrcp.f32 %v11529_v34  ;;  %vm899_vm10 = vweird.f32 %v10980_v49  ;;  %v968_v1 = vadd.f32 0.112945676, %v967_v3  ;;  %v8030_v31 = vld [vmem:[#allocation11 + $0x560] sm:$0xf0] }
 0x18c   :  { %v915_v12 = vadd.f32 0.0036580483, %v914_v4  ;;  %v926_v14 = vadd.f32 0.014752088, %v925_v6  ;;  %v841_v27 = vadd.f32 1.1283791, %v840_v60  ;;  %vm900_vm12 = vmor %vm898_vm9, %vm899_vm10  ;;  %2661 = vmatpush.bf16.msra.mxu1 %v8257_v18  ;;  %v7393_v38 = vor.u32 %v10261_v19, %v7390_v21 }
 0x18d   :  { %v895_v2 = vsub.f32 1.0, %v894_v55  ;;  %v969_v28 = vmul.f32 %v968_v1, %v11506_v62  ;;  %v862_v36 = vand.u32 2147483647, %v11529_v34  ;;  %v957_v51 = vadd.f32 0.05243302, %v956_v0 }
 0x18e   :  { %v927_v29 = vmul.f32 %v926_v14, %v11523_v32  ;;  %v10469_v39 = vld [vmem:[#allocation11 + $0x6c4] sm:$0xf]  ;;  %v916_v43 = vmul.f32 %v915_v12, %v11523_v32  ;;  %v864_v41 = vand.u32 2147483648, %v11529_v34  ;;  %2625 = vmatpush.bf16.msrb.mxu2 %v7393_v38  ;;  %v8033_v47 = vor.u32 %v10421_v46, %v8030_v31  ;;  %v7812_v46 = vld [vmem:[#allocation11 + $0x388] sm:$0xf] }
 0x18f   :  { %v896_v10 = vmul.f32 %v10980_v49, %v895_v2  ;;  %v970_v25 = vadd.f32 0.4994258, %v969_v28  ;;  %v8222_v45 = vld [vmem:[#allocation11 + $0x6e0] sm:$0xf0]  ;;  %vm858_vm13 = vweird.f32 %v11529_v34  ;;  %v958_v13 = vmul.f32 %v957_v51, %v11506_v62  ;;  %v10370_v31 = vld [vmem:[#allocation11 + $0x3a4] sm:$0xf0] }
 0x190   :  { %v928_v44 = vadd.f32 0.112945676, %v927_v29  ;;  %v10253_v48 = vld [vmem:[#allocation11 + $0x4] sm:$0xf]  ;;  %2647 = vmatpush.bf16.msra.mxu0 %v8033_v47  ;;  %v8225_v24 = vor.u32 %v10469_v39, %v8222_v45  ;;  %vm11572_vm15 = vcmp.eq.f32.partialorder %v862_v36, 8.507059e+37  ;;  %v865_v0 = vor.u32 1.1754944e-38, %v864_v41 }
 0x191   :  { %v11549_v23 = vpop.eup %10981  ;;  %v897_v26 = vadd.f32 %v10980_v49, %v896_v10  ;;  %v971_v52 = vmul.f32 %v970_v25, %v11506_v62  ;;  %v7358_v53 = vld [vmem:[#allocation11 + $0x20] sm:$0xf0]  ;;  %v10378_v10 = vld [vmem:[#allocation11 + $0x3e4] sm:$0xf0]  ;;  %v842_v1 = vmul.f32 %v841_v27, %v11479_v37  ;;  %v959_v14 = vadd.f32 0.18741608, %v958_v13 }
 0x192   :  { %v854_v35 = vmul.f32 %v11549_v23, %v11529_v34  ;;  %v10413_v54 = vld [vmem:[#allocation11 + $0x504] sm:$0xf]  ;;  %vm859_vm14 = vweird.f32 %v11549_v23  ;;  %2662 = vmatpush.bf16.msra.mxu1 %v8225_v24  ;;  %v7361_v3 = vor.u32 %v10253_v48, %v7358_v53  ;;  %v7845_v37 = vor.u32 %v10378_v10, %v7844_v8  ;;  %v7588_v39 = vld [vmem:[#allocation11 + $0x1c8] sm:$0xf] }
 0x193   :  { %v901_v42 = vsel %vm900_vm12, %v10980_v49, %v897_v26  ;;  %v929_v49 = vmul.f32 %v928_v44, %v11523_v32  ;;  %v7998_v55 = vld [vmem:[#allocation11 + $0x520] sm:$0xf0]  ;;  %v11569_v60 = vadd.f32 1.0, %v971_v52  ;;  %vm860_vm0 = vmor %vm858_vm13, %vm859_vm14  ;;  %v960_v38 = vmul.f32 %v959_v14, %v11506_v62  ;;  %v7780_v45 = vld [vmem:[#allocation11 + $0x348] sm:$0xf] }
 0x194   :  { %v906_v11 = vsel %vm11545_vm11, %v905_v16, %v901_v42  ;;  %v855_v20 = vsub.f32 1.0, %v854_v35  ;;  %v8001_v4 = vor.u32 %v10413_v54, %v7998_v55  ;;  %v10461_v6 = vld [vmem:[#allocation11 + $0x684] sm:$0xf]  ;;  %2626 = vmatpush.bf16.msrb.mxu2 %v7361_v3  ;;  %v10314_v42 = vld [vmem:[#allocation11 + $0x1e4] sm:$0xf0] }
 0x195   :  { %v907_v50 = vmul.f32 %v906_v11, %v882_v58  ;;  %v917_v58 = vadd.f32 0.05243302, %v916_v43  ;;  %v930_v61 = vadd.f32 0.4994258, %v929_v49  ;;  %v8190_v7 = vld [vmem:[#allocation11 + $0x6a0] sm:$0xf0]  ;;  %10983 = vrcp.f32 %v11569_v60 }
 0x196   :  { %v856_v56 = vmul.f32 %v11549_v23, %v855_v20  ;;  %2648 = vmatpush.bf16.msra.mxu0 %v8001_v4  ;;  %v10405_v16 = vld [vmem:[#allocation11 + $0x4c4] sm:$0xf]  ;;  %v8193_v21 = vor.u32 %v10461_v6, %v8190_v7  ;;  %v10362_v11 = vld [vmem:[#allocation11 + $0x364] sm:$0xf0]  ;;  %v961_v53 = vadd.f32 1.1283791, %v960_v38  ;;  %v7589_v24 = vor.u32 %v10314_v42, %v7588_v39 }
 0x197   :  { %v7351_v59 = vclamps-f32 %v907_v50, 1.0  ;;  %v931_v15 = vmul.f32 %v930_v61, %v11523_v32  ;;  %v7966_v17 = vld [vmem:[#allocation11 + $0x4e0] sm:$0xf0]  ;;  %v918_v19 = vmul.f32 %v917_v58, %v11523_v32  ;;  %v984_v55 = vand.u32 2147483648, %v11569_v60  ;;  %v7556_v4 = vld [vmem:[#allocation11 + $0x188] sm:$0xf] }
 0x198   :  { %v857_v63 = vadd.f32 %v11549_v23, %v856_v56  ;;  %v8158_v27 = vld [vmem:[#allocation11 + $0x660] sm:$0xf0]  ;;  %2663 = vmatpush.bf16.msra.mxu1 %v8193_v21  ;;  %v7969_v35 = vor.u32 %v10405_v16, %v7966_v17  ;;  %v982_v56 = vand.u32 2147483647, %v11569_v60  ;;  %v10306_v6 = vld [vmem:[#allocation11 + $0x1a4] sm:$0xf0]  ;;  %v962_v10 = vmul.f32 %v961_v53, %v11496_v40 }
 0x199   :  { %v991_v9 = vadd.f32 1.0, %v7351_v59  ;;  %v11588_v28 = vadd.f32 1.0, %v931_v15  ;;  %v10397_v36 = vld [vmem:[#allocation11 + $0x484] sm:$0xf]  ;;  %v919_v44 = vadd.f32 0.18741608, %v918_v19  ;;  %v7781_v59 = vor.u32 %v10362_v11, %v7780_v45 }
 0x19a   :  { %v861_v12 = vsel %vm860_vm0, %v11549_v23, %v857_v63  ;;  %v10453_v23 = vld [vmem:[#allocation11 + $0x644] sm:$0xf]  ;;  %2649 = vmatpush.bf16.msra.mxu0 %v7969_v35  ;;  %v10354_v8 = vld [vmem:[#allocation11 + $0x324] sm:$0xf0]  ;;  %vm978_vm2 = vweird.f32 %v11569_v60  ;;  %v7557_v17 = vor.u32 %v10306_v6, %v7556_v4  ;;  %vm983_vm4 = vcmp.eq.f32.partialorder %v982_v56, 8.507059e+37 }
 0x19b   :  { %v995_v18 = vmul.f32 %v991_v9, %v11535_v30  ;;  %v866_v34 = vsel %vm11572_vm15, %v865_v0, %v861_v12  ;;  %v822_v30 = vmul.f32 0.5, %v11473_v33  ;;  %10985 = vrcp.f32 %v11588_v28  ;;  %v7934_v25 = vld [vmem:[#allocation11 + $0x4a0] sm:$0xf0]  ;;  %v10984_v43 = vpop.eup %10983  ;;  %v7748_v0 = vld [vmem:[#allocation11 + $0x308] sm:$0xf] }
 0x19c   :  { %v867_v26 = vmul.f32 %v866_v34, %v842_v1  ;;  %v8161_v20 = vor.u32 %v10453_v23, %v8158_v27  ;;  %v974_v47 = vmul.f32 %v10984_v43, %v11569_v60  ;;  %v7813_v33 = vor.u32 %v10370_v31, %v7812_v46  ;;  %v10445_v62 = vld [vmem:[#allocation11 + $0x604] sm:$0xf]  ;;  %v7524_v21 = vld [vmem:[#allocation11 + $0x148] sm:$0xf] }
 0x19d   :  { %v11590_v29 = vpack.c.bf16 %v995_v18, %v995_v18  ;;  %v7937_v48 = vor.u32 %v10397_v36, %v7934_v25  ;;  %v8126_v50 = vld [vmem:[#allocation11 + $0x620] sm:$0xf0]  ;;  %v920_v13 = vmul.f32 %v919_v44, %v11523_v32  ;;  %vm979_vm1 = vweird.f32 %v10984_v43  ;;  %v10298_v60 = vld [vmem:[#allocation11 + $0x164] sm:$0xf0] }
 0x19e   :  { %v7350_v51 = vclamps-f32 %v867_v26, 1.0  ;;  %2664 = vmatpush.bf16.msra.mxu1 %v8161_v20  ;;  %v8129_v52 = vor.u32 %v10445_v62, %v8126_v50  ;;  %v975_v54 = vsub.f32 1.0, %v974_v47  ;;  %v10389_v58 = vld [vmem:[#allocation11 + $0x444] sm:$0xf]  ;;  %v985_v12 = vor.u32 1.1754944e-38, %v984_v55  ;;  %vm980_vm3 = vmor %vm978_vm2, %vm979_vm1 }
 0x19f   :  { %2588 = vmatmul.bf16.vlgmr.msra.gmra.mxu3 %v11590_v29  ;;  %2650 = vmatpush.bf16.msra.mxu0 %v7937_v48  ;;  %v7902_v61 = vld [vmem:[#allocation11 + $0x460] sm:$0xf0]  ;;  %v921_v15 = vadd.f32 1.1283791, %v920_v13  ;;  %v944_v19 = vand.u32 2147483648, %v11588_v28  ;;  %v7749_v40 = vor.u32 %v10354_v8, %v7748_v0  ;;  %vm938_vm6 = vweird.f32 %v11588_v28 }
 0x1a0   :  { %v990_v41 = vadd.f32 1.0, %v7350_v51  ;;  %2684 = vmatpush.bf16.msra.mxu3 %v7845_v37  ;;  %v976_v3 = vmul.f32 %v10984_v43, %v975_v54  ;;  %v7905_v7 = vor.u32 %v10389_v58, %v7902_v61  ;;  %v10381_v32 = vld [vmem:[#allocation11 + $0x404] sm:$0xf]  ;;  %v942_v23 = vand.u32 2147483647, %v11588_v28 }
 0x1a1   :  { %v10986_v63 = vpop.eup %10985  ;;  %v7870_v14 = vld [vmem:[#allocation11 + $0x420] sm:$0xf0]  ;;  %v7716_v27 = vld [vmem:[#allocation11 + $0x2c8] sm:$0xf]  ;;  %v7525_v36 = vor.u32 %v10298_v60, %v7524_v21  ;;  %v945_v51 = vor.u32 1.1754944e-38, %v944_v19  ;;  %v922_v25 = vmul.f32 %v921_v15, %v11510_v5  ;;  %v825_v11 = vmul.f32 0.5, %v11491_v22 }
 0x1a2   :  { %v994_v49 = vmul.f32 %v990_v41, %v822_v30  ;;  %v934_v9 = vmul.f32 %v10986_v63, %v11588_v28  ;;  %2665 = vmatpush.bf16.msra.mxu1 %v8129_v52  ;;  %v977_v1 = vadd.f32 %v10984_v43, %v976_v3  ;;  %v7873_v18 = vor.u32 %v10381_v32, %v7870_v14  ;;  %v10346_v46 = vld [vmem:[#allocation11 + $0x2e4] sm:$0xf0] }
 0x1a3   :  { %2651 = vmatpush.bf16.msra.mxu0 %v7905_v7  ;;  %vm939_vm5 = vweird.f32 %v10986_v63  ;;  %v7717_v38 = vor.u32 %v10346_v46, %v7716_v27  ;;  %v7492_v39 = vld [vmem:[#allocation11 + $0x108] sm:$0xf]  ;;  %vm943_vm8 = vcmp.eq.f32.partialorder %v942_v23, 8.507059e+37  ;;  %v10366_v23 = vld [vmem:[#allocation11 + $0x38c] sm:$0xf] }
 0x1a4   :  { %v11600_v2 = vpack.c.bf16 %v994_v49, %v994_v49  ;;  %2685 = vmatpush.bf16.msra.mxu3 %v7813_v33  ;;  %v935_v16 = vsub.f32 1.0, %v934_v9  ;;  %v981_v34 = vsel %vm980_vm3, %v10984_v43, %v977_v1  ;;  %vm940_vm7 = vmor %vm938_vm6, %vm939_vm5  ;;  %v10290_v42 = vld [vmem:[#allocation11 + $0x124] sm:$0xf0]  ;;  %v10374_v1 = vld [vmem:[#allocation11 + $0x3cc] sm:$0xf] }
 0x1a5   :  { %v986_v26 = vsel %vm983_vm4, %v985_v12, %v981_v34  ;;  %v7684_v44 = vld [vmem:[#allocation11 + $0x288] sm:$0xf]  ;;  %v7493_v48 = vor.u32 %v10290_v42, %v7492_v39  ;;  %v7846_v12 = vld [vmem:[#allocation11 + $0x3e8] sm:$0xf0] }
 0x1a6   :  { %2575 = vmatmul.bf16.vlgmr.msra.gmra.mxu2 %v11600_v2  ;;  %v936_v37 = vmul.f32 %v10986_v63, %v935_v16  ;;  %v987_v31 = vmul.f32 %v986_v26, %v962_v10  ;;  %v10338_v45 = vld [vmem:[#allocation11 + $0x2a4] sm:$0xf0]  ;;  %v7849_v60 = vor.u32 %v10374_v1, %v7846_v12  ;;  %v7814_v27 = vld [vmem:[#allocation11 + $0x3a8] sm:$0xf0] }
 0x1a7   :  { %2671 = vmatpush.bf16.msra.mxu2 %v7589_v24  ;;  %2652 = vmatpush.bf16.msra.mxu0 %v7873_v18  ;;  %v8356_v41 = vld [vmem:[#allocation11 + $0x7c8] sm:$0xf]  ;;  %v7685_v50 = vor.u32 %v10338_v45, %v7684_v44  ;;  %v824_v24 = vmul.f32 0.5, %v11502_v57  ;;  %v7817_v39 = vor.u32 %v10366_v23, %v7814_v27  ;;  %v10310_v42 = vld [vmem:[#allocation11 + $0x1cc] sm:$0xf] }
 0x1a8   :  { %2686 = vmatpush.bf16.msra.mxu3 %v7781_v59  ;;  %v937_v35 = vadd.f32 %v10986_v63, %v936_v37  ;;  %v7353_v30 = vclamps-f32 %v987_v31, 1.0  ;;  %v10506_v47 = vld [vmem:[#allocation11 + $0x7e4] sm:$0xf0]  ;;  %v10358_v45 = vld [vmem:[#allocation11 + $0x34c] sm:$0xf] }
 0x1a9   :  { %v7460_v52 = vld [vmem:[#allocation11 + $0xc8] sm:$0xf]  ;;  %v8357_v53 = vor.u32 %v10506_v47, %v8356_v41  ;;  %v7462_v23 = vld [vmem:[#allocation11 + $0xe8] sm:$0xf0] }
 0x1aa   :  { %v941_v43 = vsel %vm940_vm7, %v10986_v63, %v937_v35  ;;  %v993_v20 = vadd.f32 1.0, %v7353_v30  ;;  %v10282_v5 = vld [vmem:[#allocation11 + $0xe4] sm:$0xf0] }
 0x1ab   :  { %2672 = vmatpush.bf16.msra.mxu2 %v7557_v17  ;;  %v946_v28 = vsel %vm943_vm8, %v945_v51, %v941_v43  ;;  %v7652_v54 = vld [vmem:[#allocation11 + $0x248] sm:$0xf]  ;;  %v7461_v58 = vor.u32 %v10282_v5, %v7460_v52 }
 0x1ac   :  { %2687 = vmatpush.bf16.msra.mxu3 %v7749_v40  ;;  %v947_v33 = vmul.f32 %v946_v28, %v922_v25  ;;  %v997_v62 = vmul.f32 %v993_v20, %v825_v11  ;;  %v10330_v55 = vld [vmem:[#allocation11 + $0x264] sm:$0xf0]  ;;  %v7590_v25 = vld [vmem:[#allocation11 + $0x1e8] sm:$0xf0] }
 0x1ad   :  { %v8324_v22 = vld [vmem:[#allocation11 + $0x788] sm:$0xf]  ;;  %v7653_v3 = vor.u32 %v10330_v55, %v7652_v54  ;;  %v7782_v11 = vld [vmem:[#allocation11 + $0x368] sm:$0xf0]  ;;  %v7593_v47 = vor.u32 %v10310_v42, %v7590_v25 }
 0x1ae   :  { %v7352_v49 = vclamps-f32 %v947_v33, 1.0  ;;  %v11613_v56 = vpack.c.bf16 %v997_v62, %v997_v62  ;;  %v10498_v13 = vld [vmem:[#allocation11 + $0x7a4] sm:$0xf0]  ;;  %v10302_v62 = vld [vmem:[#allocation11 + $0x18c] sm:$0xf] }
 0x1af   :  { %2673 = vmatpush.bf16.msra.mxu2 %v7525_v36  ;;  %2640 = vmatmul.bf16.vlgmr.msrb.gmra.mxu3 %v11590_v29  ;;  %v8100_v61 = vld [vmem:[#allocation11 + $0x5c8] sm:$0xf]  ;;  %v8325_v9 = vor.u32 %v10498_v13, %v8324_v22  ;;  %v10350_v55 = vld [vmem:[#allocation11 + $0x30c] sm:$0xf] }
 0x1b0   :  { %2688 = vmatpush.bf16.msra.mxu3 %v7717_v38  ;;  %v992_v59 = vadd.f32 1.0, %v7352_v49  ;;  %v10442_v63 = vld [vmem:[#allocation11 + $0x5e4] sm:$0xf0]  ;;  %2614 = vmatmul.bf16.vlgmr.msrb.gmra.mxu1 %v11613_v56  ;;  %v7750_v22 = vld [vmem:[#allocation11 + $0x328] sm:$0xf0] }
 0x1b1   :  { %v7428_v4 = vld [vmem:[#allocation11 + $0x88] sm:$0xf]  ;;  %2710 = vmatpush.bf16.msrb.mxu1 %v8357_v53  ;;  %v8101_v57 = vor.u32 %v10442_v63, %v8100_v61  ;;  %v8102_v42 = vld [vmem:[#allocation11 + $0x5e8] sm:$0xf0] }
 0x1b2   :  { %v10274_v6 = vld [vmem:[#allocation11 + $0xa4] sm:$0xf0]  ;;  %v996_v7 = vmul.f32 %v992_v59, %v824_v24  ;;  %v10294_v59 = vld [vmem:[#allocation11 + $0x14c] sm:$0xf] }
 0x1b3   :  { %2674 = vmatpush.bf16.msra.mxu2 %v7493_v48  ;;  %v8292_v0 = vld [vmem:[#allocation11 + $0x748] sm:$0xf]  ;;  %v7429_v15 = vor.u32 %v10274_v6, %v7428_v4  ;;  %v7785_v48 = vor.u32 %v10358_v45, %v7782_v11  ;;  %v7753_v4 = vor.u32 %v10350_v55, %v7750_v22  ;;  %v10326_v25 = vld [vmem:[#allocation11 + $0x24c] sm:$0xf] }
 0x1b4   :  { %2689 = vmatpush.bf16.msra.mxu3 %v7685_v50  ;;  %v7620_v8 = vld [vmem:[#allocation11 + $0x208] sm:$0xf]  ;;  %v11618_v14 = vpack.c.bf16 %v996_v7, %v996_v7  ;;  %v7558_v50 = vld [vmem:[#allocation11 + $0x1a8] sm:$0xf0] }
 0x1b5   :  { %v10322_v32 = vld [vmem:[#allocation11 + $0x224] sm:$0xf0]  ;;  %2711 = vmatpush.bf16.msrb.mxu1 %v8325_v9  ;;  %v7561_v13 = vor.u32 %v10302_v62, %v7558_v50  ;;  %v10342_v9 = vld [vmem:[#allocation11 + $0x2cc] sm:$0xf] }
 0x1b6   :  { %2627 = vmatmul.bf16.vlgmr.msrb.gmra.mxu2 %v11600_v2  ;;  %v10490_v10 = vld [vmem:[#allocation11 + $0x764] sm:$0xf0]  ;;  %v7621_v18 = vor.u32 %v10322_v32, %v7620_v8  ;;  %2601 = vmatmul.bf16.vlgmr.msrb.gmra.mxu0 %v11618_v14  ;;  %v7430_v45 = vld [vmem:[#allocation11 + $0xa8] sm:$0xf0] }
 0x1b7   :  { %2675 = vmatpush.bf16.msra.mxu2 %v7461_v58  ;;  %v8068_v16 = vld [vmem:[#allocation11 + $0x588] sm:$0xf]  ;;  %v8293_v40 = vor.u32 %v10490_v10, %v8292_v0  ;;  %2697 = vmatpush.bf16.msrb.mxu0 %v8101_v57  ;;  %v7526_v58 = vld [vmem:[#allocation11 + $0x168] sm:$0xf0] }
 0x1b8   :  { %v10434_v17 = vld [vmem:[#allocation11 + $0x5a4] sm:$0xf0]  ;;  %2690 = vmatpush.bf16.msra.mxu3 %v7653_v3  ;;  %v7718_v0 = vld [vmem:[#allocation11 + $0x2e8] sm:$0xf0]  ;;  %v7529_v8 = vor.u32 %v10294_v59, %v7526_v58 }
 0x1b9   :  { %v7396_v34 = vld [vmem:[#allocation11 + $0x48] sm:$0xf]  ;;  %v8069_v26 = vor.u32 %v10434_v17, %v8068_v16  ;;  %2712 = vmatpush.bf16.msrb.mxu1 %v8293_v40  ;;  %v10286_v57 = vld [vmem:[#allocation11 + $0x10c] sm:$0xf]  ;;  %v7721_v16 = vor.u32 %v10342_v9, %v7718_v0 }
 0x1ba   :  { %v10266_v19 = vld [vmem:[#allocation11 + $0x64] sm:$0xf0]  ;;  %v7494_v10 = vld [vmem:[#allocation11 + $0x128] sm:$0xf0] }
 0x1bb   :  { %v8260_v21 = vld [vmem:[#allocation11 + $0x708] sm:$0xf]  ;;  %2676 = vmatpush.bf16.msra.mxu2 %v7429_v15  ;;  %v7397_v46 = vor.u32 %v10266_v19, %v7396_v34  ;;  %2698 = vmatpush.bf16.msrb.mxu0 %v8069_v26  ;;  %v10502_v17 = vld [vmem:[#allocation11 + $0x7cc] sm:$0xf]  ;;  %v7497_v40 = vor.u32 %v10286_v57, %v7494_v10  ;;  %v10315_v57 = vld [vmem:[#allocation11 + $0x1ec] sm:$0xf0] }
 0x1bc   :  { %v10482_v37 = vld [vmem:[#allocation11 + $0x724] sm:$0xf0]  ;;  %2691 = vmatpush.bf16.msra.mxu3 %v7621_v18  ;;  %v8358_v18 = vld [vmem:[#allocation11 + $0x7e8] sm:$0xf0] }
 0x1bd   :  { %v8036_v31 = vld [vmem:[#allocation11 + $0x548] sm:$0xf]  ;;  %v8261_v51 = vor.u32 %v10482_v37, %v8260_v21  ;;  %v10334_v21 = vld [vmem:[#allocation11 + $0x28c] sm:$0xf]  ;;  %v8361_v27 = vor.u32 %v10502_v17, %v8358_v18 }
 0x1be   :  { %v10426_v35 = vld [vmem:[#allocation11 + $0x564] sm:$0xf0]  ;;  %v10278_v37 = vld [vmem:[#allocation11 + $0xcc] sm:$0xf] }
 0x1bf   :  { %v7364_v36 = vld [vmem:[#allocation11 + $0x8] sm:$0xf]  ;;  %v8037_v43 = vor.u32 %v10426_v35, %v8036_v31  ;;  %2677 = vmatpush.bf16.msra.mxu2 %v7397_v46  ;;  %2692 = vmatmul.bf16.vlgmr.msra.gmra.mxu3 %v11590_v29  ;;  %v10494_v31 = vld [vmem:[#allocation11 + $0x78c] sm:$0xf] }
 0x1c0   :  { %v10258_v30 = vld [vmem:[#allocation11 + $0x24] sm:$0xf0]  ;;  %2736 = vmatpush.bf16.msrb.mxu3 %v7849_v60  ;;  %2713 = vmatpush.bf16.msrb.mxu1 %v8261_v51  ;;  %v7686_v60 = vld [vmem:[#allocation11 + $0x2a8] sm:$0xf0] }
 0x1c1   :  { %v8228_v38 = vld [vmem:[#allocation11 + $0x6c8] sm:$0xf]  ;;  %v7365_v20 = vor.u32 %v10258_v30, %v7364_v36  ;;  %2699 = vmatpush.bf16.msrb.mxu0 %v8037_v43  ;;  %2666 = vmatmul.bf16.vlgmr.msra.gmra.mxu1 %v11613_v56  ;;  %v8326_v35 = vld [vmem:[#allocation11 + $0x7a8] sm:$0xf0]  ;;  %v7689_v36 = vor.u32 %v10334_v21, %v7686_v60  ;;  %v7564_v60 = vld [vmem:[#allocation11 + $0x190] sm:$0xf] }
 0x1c2   :  { %v10474_v44 = vld [vmem:[#allocation11 + $0x6e4] sm:$0xf0]  ;;  %v7654_v43 = vld [vmem:[#allocation11 + $0x268] sm:$0xf0]  ;;  %v8329_v11 = vor.u32 %v10494_v31, %v8326_v35 }
 0x1c3   :  { %v8004_v28 = vld [vmem:[#allocation11 + $0x508] sm:$0xf]  ;;  %v8229_v33 = vor.u32 %v10474_v44, %v8228_v38  ;;  %2678 = vmatpush.bf16.msra.mxu2 %v7365_v20  ;;  %v10438_v38 = vld [vmem:[#allocation11 + $0x5cc] sm:$0xf] }
 0x1c4   :  { %v10418_v41 = vld [vmem:[#allocation11 + $0x524] sm:$0xf0]  ;;  %2737 = vmatpush.bf16.msrb.mxu3 %v7817_v39  ;;  %v7465_v39 = vor.u32 %v10278_v37, %v7462_v23  ;;  %v10270_v44 = vld [vmem:[#allocation11 + $0x8c] sm:$0xf] }
 0x1c5   :  { %v8005_v52 = vor.u32 %v10418_v41, %v8004_v28  ;;  %v8196_v5 = vld [vmem:[#allocation11 + $0x688] sm:$0xf]  ;;  %2714 = vmatpush.bf16.msrb.mxu1 %v8229_v33  ;;  %v10486_v28 = vld [vmem:[#allocation11 + $0x74c] sm:$0xf]  ;;  %v8105_v41 = vor.u32 %v10438_v38, %v8102_v42  ;;  %v7433_v50 = vor.u32 %v10270_v44, %v7430_v45  ;;  %v10299_v42 = vld [vmem:[#allocation11 + $0x16c] sm:$0xf0] }
 0x1c6   :  { %v10466_v49 = vld [vmem:[#allocation11 + $0x6a4] sm:$0xf0]  ;;  %2679 = vmatmul.bf16.vlgmr.msra.gmra.mxu2 %v11600_v2  ;;  %2653 = vmatmul.bf16.vlgmr.msra.gmra.mxu0 %v11618_v14  ;;  %v8294_v33 = vld [vmem:[#allocation11 + $0x768] sm:$0xf0] }
 0x1c7   :  { %v7972_v53 = vld [vmem:[#allocation11 + $0x4c8] sm:$0xf]  ;;  %2723 = vmatpush.bf16.msrb.mxu2 %v7593_v47  ;;  %v8197_v24 = vor.u32 %v10466_v49, %v8196_v5  ;;  %2700 = vmatpush.bf16.msrb.mxu0 %v8005_v52  ;;  %v7657_v47 = vor.u32 %v10326_v25, %v7654_v43  ;;  %v8070_v62 = vld [vmem:[#allocation11 + $0x5a8] sm:$0xf0]  ;;  %v7852_v49 = vld [vmem:[#allocation11 + $0x3d0] sm:$0xf]  ;;  %v8297_v22 = vor.u32 %v10486_v28, %v8294_v33 }
 0x1c8   :  { %v10410_v54 = vld [vmem:[#allocation11 + $0x4e4] sm:$0xf0]  ;;  %2738 = vmatpush.bf16.msrb.mxu3 %v7785_v48  ;;  %v10430_v48 = vld [vmem:[#allocation11 + $0x58c] sm:$0xf] }
 0x1c9   :  { %v7973_v61 = vor.u32 %v10410_v54, %v7972_v53  ;;  %v8164_v63 = vld [vmem:[#allocation11 + $0x648] sm:$0xf]  ;;  %2715 = vmatpush.bf16.msrb.mxu1 %v8197_v24  ;;  %v10318_v52 = vld [vmem:[#allocation11 + $0x20c] sm:$0xf]  ;;  %v10379_v53 = vld [vmem:[#allocation11 + $0x3ec] sm:$0xf0] }
 0x1ca   :  { %v10458_v3 = vld [vmem:[#allocation11 + $0x664] sm:$0xf0]  ;;  %v7622_v5 = vld [vmem:[#allocation11 + $0x228] sm:$0xf0] }
 0x1cb   :  { %v7940_v6 = vld [vmem:[#allocation11 + $0x488] sm:$0xf]  ;;  %2724 = vmatpush.bf16.msrb.mxu2 %v7561_v13  ;;  %v8165_v32 = vor.u32 %v10458_v3, %v8164_v63  ;;  %2701 = vmatpush.bf16.msrb.mxu0 %v7973_v61  ;;  %v10262_v54 = vld [vmem:[#allocation11 + $0x4c] sm:$0xf]  ;;  %v8073_v13 = vor.u32 %v10430_v48, %v8070_v62  ;;  %v7625_v24 = vor.u32 %v10318_v52, %v7622_v5  ;;  %v7500_v48 = vld [vmem:[#allocation11 + $0x110] sm:$0xf] }
 0x1cc   :  { %v10402_v7 = vld [vmem:[#allocation11 + $0x4a4] sm:$0xf0]  ;;  %2739 = vmatpush.bf16.msrb.mxu3 %v7753_v4  ;;  %v7398_v55 = vld [vmem:[#allocation11 + $0x68] sm:$0xf0]  ;;  %v7853_v61 = vor.u32 %v10379_v53, %v7852_v49  ;;  %v10291_v62 = vld [vmem:[#allocation11 + $0x12c] sm:$0xf0] }
 0x1cd   :  { %v7941_v1 = vor.u32 %v10402_v7, %v7940_v6  ;;  %v8132_v12 = vld [vmem:[#allocation11 + $0x608] sm:$0xf]  ;;  %2716 = vmatpush.bf16.msrb.mxu1 %v8165_v32  ;;  %v10478_v59 = vld [vmem:[#allocation11 + $0x70c] sm:$0xf]  ;;  %v7401_v63 = vor.u32 %v10262_v54, %v7398_v55  ;;  %v7820_v6 = vld [vmem:[#allocation11 + $0x390] sm:$0xf] }
 0x1ce   :  { %v10450_v15 = vld [vmem:[#allocation11 + $0x624] sm:$0xf0]  ;;  %v8262_v58 = vld [vmem:[#allocation11 + $0x728] sm:$0xf0]  ;;  %v10371_v7 = vld [vmem:[#allocation11 + $0x3ac] sm:$0xf0] }
 0x1cf   :  { %v7908_v34 = vld [vmem:[#allocation11 + $0x448] sm:$0xf]  ;;  %2725 = vmatpush.bf16.msrb.mxu2 %v7529_v8  ;;  %v8133_v26 = vor.u32 %v10450_v15, %v8132_v12  ;;  %2702 = vmatpush.bf16.msrb.mxu0 %v7941_v1  ;;  %v10422_v3 = vld [vmem:[#allocation11 + $0x54c] sm:$0xf]  ;;  %v8265_v8 = vor.u32 %v10478_v59, %v8262_v58  ;;  %v7596_v32 = vld [vmem:[#allocation11 + $0x1d0] sm:$0xf]  ;;  %v7821_v15 = vor.u32 %v10371_v7, %v7820_v6 }
 0x1d0   :  { %v10394_v19 = vld [vmem:[#allocation11 + $0x464] sm:$0xf0]  ;;  %2740 = vmatpush.bf16.msrb.mxu3 %v7721_v16  ;;  %v8038_v4 = vld [vmem:[#allocation11 + $0x568] sm:$0xf0]  ;;  %v8364_v49 = vld [vmem:[#allocation11 + $0x7d0] sm:$0xf] }
 0x1d1   :  { %v7909_v46 = vor.u32 %v10394_v19, %v7908_v34  ;;  %v7876_v30 = vld [vmem:[#allocation11 + $0x408] sm:$0xf]  ;;  %2717 = vmatpush.bf16.msrb.mxu1 %v8133_v26  ;;  %v10254_v9 = vld [vmem:[#allocation11 + $0xc] sm:$0xf]  ;;  %v8041_v10 = vor.u32 %v10422_v3, %v8038_v4  ;;  %v7597_v34 = vor.u32 %v10315_v57, %v7596_v32  ;;  %v7788_v19 = vld [vmem:[#allocation11 + $0x350] sm:$0xf] }
 0x1d2   :  { %v10386_v51 = vld [vmem:[#allocation11 + $0x424] sm:$0xf0]  ;;  %v7366_v0 = vld [vmem:[#allocation11 + $0x28] sm:$0xf0]  ;;  %v10307_v26 = vld [vmem:[#allocation11 + $0x1ac] sm:$0xf0] }
 0x1d3   :  { %2726 = vmatpush.bf16.msrb.mxu2 %v7497_v40  ;;  %2703 = vmatpush.bf16.msrb.mxu0 %v7909_v46  ;;  %v7877_v20 = vor.u32 %v10386_v51, %v7876_v30  ;;  %v10470_v1 = vld [vmem:[#allocation11 + $0x6cc] sm:$0xf]  ;;  %v7369_v16 = vor.u32 %v10254_v9, %v7366_v0  ;;  %v10363_v40 = vld [vmem:[#allocation11 + $0x36c] sm:$0xf0] }
 0x1d4   :  { %2741 = vmatpush.bf16.msrb.mxu3 %v7689_v36  ;;  %2718 = vmatmul.bf16.vlgmr.msrb.gmra.mxu1 %v11613_v56  ;;  %v8230_v12 = vld [vmem:[#allocation11 + $0x6e8] sm:$0xf0]  ;;  %v7789_v46 = vor.u32 %v10363_v40, %v7788_v19  ;;  %v7565_v36 = vor.u32 %v10307_v26, %v7564_v60  ;;  %v7756_v30 = vld [vmem:[#allocation11 + $0x310] sm:$0xf] }
 0x1d5   :  { %2762 = vmatpush.bf16.msra.mxu1 %v8361_v27  ;;  %v10414_v17 = vld [vmem:[#allocation11 + $0x50c] sm:$0xf]  ;;  %v8233_v21 = vor.u32 %v10470_v1, %v8230_v12  ;;  %v10355_v51 = vld [vmem:[#allocation11 + $0x32c] sm:$0xf0] }
 0x1d6   :  { %v8006_v18 = vld [vmem:[#allocation11 + $0x528] sm:$0xf0]  ;;  %v7757_v45 = vor.u32 %v10355_v51, %v7756_v30  ;;  %v10507_v54 = vld [vmem:[#allocation11 + $0x7ec] sm:$0xf0] }
 0x1d7   :  { %2727 = vmatpush.bf16.msrb.mxu2 %v7465_v39  ;;  %2704 = vmatpush.bf16.msrb.mxu0 %v7877_v20  ;;  %v8009_v37 = vor.u32 %v10414_v17, %v8006_v18  ;;  %v10462_v23 = vld [vmem:[#allocation11 + $0x68c] sm:$0xf]  ;;  %v7532_v39 = vld [vmem:[#allocation11 + $0x150] sm:$0xf]  ;;  %v8365_v3 = vor.u32 %v10507_v54, %v8364_v49 }
 0x1d8   :  { %2742 = vmatpush.bf16.msrb.mxu3 %v7657_v47  ;;  %v8198_v27 = vld [vmem:[#allocation11 + $0x6a8] sm:$0xf0]  ;;  %v7533_v28 = vor.u32 %v10299_v42, %v7532_v39  ;;  %v10347_v47 = vld [vmem:[#allocation11 + $0x2ec] sm:$0xf0] }
 0x1d9   :  { %2763 = vmatpush.bf16.msra.mxu1 %v8329_v11  ;;  %v10406_v31 = vld [vmem:[#allocation11 + $0x4cc] sm:$0xf]  ;;  %v8201_v38 = vor.u32 %v10462_v23, %v8198_v27  ;;  %v10339_v59 = vld [vmem:[#allocation11 + $0x2ac] sm:$0xf0] }
 0x1da   :  { %2705 = vmatmul.bf16.vlgmr.msrb.gmra.mxu0 %v11618_v14  ;;  %v7974_v35 = vld [vmem:[#allocation11 + $0x4e8] sm:$0xf0]  ;;  %v8332_v6 = vld [vmem:[#allocation11 + $0x790] sm:$0xf] }
 0x1db   :  { %2749 = vmatpush.bf16.msra.mxu0 %v8105_v41  ;;  %2728 = vmatpush.bf16.msrb.mxu2 %v7433_v50  ;;  %v7977_v25 = vor.u32 %v10406_v31, %v7974_v35  ;;  %v10454_v43 = vld [vmem:[#allocation11 + $0x64c] sm:$0xf]  ;;  %v7724_v41 = vld [vmem:[#allocation11 + $0x2d0] sm:$0xf]  ;;  %v7854_v31 = vld [vmem:[#allocation11 + $0x3f0] sm:$0xf0] }
 0x1dc   :  { %2743 = vmatpush.bf16.msrb.mxu3 %v7625_v24  ;;  %v8166_v44 = vld [vmem:[#allocation11 + $0x668] sm:$0xf0]  ;;  %v7725_v53 = vor.u32 %v10347_v47, %v7724_v41  ;;  %v7692_v24 = vld [vmem:[#allocation11 + $0x290] sm:$0xf] }
 0x1dd   :  { %2764 = vmatpush.bf16.msra.mxu1 %v8297_v22  ;;  %v10398_v11 = vld [vmem:[#allocation11 + $0x48c] sm:$0xf]  ;;  %v8169_v33 = vor.u32 %v10454_v43, %v8166_v44  ;;  %v10499_v7 = vld [vmem:[#allocation11 + $0x7ac] sm:$0xf0]  ;;  %v7693_v9 = vor.u32 %v10339_v59, %v7692_v24  ;;  %v10303_v59 = vld [vmem:[#allocation11 + $0x194] sm:$0xf] }
 0x1de   :  { %v7942_v20 = vld [vmem:[#allocation11 + $0x4a8] sm:$0xf0]  ;;  %v8108_v32 = vld [vmem:[#allocation11 + $0x5d0] sm:$0xf]  ;;  %v8333_v17 = vor.u32 %v10499_v7, %v8332_v6 }
 0x1df   :  { %2750 = vmatpush.bf16.msra.mxu0 %v8073_v13  ;;  %2729 = vmatpush.bf16.msrb.mxu2 %v7401_v63  ;;  %v7945_v50 = vor.u32 %v10398_v11, %v7942_v20  ;;  %v10446_v52 = vld [vmem:[#allocation11 + $0x60c] sm:$0xf]  ;;  %v7501_v13 = vor.u32 %v10291_v62, %v7500_v48  ;;  %v10283_v63 = vld [vmem:[#allocation11 + $0xec] sm:$0xf0]  ;;  %v10367_v11 = vld [vmem:[#allocation11 + $0x394] sm:$0xf] }
 0x1e0   :  { %2788 = vmatpush.bf16.msra.mxu3 %v7853_v61  ;;  %v8134_v5 = vld [vmem:[#allocation11 + $0x628] sm:$0xf0]  ;;  %v7468_v61 = vld [vmem:[#allocation11 + $0xd0] sm:$0xf]  ;;  %v7822_v20 = vld [vmem:[#allocation11 + $0x3b0] sm:$0xf0] }
 0x1e1   :  { %2765 = vmatpush.bf16.msra.mxu1 %v8265_v8  ;;  %2744 = vmatmul.bf16.vlgmr.msrb.gmra.mxu3 %v11590_v29  ;;  %v10390_v55 = vld [vmem:[#allocation11 + $0x44c] sm:$0xf]  ;;  %v8137_v58 = vor.u32 %v10446_v52, %v8134_v5  ;;  %v7469_v57 = vor.u32 %v10283_v63, %v7468_v61  ;;  %v7660_v1 = vld [vmem:[#allocation11 + $0x250] sm:$0xf]  ;;  %v7598_v48 = vld [vmem:[#allocation11 + $0x1f0] sm:$0xf0]  ;;  %v7825_v5 = vor.u32 %v10367_v11, %v7822_v20 }
 0x1e2   :  { %v7910_v22 = vld [vmem:[#allocation11 + $0x468] sm:$0xf0]  ;;  %v10331_v12 = vld [vmem:[#allocation11 + $0x26c] sm:$0xf0]  ;;  %v10495_v11 = vld [vmem:[#allocation11 + $0x794] sm:$0xf] }
 0x1e3   :  { %2751 = vmatpush.bf16.msra.mxu0 %v8041_v10  ;;  %2730 = vmatpush.bf16.msrb.mxu2 %v7369_v16  ;;  %v7913_v4 = vor.u32 %v10390_v55, %v7910_v22  ;;  %v10382_v0 = vld [vmem:[#allocation11 + $0x40c] sm:$0xf]  ;;  %v10443_v10 = vld [vmem:[#allocation11 + $0x5ec] sm:$0xf0]  ;;  %v7661_v40 = vor.u32 %v10331_v12, %v7660_v1  ;;  %v10359_v22 = vld [vmem:[#allocation11 + $0x354] sm:$0xf] }
 0x1e4   :  { %2789 = vmatpush.bf16.msra.mxu3 %v7821_v15  ;;  %v7878_v8 = vld [vmem:[#allocation11 + $0x428] sm:$0xf0]  ;;  %v7436_v15 = vld [vmem:[#allocation11 + $0x90] sm:$0xf]  ;;  %v8109_v19 = vor.u32 %v10443_v10, %v8108_v32  ;;  %v7534_v10 = vld [vmem:[#allocation11 + $0x170] sm:$0xf0] }
 0x1e5   :  { %2766 = vmatpush.bf16.msra.mxu1 %v8233_v21  ;;  %v10275_v16 = vld [vmem:[#allocation11 + $0xac] sm:$0xf0]  ;;  %v7881_v18 = vor.u32 %v10382_v0, %v7878_v8  ;;  %v10351_v0 = vld [vmem:[#allocation11 + $0x314] sm:$0xf] }
 0x1e6   :  { %2731 = vmatmul.bf16.vlgmr.msrb.gmra.mxu2 %v11600_v2  ;;  %v10491_v21 = vld [vmem:[#allocation11 + $0x76c] sm:$0xf0]  ;;  %v7758_v8 = vld [vmem:[#allocation11 + $0x330] sm:$0xf0] }
 0x1e7   :  { %2775 = vmatpush.bf16.msra.mxu2 %v7597_v34  ;;  %2752 = vmatpush.bf16.msra.mxu0 %v8009_v37  ;;  %v8300_v34 = vld [vmem:[#allocation11 + $0x750] sm:$0xf]  ;;  %v7437_v37 = vor.u32 %v10275_v16, %v7436_v15  ;;  %v7761_v16 = vor.u32 %v10351_v0, %v7758_v8  ;;  %v8334_v20 = vld [vmem:[#allocation11 + $0x7b0] sm:$0xf0] }
 0x1e8   :  { %2790 = vmatpush.bf16.msra.mxu3 %v7789_v46  ;;  %v8076_v60 = vld [vmem:[#allocation11 + $0x590] sm:$0xf]  ;;  %v10375_v46 = vld [vmem:[#allocation11 + $0x3d4] sm:$0xf]  ;;  %v8301_v30 = vor.u32 %v10491_v21, %v8300_v34 }
 0x1e9   :  { %2767 = vmatpush.bf16.msra.mxu1 %v8201_v38  ;;  %v10435_v26 = vld [vmem:[#allocation11 + $0x5ac] sm:$0xf0] }
 0x1ea   :  { %v7628_v23 = vld [vmem:[#allocation11 + $0x210] sm:$0xf]  ;;  %v8077_v51 = vor.u32 %v10435_v26, %v8076_v60  ;;  %v10287_v60 = vld [vmem:[#allocation11 + $0x114] sm:$0xf] }
 0x1eb   :  { %2776 = vmatpush.bf16.msra.mxu2 %v7565_v36  ;;  %2753 = vmatpush.bf16.msra.mxu0 %v7977_v25  ;;  %v10323_v27 = vld [vmem:[#allocation11 + $0x22c] sm:$0xf0]  ;;  %v7857_v25 = vor.u32 %v10375_v46, %v7854_v31  ;;  %v7502_v26 = vld [vmem:[#allocation11 + $0x130] sm:$0xf0] }
 0x1ec   :  { %2791 = vmatpush.bf16.msra.mxu3 %v7757_v45  ;;  %v7404_v35 = vld [vmem:[#allocation11 + $0x50] sm:$0xf]  ;;  %v7629_v38 = vor.u32 %v10323_v27, %v7628_v23  ;;  %v10503_v46 = vld [vmem:[#allocation11 + $0x7d4] sm:$0xf] }
 0x1ed   :  { %2768 = vmatpush.bf16.msra.mxu1 %v8169_v33  ;;  %v10267_v36 = vld [vmem:[#allocation11 + $0x6c] sm:$0xf0]  ;;  %v10311_v33 = vld [vmem:[#allocation11 + $0x1d4] sm:$0xf] }
 0x1ee   :  { %v8268_v39 = vld [vmem:[#allocation11 + $0x710] sm:$0xf]  ;;  %v7405_v43 = vor.u32 %v10267_v36, %v7404_v35  ;;  %v7601_v55 = vor.u32 %v10311_v33, %v7598_v48  ;;  %v8366_v35 = vld [vmem:[#allocation11 + $0x7f0] sm:$0xf0] }
 0x1ef   :  { %2777 = vmatpush.bf16.msra.mxu2 %v7533_v28  ;;  %2754 = vmatpush.bf16.msra.mxu0 %v7945_v50  ;;  %v10483_v42 = vld [vmem:[#allocation11 + $0x72c] sm:$0xf0]  ;;  %v10439_v33 = vld [vmem:[#allocation11 + $0x5d4] sm:$0xf] }
 0x1f0   :  { %2792 = vmatpush.bf16.msra.mxu3 %v7725_v53  ;;  %v8044_v44 = vld [vmem:[#allocation11 + $0x550] sm:$0xf]  ;;  %v8269_v47 = vor.u32 %v10483_v42, %v8268_v39  ;;  %v7694_v39 = vld [vmem:[#allocation11 + $0x2b0] sm:$0xf0] }
 0x1f1   :  { %2769 = vmatpush.bf16.msra.mxu1 %v8137_v58  ;;  %v10427_v45 = vld [vmem:[#allocation11 + $0x56c] sm:$0xf0]  ;;  %v7566_v58 = vld [vmem:[#allocation11 + $0x1b0] sm:$0xf0] }
 0x1f2   :  { %v7372_v28 = vld [vmem:[#allocation11 + $0x10] sm:$0xf]  ;;  %v8045_v62 = vor.u32 %v10427_v45, %v8044_v44  ;;  %v8369_v44 = vor.u32 %v10503_v46, %v8366_v35  ;;  %v8014_v35 = vld [vmem:[#allocation11 + $0x530] sm:$0xf0] }
 0x1f3   :  { %2778 = vmatpush.bf16.msra.mxu2 %v7501_v13  ;;  %2755 = vmatpush.bf16.msra.mxu0 %v7913_v4  ;;  %v10259_v41 = vld [vmem:[#allocation11 + $0x2c] sm:$0xf0]  ;;  %v7790_v13 = vld [vmem:[#allocation11 + $0x370] sm:$0xf0] }
 0x1f4   :  { %2793 = vmatpush.bf16.msra.mxu3 %v7693_v9  ;;  %2770 = vmatmul.bf16.vlgmr.msra.gmra.mxu1 %v11613_v56  ;;  %v8236_v50 = vld [vmem:[#allocation11 + $0x6d0] sm:$0xf]  ;;  %v7373_v49 = vor.u32 %v10259_v41, %v7372_v28  ;;  %v7793_v4 = vor.u32 %v10359_v22, %v7790_v13  ;;  %v7569_v9 = vor.u32 %v10303_v59, %v7566_v58  ;;  %v10431_v59 = vld [vmem:[#allocation11 + $0x594] sm:$0xf] }
 0x1f5   :  { %2814 = vmatpush.bf16.msrb.mxu1 %v8365_v3  ;;  %v10475_v52 = vld [vmem:[#allocation11 + $0x6ec] sm:$0xf0]  ;;  %v8078_v58 = vld [vmem:[#allocation11 + $0x5b0] sm:$0xf0] }
 0x1f6   :  { %v8012_v53 = vld [vmem:[#allocation11 + $0x510] sm:$0xf]  ;;  %v8237_v24 = vor.u32 %v10475_v52, %v8236_v50  ;;  %v10327_v50 = vld [vmem:[#allocation11 + $0x254] sm:$0xf]  ;;  %v8081_v8 = vor.u32 %v10431_v59, %v8078_v58  ;;  %v7508_v58 = vld [vmem:[#allocation11 + $0x118] sm:$0xf] }
 0x1f7   :  { %2779 = vmatpush.bf16.msra.mxu2 %v7469_v57  ;;  %2756 = vmatpush.bf16.msra.mxu0 %v7881_v18  ;;  %v10419_v54 = vld [vmem:[#allocation11 + $0x52c] sm:$0xf0]  ;;  %v10295_v57 = vld [vmem:[#allocation11 + $0x154] sm:$0xf] }
 0x1f8   :  { %2794 = vmatpush.bf16.msra.mxu3 %v7661_v40  ;;  %v8013_v61 = vor.u32 %v10419_v54, %v8012_v53  ;;  %v8204_v63 = vld [vmem:[#allocation11 + $0x690] sm:$0xf]  ;;  %v7537_v34 = vor.u32 %v10295_v57, %v7534_v10  ;;  %v7726_v40 = vld [vmem:[#allocation11 + $0x2f0] sm:$0xf0]  ;;  %v8337_v53 = vor.u32 %v10495_v11, %v8334_v20 }
 0x1f9   :  { %2815 = vmatpush.bf16.msrb.mxu1 %v8333_v17  ;;  %v10467_v3 = vld [vmem:[#allocation11 + $0x6ac] sm:$0xf0]  ;;  %v7662_v52 = vld [vmem:[#allocation11 + $0x270] sm:$0xf0] }
 0x1fa   :  { %2757 = vmatmul.bf16.vlgmr.msra.gmra.mxu0 %v11618_v14  ;;  %v7980_v6 = vld [vmem:[#allocation11 + $0x4d0] sm:$0xf]  ;;  %v8205_v32 = vor.u32 %v10467_v3, %v8204_v63  ;;  %v7665_v13 = vor.u32 %v10327_v50, %v7662_v52  ;;  %v10319_v63 = vld [vmem:[#allocation11 + $0x214] sm:$0xf] }
 0x1fb   :  { %2801 = vmatpush.bf16.msrb.mxu0 %v8109_v19  ;;  %2780 = vmatpush.bf16.msra.mxu2 %v7437_v37  ;;  %v10411_v7 = vld [vmem:[#allocation11 + $0x4ec] sm:$0xf0]  ;;  %v10343_v19 = vld [vmem:[#allocation11 + $0x2d4] sm:$0xf] }
 0x1fc   :  { %2795 = vmatpush.bf16.msra.mxu3 %v7629_v38  ;;  %v7981_v1 = vor.u32 %v10411_v7, %v7980_v6  ;;  %v8172_v12 = vld [vmem:[#allocation11 + $0x650] sm:$0xf]  ;;  %v7729_v31 = vor.u32 %v10343_v19, %v7726_v40  ;;  %v10335_v38 = vld [vmem:[#allocation11 + $0x294] sm:$0xf]  ;;  %v10380_v6 = vld [vmem:[#allocation11 + $0x3f4] sm:$0xf0] }
 0x1fd   :  { %2816 = vmatpush.bf16.msrb.mxu1 %v8301_v30  ;;  %v10459_v15 = vld [vmem:[#allocation11 + $0x66c] sm:$0xf0]  ;;  %v7697_v28 = vor.u32 %v10335_v38, %v7694_v39  ;;  %v7630_v3 = vld [vmem:[#allocation11 + $0x230] sm:$0xf0]  ;;  %v7572_v39 = vld [vmem:[#allocation11 + $0x198] sm:$0xf] }
 0x1fe   :  { %v7948_v17 = vld [vmem:[#allocation11 + $0x490] sm:$0xf]  ;;  %v8173_v21 = vor.u32 %v10459_v15, %v8172_v12  ;;  %v10263_v7 = vld [vmem:[#allocation11 + $0x54] sm:$0xf] }
 0x1ff   :  { %2802 = vmatpush.bf16.msrb.mxu0 %v8077_v51  ;;  %2781 = vmatpush.bf16.msra.mxu2 %v7405_v43  ;;  %v10403_v18 = vld [vmem:[#allocation11 + $0x4ac] sm:$0xf0]  ;;  %v7505_v51 = vor.u32 %v10287_v60, %v7502_v26  ;;  %v7470_v43 = vld [vmem:[#allocation11 + $0xf0] sm:$0xf0]  ;;  %v10316_v60 = vld [vmem:[#allocation11 + $0x1f4] sm:$0xf0] }
 0x200   :  { %2840 = vmatpush.bf16.msrb.mxu3 %v7857_v25  ;;  %v7949_v37 = vor.u32 %v10403_v18, %v7948_v17  ;;  %v8140_v23 = vld [vmem:[#allocation11 + $0x610] sm:$0xf]  ;;  %v10279_v25 = vld [vmem:[#allocation11 + $0xd4] sm:$0xf]  ;;  %v7828_v17 = vld [vmem:[#allocation11 + $0x398] sm:$0xf] }
 0x201   :  { %2817 = vmatpush.bf16.msrb.mxu1 %v8269_v47  ;;  %2796 = vmatmul.bf16.vlgmr.msra.gmra.mxu3 %v11590_v29  ;;  %v10451_v27 = vld [vmem:[#allocation11 + $0x62c] sm:$0xf0]  ;;  %v7473_v48 = vor.u32 %v10279_v25, %v7470_v43  ;;  %v10479_v57 = vld [vmem:[#allocation11 + $0x714] sm:$0xf]  ;;  %v10372_v18 = vld [vmem:[#allocation11 + $0x3b4] sm:$0xf0] }
 0x202   :  { %v7916_v36 = vld [vmem:[#allocation11 + $0x450] sm:$0xf]  ;;  %v8141_v42 = vor.u32 %v10451_v27, %v8140_v23  ;;  %v8270_v10 = vld [vmem:[#allocation11 + $0x730] sm:$0xf0]  ;;  %v7829_v27 = vor.u32 %v10372_v18, %v7828_v17 }
 0x203   :  { %2803 = vmatpush.bf16.msrb.mxu0 %v8045_v62  ;;  %2782 = vmatpush.bf16.msra.mxu2 %v7373_v49  ;;  %v10395_v30 = vld [vmem:[#allocation11 + $0x46c] sm:$0xf0]  ;;  %v8110_v62 = vld [vmem:[#allocation11 + $0x5f0] sm:$0xf0]  ;;  %v8273_v40 = vor.u32 %v10479_v57, %v8270_v10  ;;  %v7700_v10 = vld [vmem:[#allocation11 + $0x298] sm:$0xf] }
 0x204   :  { %2841 = vmatpush.bf16.msrb.mxu3 %v7825_v5  ;;  %v7917_v45 = vor.u32 %v10395_v30, %v7916_v36  ;;  %v7884_v41 = vld [vmem:[#allocation11 + $0x410] sm:$0xf]  ;;  %v10271_v5 = vld [vmem:[#allocation11 + $0x94] sm:$0xf]  ;;  %v8113_v22 = vor.u32 %v10439_v33, %v8110_v62  ;;  %v7796_v30 = vld [vmem:[#allocation11 + $0x358] sm:$0xf] }
 0x205   :  { %2818 = vmatpush.bf16.msrb.mxu1 %v8237_v24  ;;  %v10387_v47 = vld [vmem:[#allocation11 + $0x42c] sm:$0xf0]  ;;  %v7438_v49 = vld [vmem:[#allocation11 + $0xb0] sm:$0xf0]  ;;  %v10300_v62 = vld [vmem:[#allocation11 + $0x174] sm:$0xf0] }
 0x206   :  { %2783 = vmatmul.bf16.vlgmr.msra.gmra.mxu2 %v11600_v2  ;;  %v7885_v54 = vor.u32 %v10387_v47, %v7884_v41  ;;  %v8302_v24 = vld [vmem:[#allocation11 + $0x770] sm:$0xf0]  ;;  %v7764_v41 = vld [vmem:[#allocation11 + $0x318] sm:$0xf] }
 0x207   :  { %2827 = vmatpush.bf16.msrb.mxu2 %v7601_v55  ;;  %2804 = vmatpush.bf16.msrb.mxu0 %v8013_v61  ;;  %v10487_v55 = vld [vmem:[#allocation11 + $0x754] sm:$0xf]  ;;  %v7441_v61 = vor.u32 %v10271_v5, %v7438_v49  ;;  %v10356_v47 = vld [vmem:[#allocation11 + $0x334] sm:$0xf0] }
 0x208   :  { %2842 = vmatpush.bf16.msrb.mxu3 %v7793_v4  ;;  %v7860_v4 = vld [vmem:[#allocation11 + $0x3d8] sm:$0xf]  ;;  %v8305_v0 = vor.u32 %v10487_v55, %v8302_v24  ;;  %v10423_v15 = vld [vmem:[#allocation11 + $0x554] sm:$0xf]  ;;  %v7765_v49 = vor.u32 %v10356_v47, %v7764_v41 }
 0x209   :  { %2819 = vmatpush.bf16.msrb.mxu1 %v8205_v32  ;;  %v7633_v32 = vor.u32 %v10319_v63, %v7630_v3  ;;  %v7374_v19 = vld [vmem:[#allocation11 + $0x30] sm:$0xf0]  ;;  %v7636_v41 = vld [vmem:[#allocation11 + $0x218] sm:$0xf] }
 0x20a   :  { %v8238_v23 = vld [vmem:[#allocation11 + $0x6f0] sm:$0xf0]  ;;  %v10324_v47 = vld [vmem:[#allocation11 + $0x234] sm:$0xf0] }
 0x20b   :  { %2828 = vmatpush.bf16.msrb.mxu2 %v7569_v9  ;;  %2805 = vmatpush.bf16.msrb.mxu0 %v7981_v1  ;;  %v7406_v9 = vld [vmem:[#allocation11 + $0x70] sm:$0xf0]  ;;  %v7861_v1 = vor.u32 %v10380_v6, %v7860_v4  ;;  %v8372_v4 = vld [vmem:[#allocation11 + $0x7d8] sm:$0xf] }
 0x20c   :  { %2843 = vmatpush.bf16.msrb.mxu3 %v7761_v16  ;;  %v7409_v12 = vor.u32 %v10263_v7, %v7406_v9  ;;  %v8046_v16 = vld [vmem:[#allocation11 + $0x570] sm:$0xf0]  ;;  %v10508_v6 = vld [vmem:[#allocation11 + $0x7f4] sm:$0xf0] }
 0x20d   :  { %2820 = vmatpush.bf16.msrb.mxu1 %v8173_v21  ;;  %v7604_v21 = vld [vmem:[#allocation11 + $0x1d8] sm:$0xf]  ;;  %v8049_v26 = vor.u32 %v10423_v15, %v8046_v16  ;;  %v10463_v43 = vld [vmem:[#allocation11 + $0x694] sm:$0xf]  ;;  %v8373_v17 = vor.u32 %v10508_v6, %v8372_v4 }
 0x20e   :  { %v7605_v36 = vor.u32 %v10316_v60, %v7604_v21  ;;  %v10407_v11 = vld [vmem:[#allocation11 + $0x4d4] sm:$0xf]  ;;  %v7476_v15 = vld [vmem:[#allocation11 + $0xd8] sm:$0xf] }
 0x20f   :  { %2829 = vmatpush.bf16.msrb.mxu2 %v7537_v34  ;;  %2806 = vmatpush.bf16.msrb.mxu0 %v7949_v37  ;;  %v10255_v34 = vld [vmem:[#allocation11 + $0x14] sm:$0xf]  ;;  %v10284_v16 = vld [vmem:[#allocation11 + $0xf4] sm:$0xf0] }
 0x210   :  { %2844 = vmatpush.bf16.msrb.mxu3 %v7729_v31  ;;  %v10471_v37 = vld [vmem:[#allocation11 + $0x6d4] sm:$0xf]  ;;  %v7377_v46 = vor.u32 %v10255_v34, %v7374_v19  ;;  %v8340_v34 = vld [vmem:[#allocation11 + $0x798] sm:$0xf] }
 0x211   :  { %2821 = vmatpush.bf16.msrb.mxu1 %v8141_v42  ;;  %v10415_v31 = vld [vmem:[#allocation11 + $0x514] sm:$0xf]  ;;  %v8241_v38 = vor.u32 %v10471_v37, %v8238_v23  ;;  %v10308_v42 = vld [vmem:[#allocation11 + $0x1b4] sm:$0xf0]  ;;  %v7477_v23 = vor.u32 %v10284_v16, %v7476_v15 }
 0x212   :  { %v8017_v25 = vor.u32 %v10415_v31, %v8014_v35  ;;  %v7982_v20 = vld [vmem:[#allocation11 + $0x4f0] sm:$0xf0]  ;;  %v10500_v19 = vld [vmem:[#allocation11 + $0x7b4] sm:$0xf0] }
 0x213   :  { %2830 = vmatpush.bf16.msrb.mxu2 %v7505_v51  ;;  %2807 = vmatpush.bf16.msrb.mxu0 %v7917_v45  ;;  %v10364_v51 = vld [vmem:[#allocation11 + $0x374] sm:$0xf0]  ;;  %v7985_v50 = vor.u32 %v10407_v11, %v7982_v20  ;;  %v10455_v52 = vld [vmem:[#allocation11 + $0x654] sm:$0xf] }
 0x214   :  { %2845 = vmatpush.bf16.msrb.mxu3 %v7697_v28  ;;  %2822 = vmatmul.bf16.vlgmr.msrb.gmra.mxu1 %v11613_v56  ;;  %v7797_v45 = vor.u32 %v10364_v51, %v7796_v30  ;;  %v7573_v28 = vor.u32 %v10308_v42, %v7572_v39  ;;  %v8174_v5 = vld [vmem:[#allocation11 + $0x670] sm:$0xf0]  ;;  %v8116_v37 = vld [vmem:[#allocation11 + $0x5d8] sm:$0xf]  ;;  %v8341_v30 = vor.u32 %v10500_v19, %v8340_v34  ;;  %v10360_v19 = vld [vmem:[#allocation11 + $0x35c] sm:$0xf] }
 0x215   :  { %2866 = vmatpush.bf16.msra.mxu1 %v8369_v44  ;;  %v8206_v44 = vld [vmem:[#allocation11 + $0x6b0] sm:$0xf0]  ;;  %v8177_v24 = vor.u32 %v10455_v52, %v8174_v5  ;;  %v10332_v31 = vld [vmem:[#allocation11 + $0x274] sm:$0xf0] }
 0x216   :  { %v8209_v33 = vor.u32 %v10463_v43, %v8206_v44  ;;  %v10447_v59 = vld [vmem:[#allocation11 + $0x614] sm:$0xf]  ;;  %v7444_v35 = vld [vmem:[#allocation11 + $0x98] sm:$0xf] }
 0x217   :  { %2831 = vmatpush.bf16.msrb.mxu2 %v7473_v48  ;;  %2808 = vmatpush.bf16.msrb.mxu0 %v7885_v54  ;;  %v7540_v48 = vld [vmem:[#allocation11 + $0x158] sm:$0xf]  ;;  %v7950_v54 = vld [vmem:[#allocation11 + $0x4b0] sm:$0xf0] }
 0x218   :  { %2846 = vmatpush.bf16.msrb.mxu3 %v7665_v13  ;;  %v7541_v55 = vor.u32 %v10300_v62, %v7540_v48  ;;  %v10348_v13 = vld [vmem:[#allocation11 + $0x2f4] sm:$0xf0]  ;;  %v8142_v3 = vld [vmem:[#allocation11 + $0x630] sm:$0xf0]  ;;  %v7862_v48 = vld [vmem:[#allocation11 + $0x3f8] sm:$0xf0] }
 0x219   :  { %2867 = vmatpush.bf16.msra.mxu1 %v8337_v53  ;;  %v10399_v53 = vld [vmem:[#allocation11 + $0x494] sm:$0xf]  ;;  %v8308_v42 = vld [vmem:[#allocation11 + $0x758] sm:$0xf] }
 0x21a   :  { %2809 = vmatmul.bf16.vlgmr.msrb.gmra.mxu0 %v11618_v14  ;;  %v7953_v63 = vor.u32 %v10399_v53, %v7950_v54  ;;  %v10383_v60 = vld [vmem:[#allocation11 + $0x414] sm:$0xf]  ;;  %v8084_v11 = vld [vmem:[#allocation11 + $0x598] sm:$0xf]  ;;  %v7637_v53 = vor.u32 %v10324_v47, %v7636_v41 }
 0x21b   :  { %2853 = vmatpush.bf16.msra.mxu0 %v8113_v22  ;;  %2832 = vmatpush.bf16.msrb.mxu2 %v7441_v61  ;;  %v7732_v22 = vld [vmem:[#allocation11 + $0x2d8] sm:$0xf] }
 0x21c   :  { %2847 = vmatpush.bf16.msrb.mxu3 %v7633_v32  ;;  %v10292_v61 = vld [vmem:[#allocation11 + $0x134] sm:$0xf0]  ;;  %v7733_v9 = vor.u32 %v10348_v13, %v7732_v22  ;;  %v1258_v32 = vld [vmem:[#allocation13] sm:$0xff] }
 0x21d   :  { %2868 = vmatpush.bf16.msra.mxu1 %v8305_v0  ;;  %v10391_v0 = vld [vmem:[#allocation11 + $0x454] sm:$0xf]  ;;  %v7509_v57 = vor.u32 %v10292_v61, %v7508_v58  ;;  %v10436_v20 = vld [vmem:[#allocation11 + $0x5b4] sm:$0xf0]  ;;  %v10368_v58 = vld [vmem:[#allocation11 + $0x39c] sm:$0xf] }
 0x21e   :  { %v7412_v62 = vld [vmem:[#allocation11 + $0x58] sm:$0xf]  ;;  %v7830_v61 = vld [vmem:[#allocation11 + $0x3b8] sm:$0xf0] }
 0x21f   :  { %2854 = vmatpush.bf16.msra.mxu0 %v8081_v8  ;;  %2833 = vmatpush.bf16.msrb.mxu2 %v7409_v12  ;;  %v7918_v8 = vld [vmem:[#allocation11 + $0x470] sm:$0xf0]  ;;  %v8145_v12 = vor.u32 %v10447_v59, %v8142_v3  ;;  %v8276_v54 = vld [vmem:[#allocation11 + $0x718] sm:$0xf]  ;;  %v7833_v15 = vor.u32 %v10368_v58, %v7830_v61  ;;  %v7510_v58 = vld [vmem:[#allocation11 + $0x138] sm:$0xf0] }
 0x220   :  { %2892 = vmatpush.bf16.msra.mxu3 %v7861_v1  ;;  %v10340_v1 = vld [vmem:[#allocation11 + $0x2b4] sm:$0xf0]  ;;  %v7921_v18 = vor.u32 %v10391_v0, %v7918_v8  ;;  %v10312_v8 = vld [vmem:[#allocation11 + $0x1dc] sm:$0xf] }
 0x221   :  { %2869 = vmatpush.bf16.msra.mxu1 %v8273_v40  ;;  %2848 = vmatmul.bf16.vlgmr.msrb.gmra.mxu3 %v11590_v29  ;;  %v11639_v40 = vunpack.c.l.bf16 %v1258_v32  ;;  %v7701_v21 = vor.u32 %v10340_v1, %v7700_v10  ;;  %v10428_v59 = vld [vmem:[#allocation11 + $0x574] sm:$0xf0]  ;;  %v7606_v32 = vld [vmem:[#allocation11 + $0x1f8] sm:$0xf0] }
 0x222   :  { %v11637_v7 = vpop.f32.mrf.mxu3  ;;  %v10260_v3 = vld [vmem:[#allocation11 + $0x34] sm:$0xf0]  ;;  %v7609_v34 = vor.u32 %v10312_v8, %v7606_v32 }
 0x223   :  { %2855 = vmatpush.bf16.msra.mxu0 %v8049_v26  ;;  %2834 = vmatpush.bf16.msrb.mxu2 %v7377_v46  ;;  %v7886_v26 = vld [vmem:[#allocation11 + $0x430] sm:$0xf0]  ;;  %v7668_v46 = vld [vmem:[#allocation11 + $0x258] sm:$0xf]  ;;  %v1263_v51 = vperm.slane %v11639_v40, 0 }
 0x224   :  { %2893 = vmatpush.bf16.msra.mxu3 %v7829_v27  ;;  %v10444_v27 = vld [vmem:[#allocation11 + $0x5f4] sm:$0xf0]  ;;  %v7889_v39 = vor.u32 %v10383_v60, %v7886_v26  ;;  %v7669_v44 = vor.u32 %v10332_v31, %v7668_v46 }
 0x225   :  { %2870 = vmatpush.bf16.msra.mxu1 %v8241_v38  ;;  %v1279_v52 = vperm.slane %v1263_v51, 0  ;;  %v8244_v1 = vld [vmem:[#allocation11 + $0x6d8] sm:$0xf] }
 0x226   :  { %2835 = vmatmul.bf16.vlgmr.msrb.gmra.mxu2 %v11600_v2  ;;  %v8212_v31 = vld [vmem:[#allocation11 + $0x698] sm:$0xf] }
 0x227   :  { %2879 = vmatpush.bf16.msra.mxu2 %v7605_v36  ;;  %2856 = vmatpush.bf16.msra.mxu0 %v8017_v25  ;;  %v10276_v36 = vld [vmem:[#allocation11 + $0xb4] sm:$0xf0]  ;;  %v8117_v25 = vor.u32 %v10444_v27, %v8116_v37  ;;  %v10304_v37 = vld [vmem:[#allocation11 + $0x19c] sm:$0xf] }
 0x228   :  { %2894 = vmatpush.bf16.msra.mxu3 %v7797_v45  ;;  %v10492_v45 = vld [vmem:[#allocation11 + $0x774] sm:$0xf0] }
 0x229   :  { %2871 = vmatpush.bf16.msra.mxu1 %v8209_v33  ;;  %v2576_v38 = vpop.f32.mrf.mxu2  ;;  %v10376_v33 = vld [vmem:[#allocation11 + $0x3dc] sm:$0xf]  ;;  %v8309_v5 = vor.u32 %v10492_v45, %v8308_v42  ;;  %v7988_v51 = vld [vmem:[#allocation11 + $0x4d8] sm:$0xf] }
 0x22a   :  { %v2591_v43 = vpop.f32.mrf.mxu3  ;;  %v7865_v22 = vor.u32 %v10376_v33, %v7862_v48  ;;  %v2577_v4 = vadd.f32 %v2576_v38, %v1279_v52  ;;  %v10412_v38 = vld [vmem:[#allocation11 + $0x4f4] sm:$0xf0]  ;;  %v10352_v42 = vld [vmem:[#allocation11 + $0x31c] sm:$0xf] }
 0x22b   :  { %2880 = vmatpush.bf16.msra.mxu2 %v7573_v28  ;;  %2857 = vmatpush.bf16.msra.mxu0 %v7985_v50  ;;  %v7445_v28 = vor.u32 %v10276_v36, %v7444_v35  ;;  %v10268_v50 = vld [vmem:[#allocation11 + $0x74] sm:$0xf0]  ;;  %v7989_v41 = vor.u32 %v10412_v38, %v7988_v51 }
 0x22c   :  { %2895 = vmatpush.bf16.msra.mxu3 %v7765_v49  ;;  %v8085_v49 = vor.u32 %v10436_v20, %v8084_v11  ;;  %v7413_v13 = vor.u32 %v10268_v50, %v7412_v62  ;;  %v2590_v60 = vadd.f32 %v11637_v7, %v2577_v4  ;;  %v10468_v35 = vld [vmem:[#allocation11 + $0x6b4] sm:$0xf0]  ;;  %v10296_v20 = vld [vmem:[#allocation11 + $0x15c] sm:$0xf] }
 0x22d   :  { %2872 = vmatpush.bf16.msra.mxu1 %v8177_v24  ;;  %v8052_v24 = vld [vmem:[#allocation11 + $0x558] sm:$0xf]  ;;  %v2615_v6 = vpop.f32.mrf.mxu1  ;;  %v8213_v45 = vor.u32 %v10468_v35, %v8212_v31  ;;  %v10504_v4 = vld [vmem:[#allocation11 + $0x7dc] sm:$0xf] }
 0x22e   :  { %v8180_v33 = vld [vmem:[#allocation11 + $0x658] sm:$0xf] }
 0x22f   :  { %2881 = vmatpush.bf16.msra.mxu2 %v7541_v55  ;;  %2858 = vmatpush.bf16.msra.mxu0 %v7953_v63  ;;  %v10484_v55 = vld [vmem:[#allocation11 + $0x734] sm:$0xf0] }
 0x230   :  { %2896 = vmatpush.bf16.msra.mxu3 %v7733_v9  ;;  %v7380_v63 = vld [vmem:[#allocation11 + $0x18] sm:$0xf]  ;;  %v8277_v9 = vor.u32 %v10484_v55, %v8276_v54  ;;  %v10344_v54 = vld [vmem:[#allocation11 + $0x2dc] sm:$0xf] }
 0x231   :  { %2873 = vmatpush.bf16.msra.mxu1 %v8145_v12  ;;  %v2578_v0 = vpop.f32.mrf.mxu2  ;;  %v10476_v12 = vld [vmem:[#allocation11 + $0x6f4] sm:$0xf0]  ;;  %v7381_v16 = vor.u32 %v10260_v3, %v7380_v63  ;;  %v7734_v55 = vld [vmem:[#allocation11 + $0x2f8] sm:$0xf0] }
 0x232   :  { %v11644_v10 = vpop.f32.mrf.mxu3  ;;  %v8245_v26 = vor.u32 %v10476_v12, %v8244_v1  ;;  %v10460_v48 = vld [vmem:[#allocation11 + $0x674] sm:$0xf0]  ;;  %v7737_v0 = vor.u32 %v10344_v54, %v7734_v55  ;;  %v10336_v1 = vld [vmem:[#allocation11 + $0x29c] sm:$0xf] }
 0x233   :  { %2882 = vmatpush.bf16.msra.mxu2 %v7509_v57  ;;  %2859 = vmatpush.bf16.msra.mxu0 %v7921_v18  ;;  %v8053_v57 = vor.u32 %v10428_v59, %v8052_v24  ;;  %v10420_v18 = vld [vmem:[#allocation11 + $0x534] sm:$0xf0]  ;;  %v2602_v27 = vpop.f32.mrf.mxu0  ;;  %v10288_v59 = vld [vmem:[#allocation11 + $0x11c] sm:$0xf] }
 0x234   :  { %2897 = vmatpush.bf16.msra.mxu3 %v7701_v21  ;;  %2874 = vmatmul.bf16.vlgmr.msra.gmra.mxu1 %v11613_v56  ;;  %v7798_v21 = vld [vmem:[#allocation11 + $0x378] sm:$0xf0]  ;;  %v2603_v36 = vadd.f32 %v2602_v27, %v2590_v60  ;;  %v7956_v52 = vld [vmem:[#allocation11 + $0x498] sm:$0xf] }
 0x235   :  { %2918 = vmatpush.bf16.msrb.mxu1 %v8373_v17  ;;  %v8020_v17 = vld [vmem:[#allocation11 + $0x518] sm:$0xf]  ;;  %v7702_v12 = vld [vmem:[#allocation11 + $0x2b8] sm:$0xf0] }
 0x236   :  { %v8021_v46 = vor.u32 %v10420_v18, %v8020_v17  ;;  %v11649_v43 = vadd.f32 %v2615_v6, %v2603_v36  ;;  %v8148_v24 = vld [vmem:[#allocation11 + $0x618] sm:$0xf]  ;;  %v8374_v6 = vld [vmem:[#allocation11 + $0x7f8] sm:$0xf0]  ;;  %v7705_v38 = vor.u32 %v10336_v1, %v7702_v12 }
 0x237   :  { %2883 = vmatpush.bf16.msra.mxu2 %v7477_v23  ;;  %2860 = vmatpush.bf16.msra.mxu0 %v7889_v39  ;;  %v7574_v23 = vld [vmem:[#allocation11 + $0x1b8] sm:$0xf0]  ;;  %v1264_v39 = vperm.slane %v11639_v40, 2  ;;  %v10452_v3 = vld [vmem:[#allocation11 + $0x634] sm:$0xf0] }
 0x238   :  { %2898 = vmatpush.bf16.msra.mxu3 %v7669_v44  ;;  %v7577_v7 = vor.u32 %v10304_v37, %v7574_v23  ;;  %v2617_v44 = vpop.f32.mrf.mxu1  ;;  %v11653_v62 = vmul.f32 0.70710677, %v11649_v43  ;;  %v7924_v8 = vld [vmem:[#allocation11 + $0x458] sm:$0xf]  ;;  %v10496_v60 = vld [vmem:[#allocation11 + $0x79c] sm:$0xf]  ;;  %v8377_v23 = vor.u32 %v10504_v4, %v8374_v6 }
 0x239   :  { %2919 = vmatpush.bf16.msrb.mxu1 %v8341_v30  ;;  %v7801_v30 = vor.u32 %v10360_v19, %v7798_v21  ;;  %v2628_v11 = vpop.f32.mrf.mxu2  ;;  %v10396_v32 = vld [vmem:[#allocation11 + $0x474] sm:$0xf0]  ;;  %v8149_v19 = vor.u32 %v10452_v3, %v8148_v24  ;;  %v7478_v37 = vld [vmem:[#allocation11 + $0xf8] sm:$0xf0] }
 0x23a   :  { %2861 = vmatmul.bf16.vlgmr.msra.gmra.mxu0 %v11618_v14  ;;  %v2643_v47 = vpop.f32.mrf.mxu3  ;;  %v7925_v27 = vor.u32 %v10396_v32, %v7924_v8  ;;  %v7892_v31 = vld [vmem:[#allocation11 + $0x418] sm:$0xf]  ;;  %v10440_v36 = vld [vmem:[#allocation11 + $0x5dc] sm:$0xf]  ;;  %v10617_v8 = vld [vmem:[#allocation14 + $0x360] sm:$0xf0] }
 0x23b   :  { %2905 = vmatpush.bf16.msrb.mxu0 %v8117_v25  ;;  %2884 = vmatpush.bf16.msra.mxu2 %v7445_v28  ;;  %v7766_v25 = vld [vmem:[#allocation11 + $0x338] sm:$0xf0]  ;;  %v2604_v61 = vpop.f32.mrf.mxu0  ;;  %v10388_v35 = vld [vmem:[#allocation11 + $0x434] sm:$0xf0] }
 0x23c   :  { %2899 = vmatpush.bf16.msra.mxu3 %v7637_v53  ;;  %v7542_v28 = vld [vmem:[#allocation11 + $0x178] sm:$0xf0]  ;;  %v7769_v50 = vor.u32 %v10352_v42, %v7766_v25 }
 0x23d   :  { %2920 = vmatpush.bf16.msrb.mxu1 %v8309_v5  ;;  %v10404_v5 = vld [vmem:[#allocation11 + $0x4b4] sm:$0xf0]  ;;  %v7545_v53 = vor.u32 %v10296_v20, %v7542_v28  ;;  %v10328_v42 = vld [vmem:[#allocation11 + $0x25c] sm:$0xf]  ;;  %v1265_v20 = vperm.slane %v11639_v40, 4 }
 0x23e   :  { %v7957_v63 = vor.u32 %v10404_v5, %v7956_v52  ;;  %v7670_v25 = vld [vmem:[#allocation11 + $0x278] sm:$0xf0] }
 0x23f   :  { %2906 = vmatpush.bf16.msrb.mxu0 %v8085_v49  ;;  %2885 = vmatpush.bf16.msra.mxu2 %v7413_v13  ;;  %v1280_v49 = vperm.slane %v1264_v39, 0  ;;  %v8181_v13 = vor.u32 %v10460_v48, %v8180_v33  ;;  %v8118_v39 = vld [vmem:[#allocation11 + $0x5f8] sm:$0xf0]  ;;  %v7893_v48 = vor.u32 %v10388_v35, %v7892_v31  ;;  %v1281_v32 = vperm.slane %v1265_v20, 0  ;;  %v8780_v35 = vld [vmem:[#allocation14 + $0x310] sm:$0xf] }
 0x240   :  { %2944 = vmatpush.bf16.msrb.mxu3 %v7865_v22  ;;  %v2999_v22 = vmul.f32 %v11653_v62, %v11653_v62  ;;  %v10272_v28 = vld [vmem:[#allocation11 + $0x9c] sm:$0xf] }
 0x241   :  { %2921 = vmatpush.bf16.msrb.mxu1 %v8277_v9  ;;  %2900 = vmatmul.bf16.vlgmr.msra.gmra.mxu3 %v11590_v29  ;;  %v2629_v18 = vadd.f32 %v2628_v11, %v1280_v49  ;;  %v2630_v21 = vpop.f32.mrf.mxu2  ;;  %v10488_v52 = vld [vmem:[#allocation11 + $0x75c] sm:$0xf] }
 0x242   :  { %v11657_v9 = vmin.f32 %v2999_v22, 16.0  ;;  %v8310_v5 = vld [vmem:[#allocation11 + $0x778] sm:$0xf0]  ;;  %v7673_v22 = vor.u32 %v10328_v42, %v7670_v25  ;;  %v10561_v42 = vld [vmem:[#allocation14 + $0x1a0] sm:$0xf0] }
 0x243   :  { %2907 = vmatpush.bf16.msrb.mxu0 %v8053_v57  ;;  %2886 = vmatpush.bf16.msra.mxu2 %v7381_v16  ;;  %v7513_v57 = vor.u32 %v10288_v59, %v7510_v58  ;;  %v2642_v11 = vadd.f32 %v11644_v10, %v2629_v18  ;;  %v2654_v47 = vpop.f32.mrf.mxu0  ;;  %v10432_v49 = vld [vmem:[#allocation11 + $0x59c] sm:$0xf] }
 0x244   :  { %2945 = vmatpush.bf16.msrb.mxu3 %v7833_v15  ;;  %v10280_v15 = vld [vmem:[#allocation11 + $0xdc] sm:$0xf]  ;;  %v3001_v16 = vmul.f32 2.1237322e-06, %v11657_v9  ;;  %v3012_v17 = vmul.f32 3.8918573e-05, %v11657_v9 }
 0x245   :  { %2922 = vmatpush.bf16.msrb.mxu1 %v8245_v26  ;;  %v8342_v26 = vld [vmem:[#allocation11 + $0x7b8] sm:$0xf0]  ;;  %v2655_v55 = vadd.f32 %v2654_v47, %v2642_v11 }
 0x246   :  { %2887 = vmatmul.bf16.vlgmr.msra.gmra.mxu2 %v11600_v2  ;;  %v3013_v51 = vadd.f32 0.001143296, %v3012_v17  ;;  %v8345_v33 = vor.u32 %v10496_v60, %v8342_v26  ;;  %v10320_v24 = vld [vmem:[#allocation11 + $0x21c] sm:$0xf] }
 0x247   :  { %2931 = vmatpush.bf16.msrb.mxu2 %v7609_v34  ;;  %2908 = vmatpush.bf16.msrb.mxu0 %v8021_v46  ;;  %v2667_v34 = vpop.f32.mrf.mxu1  ;;  %v11661_v46 = vpop.f32.mrf.mxu3  ;;  %v7638_v59 = vld [vmem:[#allocation11 + $0x238] sm:$0xf0] }
 0x248   :  { %2946 = vmatpush.bf16.msrb.mxu3 %v7801_v30  ;;  %v3002_v30 = vadd.f32 0.00028619796, %v3001_v16  ;;  %v10264_v58 = vld [vmem:[#allocation11 + $0x5c] sm:$0xf]  ;;  %v7641_v18 = vor.u32 %v10320_v24, %v7638_v59  ;;  %v10554_v59 = vld [vmem:[#allocation14 + $0x168] sm:$0xf0] }
 0x249   :  { %2923 = vmatpush.bf16.msrb.mxu1 %v8213_v45  ;;  %v3014_v45 = vmul.f32 %v3013_v51, %v11657_v9  ;;  %v2680_v4 = vpop.f32.mrf.mxu2  ;;  %v7414_v6 = vld [vmem:[#allocation11 + $0x78] sm:$0xf0] }
 0x24a   :  { %v3003_v44 = vmul.f32 %v3002_v30, %v11657_v9  ;;  %v10480_v12 = vld [vmem:[#allocation11 + $0x71c] sm:$0xf]  ;;  %v7417_v60 = vor.u32 %v10264_v58, %v7414_v6 }
 0x24b   :  { %2932 = vmatpush.bf16.msrb.mxu2 %v7577_v7  ;;  %2909 = vmatpush.bf16.msrb.mxu0 %v7989_v41  ;;  %v7481_v7 = vor.u32 %v10280_v15, %v7478_v37  ;;  %v7446_v41 = vld [vmem:[#allocation11 + $0xb8] sm:$0xf0]  ;;  %v3015_v54 = vadd.f32 0.014752088, %v3014_v45  ;;  %v2656_v51 = vpop.f32.mrf.mxu0 }
 0x24c   :  { %2947 = vmatpush.bf16.msrb.mxu3 %v7769_v50  ;;  %v8121_v50 = vor.u32 %v10440_v36, %v8118_v39  ;;  %v7449_v10 = vor.u32 %v10272_v28, %v7446_v41  ;;  %v8054_v26 = vld [vmem:[#allocation11 + $0x578] sm:$0xf0]  ;;  %v10610_v36 = vld [vmem:[#allocation14 + $0x328] sm:$0xf0] }
 0x24d   :  { %2924 = vmatpush.bf16.msrb.mxu1 %v8181_v13  ;;  %v8086_v13 = vld [vmem:[#allocation11 + $0x5b8] sm:$0xf0]  ;;  %v3016_v61 = vmul.f32 %v3015_v54, %v11657_v9  ;;  %v8556_v54 = vld [vmem:[#allocation14 + $0x150] sm:$0xf] }
 0x24e   :  { %v8089_v17 = vor.u32 %v10432_v49, %v8086_v13  ;;  %v10256_v37 = vld [vmem:[#allocation11 + $0x1c] sm:$0xf] }
 0x24f   :  { %2933 = vmatpush.bf16.msrb.mxu2 %v7545_v53  ;;  %2910 = vmatpush.bf16.msrb.mxu0 %v7957_v63  ;;  %v3004_v53 = vadd.f32 0.0036580483, %v3003_v44  ;;  %v11669_v63 = vadd.f32 %v2667_v34, %v2655_v55  ;;  %v2669_v3 = vpop.f32.mrf.mxu1  ;;  %v2695_v1 = vpop.f32.mrf.mxu3  ;;  %v3017_v16 = vadd.f32 0.112945676, %v3016_v61  ;;  %v8278_v34 = vld [vmem:[#allocation11 + $0x738] sm:$0xf0] }
 0x250   :  { %2948 = vmatpush.bf16.msrb.mxu3 %v7737_v0  ;;  %v8808_v0 = vld [vmem:[#allocation14 + $0x348] sm:$0xf]  ;;  %v7382_v31 = vld [vmem:[#allocation11 + $0x38] sm:$0xf0]  ;;  %v8752_v55 = vld [vmem:[#allocation14 + $0x2d8] sm:$0xf]  ;;  %v8557_v1 = vor.u32 %v10554_v59, %v8556_v54 }
 0x251   :  { %2925 = vmatpush.bf16.msrb.mxu1 %v8149_v19  ;;  %v3005_v15 = vmul.f32 %v3004_v53, %v11657_v9  ;;  %v10424_v19 = vld [vmem:[#allocation11 + $0x55c] sm:$0xf]  ;;  %v11673_v21 = vmul.f32 0.70710677, %v11669_v63  ;;  %v7385_v28 = vor.u32 %v10256_v37, %v7382_v31 }
 0x252   :  { %v10472_v39 = vld [vmem:[#allocation11 + $0x6dc] sm:$0xf]  ;;  %v8057_v45 = vor.u32 %v10424_v19, %v8054_v26 }
 0x253   :  { %2934 = vmatpush.bf16.msrb.mxu2 %v7513_v57  ;;  %2911 = vmatpush.bf16.msrb.mxu0 %v7925_v27  ;;  %v8313_v57 = vor.u32 %v10488_v52, %v8310_v5  ;;  %v3018_v27 = vmul.f32 %v3017_v16, %v11657_v9  ;;  %v3039_v30 = vmul.f32 %v11673_v21, %v11673_v21  ;;  %v3006_v25 = vadd.f32 0.05243302, %v3005_v15  ;;  %v8246_v11 = vld [vmem:[#allocation11 + $0x6f8] sm:$0xf0]  ;;  %v2682_v5 = vpop.f32.mrf.mxu2  ;;  %v8528_v16 = vld [vmem:[#allocation14 + $0x118] sm:$0xf] }
 0x254   :  { %2949 = vmatpush.bf16.msrb.mxu3 %v7705_v38  ;;  %2926 = vmatmul.bf16.vlgmr.msrb.gmra.mxu1 %v11613_v56  ;;  %v8281_v38 = vor.u32 %v10480_v12, %v8278_v34  ;;  %v10416_v41 = vld [vmem:[#allocation11 + $0x51c] sm:$0xf]  ;;  %v8249_v24 = vor.u32 %v10472_v39, %v8246_v11 }
 0x255   :  { %2970 = vmatpush.bf16.msra.mxu1 %v8377_v23  ;;  %v8809_v23 = vor.u32 %v10617_v8, %v8808_v0  ;;  %v3019_v44 = vadd.f32 0.4994258, %v3018_v27  ;;  %v11679_v20 = vmin.f32 %v3039_v30, 16.0  ;;  %v8022_v47 = vld [vmem:[#allocation11 + $0x538] sm:$0xf0]  ;;  %v3007_v58 = vmul.f32 %v3006_v25, %v11657_v9 }
 0x256   :  { %v11682_v53 = vld [vmem:[#allocation11 + $0x69c] sm:$0xf]  ;;  %v8025_v3 = vor.u32 %v10416_v41, %v8022_v47  ;;  %v10540_v25 = vld [vmem:[#allocation14 + $0xf8] sm:$0xf0]  ;;  %v8696_v47 = vld [vmem:[#allocation14 + $0x268] sm:$0xf] }
 0x257   :  { %2935 = vmatpush.bf16.msrb.mxu2 %v7481_v7  ;;  %2912 = vmatpush.bf16.msrb.mxu0 %v7893_v48  ;;  %v8584_v7 = vld [vmem:[#allocation14 + $0x188] sm:$0xf]  ;;  %v3020_v48 = vmul.f32 %v3019_v44, %v11657_v9  ;;  %v2719_v52 = vpop.f32.mrf.mxu1  ;;  %v3041_v13 = vmul.f32 2.1237322e-06, %v11679_v20  ;;  %v10408_v6 = vld [vmem:[#allocation11 + $0x4dc] sm:$0xf] }
 0x258   :  { %2950 = vmatpush.bf16.msrb.mxu3 %v7673_v22  ;;  %v8585_v49 = vor.u32 %v10561_v42, %v8584_v7  ;;  %v10603_v22 = vld [vmem:[#allocation14 + $0x2f0] sm:$0xf0]  ;;  %v8500_v42 = vld [vmem:[#allocation14 + $0xe0] sm:$0xf] }
 0x259   :  { %2971 = vmatpush.bf16.msra.mxu1 %v8345_v33  ;;  %v8781_v33 = vor.u32 %v10610_v36, %v8780_v35  ;;  %v11688_v61 = vadd.f32 1.0, %v3020_v48  ;;  %v3042_v0 = vadd.f32 0.00028619796, %v3041_v13  ;;  %v11692_v12 = vld [vmem:[#allocation11 + $0x65c] sm:$0xf] }
 0x25a   :  { %2913 = vmatmul.bf16.vlgmr.msrb.gmra.mxu0 %v11618_v14  ;;  %v11694_v15 = vld [vmem:[#allocation11 + $0x678] sm:$0xf0]  ;;  %v3008_v35 = vadd.f32 0.18741608, %v3007_v58  ;;  %v11740_v58 = vld [vmem:[#allocation14 + $0x70] sm:$0xf] }
 0x25b   :  { %2957 = vmatpush.bf16.msra.mxu0 %v8121_v50  ;;  %2936 = vmatpush.bf16.msrb.mxu2 %v7449_v10  ;;  %v2681_v50 = vadd.f32 %v2680_v4, %v1281_v32  ;;  %v3052_v10 = vmul.f32 3.8918573e-05, %v11679_v20  ;;  %v8214_v4 = vld [vmem:[#allocation11 + $0x6b8] sm:$0xf0]  ;;  %10987 = vrcp.f32 %v11688_v61  ;;  %v3043_v34 = vmul.f32 %v3042_v0, %v11679_v20 }
 0x25c   :  { %2951 = vmatpush.bf16.msrb.mxu3 %v7641_v18  ;;  %v7990_v32 = vld [vmem:[#allocation11 + $0x4f8] sm:$0xf0]  ;;  %v10596_v18 = vld [vmem:[#allocation14 + $0x2b8] sm:$0xf0]  ;;  %v8217_v26 = vor.u32 %v11682_v53, %v8214_v4  ;;  %v3009_v54 = vmul.f32 %v3008_v35, %v11657_v9  ;;  %v11742_v9 = vld [vmem:[#allocation14 + $0x88] sm:$0xf0]  ;;  %vm3027_vm10 = vweird.f32 %v11688_v61 }
 0x25d   :  { %2972 = vmatpush.bf16.msra.mxu1 %v8313_v57  ;;  %v3053_v8 = vadd.f32 0.001143296, %v3052_v10  ;;  %v8753_v57 = vor.u32 %v10603_v22, %v8752_v55  ;;  %v11699_v37 = vld [vmem:[#allocation11 + $0x49c] sm:$0xf]  ;;  %v7993_v30 = vor.u32 %v10408_v6, %v7990_v32  ;;  %v3044_v39 = vadd.f32 0.0036580483, %v3043_v34 }
 0x25e   :  { %v11703_v27 = vld [vmem:[#allocation11 + $0x61c] sm:$0xf]  ;;  %v8501_v6 = vor.u32 %v10540_v25, %v8500_v42  ;;  %v11750_v32 = vld [vmem:[#allocation14 + $0x508] sm:$0xf]  ;;  %v3010_v34 = vadd.f32 1.1283791, %v3009_v54 }
 0x25f   :  { %2958 = vmatpush.bf16.msra.mxu0 %v8089_v17  ;;  %2937 = vmatpush.bf16.msrb.mxu2 %v7417_v60  ;;  %v8724_v17 = vld [vmem:[#allocation14 + $0x2a0] sm:$0xf]  ;;  %v3054_v19 = vmul.f32 %v3053_v8, %v11679_v20  ;;  %v2706_v60 = vpop.f32.mrf.mxu0  ;;  %v11705_v31 = vld [vmem:[#allocation11 + $0x638] sm:$0xf0]  ;;  %v2721_v11 = vpop.f32.mrf.mxu1  ;;  %v8416_v54 = vld [vmem:[#allocation14 + $0x38] sm:$0xf] }
 0x260   :  { %6198 = vmatpush.bf16.msra.mxu3 %v8809_v23  ;;  %v10547_v23 = vld [vmem:[#allocation14 + $0x130] sm:$0xf0]  ;;  %v8725_v44 = vor.u32 %v10596_v18, %v8724_v17  ;;  %v8153_v13 = vor.u32 %v11703_v27, %v11705_v31  ;;  %v1266_v17 = vperm.slane %v11639_v40, 6  ;;  %v10673_v18 = vld [vmem:[#allocation14 + $0x520] sm:$0xf0]  ;;  %v3011_v42 = vmul.f32 %v3010_v34, %v11653_v62 }
 0x261   :  { %2973 = vmatpush.bf16.msra.mxu1 %v8281_v38  ;;  %2952 = vmatmul.bf16.vlgmr.msrb.gmra.mxu3 %v11590_v29  ;;  %v2694_v29 = vadd.f32 %v11661_v46, %v2681_v50  ;;  %v11701_v46 = vld [vmem:[#allocation11 + $0x4b8] sm:$0xf0]  ;;  %v3055_v7 = vadd.f32 0.014752088, %v3054_v19  ;;  %v8185_v50 = vor.u32 %v11692_v12, %v11694_v15  ;;  %v11726_v53 = vpop.eup %10987  ;;  %v3031_v19 = vand.u32 2147483647, %v11688_v61 }
 0x262   :  { %v11708_v51 = vld [vmem:[#allocation11 + $0x45c] sm:$0xf]  ;;  %v7961_v22 = vor.u32 %v11699_v37, %v11701_v46  ;;  %v3023_v10 = vmul.f32 %v11726_v53, %v11688_v61  ;;  %vm3028_vm9 = vweird.f32 %v11726_v53  ;;  %v8640_v27 = vld [vmem:[#allocation14 + $0x1f8] sm:$0xf] }
 0x263   :  { %2959 = vmatpush.bf16.msra.mxu0 %v8057_v45  ;;  %2938 = vmatpush.bf16.msrb.mxu2 %v7385_v28  ;;  %v2707_v36 = vadd.f32 %v2706_v60, %v2694_v29  ;;  %v11710_v38 = vld [vmem:[#allocation11 + $0x478] sm:$0xf0]  ;;  %v8529_v28 = vor.u32 %v10547_v23, %v8528_v16  ;;  %v3056_v48 = vmul.f32 %v3055_v7, %v11679_v20  ;;  %v10582_v29 = vld [vmem:[#allocation14 + $0x248] sm:$0xf0]  ;;  %v3033_v60 = vand.u32 2147483648, %v11688_v61  ;;  %vm3029_vm11 = vmor %vm3027_vm10, %vm3028_vm9 }
 0x264   :  { %6199 = vmatpush.bf16.msra.mxu3 %v8781_v33  ;;  %v11714_v41 = vld [vmem:[#allocation11 + $0x41c] sm:$0xf]  ;;  %v3045_v33 = vmul.f32 %v3044_v39, %v11679_v20  ;;  %v7929_v59 = vor.u32 %v11708_v51, %v11710_v38  ;;  %v11762_v35 = vpop.f32.mrf.mxu3  ;;  %vm3032_vm12 = vcmp.eq.f32.partialorder %v3031_v19, 8.507059e+37  ;;  %v9004_v61 = vld [vmem:[#allocation14 + $0x4d0] sm:$0xf] }
 0x265   :  { %2974 = vmatpush.bf16.msra.mxu1 %v8249_v24  ;;  %v11712_v45 = vadd.f32 %v2719_v52, %v2707_v36  ;;  %v11720_v5 = vld [vmem:[#allocation11 + $0x438] sm:$0xf0]  ;;  %v11724_v52 = vld [vmem:[#allocation14 + $0xc0] sm:$0xf0]  ;;  %v3057_v24 = vadd.f32 0.112945676, %v3056_v48  ;;  %v8445_v36 = vor.u32 %v11742_v9, %v11740_v58 }
 0x266   :  { %2939 = vmatmul.bf16.vlgmr.msrb.gmra.mxu2 %v11600_v2  ;;  %v10589_v2 = vld [vmem:[#allocation14 + $0x280] sm:$0xf0]  ;;  %v7897_v0 = vor.u32 %v11714_v41, %v11720_v5  ;;  %v3046_v12 = vadd.f32 0.05243302, %v3045_v33  ;;  %v10575_v51 = vld [vmem:[#allocation14 + $0x210] sm:$0xf0] }
 0x267   :  { %6185 = vmatpush.bf16.msra.mxu2 %v8585_v49  ;;  %2960 = vmatpush.bf16.msra.mxu0 %v8025_v3  ;;  %v11722_v49 = vld [vmem:[#allocation14 + $0xa8] sm:$0xf]  ;;  %v11730_v55 = vmul.f32 0.70710677, %v11712_v45  ;;  %v8697_v3 = vor.u32 %v10589_v2, %v8696_v47  ;;  %v3058_v15 = vmul.f32 %v3057_v24, %v11679_v20  ;;  %v2708_v16 = vpop.f32.mrf.mxu0  ;;  %v3034_v25 = vor.u32 1.1754944e-38, %v3033_v60 }
 0x268   :  { %6200 = vmatpush.bf16.msra.mxu3 %v8753_v57  ;;  %v8473_v8 = vor.u32 %v11724_v52, %v11722_v49  ;;  %v8668_v57 = vld [vmem:[#allocation14 + $0x230] sm:$0xf]  ;;  %v3047_v39 = vmul.f32 %v3046_v12, %v11679_v20  ;;  %v8641_v47 = vor.u32 %v10575_v51, %v8640_v27  ;;  %v10666_v48 = vld [vmem:[#allocation14 + $0x4e8] sm:$0xf0]  ;;  %v10568_v5 = vld [vmem:[#allocation14 + $0x1d8] sm:$0xf0] }
 0x269   :  { %2975 = vmatpush.bf16.msra.mxu1 %v8217_v26  ;;  %v3079_v4 = vmul.f32 %v11730_v55, %v11730_v55  ;;  %v3059_v46 = vadd.f32 0.4994258, %v3058_v15  ;;  %v8669_v23 = vor.u32 %v10582_v29, %v8668_v57  ;;  %v2983_v15 = vmul.f32 0.5, %v11649_v43  ;;  %v8948_v19 = vld [vmem:[#allocation14 + $0x460] sm:$0xf] }
 0x26a   :  { %v3048_v52 = vadd.f32 0.18741608, %v3047_v39  ;;  %v10652_v60 = vld [vmem:[#allocation14 + $0x478] sm:$0xf0] }
 0x26b   :  { %6186 = vmatpush.bf16.msra.mxu2 %v8557_v1  ;;  %2961 = vmatpush.bf16.msra.mxu0 %v7993_v30  ;;  %v3024_v1 = vsub.f32 1.0, %v3023_v10  ;;  %v11756_v26 = vmin.f32 %v3079_v4, 16.0  ;;  %v9033_v30 = vor.u32 %v10673_v18, %v11750_v32  ;;  %v3060_v7 = vmul.f32 %v3059_v46, %v11679_v20  ;;  %v8976_v4 = vld [vmem:[#allocation14 + $0x498] sm:$0xf] }
 0x26c   :  { %6201 = vmatpush.bf16.msra.mxu3 %v8725_v44  ;;  %v2747_v9 = vpop.f32.mrf.mxu3  ;;  %v3049_v32 = vmul.f32 %v3048_v52, %v11679_v20 }
 0x26d   :  { %2976 = vmatpush.bf16.msra.mxu1 %v8185_v50  ;;  %v3025_v37 = vmul.f32 %v11726_v53, %v3024_v1  ;;  %v3081_v31 = vmul.f32 2.1237322e-06, %v11756_v26  ;;  %v3092_v40 = vmul.f32 3.8918573e-05, %v11756_v26  ;;  %v11775_v41 = vadd.f32 1.0, %v3060_v7 }
 0x26e   :  { %v8612_v50 = vld [vmem:[#allocation14 + $0x1c0] sm:$0xf]  ;;  %v10512_v1 = vld [vmem:[#allocation14 + $0x18] sm:$0xf0]  ;;  %v3050_v46 = vadd.f32 1.1283791, %v3049_v32 }
 0x26f   :  { %6187 = vmatpush.bf16.msra.mxu2 %v8529_v28  ;;  %2962 = vmatpush.bf16.msra.mxu0 %v7961_v22  ;;  %v3026_v38 = vadd.f32 %v11726_v53, %v3025_v37  ;;  %v3082_v44 = vadd.f32 0.00028619796, %v3081_v31  ;;  %v3093_v11 = vadd.f32 0.001143296, %v3092_v40  ;;  %10989 = vrcp.f32 %v11775_v41  ;;  %v10519_v22 = vld [vmem:[#allocation14 + $0x50] sm:$0xf0] }
 0x270   :  { %6202 = vmatpush.bf16.msra.mxu3 %v8697_v3  ;;  %v8613_v58 = vor.u32 %v10568_v5, %v8612_v50  ;;  %v8417_v3 = vor.u32 %v10519_v22, %v8416_v54  ;;  %v9256_v37 = vld [vmem:[#allocation14 + $0x6c8] sm:$0xf]  ;;  %vm3067_vm14 = vweird.f32 %v11775_v41  ;;  %v10778_v54 = vld [vmem:[#allocation14 + $0x868] sm:$0xf0] }
 0x271   :  { %2977 = vmatpush.bf16.msra.mxu1 %v8153_v13  ;;  %v3030_v28 = vsel %vm3029_vm11, %v11726_v53, %v3026_v38  ;;  %v3083_v33 = vmul.f32 %v3082_v44, %v11756_v26  ;;  %v3094_v62 = vmul.f32 %v3093_v11, %v11756_v26  ;;  %v2732_v53 = vpop.f32.mrf.mxu2  ;;  %v2771_v31 = vpop.f32.mrf.mxu1  ;;  %v8920_v40 = vld [vmem:[#allocation14 + $0x428] sm:$0xf]  ;;  %v3071_v38 = vand.u32 2147483647, %v11775_v41  ;;  %v10785_v11 = vld [vmem:[#allocation14 + $0x8a0] sm:$0xf0] }
 0x272   :  { %v3035_v2 = vsel %vm3032_vm12, %v3034_v25, %v3030_v28  ;;  %v9480_v7 = vld [vmem:[#allocation14 + $0x888] sm:$0xf]  ;;  %v8949_v44 = vor.u32 %v10652_v60, %v8948_v19  ;;  %v9172_v19 = vld [vmem:[#allocation14 + $0x620] sm:$0xf]  ;;  %v10708_v60 = vld [vmem:[#allocation14 + $0x638] sm:$0xf0] }
 0x273   :  { %6188 = vmatpush.bf16.msra.mxu2 %v8501_v6  ;;  %2963 = vmatpush.bf16.msra.mxu0 %v7929_v59  ;;  %v3036_v49 = vmul.f32 %v3035_v2, %v3011_v42  ;;  %v3084_v13 = vadd.f32 0.0036580483, %v3083_v33  ;;  %v3095_v24 = vadd.f32 0.014752088, %v3094_v62  ;;  %v9005_v59 = vor.u32 %v10666_v48, %v9004_v61  ;;  %v10659_v6 = vld [vmem:[#allocation14 + $0x4b0] sm:$0xf0] }
 0x274   :  { %6203 = vmatpush.bf16.msra.mxu3 %v8669_v23  ;;  %2978 = vmatmul.bf16.vlgmr.msra.gmra.mxu1 %v11613_v56  ;;  %v1282_v56 = vperm.slane %v1266_v17, 0  ;;  %v8977_v17 = vor.u32 %v10659_v6, %v8976_v4  ;;  %v3073_v42 = vand.u32 2147483648, %v11775_v41  ;;  %v9228_v2 = vld [vmem:[#allocation14 + $0x690] sm:$0xf]  ;;  %v10722_v33 = vld [vmem:[#allocation14 + $0x6a8] sm:$0xf0] }
 0x275   :  { %v8378_v10 = vclamps-f32 %v3036_v49, 1.0  ;;  %v3085_v57 = vmul.f32 %v3084_v13, %v11756_v26  ;;  %v3096_v29 = vmul.f32 %v3095_v24, %v11756_v26  ;;  %v11785_v12 = vpop.eup %10989  ;;  %v9229_v5 = vor.u32 %v10722_v33, %v9228_v2  ;;  %v10715_v4 = vld [vmem:[#allocation14 + $0x670] sm:$0xf0] }
 0x276   :  { %v3063_v18 = vmul.f32 %v11785_v12, %v11775_v41  ;;  %v2733_v20 = vadd.f32 %v2732_v53, %v1282_v56  ;;  %vm3068_vm13 = vweird.f32 %v11785_v12  ;;  %v3074_v13 = vor.u32 1.1754944e-38, %v3073_v42  ;;  %v10638_v41 = vld [vmem:[#allocation14 + $0x408] sm:$0xf0]  ;;  %v10701_v42 = vld [vmem:[#allocation14 + $0x600] sm:$0xf0] }
 0x277   :  { %6189 = vmatpush.bf16.msra.mxu2 %v8473_v8  ;;  %2964 = vmatpush.bf16.msra.mxu0 %v7897_v0  ;;  %v3319_v8 = vadd.f32 1.0, %v8378_v10  ;;  %v8388_v0 = vld [vmem:[#allocation14] sm:$0xf]  ;;  %v3097_v16 = vadd.f32 0.112945676, %v3096_v29  ;;  %v2758_v52 = vpop.f32.mrf.mxu0  ;;  %vm11804_vm15 = vmor %vm3067_vm14, %vm3068_vm13  ;;  %v3051_v56 = vmul.f32 %v3050_v46, %v11673_v21  ;;  %vm3072_vm0 = vcmp.eq.f32.partialorder %v3071_v38, 8.507059e+37 }
 0x278   :  { %6204 = vmatpush.bf16.msra.mxu3 %v8641_v47  ;;  %v8389_v34 = vor.u32 %v10512_v1, %v8388_v0  ;;  %v3086_v23 = vadd.f32 0.05243302, %v3085_v57  ;;  %v3064_v51 = vsub.f32 1.0, %v3063_v18  ;;  %v2746_v61 = vadd.f32 %v11762_v35, %v2733_v20  ;;  %v9452_v35 = vld [vmem:[#allocation14 + $0x850] sm:$0xf] }
 0x279   :  { %v3098_v27 = vmul.f32 %v3097_v16, %v11756_v26  ;;  %v2734_v43 = vpop.f32.mrf.mxu2  ;;  %v9481_v47 = vor.u32 %v10785_v11, %v9480_v7  ;;  %v2773_v32 = vpop.f32.mrf.mxu1  ;;  %v9424_v1 = vld [vmem:[#allocation14 + $0x818] sm:$0xf]  ;;  %v10771_v21 = vld [vmem:[#allocation14 + $0x830] sm:$0xf0] }
 0x27a   :  { %2965 = vmatmul.bf16.vlgmr.msra.gmra.mxu0 %v11618_v14  ;;  %v3327_v14 = vmul.f32 %v3319_v8, %v2983_v15  ;;  %v3065_v28 = vmul.f32 %v11785_v12, %v3064_v51  ;;  %v3087_v48 = vmul.f32 %v3086_v23, %v11756_v26  ;;  %v2759_v24 = vadd.f32 %v2758_v52, %v2746_v61  ;;  %v8864_v16 = vld [vmem:[#allocation14 + $0x3b8] sm:$0xf]  ;;  %v10631_v20 = vld [vmem:[#allocation14 + $0x3d0] sm:$0xf0]  ;;  %v10764_v43 = vld [vmem:[#allocation14 + $0x7f8] sm:$0xf0] }
 0x27b   :  { %6211 = vmatpush.bf16.msrb.mxu0 %v9033_v30  ;;  %6190 = vmatpush.bf16.msra.mxu2 %v8445_v36  ;;  %v10645_v36 = vld [vmem:[#allocation14 + $0x440] sm:$0xf0]  ;;  %v3099_v25 = vadd.f32 0.4994258, %v3098_v27  ;;  %v9173_v27 = vor.u32 %v10708_v60, %v9172_v19  ;;  %v10624_v51 = vld [vmem:[#allocation14 + $0x398] sm:$0xf0] }
 0x27c   :  { %6205 = vmatpush.bf16.msra.mxu3 %v8613_v58  ;;  %v10729_v30 = vld [vmem:[#allocation14 + $0x6e0] sm:$0xf0]  ;;  %v11796_v62 = vpack.c.bf16 %v3327_v14, %v3327_v14  ;;  %v3066_v49 = vadd.f32 %v11785_v12, %v3065_v28  ;;  %v8921_v53 = vor.u32 %v10645_v36, %v8920_v40  ;;  %v9453_v58 = vor.u32 %v10778_v54, %v9452_v35  ;;  %v11031_v28 = vld [vmem:[#allocation13] sm:$0xff]  ;;  %v9368_v52 = vld [vmem:[#allocation14 + $0x7a8] sm:$0xf] }
 0x27d   :  { %v9257_v39 = vor.u32 %v10729_v30, %v9256_v37  ;;  %v3100_v50 = vmul.f32 %v3099_v25, %v11756_v26  ;;  %v3088_v8 = vadd.f32 0.18741608, %v3087_v48  ;;  %v11816_v29 = vadd.f32 %v2771_v31, %v2759_v24  ;;  %v9396_v31 = vld [vmem:[#allocation14 + $0x7e0] sm:$0xf]  ;;  %v9116_v24 = vld [vmem:[#allocation14 + $0x5b0] sm:$0xf] }
 0x27e   :  { %v3070_v9 = vsel %vm11804_vm15, %v11785_v12, %v3066_v49  ;;  %v9425_v12 = vor.u32 %v10771_v21, %v9424_v1  ;;  %v2984_v37 = vmul.f32 0.5, %v11669_v63  ;;  %v8865_v36 = vor.u32 %v10631_v20, %v8864_v16  ;;  %v8836_v30 = vld [vmem:[#allocation14 + $0x380] sm:$0xf]  ;;  %v9144_v63 = vld [vmem:[#allocation14 + $0x5e8] sm:$0xf] }
 0x27f   :  { %6212 = vmatpush.bf16.msrb.mxu0 %v9005_v59  ;;  %6191 = vmatpush.bf16.msra.mxu2 %v8417_v3  ;;  %v11808_v10 = vadd.f32 1.0, %v3100_v50  ;;  %v8892_v59 = vld [vmem:[#allocation14 + $0x3f0] sm:$0xf]  ;;  %v9200_v3 = vld [vmem:[#allocation14 + $0x658] sm:$0xf]  ;;  %v3075_v6 = vsel %vm3072_vm0, %v3074_v13, %v3070_v9  ;;  %v2760_v23 = vpop.f32.mrf.mxu0  ;;  %v9397_v38 = vor.u32 %v10764_v43, %v9396_v31  ;;  %v11831_v61 = vunpack.c.h.bf16 %v11031_v28 }
 0x280   :  { %6224 = vmatpush.bf16.msrb.mxu1 %v9257_v39  ;;  %v3076_v57 = vmul.f32 %v3075_v6, %v3051_v56  ;;  %v9201_v0 = vor.u32 %v10715_v4, %v9200_v3  ;;  %v8893_v15 = vor.u32 %v10638_v41, %v8892_v59  ;;  %v11819_v18 = vmul.f32 0.70710677, %v11816_v29  ;;  %v10694_v41 = vld [vmem:[#allocation14 + $0x5c8] sm:$0xf0]  ;;  %v9340_v6 = vld [vmem:[#allocation14 + $0x770] sm:$0xf] }
 0x281   :  { %10991 = vrcp.f32 %v11808_v10  ;;  %v8837_v49 = vor.u32 %v10624_v51, %v8836_v30  ;;  %vm3107_vm2 = vweird.f32 %v11808_v10  ;;  %v1267_v59 = vperm.slane %v11831_v61, 0  ;;  %v10687_v20 = vld [vmem:[#allocation14 + $0x590] sm:$0xf0]  ;;  %v9704_v28 = vld [vmem:[#allocation14 + $0xa48] sm:$0xf] }
 0x282   :  { %v3119_v46 = vmul.f32 %v11819_v18, %v11819_v18  ;;  %v9117_v4 = vor.u32 %v10694_v41, %v9116_v24  ;;  %v2985_v30 = vmul.f32 0.5, %v11712_v45  ;;  %v10834_v24 = vld [vmem:[#allocation14 + $0xa28] sm:$0xf0] }
 0x283   :  { %6213 = vmatpush.bf16.msrb.mxu0 %v8977_v17  ;;  %6192 = vmatpush.bf16.msra.mxu2 %v8389_v34  ;;  %v8379_v17 = vclamps-f32 %v3076_v57, 1.0  ;;  %v3089_v34 = vmul.f32 %v3088_v8, %v11756_v26  ;;  %v10750_v8 = vld [vmem:[#allocation14 + $0x788] sm:$0xf0] }
 0x284   :  { %6225 = vmatpush.bf16.msrb.mxu1 %v9229_v5  ;;  %v11826_v7 = vmin.f32 %v3119_v46, 16.0  ;;  %v11829_v11 = vpop.f32.mrf.mxu3  ;;  %v3113_v5 = vand.u32 2147483648, %v11808_v10  ;;  %v9341_v57 = vor.u32 %v10750_v8, %v9340_v6  ;;  %v10743_v46 = vld [vmem:[#allocation14 + $0x750] sm:$0xf0]  ;;  %v9648_v8 = vld [vmem:[#allocation14 + $0x9d8] sm:$0xf] }
 0x285   :  { %v3320_v14 = vadd.f32 1.0, %v8379_v17  ;;  %v3090_v25 = vadd.f32 1.1283791, %v3089_v34 }
 0x286   :  { %6193 = vmatmul.bf16.vlgmr.msra.gmra.mxu2 %v11796_v62  ;;  %v3121_v48 = vmul.f32 2.1237322e-06, %v11826_v7  ;;  %v3132_v50 = vmul.f32 3.8918573e-05, %v11826_v7  ;;  %v3114_v32 = vor.u32 1.1754944e-38, %v3113_v5 }
 0x287   :  { %6237 = vmatpush.bf16.msrb.mxu2 %v9481_v47  ;;  %6214 = vmatpush.bf16.msrb.mxu0 %v8949_v44  ;;  %v10992_v40 = vpop.eup %10991  ;;  %v3328_v26 = vmul.f32 %v3320_v14, %v2984_v37  ;;  %v3111_v44 = vand.u32 2147483647, %v11808_v10  ;;  %v9145_v47 = vor.u32 %v10701_v42, %v9144_v63  ;;  %v9312_v14 = vld [vmem:[#allocation14 + $0x738] sm:$0xf]  ;;  %v9284_v42 = vld [vmem:[#allocation14 + $0x700] sm:$0xf] }
 0x288   :  { %6226 = vmatpush.bf16.msrb.mxu1 %v9201_v0  ;;  %v3103_v39 = vmul.f32 %v10992_v40, %v11808_v10  ;;  %vm3108_vm1 = vweird.f32 %v10992_v40  ;;  %v3122_v54 = vadd.f32 0.00028619796, %v3121_v48  ;;  %v3133_v22 = vadd.f32 0.001143296, %v3132_v50 }
 0x289   :  { %v11833_v2 = vpack.c.bf16 %v3328_v26, %v3328_v26  ;;  %v2784_v3 = vpop.f32.mrf.mxu2  ;;  %vm3109_vm3 = vmor %vm3107_vm2, %vm3108_vm1  ;;  %vm3112_vm4 = vcmp.eq.f32.partialorder %v3111_v44, 8.507059e+37  ;;  %v3091_v10 = vmul.f32 %v3090_v25, %v11730_v55  ;;  %v9313_v23 = vor.u32 %v10743_v46, %v9312_v14  ;;  %v10736_v25 = vld [vmem:[#allocation14 + $0x718] sm:$0xf0] }
 0x28a   :  { %v3104_v33 = vsub.f32 1.0, %v3103_v39  ;;  %v3123_v56 = vmul.f32 %v3122_v54, %v11826_v7  ;;  %v3134_v9 = vmul.f32 %v3133_v22, %v11826_v7  ;;  %v9285_v44 = vor.u32 %v10736_v25, %v9284_v42  ;;  %v8474_v25 = vld [vmem:[#allocation14 + $0xc4] sm:$0xf0] }
 0x28b   :  { %6238 = vmatpush.bf16.msrb.mxu2 %v9453_v58  ;;  %6215 = vmatpush.bf16.msrb.mxu0 %v8921_v53  ;;  %v10757_v53 = vld [vmem:[#allocation14 + $0x7c0] sm:$0xf0] }
 0x28c   :  { %6227 = vmatpush.bf16.msrb.mxu1 %v9173_v27  ;;  %v3105_v35 = vmul.f32 %v10992_v40, %v3104_v33  ;;  %6206 = vmatmul.bf16.vlgmr.msra.gmra.mxu3 %v11833_v2  ;;  %v9369_v13 = vor.u32 %v10757_v53, %v9368_v52  ;;  %v3124_v1 = vadd.f32 0.0036580483, %v3123_v56  ;;  %v3135_v21 = vadd.f32 0.014752088, %v3134_v9  ;;  %v2799_v17 = vpop.f32.mrf.mxu3  ;;  %v10558_v33 = vld [vmem:[#allocation14 + $0x18c] sm:$0xf] }
 0x28d   :  { %v8558_v56 = vld [vmem:[#allocation14 + $0x16c] sm:$0xf0]  ;;  %v9620_v17 = vld [vmem:[#allocation14 + $0x9a0] sm:$0xf] }
 0x28e   :  { %v3106_v58 = vadd.f32 %v10992_v40, %v3105_v35  ;;  %v3125_v19 = vmul.f32 %v3124_v1, %v11826_v7  ;;  %v3136_v60 = vmul.f32 %v3135_v21, %v11826_v7 }
 0x28f   :  { %6239 = vmatpush.bf16.msrb.mxu2 %v9425_v12  ;;  %6216 = vmatpush.bf16.msrb.mxu0 %v8893_v15  ;;  %v9088_v15 = vld [vmem:[#allocation14 + $0x578] sm:$0xf]  ;;  %v1283_v12 = vperm.slane %v1267_v59, 0  ;;  %v10551_v59 = vld [vmem:[#allocation14 + $0x154] sm:$0xf] }
 0x290   :  { %6228 = vmatpush.bf16.msrb.mxu1 %v9145_v47  ;;  %v3110_v0 = vsel %vm3109_vm3, %v10992_v40, %v3106_v58  ;;  %v9089_v37 = vor.u32 %v10687_v20, %v9088_v15  ;;  %v3137_v27 = vadd.f32 0.112945676, %v3136_v60  ;;  %v3126_v31 = vadd.f32 0.05243302, %v3125_v19  ;;  %v9060_v40 = vld [vmem:[#allocation14 + $0x540] sm:$0xf] }
 0x291   :  { %v3115_v16 = vsel %vm3112_vm4, %v3114_v32, %v3110_v0  ;;  %v2785_v43 = vadd.f32 %v2784_v3, %v1283_v12  ;;  %v2823_v26 = vpop.f32.mrf.mxu1  ;;  %v2786_v39 = vpop.f32.mrf.mxu2  ;;  %v10841_v47 = vld [vmem:[#allocation14 + $0xa60] sm:$0xf0]  ;;  %v8561_v9 = vor.u32 %v10551_v59, %v8558_v56  ;;  %v10827_v32 = vld [vmem:[#allocation14 + $0x9f0] sm:$0xf0]  ;;  %v8530_v0 = vld [vmem:[#allocation14 + $0x134] sm:$0xf0] }
 0x292   :  { %v3116_v34 = vmul.f32 %v3115_v16, %v3091_v10  ;;  %v9705_v5 = vor.u32 %v10841_v47, %v9704_v28  ;;  %v3127_v35 = vmul.f32 %v3126_v31, %v11826_v7  ;;  %v10544_v10 = vld [vmem:[#allocation14 + $0x11c] sm:$0xf] }
 0x293   :  { %6240 = vmatpush.bf16.msrb.mxu2 %v9397_v38  ;;  %6217 = vmatpush.bf16.msrb.mxu0 %v8865_v36  ;;  %v10680_v36 = vld [vmem:[#allocation14 + $0x558] sm:$0xf0]  ;;  %v3138_v38 = vmul.f32 %v3137_v27, %v11826_v7  ;;  %v2798_v45 = vadd.f32 %v11829_v11, %v2785_v43  ;;  %v8533_v21 = vor.u32 %v10544_v10, %v8530_v0  ;;  %v8418_v10 = vld [vmem:[#allocation14 + $0x54] sm:$0xf0] }
 0x294   :  { %6229 = vmatpush.bf16.msrb.mxu1 %v9117_v4  ;;  %v8380_v55 = vclamps-f32 %v3116_v34, 1.0  ;;  %v9061_v63 = vor.u32 %v10680_v36, %v9060_v40  ;;  %6250 = vmatpush.bf16.msrb.mxu3 %v9705_v5  ;;  %v3128_v3 = vadd.f32 0.18741608, %v3127_v35  ;;  %v10820_v20 = vld [vmem:[#allocation14 + $0x9b8] sm:$0xf0] }
 0x295   :  { %v3139_v50 = vadd.f32 0.4994258, %v3138_v38  ;;  %v10537_v34 = vld [vmem:[#allocation14 + $0xe4] sm:$0xf]  ;;  %v9621_v60 = vor.u32 %v10820_v20, %v9620_v17  ;;  %v10530_v38 = vld [vmem:[#allocation14 + $0xac] sm:$0xf] }
 0x296   :  { %v3321_v51 = vadd.f32 1.0, %v8380_v55  ;;  %v3129_v15 = vmul.f32 %v3128_v3, %v11826_v7  ;;  %v8477_v28 = vor.u32 %v10530_v38, %v8474_v25  ;;  %v9564_v5 = vld [vmem:[#allocation14 + $0x930] sm:$0xf]  ;;  %v2986_v17 = vmul.f32 0.5, %v11816_v29  ;;  %v10614_v38 = vld [vmem:[#allocation14 + $0x34c] sm:$0xf] }
 0x297   :  { %6241 = vmatpush.bf16.msrb.mxu2 %v9369_v13  ;;  %6218 = vmatpush.bf16.msrb.mxu0 %v8837_v49  ;;  %v8586_v49 = vld [vmem:[#allocation14 + $0x1a4] sm:$0xf0]  ;;  %v3140_v54 = vmul.f32 %v3139_v50, %v11826_v7  ;;  %v2810_v22 = vpop.f32.mrf.mxu0  ;;  %v9676_v13 = vld [vmem:[#allocation14 + $0xa10] sm:$0xf] }
 0x298   :  { %6230 = vmatpush.bf16.msrb.mxu1 %v9089_v37  ;;  %v3329_v48 = vmul.f32 %v3321_v51, %v2985_v30  ;;  %v8589_v52 = vor.u32 %v10558_v33, %v8586_v49  ;;  %v2811_v58 = vadd.f32 %v2810_v22, %v2798_v45  ;;  %v9677_v11 = vor.u32 %v10834_v24, %v9676_v13  ;;  %v8502_v37 = vld [vmem:[#allocation14 + $0xfc] sm:$0xf0]  ;;  %v9592_v30 = vld [vmem:[#allocation14 + $0x968] sm:$0xf]  ;;  %v10813_v51 = vld [vmem:[#allocation14 + $0x980] sm:$0xf0] }
 0x299   :  { %v11854_v41 = vadd.f32 1.0, %v3140_v54  ;;  %v2825_v4 = vpop.f32.mrf.mxu1  ;;  %v3130_v55 = vadd.f32 1.1283791, %v3129_v15  ;;  %v9593_v42 = vor.u32 %v10813_v51, %v9592_v30  ;;  %v10806_v49 = vld [vmem:[#allocation14 + $0x948] sm:$0xf0] }
 0x29a   :  { %v11850_v53 = vpack.c.bf16 %v3329_v48, %v3329_v48  ;;  %6251 = vmatpush.bf16.msrb.mxu3 %v9677_v11  ;;  %v11858_v6 = vadd.f32 %v2823_v26, %v2811_v58  ;;  %v10523_v45 = vld [vmem:[#allocation14 + $0x74] sm:$0xf]  ;;  %v9565_v54 = vor.u32 %v10806_v49, %v9564_v5  ;;  %v8446_v22 = vld [vmem:[#allocation14 + $0x8c] sm:$0xf0]  ;;  %v10897_v30 = vld [vmem:[#allocation14 + $0xc20] sm:$0xf0] }
 0x29b   :  { %6242 = vmatpush.bf16.msrb.mxu2 %v9341_v57  ;;  %10993 = vrcp.f32 %v11854_v41  ;;  %v9649_v57 = vor.u32 %v10827_v32, %v9648_v8  ;;  %v3151_v7 = vand.u32 2147483647, %v11854_v41  ;;  %v3153_v43 = vand.u32 2147483648, %v11854_v41  ;;  %v10799_v8 = vld [vmem:[#allocation14 + $0x910] sm:$0xf0] }
 0x29c   :  { %6231 = vmatpush.bf16.msrb.mxu1 %v9061_v63  ;;  %6219 = vmatmul.bf16.vlgmr.msrb.gmra.mxu0 %v11850_v53  ;;  %v11861_v1 = vmul.f32 0.70710677, %v11858_v6  ;;  %vm3147_vm6 = vweird.f32 %v11854_v41  ;;  %v10516_v32 = vld [vmem:[#allocation14 + $0x3c] sm:$0xf]  ;;  %v8782_v5 = vld [vmem:[#allocation14 + $0x32c] sm:$0xf0] }
 0x29d   :  { %vm3152_vm8 = vcmp.eq.f32.partialorder %v3151_v7, 8.507059e+37  ;;  %v3154_v35 = vor.u32 1.1754944e-38, %v3153_v43  ;;  %v8421_v15 = vor.u32 %v10516_v32, %v8418_v10  ;;  %v8390_v7 = vld [vmem:[#allocation14 + $0x1c] sm:$0xf0] }
 0x29e   :  { %6252 = vmatpush.bf16.msrb.mxu3 %v9649_v57  ;;  %v3159_v16 = vmul.f32 %v11861_v1, %v11861_v1 }
 0x29f   :  { %6243 = vmatpush.bf16.msrb.mxu2 %v9313_v23  ;;  %v2812_v12 = vpop.f32.mrf.mxu0  ;;  %v8505_v23 = vor.u32 %v10537_v34, %v8502_v37  ;;  %v9508_v37 = vld [vmem:[#allocation14 + $0x8c0] sm:$0xf] }
 0x2a0   :  { %v11867_v46 = vmin.f32 %v3159_v16, 16.0 }
 0x2a1   :  { %v10994_v19 = vpop.eup %10993 }
 0x2a2   :  { %v3143_v14 = vmul.f32 %v10994_v19, %v11854_v41  ;;  %6253 = vmatpush.bf16.msrb.mxu3 %v9621_v60  ;;  %v3161_v40 = vmul.f32 2.1237322e-06, %v11867_v46  ;;  %v3172_v36 = vmul.f32 3.8918573e-05, %v11867_v46  ;;  %vm3148_vm5 = vweird.f32 %v10994_v19 }
 0x2a3   :  { %6244 = vmatpush.bf16.msrb.mxu2 %v9285_v44  ;;  %v1268_v44 = vperm.slane %v11831_v61, 2  ;;  %vm3149_vm7 = vmor %vm3147_vm6, %vm3148_vm5  ;;  %v8449_v41 = vor.u32 %v10523_v45, %v8446_v22  ;;  %v10883_v22 = vld [vmem:[#allocation14 + $0xbb0] sm:$0xf0] }
 0x2a4   :  { %v11870_v27 = vpop.f32.mrf.mxu3  ;;  %v3144_v31 = vsub.f32 1.0, %v3143_v14  ;;  %v3162_v39 = vadd.f32 0.00028619796, %v3161_v40  ;;  %v3173_v63 = vadd.f32 0.001143296, %v3172_v36 }
 0x2a5   :  { %v1284_v11 = vperm.slane %v1268_v44, 0  ;;  %v10792_v14 = vld [vmem:[#allocation14 + $0x8d8] sm:$0xf0] }
 0x2a6   :  { %v3145_v26 = vmul.f32 %v10994_v19, %v3144_v31  ;;  %v3163_v33 = vmul.f32 %v3162_v39, %v11867_v46  ;;  %v3174_v48 = vmul.f32 %v3173_v63, %v11867_v46  ;;  %6254 = vmatpush.bf16.msrb.mxu3 %v9593_v42  ;;  %v9928_v31 = vld [vmem:[#allocation14 + $0xc08] sm:$0xf] }
 0x2a7   :  { %6289 = vmatpush.bf16.msra.mxu2 %v8589_v52  ;;  %v3131_v52 = vmul.f32 %v3130_v55, %v11819_v18  ;;  %v9536_v18 = vld [vmem:[#allocation14 + $0x8f8] sm:$0xf]  ;;  %v10509_v55 = vld [vmem:[#allocation14 + $0x4] sm:$0xf]  ;;  %v9929_v29 = vor.u32 %v10897_v30, %v9928_v31  ;;  %v8698_v31 = vld [vmem:[#allocation14 + $0x284] sm:$0xf0] }
 0x2a8   :  { %v3146_v47 = vadd.f32 %v10994_v19, %v3145_v26  ;;  %v3164_v24 = vadd.f32 0.0036580483, %v3163_v33  ;;  %v3175_v59 = vadd.f32 0.014752088, %v3174_v48  ;;  %v9537_v57 = vor.u32 %v10799_v8, %v9536_v18  ;;  %v8810_v26 = vld [vmem:[#allocation14 + $0x364] sm:$0xf0] }
 0x2a9   :  { %v2836_v50 = vpop.f32.mrf.mxu2  ;;  %v8393_v36 = vor.u32 %v10509_v55, %v8390_v7  ;;  %v8813_v25 = vor.u32 %v10614_v38, %v8810_v26  ;;  %6263 = vmatpush.bf16.msra.mxu0 %v9929_v29  ;;  %v10607_v33 = vld [vmem:[#allocation14 + $0x314] sm:$0xf]  ;;  %v10593_v18 = vld [vmem:[#allocation14 + $0x2a4] sm:$0xf]  ;;  %v9788_v38 = vld [vmem:[#allocation14 + $0xaf0] sm:$0xf] }
 0x2aa   :  { %v3150_v13 = vsel %vm3149_vm7, %v10994_v19, %v3146_v47  ;;  %v3165_v3 = vmul.f32 %v3164_v24, %v11867_v46  ;;  %v3176_v4 = vmul.f32 %v3175_v59, %v11867_v46  ;;  %6255 = vmatpush.bf16.msrb.mxu3 %v9565_v54  ;;  %v2837_v12 = vadd.f32 %v2836_v50, %v1284_v11  ;;  %v10890_v47 = vld [vmem:[#allocation14 + $0xbe8] sm:$0xf0]  ;;  %v9872_v54 = vld [vmem:[#allocation14 + $0xb98] sm:$0xf]  ;;  %v10600_v24 = vld [vmem:[#allocation14 + $0x2dc] sm:$0xf] }
 0x2ab   :  { %6290 = vmatpush.bf16.msra.mxu2 %v8561_v9  ;;  %v3155_v58 = vsel %vm3152_vm8, %v3154_v35, %v3150_v13  ;;  %v8785_v49 = vor.u32 %v10607_v33, %v8782_v5  ;;  %v9873_v13 = vor.u32 %v10883_v22, %v9872_v54  ;;  %v8754_v59 = vld [vmem:[#allocation14 + $0x2f4] sm:$0xf0]  ;;  %v10862_v26 = vld [vmem:[#allocation14 + $0xb08] sm:$0xf0]  ;;  %v10855_v22 = vld [vmem:[#allocation14 + $0xad0] sm:$0xf0] }
 0x2ac   :  { %v2851_v56 = vpop.f32.mrf.mxu3  ;;  %v3156_v9 = vmul.f32 %v3155_v58, %v3131_v52  ;;  %v3166_v16 = vadd.f32 0.05243302, %v3165_v3  ;;  %v2850_v51 = vadd.f32 %v11870_v27, %v2837_v12  ;;  %v8757_v58 = vor.u32 %v10600_v24, %v8754_v59  ;;  %v9844_v3 = vld [vmem:[#allocation14 + $0xb60] sm:$0xf]  ;;  %v8642_v59 = vld [vmem:[#allocation14 + $0x214] sm:$0xf0] }
 0x2ae   :  { %v8381_v0 = vclamps-f32 %v3156_v9, 1.0  ;;  %6256 = vmatpush.bf16.msrb.mxu3 %v9537_v57  ;;  %v3167_v63 = vmul.f32 %v3166_v16, %v11867_v46  ;;  %v8726_v57 = vld [vmem:[#allocation14 + $0x2bc] sm:$0xf0] }
 0x2af   :  { %6291 = vmatpush.bf16.msra.mxu2 %v8533_v21  ;;  %v3177_v21 = vadd.f32 0.112945676, %v3176_v4  ;;  %v10876_v4 = vld [vmem:[#allocation14 + $0xb78] sm:$0xf0] }
 0x2b0   :  { %v3322_v20 = vadd.f32 1.0, %v8381_v0  ;;  %v3168_v45 = vadd.f32 0.18741608, %v3167_v63  ;;  %v9845_v32 = vor.u32 %v10876_v4, %v9844_v3  ;;  %v10579_v63 = vld [vmem:[#allocation14 + $0x234] sm:$0xf] }
 0x2b1   :  { %v3178_v34 = vmul.f32 %v3177_v21, %v11867_v46  ;;  %v2875_v19 = vpop.f32.mrf.mxu1  ;;  %v2838_v60 = vpop.f32.mrf.mxu2  ;;  %v8729_v21 = vor.u32 %v10593_v18, %v8726_v57  ;;  %v10782_v4 = vld [vmem:[#allocation14 + $0x88c] sm:$0xf]  ;;  %v9482_v18 = vld [vmem:[#allocation14 + $0x8a4] sm:$0xf0] }
 0x2b2   :  { %v3330_v43 = vmul.f32 %v3322_v20, %v2986_v17  ;;  %v3169_v11 = vmul.f32 %v3168_v45, %v11867_v46  ;;  %v10869_v60 = vld [vmem:[#allocation14 + $0xb40] sm:$0xf0] }
 0x2b3   :  { %6292 = vmatpush.bf16.msra.mxu2 %v8505_v23  ;;  %v9509_v23 = vor.u32 %v10792_v14, %v9508_v37  ;;  %v3179_v40 = vadd.f32 0.4994258, %v3178_v34  ;;  %v10586_v37 = vld [vmem:[#allocation14 + $0x26c] sm:$0xf] }
 0x2b4   :  { %v11886_v39 = vpack.c.bf16 %v3330_v43, %v3330_v43  ;;  %v1269_v43 = vperm.slane %v11831_v61, 4 }
 0x2b5   :  { %v3180_v42 = vmul.f32 %v3179_v40, %v11867_v46  ;;  %6257 = vmatpush.bf16.msrb.mxu3 %v9509_v23  ;;  %v8701_v40 = vor.u32 %v10586_v37, %v8698_v31 }
 0x2b6   :  { %6232 = vmatmul.bf16.vlgmr.msrb.gmra.mxu1 %v11886_v39  ;;  %v1285_v5 = vperm.slane %v1269_v43, 0 }
 0x2b7   :  { %6293 = vmatpush.bf16.msra.mxu2 %v8477_v28  ;;  %v2862_v44 = vpop.f32.mrf.mxu0  ;;  %v9900_v28 = vld [vmem:[#allocation14 + $0xbd0] sm:$0xf]  ;;  %v11890_v48 = vadd.f32 1.0, %v3180_v42 }
 0x2b8   :  { %v2863_v27 = vadd.f32 %v2862_v44, %v2850_v51  ;;  %v9901_v50 = vor.u32 %v10890_v47, %v9900_v28  ;;  %v9789_v44 = vor.u32 %v10862_v26, %v9788_v38  ;;  %v8670_v28 = vld [vmem:[#allocation14 + $0x24c] sm:$0xf0] }
 0x2b9   :  { %6302 = vmatpush.bf16.msra.mxu3 %v8813_v25  ;;  %10995 = vrcp.f32 %v11890_v48  ;;  %v2877_v52 = vpop.f32.mrf.mxu1  ;;  %v3191_v46 = vand.u32 2147483647, %v11890_v48  ;;  %v3193_v17 = vand.u32 2147483648, %v11890_v48  ;;  %vm3187_vm10 = vweird.f32 %v11890_v48  ;;  %v10124_v26 = vld [vmem:[#allocation14 + $0xd90] sm:$0xf] }
 0x2ba   :  { %v11894_v35 = vadd.f32 %v2875_v19, %v2863_v27  ;;  %6264 = vmatpush.bf16.msra.mxu0 %v9901_v50  ;;  %v9816_v19 = vld [vmem:[#allocation14 + $0xb28] sm:$0xf]  ;;  %v8673_v27 = vor.u32 %v10579_v63, %v8670_v28  ;;  %v10663_v28 = vld [vmem:[#allocation14 + $0x4d4] sm:$0xf] }
 0x2bb   :  { %6294 = vmatpush.bf16.msra.mxu2 %v8449_v41  ;;  %v9817_v7 = vor.u32 %v10869_v60, %v9816_v19  ;;  %vm3192_vm12 = vcmp.eq.f32.partialorder %v3191_v46, 8.507059e+37  ;;  %v3194_v25 = vor.u32 1.1754944e-38, %v3193_v17  ;;  %v10848_v46 = vld [vmem:[#allocation14 + $0xa98] sm:$0xf0]  ;;  %v10565_v17 = vld [vmem:[#allocation14 + $0x1c4] sm:$0xf] }
 0x2bc   :  { %v11897_v41 = vmul.f32 0.70710677, %v11894_v35 }
 0x2bd   :  { %6303 = vmatpush.bf16.msra.mxu3 %v8785_v49 }
 0x2be   :  { %v3199_v56 = vmul.f32 %v11897_v41, %v11897_v41  ;;  %6265 = vmatpush.bf16.msra.mxu0 %v9873_v13  ;;  %v10572_v13 = vld [vmem:[#allocation14 + $0x1fc] sm:$0xf] }
 0x2bf   :  { %6295 = vmatpush.bf16.msra.mxu2 %v8421_v15  ;;  %v2864_v9 = vpop.f32.mrf.mxu0  ;;  %v10996_v8 = vpop.eup %10995  ;;  %v3170_v15 = vadd.f32 1.1283791, %v3169_v11 }
 0x2c0   :  { %v3183_v10 = vmul.f32 %v10996_v8, %v11890_v48  ;;  %v11903_v0 = vmin.f32 %v3199_v56, 16.0  ;;  %vm3188_vm9 = vweird.f32 %v10996_v8  ;;  %v8645_v56 = vor.u32 %v10572_v13, %v8642_v59 }
 0x2c1   :  { %6304 = vmatpush.bf16.msra.mxu3 %v8757_v58  ;;  %v3171_v42 = vmul.f32 %v3170_v15, %v11861_v1  ;;  %vm3189_vm11 = vmor %vm3187_vm10, %vm3188_vm9  ;;  %v9760_v1 = vld [vmem:[#allocation14 + $0xab8] sm:$0xf]  ;;  %v9732_v15 = vld [vmem:[#allocation14 + $0xa80] sm:$0xf] }
 0x2c2   :  { %v3184_v12 = vsub.f32 1.0, %v3183_v10  ;;  %v3201_v20 = vmul.f32 2.1237322e-06, %v11903_v0  ;;  %v3212_v34 = vmul.f32 3.8918573e-05, %v11903_v0  ;;  %6266 = vmatpush.bf16.msra.mxu0 %v9845_v32  ;;  %v9761_v24 = vor.u32 %v10855_v22, %v9760_v1 }
 0x2c3   :  { %6296 = vmatpush.bf16.msra.mxu2 %v8393_v36 }
 0x2c4   :  { %v11906_v16 = vpop.f32.mrf.mxu3  ;;  %v3185_v14 = vmul.f32 %v10996_v8, %v3184_v12  ;;  %v3202_v23 = vadd.f32 0.00028619796, %v3201_v20  ;;  %v3213_v55 = vadd.f32 0.001143296, %v3212_v34  ;;  %v9733_v12 = vor.u32 %v10848_v46, %v9732_v15  ;;  %v8614_v20 = vld [vmem:[#allocation14 + $0x1dc] sm:$0xf0] }
 0x2c5   :  { %6305 = vmatpush.bf16.msra.mxu3 %v8729_v21  ;;  %v8617_v60 = vor.u32 %v10565_v17, %v8614_v20  ;;  %v10754_v46 = vld [vmem:[#allocation14 + $0x7ac] sm:$0xf] }
 0x2c6   :  { %v3186_v36 = vadd.f32 %v10996_v8, %v3185_v14  ;;  %v3203_v30 = vmul.f32 %v3202_v23, %v11903_v0  ;;  %v3214_v51 = vmul.f32 %v3213_v55, %v11903_v0  ;;  %6267 = vmatpush.bf16.msra.mxu0 %v9817_v7  ;;  %v9485_v14 = vor.u32 %v10782_v4, %v9482_v18  ;;  %v10152_v23 = vld [vmem:[#allocation14 + $0xdc8] sm:$0xf]  ;;  %v10670_v55 = vld [vmem:[#allocation14 + $0x50c] sm:$0xf]  ;;  %v10068_v4 = vld [vmem:[#allocation14 + $0xd20] sm:$0xf] }
 0x2c7   :  { %v10932_v18 = vld [vmem:[#allocation14 + $0xd38] sm:$0xf0] }
 0x2c8   :  { %v3190_v47 = vsel %vm3189_vm11, %v10996_v8, %v3186_v36  ;;  %v3204_v33 = vadd.f32 0.0036580483, %v3203_v30  ;;  %v3215_v48 = vadd.f32 0.014752088, %v3214_v51  ;;  %v2987_v8 = vmul.f32 0.5, %v11858_v6 }
 0x2c9   :  { %v2888_v29 = vpop.f32.mrf.mxu2  ;;  %6306 = vmatpush.bf16.msra.mxu3 %v8701_v40  ;;  %v3195_v50 = vsel %vm3192_vm12, %v3194_v25, %v3190_v47  ;;  %v10953_v6 = vld [vmem:[#allocation14 + $0xde0] sm:$0xf0]  ;;  %v10775_v40 = vld [vmem:[#allocation14 + $0x854] sm:$0xf]  ;;  %v9454_v36 = vld [vmem:[#allocation14 + $0x86c] sm:$0xf0] }
 0x2ca   :  { %v3196_v45 = vmul.f32 %v3195_v50, %v3171_v42  ;;  %v3205_v52 = vmul.f32 %v3204_v33, %v11903_v0  ;;  %v3216_v54 = vmul.f32 %v3215_v48, %v11903_v0  ;;  %6268 = vmatpush.bf16.msra.mxu0 %v9789_v44  ;;  %v2889_v3 = vadd.f32 %v2888_v29, %v1285_v5  ;;  %v9034_v51 = vld [vmem:[#allocation14 + $0x524] sm:$0xf0]  ;;  %v10946_v42 = vld [vmem:[#allocation14 + $0xda8] sm:$0xf0]  ;;  %v9006_v47 = vld [vmem:[#allocation14 + $0x4ec] sm:$0xf0] }
 0x2cb   :  { %v10153_v30 = vor.u32 %v10953_v6, %v10152_v23  ;;  %v9037_v38 = vor.u32 %v10670_v55, %v9034_v51  ;;  %v9457_v25 = vor.u32 %v10775_v40, %v9454_v36  ;;  %v10125_v44 = vor.u32 %v10946_v42, %v10124_v26  ;;  %v9426_v50 = vld [vmem:[#allocation14 + $0x834] sm:$0xf0]  ;;  %v10747_v6 = vld [vmem:[#allocation14 + $0x774] sm:$0xf]  ;;  %v9342_v55 = vld [vmem:[#allocation14 + $0x78c] sm:$0xf0] }
 0x2cc   :  { %v2903_v49 = vpop.f32.mrf.mxu3  ;;  %v8382_v58 = vclamps-f32 %v3196_v45, 1.0  ;;  %v3217_v11 = vadd.f32 0.112945676, %v3216_v54  ;;  %v3206_v9 = vadd.f32 0.05243302, %v3205_v52  ;;  %v2902_v37 = vadd.f32 %v11906_v16, %v2889_v3 }
 0x2cd   :  { %6307 = vmatpush.bf16.msra.mxu3 %v8673_v27  ;;  %6276 = vmatpush.bf16.msra.mxu1 %v10153_v30  ;;  %v10768_v27 = vld [vmem:[#allocation14 + $0x81c] sm:$0xf]  ;;  %v9009_v49 = vor.u32 %v10663_v28, %v9006_v47  ;;  %v10096_v45 = vld [vmem:[#allocation14 + $0xd58] sm:$0xf]  ;;  %v10939_v52 = vld [vmem:[#allocation14 + $0xd70] sm:$0xf0] }
 0x2ce   :  { %v3323_v32 = vadd.f32 1.0, %v8382_v58  ;;  %v3218_v57 = vmul.f32 %v3217_v11, %v11903_v0  ;;  %6269 = vmatpush.bf16.msra.mxu0 %v9761_v24  ;;  %v3207_v31 = vmul.f32 %v3206_v9, %v11903_v0  ;;  %v10656_v54 = vld [vmem:[#allocation14 + $0x49c] sm:$0xf]  ;;  %v9429_v22 = vor.u32 %v10768_v27, %v9426_v50  ;;  %v8978_v24 = vld [vmem:[#allocation14 + $0x4b4] sm:$0xf0] }
 0x2cf   :  { %v10097_v13 = vor.u32 %v10939_v52, %v10096_v45  ;;  %v10761_v58 = vld [vmem:[#allocation14 + $0x7e4] sm:$0xf]  ;;  %v9398_v11 = vld [vmem:[#allocation14 + $0x7fc] sm:$0xf0]  ;;  %v10642_v36 = vld [vmem:[#allocation14 + $0x42c] sm:$0xf] }
 0x2d0   :  { %v3331_v34 = vmul.f32 %v3323_v32, %v2987_v8  ;;  %v3219_v19 = vadd.f32 0.4994258, %v3218_v57  ;;  %v3208_v33 = vadd.f32 0.18741608, %v3207_v31  ;;  %v10069_v32 = vor.u32 %v10932_v18, %v10068_v4  ;;  %v10649_v57 = vld [vmem:[#allocation14 + $0x464] sm:$0xf] }
 0x2d1   :  { %v2927_v10 = vpop.f32.mrf.mxu1  ;;  %v2890_v21 = vpop.f32.mrf.mxu2  ;;  %6308 = vmatpush.bf16.msra.mxu3 %v8645_v56  ;;  %6277 = vmatpush.bf16.msra.mxu1 %v10125_v44  ;;  %v8981_v56 = vor.u32 %v10656_v54, %v8978_v24  ;;  %v10925_v40 = vld [vmem:[#allocation14 + $0xd00] sm:$0xf0]  ;;  %v8922_v26 = vld [vmem:[#allocation14 + $0x444] sm:$0xf0]  ;;  %v1270_v42 = vperm.slane %v11831_v61, 6 }
 0x2d2   :  { %v11922_v7 = vpack.c.bf16 %v3331_v34, %v3331_v34  ;;  %v3220_v43 = vmul.f32 %v3219_v19, %v11903_v0  ;;  %6270 = vmatpush.bf16.msra.mxu0 %v9733_v12  ;;  %v3209_v59 = vmul.f32 %v3208_v33, %v11903_v0  ;;  %v9401_v0 = vor.u32 %v10761_v58, %v9398_v11  ;;  %v9370_v12 = vld [vmem:[#allocation14 + $0x7c4] sm:$0xf0]  ;;  %v10918_v61 = vld [vmem:[#allocation14 + $0xcc8] sm:$0xf0]  ;;  %v10635_v45 = vld [vmem:[#allocation14 + $0x3f4] sm:$0xf] }
 0x2d3   :  { %v9373_v31 = vor.u32 %v10754_v46, %v9370_v12  ;;  %v8894_v52 = vld [vmem:[#allocation14 + $0x40c] sm:$0xf0]  ;;  %v1286_v58 = vperm.slane %v1270_v42, 0  ;;  %v10740_v11 = vld [vmem:[#allocation14 + $0x73c] sm:$0xf] }
 0x2d4   :  { %v11926_v16 = vadd.f32 1.0, %v3220_v43  ;;  %6245 = vmatmul.bf16.vlgmr.msrb.gmra.mxu2 %v11922_v7  ;;  %v3210_v20 = vadd.f32 1.1283791, %v3209_v59  ;;  %v10040_v43 = vld [vmem:[#allocation14 + $0xce8] sm:$0xf] }
 0x2d5   :  { %6309 = vmatpush.bf16.msra.mxu3 %v8617_v60  ;;  %6341 = vmatpush.bf16.msrb.mxu2 %v9485_v14  ;;  %v8866_v46 = vld [vmem:[#allocation14 + $0x3d4] sm:$0xf0] }
 0x2d6   :  { %6315 = vmatpush.bf16.msrb.mxu0 %v9037_v38  ;;  %10997 = vrcp.f32 %v11926_v16  ;;  %6278 = vmatpush.bf16.msra.mxu1 %v10097_v13  ;;  %v3231_v34 = vand.u32 2147483647, %v11926_v16  ;;  %v10041_v38 = vor.u32 %v10925_v40, %v10040_v43  ;;  %vm3227_vm14 = vweird.f32 %v11926_v16 }
 0x2d7   :  { %v2914_v29 = vpop.f32.mrf.mxu0  ;;  %v3211_v50 = vmul.f32 %v3210_v20, %v11897_v41 }
 0x2d8   :  { %v2915_v63 = vadd.f32 %v2914_v29, %v2902_v37  ;;  %v3233_v37 = vand.u32 2147483648, %v11926_v16  ;;  %vm11948_vm15 = vcmp.eq.f32.partialorder %v3231_v34, 8.507059e+37  ;;  %v10838_v34 = vld [vmem:[#allocation14 + $0xa4c] sm:$0xf] }
 0x2d9   :  { %v2929_v48 = vpop.f32.mrf.mxu1  ;;  %6342 = vmatpush.bf16.msrb.mxu2 %v9457_v25  ;;  %v8925_v25 = vor.u32 %v10642_v36, %v8922_v26  ;;  %v8838_v26 = vld [vmem:[#allocation14 + $0x39c] sm:$0xf0] }
 0x2da   :  { %v11930_v5 = vadd.f32 %v2927_v10, %v2915_v63  ;;  %6316 = vmatpush.bf16.msrb.mxu0 %v9009_v49  ;;  %v8950_v10 = vld [vmem:[#allocation14 + $0x47c] sm:$0xf0]  ;;  %6279 = vmatpush.bf16.msra.mxu1 %v10069_v32  ;;  %v3234_v47 = vor.u32 1.1754944e-38, %v3233_v37  ;;  %v9345_v49 = vor.u32 %v10747_v6, %v9342_v55  ;;  %v9984_v32 = vld [vmem:[#allocation14 + $0xc78] sm:$0xf]  ;;  %v2988_v55 = vmul.f32 0.5, %v11894_v35 }
 0x2db   :  { %v8953_v17 = vor.u32 %v10649_v57, %v8950_v10  ;;  %v10733_v57 = vld [vmem:[#allocation14 + $0x704] sm:$0xf]  ;;  %v9286_v10 = vld [vmem:[#allocation14 + $0x71c] sm:$0xf0]  ;;  %v10562_v6 = vld [vmem:[#allocation14 + $0x1a8] sm:$0xf0] }
 0x2dc   :  { %v11933_v1 = vmul.f32 0.70710677, %v11930_v5  ;;  %v10998_v8 = vpop.eup %10997 }
 0x2dd   :  { %v3223_v21 = vmul.f32 %v10998_v8, %v11926_v16  ;;  %6343 = vmatpush.bf16.msrb.mxu2 %v9429_v22  ;;  %vm3228_vm13 = vweird.f32 %v10998_v8  ;;  %v10012_v16 = vld [vmem:[#allocation14 + $0xcb0] sm:$0xf] }
 0x2de   :  { %v3239_v9 = vmul.f32 %v11933_v1, %v11933_v1  ;;  %6317 = vmatpush.bf16.msrb.mxu0 %v8981_v56  ;;  %vm11954_vm0 = vmor %vm3227_vm14, %vm3228_vm13  ;;  %6280 = vmatpush.bf16.msra.mxu1 %v10041_v38  ;;  %v10013_v24 = vor.u32 %v10918_v61, %v10012_v16  ;;  %v9314_v56 = vld [vmem:[#allocation14 + $0x754] sm:$0xf0]  ;;  %v10621_v38 = vld [vmem:[#allocation14 + $0x384] sm:$0xf] }
 0x2df   :  { %v2916_v3 = vpop.f32.mrf.mxu0  ;;  %v3224_v60 = vsub.f32 1.0, %v3223_v21  ;;  %v9317_v20 = vor.u32 %v10740_v11, %v9314_v56  ;;  %v10555_v61 = vld [vmem:[#allocation14 + $0x170] sm:$0xf0]  ;;  %v9650_v11 = vld [vmem:[#allocation14 + $0x9f4] sm:$0xf0] }
 0x2e0   :  { %v11939_v15 = vmin.f32 %v3239_v9, 16.0  ;;  %v8897_v9 = vor.u32 %v10635_v45, %v8894_v52  ;;  %v8841_v45 = vor.u32 %v10621_v38, %v8838_v26  ;;  %v10726_v52 = vld [vmem:[#allocation14 + $0x6cc] sm:$0xf]  ;;  %v10719_v56 = vld [vmem:[#allocation14 + $0x694] sm:$0xf] }
 0x2e1   :  { %v3225_v30 = vmul.f32 %v10998_v8, %v3224_v60  ;;  %6344 = vmatpush.bf16.msrb.mxu2 %v9401_v0  ;;  %v10628_v0 = vld [vmem:[#allocation14 + $0x3bc] sm:$0xf]  ;;  %v8480_v38 = vld [vmem:[#allocation14 + $0xb0] sm:$0xf]  ;;  %v10534_v26 = vld [vmem:[#allocation14 + $0xc8] sm:$0xf0] }
 0x2e2   :  { %v3241_v14 = vmul.f32 2.1237322e-06, %v11939_v15  ;;  %v3252_v23 = vmul.f32 3.8918573e-05, %v11939_v15  ;;  %6318 = vmatpush.bf16.msrb.mxu0 %v8953_v17  ;;  %6281 = vmatpush.bf16.msra.mxu1 %v10013_v24  ;;  %v8869_v60 = vor.u32 %v10628_v0, %v8866_v46 }
 0x2e3   :  { %v3226_v44 = vadd.f32 %v10998_v8, %v3225_v30 }
 0x2e4   :  { %v11942_v19 = vpop.f32.mrf.mxu3  ;;  %v3242_v51 = vadd.f32 0.00028619796, %v3241_v14  ;;  %v3253_v29 = vadd.f32 0.001143296, %v3252_v23  ;;  %6297 = vmatmul.bf16.vlgmr.msra.gmra.mxu2 %v11796_v62  ;;  %v9706_v14 = vld [vmem:[#allocation14 + $0xa64] sm:$0xf0] }
 0x2e5   :  { %v3230_v54 = vsel %vm11954_vm0, %v10998_v8, %v3226_v44  ;;  %6345 = vmatpush.bf16.msrb.mxu2 %v9373_v31  ;;  %v10911_v8 = vld [vmem:[#allocation14 + $0xc90] sm:$0xf0]  ;;  %v8592_v23 = vld [vmem:[#allocation14 + $0x190] sm:$0xf]  ;;  %v9709_v35 = vor.u32 %v10838_v34, %v9706_v14  ;;  %v8508_v34 = vld [vmem:[#allocation14 + $0xe8] sm:$0xf] }
 0x2e6   :  { %v3243_v33 = vmul.f32 %v3242_v51, %v11939_v15  ;;  %v3254_v48 = vmul.f32 %v3253_v29, %v11939_v15  ;;  %6319 = vmatpush.bf16.msrb.mxu0 %v8925_v25  ;;  %v3235_v59 = vsel %vm11948_vm15, %v3234_v47, %v3230_v54  ;;  %v9985_v21 = vor.u32 %v10911_v8, %v9984_v32  ;;  %v9956_v51 = vld [vmem:[#allocation14 + $0xc40] sm:$0xf]  ;;  %v10904_v29 = vld [vmem:[#allocation14 + $0xc58] sm:$0xf0]  ;;  %v9258_v54 = vld [vmem:[#allocation14 + $0x6e4] sm:$0xf0] }
 0x2e7   :  { %v3236_v3 = vmul.f32 %v3235_v59, %v3211_v50  ;;  %v9289_v25 = vor.u32 %v10733_v57, %v9286_v10  ;;  %v9957_v44 = vor.u32 %v10904_v29, %v9956_v51  ;;  %v8593_v47 = vor.u32 %v10562_v6, %v8592_v23  ;;  %v10824_v59 = vld [vmem:[#allocation14 + $0x9dc] sm:$0xf]  ;;  %v10817_v10 = vld [vmem:[#allocation14 + $0x9a4] sm:$0xf]  ;;  %v10810_v6 = vld [vmem:[#allocation14 + $0x96c] sm:$0xf] }
 0x2e8   :  { %v3244_v22 = vadd.f32 0.0036580483, %v3243_v33  ;;  %v3255_v13 = vadd.f32 0.014752088, %v3254_v48  ;;  %6282 = vmatpush.bf16.msra.mxu1 %v9985_v21  ;;  %v10831_v33 = vld [vmem:[#allocation14 + $0xa14] sm:$0xf]  ;;  %v9653_v0 = vor.u32 %v10824_v59, %v9650_v11 }
 0x2e9   :  { %v2940_v27 = vpop.f32.mrf.mxu2  ;;  %v8383_v12 = vclamps-f32 %v3236_v3, 1.0  ;;  %6346 = vmatpush.bf16.msrb.mxu2 %v9345_v49  ;;  %v9678_v48 = vld [vmem:[#allocation14 + $0xa2c] sm:$0xf0]  ;;  %v10548_v32 = vld [vmem:[#allocation14 + $0x138] sm:$0xf0] }
 0x2ea   :  { %v3245_v4 = vmul.f32 %v3244_v22, %v11939_v15  ;;  %v3256_v18 = vmul.f32 %v3255_v13, %v11939_v15  ;;  %6320 = vmatpush.bf16.msrb.mxu0 %v8897_v9  ;;  %v2941_v37 = vadd.f32 %v2940_v27, %v1286_v58  ;;  %v8564_v27 = vld [vmem:[#allocation14 + $0x158] sm:$0xf]  ;;  %v9261_v13 = vor.u32 %v10726_v52, %v9258_v54  ;;  %v9230_v9 = vld [vmem:[#allocation14 + $0x6ac] sm:$0xf0]  ;;  %v10698_v52 = vld [vmem:[#allocation14 + $0x5ec] sm:$0xf] }
 0x2eb   :  { %v3324_v31 = vadd.f32 1.0, %v8383_v12  ;;  %v9681_v58 = vor.u32 %v10831_v33, %v9678_v48  ;;  %v9233_v57 = vor.u32 %v10719_v56, %v9230_v9  ;;  %v9622_v12 = vld [vmem:[#allocation14 + $0x9bc] sm:$0xf0]  ;;  %v9566_v33 = vld [vmem:[#allocation14 + $0x94c] sm:$0xf0] }
 0x2ec   :  { %v2955_v41 = vpop.f32.mrf.mxu3  ;;  %v3257_v17 = vadd.f32 0.112945676, %v3256_v18  ;;  %v3246_v43 = vadd.f32 0.05243302, %v3245_v4  ;;  %v2954_v28 = vadd.f32 %v11942_v19, %v2941_v37  ;;  %6283 = vmatpush.bf16.msra.mxu1 %v9957_v44  ;;  %v8536_v18 = vld [vmem:[#allocation14 + $0x120] sm:$0xf] }
 0x2ed   :  { %v3332_v63 = vmul.f32 %v3324_v31, %v2988_v55  ;;  %6347 = vmatpush.bf16.msrb.mxu2 %v9317_v20  ;;  %v8565_v41 = vor.u32 %v10555_v61, %v8564_v27  ;;  %v8537_v46 = vor.u32 %v10548_v32, %v8536_v18  ;;  %v9202_v37 = vld [vmem:[#allocation14 + $0x674] sm:$0xf0]  ;;  %v10527_v27 = vld [vmem:[#allocation14 + $0x90] sm:$0xf0] }
 0x2ee   :  { %v3258_v40 = vmul.f32 %v3257_v17, %v11939_v15  ;;  %6321 = vmatpush.bf16.msrb.mxu0 %v8869_v60  ;;  %v3247_v50 = vmul.f32 %v3246_v43, %v11939_v15  ;;  %v10712_v17 = vld [vmem:[#allocation14 + $0x65c] sm:$0xf]  ;;  %v10541_v60 = vld [vmem:[#allocation14 + $0x100] sm:$0xf0]  ;;  %v9594_v43 = vld [vmem:[#allocation14 + $0x984] sm:$0xf0] }
 0x2ef   :  { %v11971_v16 = vpack.c.bf16 %v3332_v63, %v3332_v63  ;;  %v9205_v55 = vor.u32 %v10712_v17, %v9202_v37  ;;  %v8509_v29 = vor.u32 %v10541_v60, %v8508_v34  ;;  %v8452_v48 = vld [vmem:[#allocation14 + $0x78] sm:$0xf]  ;;  %v9597_v61 = vor.u32 %v10810_v6, %v9594_v43  ;;  %v8424_v60 = vld [vmem:[#allocation14 + $0x40] sm:$0xf]  ;;  %v10520_v37 = vld [vmem:[#allocation14 + $0x58] sm:$0xf0] }
 0x2f0   :  { %v3259_v42 = vadd.f32 0.4994258, %v3258_v40  ;;  %v3248_v3 = vadd.f32 0.18741608, %v3247_v50  ;;  %6328 = vmatpush.bf16.msrb.mxu1 %v9261_v13  ;;  %v10705_v40 = vld [vmem:[#allocation14 + $0x624] sm:$0xf]  ;;  %v8453_v32 = vor.u32 %v10527_v27, %v8452_v48 }
 0x2f1   :  { %v2979_v36 = vpop.f32.mrf.mxu1  ;;  %v2942_v30 = vpop.f32.mrf.mxu2  ;;  %6348 = vmatpush.bf16.msrb.mxu2 %v9289_v25  ;;  %6258 = vmatmul.bf16.vlgmr.msrb.gmra.mxu3 %v11971_v16  ;;  %v9538_v17 = vld [vmem:[#allocation14 + $0x914] sm:$0xf0]  ;;  %v10789_v43 = vld [vmem:[#allocation14 + $0x8c4] sm:$0xf]  ;;  %v8816_v48 = vld [vmem:[#allocation14 + $0x350] sm:$0xf] }
 0x2f2   :  { %v3260_v49 = vmul.f32 %v3259_v42, %v11939_v15  ;;  %6354 = vmatpush.bf16.msrb.mxu3 %v9709_v35  ;;  %6322 = vmatpush.bf16.msrb.mxu0 %v8841_v45  ;;  %v3249_v20 = vmul.f32 %v3248_v3, %v11939_v15  ;;  %v9625_v15 = vor.u32 %v10817_v10, %v9622_v12  ;;  %v3855_v42 = vld [vmem:[#allocation16] sm:$0x7f]  ;;  %v10691_v10 = vld [vmem:[#allocation14 + $0x5b4] sm:$0xf]  ;;  %v10618_v27 = vld [vmem:[#allocation14 + $0x368] sm:$0xf0] }
 0x2f3   :  { %v8481_v45 = vor.u32 %v10534_v26, %v8480_v38  ;;  %v11995_v59 = vunpack.c.l.bf16 %v3855_v42  ;;  %v8425_v38 = vor.u32 %v10520_v37, %v8424_v60  ;;  %v8396_v26 = vld [vmem:[#allocation14 + $0x8] sm:$0xf]  ;;  %v10513_v42 = vld [vmem:[#allocation14 + $0x20] sm:$0xf0] }
 0x2f4   :  { %v11975_v24 = vadd.f32 1.0, %v3260_v49  ;;  %6349 = vmatmul.bf16.vlgmr.msrb.gmra.mxu2 %v11922_v7  ;;  %6329 = vmatpush.bf16.msrb.mxu1 %v9233_v57  ;;  %v3250_v63 = vadd.f32 1.1283791, %v3249_v20  ;;  %v10796_v57 = vld [vmem:[#allocation14 + $0x8fc] sm:$0xf] }
 0x2f5   :  { %6393 = vmatpush.bf16.msra.mxu2 %v8593_v47  ;;  %v10803_v47 = vld [vmem:[#allocation14 + $0x934] sm:$0xf] }
 0x2f6   :  { %10999 = vrcp.f32 %v11975_v24  ;;  %6355 = vmatpush.bf16.msrb.mxu3 %v9681_v58  ;;  %v3271_v50 = vand.u32 2147483647, %v11975_v24  ;;  %v3273_v49 = vand.u32 2147483648, %v11975_v24  ;;  %vm3267_vm2 = vweird.f32 %v11975_v24 }
 0x2f7   :  { %v2966_v22 = vpop.f32.mrf.mxu0  ;;  %v9569_v18 = vor.u32 %v10803_v47, %v9566_v33 }
 0x2f8   :  { %v2967_v19 = vadd.f32 %v2966_v22, %v2954_v28  ;;  %6330 = vmatpush.bf16.msrb.mxu1 %v9205_v55  ;;  %vm3272_vm4 = vcmp.eq.f32.partialorder %v3271_v50, 8.507059e+37  ;;  %v9488_v50 = vld [vmem:[#allocation14 + $0x890] sm:$0xf] }
 0x2f9   :  { %v2981_v4 = vpop.f32.mrf.mxu1  ;;  %6394 = vmatpush.bf16.msra.mxu2 %v8565_v41 }
 0x2fa   :  { %v11979_v8 = vadd.f32 %v2979_v36, %v2967_v19  ;;  %v9174_v36 = vld [vmem:[#allocation14 + $0x63c] sm:$0xf0]  ;;  %6356 = vmatpush.bf16.msrb.mxu3 %v9653_v0  ;;  %v9146_v19 = vld [vmem:[#allocation14 + $0x604] sm:$0xf0]  ;;  %v3274_v4 = vor.u32 1.1754944e-38, %v3273_v49 }
 0x2fb   :  { %v9177_v25 = vor.u32 %v10705_v40, %v9174_v36  ;;  %v9149_v58 = vor.u32 %v10698_v52, %v9146_v19  ;;  %v9118_v0 = vld [vmem:[#allocation14 + $0x5cc] sm:$0xf0]  ;;  %v10684_v40 = vld [vmem:[#allocation14 + $0x57c] sm:$0xf]  ;;  %v9090_v36 = vld [vmem:[#allocation14 + $0x594] sm:$0xf0]  ;;  %v8817_v19 = vor.u32 %v10618_v27, %v8816_v48 }
 0x2fc   :  { %v11983_v21 = vmul.f32 0.70710677, %v11979_v8  ;;  %v11000_v31 = vpop.eup %10999  ;;  %v10786_v49 = vld [vmem:[#allocation14 + $0x8a8] sm:$0xf0] }
 0x2fd   :  { %v3263_v30 = vmul.f32 %v11000_v31, %v11975_v24  ;;  %6395 = vmatpush.bf16.msra.mxu2 %v8537_v46  ;;  %vm3268_vm1 = vweird.f32 %v11000_v31  ;;  %6331 = vmatpush.bf16.msrb.mxu1 %v9177_v25  ;;  %v3251_v24 = vmul.f32 %v3250_v63, %v11933_v1  ;;  %v3860_v1 = vperm.slane %v11995_v59, 0  ;;  %v9930_v25 = vld [vmem:[#allocation14 + $0xc24] sm:$0xf0]  ;;  %v10590_v48 = vld [vmem:[#allocation14 + $0x288] sm:$0xf0] }
 0x2fe   :  { %v3279_v14 = vmul.f32 %v11983_v21, %v11983_v21  ;;  %6357 = vmatpush.bf16.msrb.mxu3 %v9625_v15  ;;  %vm12002_vm3 = vmor %vm3267_vm2, %vm3268_vm1 }
 0x2ff   :  { %v2968_v23 = vpop.f32.mrf.mxu0  ;;  %v3264_v44 = vsub.f32 1.0, %v3263_v30  ;;  %v3874_v47 = vperm.slane %v3860_v1, 0  ;;  %v9432_v1 = vld [vmem:[#allocation14 + $0x820] sm:$0xf] }
 0x300   :  { %v11989_v51 = vmin.f32 %v3279_v14, 16.0  ;;  %v9121_v14 = vor.u32 %v10691_v10, %v9118_v0  ;;  %v2989_v23 = vmul.f32 0.5, %v11930_v5  ;;  %v10894_v5 = vld [vmem:[#allocation14 + $0xc0c] sm:$0xf]  ;;  %v9902_v0 = vld [vmem:[#allocation14 + $0xbec] sm:$0xf0] }
 0x301   :  { %v3265_v54 = vmul.f32 %v11000_v31, %v3264_v44  ;;  %6396 = vmatpush.bf16.msra.mxu2 %v8509_v29  ;;  %6310 = vmatmul.bf16.vlgmr.msra.gmra.mxu3 %v11833_v2  ;;  %v9541_v29 = vor.u32 %v10796_v57, %v9538_v17  ;;  %v9093_v44 = vor.u32 %v10684_v40, %v9090_v36  ;;  %v10611_v57 = vld [vmem:[#allocation14 + $0x330] sm:$0xf0] }
 0x302   :  { %v3281_v28 = vmul.f32 2.1237322e-06, %v11989_v51  ;;  %v3292_v35 = vmul.f32 3.8918573e-05, %v11989_v51  ;;  %6358 = vmatpush.bf16.msrb.mxu3 %v9597_v61  ;;  %6332 = vmatpush.bf16.msrb.mxu1 %v9149_v58  ;;  %v10677_v58 = vld [vmem:[#allocation14 + $0x544] sm:$0xf] }
 0x303   :  { %v3266_v41 = vadd.f32 %v11000_v31, %v3265_v54  ;;  %v8397_v54 = vor.u32 %v10513_v42, %v8396_v26  ;;  %v9404_v42 = vld [vmem:[#allocation14 + $0x7e8] sm:$0xf] }
 0x304   :  { %v3282_v22 = vadd.f32 0.00028619796, %v3281_v28  ;;  %v3293_v13 = vadd.f32 0.001143296, %v3292_v35 }
 0x305   :  { %v3270_v46 = vsel %vm12002_vm3, %v11000_v31, %v3266_v41  ;;  %6397 = vmatpush.bf16.msra.mxu2 %v8481_v45  ;;  %v9510_v31 = vld [vmem:[#allocation14 + $0x8dc] sm:$0xf0] }
 0x306   :  { %v3283_v11 = vmul.f32 %v3282_v22, %v11989_v51  ;;  %v3294_v56 = vmul.f32 %v3293_v13, %v11989_v51  ;;  %v3275_v20 = vsel %vm3272_vm4, %v3274_v4, %v3270_v46  ;;  %6359 = vmatpush.bf16.msrb.mxu3 %v9569_v18  ;;  %6333 = vmatpush.bf16.msrb.mxu1 %v9121_v14  ;;  %v9062_v41 = vld [vmem:[#allocation14 + $0x55c] sm:$0xf0]  ;;  %v10887_v18 = vld [vmem:[#allocation14 + $0xbd4] sm:$0xf]  ;;  %v10880_v14 = vld [vmem:[#allocation14 + $0xb9c] sm:$0xf] }
 0x307   :  { %v3276_v6 = vmul.f32 %v3275_v20, %v3251_v24  ;;  %v9513_v52 = vor.u32 %v10789_v43, %v9510_v31  ;;  %v9933_v13 = vor.u32 %v10894_v5, %v9930_v25  ;;  %v9489_v4 = vor.u32 %v10786_v49, %v9488_v50  ;;  %v9460_v24 = vld [vmem:[#allocation14 + $0x858] sm:$0xf]  ;;  %v10779_v46 = vld [vmem:[#allocation14 + $0x870] sm:$0xf0]  ;;  %v10772_v43 = vld [vmem:[#allocation14 + $0x838] sm:$0xf0] }
 0x308   :  { %v3295_v12 = vadd.f32 0.014752088, %v3294_v56  ;;  %v3284_v34 = vadd.f32 0.0036580483, %v3283_v11  ;;  %v9065_v20 = vor.u32 %v10677_v58, %v9062_v41  ;;  %v9905_v60 = vor.u32 %v10887_v18, %v9902_v0  ;;  %v10765_v5 = vld [vmem:[#allocation14 + $0x800] sm:$0xf0] }
 0x309   :  { %v12000_v9 = vpop.f32.mrf.mxu2  ;;  %v8384_v30 = vclamps-f32 %v3276_v6, 1.0  ;;  %6398 = vmatpush.bf16.msra.mxu2 %v8453_v32  ;;  %v8788_v32 = vld [vmem:[#allocation14 + $0x318] sm:$0xf]  ;;  %v9461_v37 = vor.u32 %v10779_v46, %v9460_v24  ;;  %v10604_v6 = vld [vmem:[#allocation14 + $0x2f8] sm:$0xf0]  ;;  %v9405_v49 = vor.u32 %v10765_v5, %v9404_v42  ;;  %v2990_v5 = vmul.f32 0.5, %v11979_v8 }
 0x30a   :  { %v3296_v55 = vmul.f32 %v3295_v12, %v11989_v51  ;;  %v3285_v63 = vmul.f32 %v3284_v34, %v11989_v51  ;;  %6360 = vmatpush.bf16.msrb.mxu3 %v9541_v29  ;;  %6334 = vmatpush.bf16.msrb.mxu1 %v9093_v44  ;;  %v6195_v3 = vadd.f32 %v12000_v9, %v3874_v47  ;;  %v8732_v29 = vld [vmem:[#allocation14 + $0x2a8] sm:$0xf]  ;;  %v8676_v18 = vld [vmem:[#allocation14 + $0x238] sm:$0xf]  ;;  %v10751_v24 = vld [vmem:[#allocation14 + $0x790] sm:$0xf0] }
 0x30b   :  { %v3325_v28 = vadd.f32 1.0, %v8384_v30  ;;  %v8789_v9 = vor.u32 %v10611_v57, %v8788_v32  ;;  %v9433_v30 = vor.u32 %v10772_v43, %v9432_v1  ;;  %v10583_v32 = vld [vmem:[#allocation14 + $0x250] sm:$0xf0]  ;;  %v9348_v0 = vld [vmem:[#allocation14 + $0x778] sm:$0xf] }
 0x30c   :  { %v3297_v15 = vadd.f32 0.112945676, %v3296_v55  ;;  %v3286_v22 = vadd.f32 0.05243302, %v3285_v63  ;;  %v9874_v55 = vld [vmem:[#allocation14 + $0xbb4] sm:$0xf0] }
 0x30d   :  { %v3333_v61 = vmul.f32 %v3325_v28, %v2989_v23  ;;  %6399 = vmatpush.bf16.msra.mxu2 %v8425_v38  ;;  %v8760_v23 = vld [vmem:[#allocation14 + $0x2e0] sm:$0xf]  ;;  %v9877_v36 = vor.u32 %v10880_v14, %v9874_v55  ;;  %v10597_v38 = vld [vmem:[#allocation14 + $0x2c0] sm:$0xf0]  ;;  %v10852_v14 = vld [vmem:[#allocation14 + $0xabc] sm:$0xf] }
 0x30e   :  { %v3298_v35 = vmul.f32 %v3297_v15, %v11989_v51  ;;  %6361 = vmatpush.bf16.msrb.mxu3 %v9513_v52  ;;  %v3287_v34 = vmul.f32 %v3286_v22, %v11989_v51  ;;  %6335 = vmatpush.bf16.msrb.mxu1 %v9065_v20  ;;  %v8761_v40 = vor.u32 %v10604_v6, %v8760_v23  ;;  %v10873_v15 = vld [vmem:[#allocation14 + $0xb64] sm:$0xf]  ;;  %v9846_v63 = vld [vmem:[#allocation14 + $0xb7c] sm:$0xf0]  ;;  %v10758_v22 = vld [vmem:[#allocation14 + $0x7c8] sm:$0xf0] }
 0x30f   :  { %v12015_v11 = vpack.c.bf16 %v3333_v61, %v3333_v61  ;;  %v6207_v10 = vpop.f32.mrf.mxu3  ;;  %v8733_v47 = vor.u32 %v10597_v38, %v8732_v29  ;;  %v9849_v50 = vor.u32 %v10873_v15, %v9846_v63  ;;  %v10866_v61 = vld [vmem:[#allocation14 + $0xb2c] sm:$0xf]  ;;  %v8648_v23 = vld [vmem:[#allocation14 + $0x200] sm:$0xf]  ;;  %v10576_v6 = vld [vmem:[#allocation14 + $0x218] sm:$0xf0] }
 0x310   :  { %v3299_v45 = vadd.f32 0.4994258, %v3298_v35  ;;  %v6208_v17 = vadd.f32 %v6207_v10, %v6195_v3  ;;  %v3288_v31 = vadd.f32 0.18741608, %v3287_v34  ;;  %v9790_v10 = vld [vmem:[#allocation14 + $0xb0c] sm:$0xf0] }
 0x311   :  { %v6196_v33 = vpop.f32.mrf.mxu2  ;;  %6400 = vmatpush.bf16.msra.mxu2 %v8397_v54  ;;  %6271 = vmatmul.bf16.vlgmr.msra.gmra.mxu0 %v12015_v11  ;;  %v9376_v54 = vld [vmem:[#allocation14 + $0x7b0] sm:$0xf]  ;;  %v9762_v1 = vld [vmem:[#allocation14 + $0xad4] sm:$0xf0]  ;;  %v9320_v43 = vld [vmem:[#allocation14 + $0x740] sm:$0xf] }
 0x312   :  { %v3300_v56 = vmul.f32 %v3299_v45, %v11989_v51  ;;  %6406 = vmatpush.bf16.msra.mxu3 %v8817_v19  ;;  %6367 = vmatpush.bf16.msra.mxu0 %v9933_v13  ;;  %v3289_v44 = vmul.f32 %v3288_v31, %v11989_v51  ;;  %v8704_v33 = vld [vmem:[#allocation14 + $0x270] sm:$0xf]  ;;  %v9818_v45 = vld [vmem:[#allocation14 + $0xb44] sm:$0xf0]  ;;  %v9377_v3 = vor.u32 %v10758_v22, %v9376_v54  ;;  %v10744_v31 = vld [vmem:[#allocation14 + $0x758] sm:$0xf0] }
 0x313   :  { %6362 = vmatmul.bf16.vlgmr.msrb.gmra.mxu3 %v11971_v16  ;;  %v8705_v13 = vor.u32 %v10590_v48, %v8704_v33  ;;  %v8620_v15 = vld [vmem:[#allocation14 + $0x1c8] sm:$0xf]  ;;  %v9765_v29 = vor.u32 %v10852_v14, %v9762_v1  ;;  %v9321_v38 = vor.u32 %v10744_v31, %v9320_v43  ;;  %v10737_v42 = vld [vmem:[#allocation14 + $0x720] sm:$0xf0]  ;;  %v9712_v33 = vld [vmem:[#allocation14 + $0xa50] sm:$0xf] }
 0x314   :  { %v12019_v12 = vadd.f32 1.0, %v3300_v56  ;;  %6401 = vmatmul.bf16.vlgmr.msra.gmra.mxu2 %v11796_v62  ;;  %v3290_v19 = vadd.f32 1.1283791, %v3289_v44  ;;  %v9821_v56 = vor.u32 %v10866_v61, %v9818_v45  ;;  %v9292_v63 = vld [vmem:[#allocation14 + $0x708] sm:$0xf] }
 0x315   :  { %6445 = vmatpush.bf16.msrb.mxu2 %v9489_v4  ;;  %v10859_v4 = vld [vmem:[#allocation14 + $0xaf4] sm:$0xf]  ;;  %v10950_v44 = vld [vmem:[#allocation14 + $0xdcc] sm:$0xf]  ;;  %v8594_v45 = vld [vmem:[#allocation14 + $0x1ac] sm:$0xf0]  ;;  %v9293_v54 = vor.u32 %v10737_v42, %v9292_v63 }
 0x316   :  { %11001 = vrcp.f32 %v12019_v12  ;;  %6407 = vmatpush.bf16.msra.mxu3 %v8789_v9  ;;  %6368 = vmatpush.bf16.msra.mxu0 %v9905_v60  ;;  %v3313_v51 = vand.u32 2147483648, %v12019_v12  ;;  %v3311_v41 = vand.u32 2147483647, %v12019_v12  ;;  %vm3307_vm6 = vweird.f32 %v12019_v12  ;;  %v10559_v61 = vld [vmem:[#allocation14 + $0x194] sm:$0xf] }
 0x317   :  { %v6209_v26 = vpop.f32.mrf.mxu3  ;;  %v8677_v9 = vor.u32 %v10583_v32, %v8676_v18  ;;  %v10835_v18 = vld [vmem:[#allocation14 + $0xa30] sm:$0xf0]  ;;  %v10552_v32 = vld [vmem:[#allocation14 + $0x15c] sm:$0xf]  ;;  %v8538_v14 = vld [vmem:[#allocation14 + $0x13c] sm:$0xf0] }
 0x318   :  { %v3314_v46 = vor.u32 1.1754944e-38, %v3313_v51  ;;  %vm3312_vm8 = vcmp.eq.f32.partialorder %v3311_v41, 8.507059e+37  ;;  %v10569_v26 = vld [vmem:[#allocation14 + $0x1e0] sm:$0xf0]  ;;  %v8597_v41 = vor.u32 %v10559_v61, %v8594_v45  ;;  %v10070_v1 = vld [vmem:[#allocation14 + $0xd3c] sm:$0xf0] }
 0x319   :  { %6446 = vmatpush.bf16.msrb.mxu2 %v9461_v37  ;;  %v6220_v35 = vpop.f32.mrf.mxu0  ;;  %v9793_v37 = vor.u32 %v10859_v4, %v9790_v10  ;;  %v9684_v4 = vld [vmem:[#allocation14 + $0xa18] sm:$0xf] }
 0x31a   :  { %6408 = vmatpush.bf16.msra.mxu3 %v8761_v40  ;;  %6369 = vmatpush.bf16.msra.mxu0 %v9877_v36  ;;  %v12028_v27 = vadd.f32 %v6220_v35, %v6208_v17  ;;  %v3291_v17 = vmul.f32 %v3290_v19, %v11983_v21  ;;  %v8649_v40 = vor.u32 %v10576_v6, %v8648_v23  ;;  %v10845_v36 = vld [vmem:[#allocation14 + $0xa84] sm:$0xf]  ;;  %v9040_v35 = vld [vmem:[#allocation14 + $0x510] sm:$0xf] }
 0x31b   :  { %v10126_v19 = vld [vmem:[#allocation14 + $0xdac] sm:$0xf0] }
 0x31c   :  { %v11002_v25 = vpop.eup %11001 }
 0x31d   :  { %v3303_v28 = vmul.f32 %v11002_v25, %v12019_v12  ;;  %6447 = vmatpush.bf16.msrb.mxu2 %v9433_v30  ;;  %vm3308_vm5 = vweird.f32 %v11002_v25  ;;  %v9349_v12 = vor.u32 %v10751_v24, %v9348_v0  ;;  %v9734_v30 = vld [vmem:[#allocation14 + $0xa9c] sm:$0xf0]  ;;  %v10936_v24 = vld [vmem:[#allocation14 + $0xd5c] sm:$0xf] }
 0x31e   :  { %6409 = vmatpush.bf16.msra.mxu3 %v8733_v47  ;;  %6370 = vmatpush.bf16.msra.mxu0 %v9849_v50  ;;  %vm3309_vm7 = vmor %vm3307_vm6, %vm3308_vm5  ;;  %v10674_v47 = vld [vmem:[#allocation14 + $0x528] sm:$0xf0]  ;;  %v8621_v50 = vor.u32 %v10569_v26, %v8620_v15 }
 0x31f   :  { %v3304_v52 = vsub.f32 1.0, %v3303_v28  ;;  %v10154_v28 = vld [vmem:[#allocation14 + $0xde4] sm:$0xf0]  ;;  %v9041_v8 = vor.u32 %v10674_v47, %v9040_v35  ;;  %v10538_v15 = vld [vmem:[#allocation14 + $0xec] sm:$0xf] }
 0x320   :  { %v10157_v51 = vor.u32 %v10950_v44, %v10154_v28  ;;  %v8928_v35 = vld [vmem:[#allocation14 + $0x430] sm:$0xf]  ;;  %v10646_v47 = vld [vmem:[#allocation14 + $0x448] sm:$0xf0] }
 0x321   :  { %v3305_v58 = vmul.f32 %v11002_v25, %v3304_v52  ;;  %6448 = vmatpush.bf16.msrb.mxu2 %v9405_v49  ;;  %6323 = vmatmul.bf16.vlgmr.msrb.gmra.mxu0 %v11850_v53  ;;  %v6222_v34 = vpop.f32.mrf.mxu0  ;;  %v10842_v49 = vld [vmem:[#allocation14 + $0xa68] sm:$0xf0]  ;;  %v9737_v52 = vor.u32 %v10845_v36, %v9734_v30  ;;  %v9628_v36 = vld [vmem:[#allocation14 + $0x9a8] sm:$0xf]  ;;  %v10821_v30 = vld [vmem:[#allocation14 + $0x9c0] sm:$0xf0]  ;;  %v8929_v45 = vor.u32 %v10646_v47, %v8928_v35 }
 0x322   :  { %6410 = vmatpush.bf16.msra.mxu3 %v8705_v13  ;;  %6371 = vmatpush.bf16.msra.mxu0 %v9821_v56  ;;  %v10943_v13 = vld [vmem:[#allocation14 + $0xd94] sm:$0xf]  ;;  %v9012_v56 = vld [vmem:[#allocation14 + $0x4d8] sm:$0xf]  ;;  %v8984_v34 = vld [vmem:[#allocation14 + $0x4a0] sm:$0xf]  ;;  %v9629_v44 = vor.u32 %v10821_v30, %v9628_v36 }
 0x323   :  { %v3306_v57 = vadd.f32 %v11002_v25, %v3305_v58  ;;  %v9713_v58 = vor.u32 %v10842_v49, %v9712_v33  ;;  %v10129_v10 = vor.u32 %v10943_v13, %v10126_v19  ;;  %v9600_v33 = vld [vmem:[#allocation14 + $0x970] sm:$0xf]  ;;  %v10639_v13 = vld [vmem:[#allocation14 + $0x410] sm:$0xf0]  ;;  %v9572_v19 = vld [vmem:[#allocation14 + $0x938] sm:$0xf] }
 0x324   :  { %v8482_v49 = vld [vmem:[#allocation14 + $0xcc] sm:$0xf0]  ;;  %v10730_v30 = vld [vmem:[#allocation14 + $0x6e8] sm:$0xf0] }
 0x325   :  { %v3310_v20 = vsel %vm3309_vm7, %v11002_v25, %v3306_v57  ;;  %6449 = vmatpush.bf16.msrb.mxu2 %v9377_v3  ;;  %v10667_v3 = vld [vmem:[#allocation14 + $0x4f0] sm:$0xf0]  ;;  %v8566_v57 = vld [vmem:[#allocation14 + $0x174] sm:$0xf0]  ;;  %v9264_v36 = vld [vmem:[#allocation14 + $0x6d0] sm:$0xf] }
 0x326   :  { %v3315_v60 = vsel %vm3312_vm8, %v3314_v46, %v3310_v20  ;;  %6411 = vmatpush.bf16.msra.mxu3 %v8677_v9  ;;  %6372 = vmatpush.bf16.msra.mxu0 %v9793_v37  ;;  %v9013_v0 = vor.u32 %v10667_v3, %v9012_v56  ;;  %v10098_v46 = vld [vmem:[#allocation14 + $0xd74] sm:$0xf0]  ;;  %v8569_v20 = vor.u32 %v10552_v32, %v8566_v57  ;;  %v10660_v9 = vld [vmem:[#allocation14 + $0x4b8] sm:$0xf0] }
 0x327   :  { %v3316_v55 = vmul.f32 %v3315_v60, %v3291_v17  ;;  %v9685_v17 = vor.u32 %v10835_v18, %v9684_v4  ;;  %v9656_v60 = vld [vmem:[#allocation14 + $0x9e0] sm:$0xf]  ;;  %v10828_v37 = vld [vmem:[#allocation14 + $0x9f8] sm:$0xf0]  ;;  %v10101_v23 = vor.u32 %v10936_v24, %v10098_v46  ;;  %v8985_v6 = vor.u32 %v10660_v9, %v8984_v34  ;;  %v8454_v56 = vld [vmem:[#allocation14 + $0x94] sm:$0xf0] }
 0x328   :  { %v9657_v43 = vor.u32 %v10828_v37, %v9656_v60  ;;  %v10908_v32 = vld [vmem:[#allocation14 + $0xc7c] sm:$0xf]  ;;  %v9986_v57 = vld [vmem:[#allocation14 + $0xc94] sm:$0xf0]  ;;  %v8872_v24 = vld [vmem:[#allocation14 + $0x3c0] sm:$0xf]  ;;  %v9265_v47 = vor.u32 %v10730_v30, %v9264_v36 }
 0x329   :  { %v8385_v21 = vclamps-f32 %v3316_v55, 1.0  ;;  %6450 = vmatpush.bf16.msrb.mxu2 %v9349_v12  ;;  %v10545_v12 = vld [vmem:[#allocation14 + $0x124] sm:$0xf]  ;;  %v10632_v46 = vld [vmem:[#allocation14 + $0x3d8] sm:$0xf0]  ;;  %v9989_v37 = vor.u32 %v10908_v32, %v9986_v57 }
 0x32a   :  { %6412 = vmatpush.bf16.msra.mxu3 %v8649_v40  ;;  %6373 = vmatpush.bf16.msra.mxu0 %v9765_v29  ;;  %v10929_v55 = vld [vmem:[#allocation14 + $0xd24] sm:$0xf]  ;;  %v8541_v31 = vor.u32 %v10545_v12, %v8538_v14  ;;  %v8510_v29 = vld [vmem:[#allocation14 + $0x104] sm:$0xf0]  ;;  %v8426_v9 = vld [vmem:[#allocation14 + $0x5c] sm:$0xf0]  ;;  %v8873_v12 = vor.u32 %v10632_v46, %v8872_v24 }
 0x32b   :  { %v3326_v25 = vadd.f32 1.0, %v8385_v21  ;;  %v8956_v21 = vld [vmem:[#allocation14 + $0x468] sm:$0xf]  ;;  %v10653_v40 = vld [vmem:[#allocation14 + $0x480] sm:$0xf0]  ;;  %v10073_v63 = vor.u32 %v10929_v55, %v10070_v1  ;;  %v8513_v28 = vor.u32 %v10538_v15, %v8510_v29 }
 0x32c   :  { %v8957_v42 = vor.u32 %v10653_v40, %v8956_v21  ;;  %v10517_v34 = vld [vmem:[#allocation14 + $0x44] sm:$0xf]  ;;  %v9958_v14 = vld [vmem:[#allocation14 + $0xc5c] sm:$0xf0]  ;;  %v10510_v21 = vld [vmem:[#allocation14 + $0xc] sm:$0xf] }
 0x32d   :  { %v3334_v48 = vmul.f32 %v3326_v25, %v2990_v5  ;;  %6451 = vmatpush.bf16.msrb.mxu2 %v9321_v38  ;;  %v10922_v5 = vld [vmem:[#allocation14 + $0xcec] sm:$0xf]  ;;  %v10042_v25 = vld [vmem:[#allocation14 + $0xd04] sm:$0xf0]  ;;  %v10901_v60 = vld [vmem:[#allocation14 + $0xc44] sm:$0xf]  ;;  %v8429_v1 = vor.u32 %v10517_v34, %v8426_v9 }
 0x32e   :  { %6413 = vmatpush.bf16.msra.mxu3 %v8621_v50  ;;  %6374 = vmatpush.bf16.msra.mxu0 %v9737_v52  ;;  %v10531_v50 = vld [vmem:[#allocation14 + $0xb4] sm:$0xf]  ;;  %v10045_v61 = vor.u32 %v10922_v5, %v10042_v25  ;;  %v10014_v52 = vld [vmem:[#allocation14 + $0xccc] sm:$0xf0]  ;;  %v8398_v40 = vld [vmem:[#allocation14 + $0x24] sm:$0xf0] }
 0x32f   :  { %v12037_v22 = vpack.c.bf16 %v3334_v48, %v3334_v48  ;;  %v10814_v48 = vld [vmem:[#allocation14 + $0x988] sm:$0xf0]  ;;  %v9936_v15 = vld [vmem:[#allocation14 + $0xc10] sm:$0xf]  ;;  %v10783_v25 = vld [vmem:[#allocation14 + $0x894] sm:$0xf]  ;;  %v8401_v35 = vor.u32 %v10510_v21, %v8398_v40 }
 0x330   :  { %v10898_v29 = vld [vmem:[#allocation14 + $0xc28] sm:$0xf0]  ;;  %v8818_v5 = vld [vmem:[#allocation14 + $0x36c] sm:$0xf0]  ;;  %v10601_v32 = vld [vmem:[#allocation14 + $0x2e4] sm:$0xf] }
 0x331   :  { %6284 = vmatmul.bf16.vlgmr.msra.gmra.mxu1 %v12037_v22  ;;  %6452 = vmatpush.bf16.msrb.mxu2 %v9293_v54  ;;  %v9601_v54 = vor.u32 %v10814_v48, %v9600_v33  ;;  %v9937_v33 = vor.u32 %v10898_v29, %v9936_v15  ;;  %v9236_v48 = vld [vmem:[#allocation14 + $0x698] sm:$0xf]  ;;  %v8762_v57 = vld [vmem:[#allocation14 + $0x2fc] sm:$0xf0]  ;;  %v9824_v36 = vld [vmem:[#allocation14 + $0xb30] sm:$0xf] }
 0x332   :  { %6380 = vmatpush.bf16.msra.mxu1 %v10157_v51  ;;  %6419 = vmatpush.bf16.msrb.mxu0 %v9041_v8  ;;  %v8485_v51 = vor.u32 %v10531_v50, %v8482_v49  ;;  %v8900_v8 = vld [vmem:[#allocation14 + $0x3f8] sm:$0xf]  ;;  %v10723_v50 = vld [vmem:[#allocation14 + $0x6b0] sm:$0xf0]  ;;  %v8765_v34 = vor.u32 %v10601_v32, %v8762_v57  ;;  %v10870_v30 = vld [vmem:[#allocation14 + $0xb48] sm:$0xf0] }
 0x333   :  { %6458 = vmatpush.bf16.msrb.mxu3 %v9713_v58  ;;  %6375 = vmatmul.bf16.vlgmr.msra.gmra.mxu0 %v12015_v11  ;;  %v6233_v38 = vpop.f32.mrf.mxu1  ;;  %v10807_v58 = vld [vmem:[#allocation14 + $0x950] sm:$0xf0]  ;;  %v8901_v18 = vor.u32 %v10639_v13, %v8900_v8  ;;  %v9462_v8 = vld [vmem:[#allocation14 + $0x874] sm:$0xf0]  ;;  %v9237_v13 = vor.u32 %v10723_v50, %v9236_v48  ;;  %v8706_v29 = vld [vmem:[#allocation14 + $0x28c] sm:$0xf0] }
 0x334   :  { %6414 = vmatmul.bf16.vlgmr.msra.gmra.mxu3 %v11833_v2  ;;  %6453 = vmatmul.bf16.vlgmr.msrb.gmra.mxu2 %v11922_v7  ;;  %v12044_v26 = vadd.f32 %v6233_v38, %v12028_v27  ;;  %v10915_v27 = vld [vmem:[#allocation14 + $0xcb4] sm:$0xf]  ;;  %v9796_v48 = vld [vmem:[#allocation14 + $0xaf8] sm:$0xf] }
 0x335   :  { %6497 = vmatpush.bf16.msra.mxu2 %v8597_v41  ;;  %v10524_v41 = vld [vmem:[#allocation14 + $0x7c] sm:$0xf]  ;;  %v10017_v4 = vor.u32 %v10915_v27, %v10014_v52  ;;  %v10615_v38 = vld [vmem:[#allocation14 + $0x354] sm:$0xf] }
 0x336   :  { %6381 = vmatpush.bf16.msra.mxu1 %v10129_v10  ;;  %6420 = vmatpush.bf16.msrb.mxu0 %v9013_v0  ;;  %v9573_v10 = vor.u32 %v10807_v58, %v9572_v19  ;;  %v8457_v0 = vor.u32 %v10524_v41, %v8454_v56  ;;  %v8821_v49 = vor.u32 %v10615_v38, %v8818_v5  ;;  %v10891_v27 = vld [vmem:[#allocation14 + $0xbf0] sm:$0xf0]  ;;  %v10608_v52 = vld [vmem:[#allocation14 + $0x31c] sm:$0xf]  ;;  %v9208_v58 = vld [vmem:[#allocation14 + $0x660] sm:$0xf] }
 0x337   :  { %6459 = vmatpush.bf16.msrb.mxu3 %v9685_v17  ;;  %v9544_v17 = vld [vmem:[#allocation14 + $0x900] sm:$0xf]  ;;  %v10716_v41 = vld [vmem:[#allocation14 + $0x678] sm:$0xf0]  ;;  %v10587_v15 = vld [vmem:[#allocation14 + $0x274] sm:$0xf] }
 0x338   :  { %v9209_v24 = vor.u32 %v10716_v41, %v9208_v58  ;;  %v10755_v38 = vld [vmem:[#allocation14 + $0x7b4] sm:$0xf]  ;;  %v10856_v58 = vld [vmem:[#allocation14 + $0xad8] sm:$0xf0]  ;;  %v10573_v41 = vld [vmem:[#allocation14 + $0x204] sm:$0xf] }
 0x339   :  { %6498 = vmatpush.bf16.msra.mxu2 %v8569_v20  ;;  %v10800_v20 = vld [vmem:[#allocation14 + $0x918] sm:$0xf0]  ;;  %v10863_v50 = vld [vmem:[#allocation14 + $0xb10] sm:$0xf0] }
 0x33a   :  { %6382 = vmatpush.bf16.msra.mxu1 %v10101_v23  ;;  %6421 = vmatpush.bf16.msrb.mxu0 %v8985_v6  ;;  %v8844_v23 = vld [vmem:[#allocation14 + $0x388] sm:$0xf]  ;;  %v10625_v6 = vld [vmem:[#allocation14 + $0x3a0] sm:$0xf0]  ;;  %v9545_v55 = vor.u32 %v10800_v20, %v9544_v17 }
 0x33b   :  { %6460 = vmatpush.bf16.msrb.mxu3 %v9657_v43  ;;  %v6235_v3 = vpop.f32.mrf.mxu1  ;;  %v9516_v43 = vld [vmem:[#allocation14 + $0x8c8] sm:$0xf]  ;;  %v10709_v20 = vld [vmem:[#allocation14 + $0x640] sm:$0xf0] }
 0x33c   :  { %v9180_v17 = vld [vmem:[#allocation14 + $0x628] sm:$0xf] }
 0x33d   :  { %6499 = vmatpush.bf16.msra.mxu2 %v8541_v31  ;;  %v10793_v31 = vld [vmem:[#allocation14 + $0x8e0] sm:$0xf0] }
 0x33e   :  { %6383 = vmatpush.bf16.msra.mxu1 %v10073_v63  ;;  %6422 = vmatpush.bf16.msrb.mxu0 %v8957_v42  ;;  %v9961_v63 = vor.u32 %v10901_v60, %v9958_v14  ;;  %v8845_v42 = vor.u32 %v10625_v6, %v8844_v23  ;;  %v9852_v60 = vld [vmem:[#allocation14 + $0xb68] sm:$0xf]  ;;  %v10762_v23 = vld [vmem:[#allocation14 + $0x7ec] sm:$0xf] }
 0x33f   :  { %6461 = vmatpush.bf16.msrb.mxu3 %v9629_v44  ;;  %v9490_v44 = vld [vmem:[#allocation14 + $0x8ac] sm:$0xf0]  ;;  %v8734_v14 = vld [vmem:[#allocation14 + $0x2c4] sm:$0xf0] }
 0x340   :  { %v9406_v6 = vld [vmem:[#allocation14 + $0x804] sm:$0xf0] }
 0x341   :  { %6500 = vmatpush.bf16.msra.mxu2 %v8513_v28  ;;  %6336 = vmatmul.bf16.vlgmr.msrb.gmra.mxu1 %v11886_v39  ;;  %v9517_v28 = vor.u32 %v10793_v31, %v9516_v43  ;;  %v9152_v43 = vld [vmem:[#allocation14 + $0x5f0] sm:$0xf]  ;;  %v10702_v31 = vld [vmem:[#allocation14 + $0x608] sm:$0xf0]  ;;  %v9409_v40 = vor.u32 %v10762_v23, %v9406_v6  ;;  %v10671_v23 = vld [vmem:[#allocation14 + $0x514] sm:$0xf] }
 0x342   :  { %6384 = vmatpush.bf16.msra.mxu1 %v10045_v61  ;;  %6423 = vmatpush.bf16.msrb.mxu0 %v8929_v45  ;;  %v9493_v61 = vor.u32 %v10783_v25, %v9490_v44  ;;  %v9908_v45 = vld [vmem:[#allocation14 + $0xbd8] sm:$0xf]  ;;  %v9153_v5 = vor.u32 %v10702_v31, %v9152_v43  ;;  %v9825_v25 = vor.u32 %v10870_v30, %v9824_v36  ;;  %v9042_v6 = vld [vmem:[#allocation14 + $0x52c] sm:$0xf0] }
 0x343   :  { %6462 = vmatpush.bf16.msrb.mxu3 %v9601_v54  ;;  %v8790_v54 = vld [vmem:[#allocation14 + $0x334] sm:$0xf0]  ;;  %v9909_v19 = vor.u32 %v10891_v27, %v9908_v45  ;;  %v10748_v45 = vld [vmem:[#allocation14 + $0x77c] sm:$0xf]  ;;  %v9714_v31 = vld [vmem:[#allocation14 + $0xa6c] sm:$0xf0] }
 0x344   :  { %v8793_v56 = vor.u32 %v10608_v52, %v8790_v54  ;;  %v9124_v44 = vld [vmem:[#allocation14 + $0x5b8] sm:$0xf]  ;;  %v9797_v54 = vor.u32 %v10863_v50, %v9796_v48  ;;  %v8572_v48 = vld [vmem:[#allocation14 + $0x160] sm:$0xf]  ;;  %v10556_v50 = vld [vmem:[#allocation14 + $0x178] sm:$0xf0] }
 0x345   :  { %6501 = vmatpush.bf16.msra.mxu2 %v8485_v51  ;;  %v10776_v51 = vld [vmem:[#allocation14 + $0x85c] sm:$0xf]  ;;  %v9350_v27 = vld [vmem:[#allocation14 + $0x794] sm:$0xf0] }
 0x346   :  { %6385 = vmatpush.bf16.msra.mxu1 %v10017_v4  ;;  %6424 = vmatpush.bf16.msrb.mxu0 %v8901_v18  ;;  %v9465_v3 = vor.u32 %v10776_v51, %v9462_v8  ;;  %v9880_v4 = vld [vmem:[#allocation14 + $0xba0] sm:$0xf]  ;;  %v10884_v18 = vld [vmem:[#allocation14 + $0xbb8] sm:$0xf0] }
 0x347   :  { %6463 = vmatpush.bf16.msrb.mxu3 %v9573_v10  ;;  %v10769_v10 = vld [vmem:[#allocation14 + $0x824] sm:$0xf]  ;;  %v9881_v46 = vor.u32 %v10884_v18, %v9880_v4  ;;  %v9096_v51 = vld [vmem:[#allocation14 + $0x580] sm:$0xf]  ;;  %v10688_v8 = vld [vmem:[#allocation14 + $0x598] sm:$0xf0] }
 0x348   :  { %v9322_v4 = vld [vmem:[#allocation14 + $0x75c] sm:$0xf0]  ;;  %v9068_v18 = vld [vmem:[#allocation14 + $0x548] sm:$0xf]  ;;  %v9097_v57 = vor.u32 %v10688_v8, %v9096_v51  ;;  %v10657_v51 = vld [vmem:[#allocation14 + $0x4a4] sm:$0xf] }
 0x349   :  { %6502 = vmatpush.bf16.msra.mxu2 %v8457_v0  ;;  %v9434_v0 = vld [vmem:[#allocation14 + $0x83c] sm:$0xf0] }
 0x34a   :  { %6386 = vmatpush.bf16.msra.mxu1 %v9989_v37  ;;  %6425 = vmatpush.bf16.msrb.mxu0 %v8873_v12  ;;  %v9437_v9 = vor.u32 %v10769_v10, %v9434_v0  ;;  %v10877_v37 = vld [vmem:[#allocation14 + $0xb80] sm:$0xf0]  ;;  %v10594_v12 = vld [vmem:[#allocation14 + $0x2ac] sm:$0xf]  ;;  %v8986_v8 = vld [vmem:[#allocation14 + $0x4bc] sm:$0xf0] }
 0x34b   :  { %6464 = vmatpush.bf16.msrb.mxu3 %v9545_v55  ;;  %v9181_v55 = vor.u32 %v10709_v20, %v9180_v17  ;;  %v8737_v21 = vor.u32 %v10594_v12, %v8734_v14  ;;  %v10681_v0 = vld [vmem:[#allocation14 + $0x560] sm:$0xf0]  ;;  %v10160_v12 = vld [vmem:[#allocation14 + $0xdd0] sm:$0xf]  ;;  %v10954_v14 = vld [vmem:[#allocation14 + $0xde8] sm:$0xf0] }
 0x34d   :  { %6503 = vmatpush.bf16.msra.mxu2 %v8429_v1  ;;  %v9853_v1 = vor.u32 %v10877_v37, %v9852_v60  ;;  %v10734_v60 = vld [vmem:[#allocation14 + $0x70c] sm:$0xf]  ;;  %v9294_v37 = vld [vmem:[#allocation14 + $0x724] sm:$0xf0] }
 0x34e   :  { %6387 = vmatpush.bf16.msra.mxu1 %v9961_v63  ;;  %6426 = vmatpush.bf16.msrb.mxu0 %v8845_v42  ;;  %v9378_v63 = vld [vmem:[#allocation14 + $0x7cc] sm:$0xf0]  ;;  %v9297_v30 = vor.u32 %v10734_v60, %v9294_v37  ;;  %v10926_v37 = vld [vmem:[#allocation14 + $0xd08] sm:$0xf0] }
 0x34f   :  { %6465 = vmatpush.bf16.msrb.mxu3 %v9517_v28  ;;  %v10695_v28 = vld [vmem:[#allocation14 + $0x5d0] sm:$0xf0]  ;;  %v10048_v60 = vld [vmem:[#allocation14 + $0xcf0] sm:$0xf] }
 0x350   :  { %v9125_v52 = vor.u32 %v10695_v28, %v9124_v44  ;;  %v9014_v44 = vld [vmem:[#allocation14 + $0x4f4] sm:$0xf0]  ;;  %v10832_v28 = vld [vmem:[#allocation14 + $0xa1c] sm:$0xf] }
 0x351   :  { %6504 = vmatpush.bf16.msra.mxu2 %v8401_v35  ;;  %6427 = vmatmul.bf16.vlgmr.msrb.gmra.mxu0 %v11850_v53 }
 0x352   :  { %6432 = vmatpush.bf16.msrb.mxu1 %v9265_v47  ;;  %6471 = vmatpush.bf16.msra.mxu0 %v9937_v33  ;;  %v8709_v47 = vor.u32 %v10587_v15, %v8706_v29  ;;  %v9381_v33 = vor.u32 %v10755_v38, %v9378_v63  ;;  %v10161_v15 = vor.u32 %v10954_v14, %v10160_v12  ;;  %v10132_v38 = vld [vmem:[#allocation14 + $0xd98] sm:$0xf]  ;;  %v10947_v63 = vld [vmem:[#allocation14 + $0xdb0] sm:$0xf0] }
 0x353   :  { %6510 = vmatpush.bf16.msra.mxu3 %v8821_v49  ;;  %6388 = vmatmul.bf16.vlgmr.msra.gmra.mxu1 %v12037_v22  ;;  %v10580_v49 = vld [vmem:[#allocation14 + $0x23c] sm:$0xf]  ;;  %v9045_v29 = vor.u32 %v10671_v23, %v9042_v6  ;;  %v10643_v23 = vld [vmem:[#allocation14 + $0x434] sm:$0xf]  ;;  %v8930_v6 = vld [vmem:[#allocation14 + $0x44c] sm:$0xf0] }
 0x354   :  { %6466 = vmatmul.bf16.vlgmr.msrb.gmra.mxu3 %v11971_v16  ;;  %6505 = vmatmul.bf16.vlgmr.msra.gmra.mxu2 %v11796_v62 }
 0x355   :  { %6549 = vmatpush.bf16.msrb.mxu2 %v9493_v61  ;;  %v8678_v61 = vld [vmem:[#allocation14 + $0x254] sm:$0xf0] }
 0x356   :  { %6433 = vmatpush.bf16.msrb.mxu1 %v9237_v13  ;;  %6472 = vmatpush.bf16.msra.mxu0 %v9909_v19  ;;  %v8681_v13 = vor.u32 %v10580_v49, %v8678_v61  ;;  %v9353_v19 = vor.u32 %v10748_v45, %v9350_v27  ;;  %v10133_v49 = vor.u32 %v10947_v63, %v10132_v38  ;;  %v10104_v45 = vld [vmem:[#allocation14 + $0xd60] sm:$0xf]  ;;  %v10940_v27 = vld [vmem:[#allocation14 + $0xd78] sm:$0xf0] }
 0x357   :  { %6511 = vmatpush.bf16.msra.mxu3 %v8793_v56  ;;  %v6246_v42 = vpop.f32.mrf.mxu2  ;;  %v8650_v56 = vld [vmem:[#allocation14 + $0x21c] sm:$0xf0]  ;;  %v10636_v63 = vld [vmem:[#allocation14 + $0x3fc] sm:$0xf] }
 0x358   :  { %v12052_v35 = vadd.f32 %v6246_v42, %v12044_v26  ;;  %v9768_v26 = vld [vmem:[#allocation14 + $0xac0] sm:$0xf]  ;;  %v8653_v17 = vor.u32 %v10573_v41, %v8650_v56  ;;  %v10105_v41 = vor.u32 %v10940_v27, %v10104_v45  ;;  %v8989_v56 = vor.u32 %v10657_v51, %v8986_v8  ;;  %v10797_v51 = vld [vmem:[#allocation14 + $0x904] sm:$0xf] }
 0x359   :  { %6550 = vmatpush.bf16.msrb.mxu2 %v9465_v3  ;;  %v10741_v3 = vld [vmem:[#allocation14 + $0x744] sm:$0xf]  ;;  %v9769_v10 = vor.u32 %v10856_v58, %v9768_v26  ;;  %v8544_v26 = vld [vmem:[#allocation14 + $0x128] sm:$0xf]  ;;  %v9546_v8 = vld [vmem:[#allocation14 + $0x91c] sm:$0xf0] }
 0x35a   :  { %6434 = vmatpush.bf16.msrb.mxu1 %v9209_v24  ;;  %6473 = vmatpush.bf16.msra.mxu0 %v9881_v46  ;;  %v9740_v24 = vld [vmem:[#allocation14 + $0xa88] sm:$0xf]  ;;  %v10849_v46 = vld [vmem:[#allocation14 + $0xaa0] sm:$0xf0]  ;;  %v9325_v20 = vor.u32 %v10741_v3, %v9322_v4 }
 0x35b   :  { %6512 = vmatpush.bf16.msra.mxu3 %v8765_v34  ;;  %v10566_v34 = vld [vmem:[#allocation14 + $0x1cc] sm:$0xf]  ;;  %v9741_v43 = vor.u32 %v10849_v46, %v9740_v24  ;;  %v10549_v58 = vld [vmem:[#allocation14 + $0x140] sm:$0xf0]  ;;  %v10076_v3 = vld [vmem:[#allocation14 + $0xd28] sm:$0xf] }
 0x35c   :  { %v10933_v4 = vld [vmem:[#allocation14 + $0xd40] sm:$0xf0]  ;;  %v9630_v46 = vld [vmem:[#allocation14 + $0x9c4] sm:$0xf0] }
 0x35d   :  { %6551 = vmatpush.bf16.msrb.mxu2 %v9437_v9  ;;  %v8622_v9 = vld [vmem:[#allocation14 + $0x1e4] sm:$0xf0] }
 0x35e   :  { %6435 = vmatpush.bf16.msrb.mxu1 %v9181_v55  ;;  %6474 = vmatpush.bf16.msra.mxu0 %v9853_v1  ;;  %v10839_v55 = vld [vmem:[#allocation14 + $0xa54] sm:$0xf]  ;;  %v9069_v1 = vor.u32 %v10681_v0, %v9068_v18  ;;  %v8625_v36 = vor.u32 %v10566_v34, %v8622_v9  ;;  %v10818_v0 = vld [vmem:[#allocation14 + $0x9ac] sm:$0xf]  ;;  %v10077_v34 = vor.u32 %v10933_v4, %v10076_v3  ;;  %v10905_v3 = vld [vmem:[#allocation14 + $0xc60] sm:$0xf0] }
 0x35f   :  { %6513 = vmatpush.bf16.msra.mxu3 %v8737_v21  ;;  %v6248_v32 = vpop.f32.mrf.mxu2  ;;  %v8600_v21 = vld [vmem:[#allocation14 + $0x198] sm:$0xf]  ;;  %v9717_v42 = vor.u32 %v10839_v55, %v9714_v31  ;;  %v9633_v12 = vor.u32 %v10818_v0, %v9630_v46  ;;  %v10811_v55 = vld [vmem:[#allocation14 + $0x974] sm:$0xf]  ;;  %v10622_v4 = vld [vmem:[#allocation14 + $0x38c] sm:$0xf] }
 0x360   :  { %v8545_v32 = vor.u32 %v10549_v58, %v8544_v26  ;;  %v10535_v31 = vld [vmem:[#allocation14 + $0xd0] sm:$0xf0]  ;;  %v9964_v58 = vld [vmem:[#allocation14 + $0xc48] sm:$0xf] }
 0x361   :  { %6552 = vmatpush.bf16.msrb.mxu2 %v9409_v40  ;;  %v10563_v40 = vld [vmem:[#allocation14 + $0x1b0] sm:$0xf0]  ;;  %v9518_v0 = vld [vmem:[#allocation14 + $0x8e4] sm:$0xf0] }
 0x362   :  { %6436 = vmatpush.bf16.msrb.mxu1 %v9153_v5  ;;  %6475 = vmatpush.bf16.msra.mxu0 %v9825_v25  ;;  %v8601_v5 = vor.u32 %v10563_v40, %v8600_v21  ;;  %v10664_v25 = vld [vmem:[#allocation14 + $0x4dc] sm:$0xf]  ;;  %v10049_v40 = vor.u32 %v10926_v37, %v10048_v60  ;;  %v9938_v60 = vld [vmem:[#allocation14 + $0xc2c] sm:$0xf0]  ;;  %v8824_v37 = vld [vmem:[#allocation14 + $0x358] sm:$0xf] }
 0x363   :  { %6514 = vmatpush.bf16.msra.mxu3 %v8709_v47  ;;  %v9017_v61 = vor.u32 %v10664_v25, %v9014_v44  ;;  %v9574_v44 = vld [vmem:[#allocation14 + $0x954] sm:$0xf0] }
 0x365   :  { %6553 = vmatpush.bf16.msrb.mxu2 %v9381_v33  ;;  %v9686_v33 = vld [vmem:[#allocation14 + $0xa34] sm:$0xf0] }
 0x366   :  { %6437 = vmatpush.bf16.msrb.mxu1 %v9125_v52  ;;  %6476 = vmatpush.bf16.msra.mxu0 %v9797_v54  ;;  %v9689_v52 = vor.u32 %v10832_v28, %v9686_v33  ;;  %v8573_v54 = vor.u32 %v10556_v50, %v8572_v48  ;;  %v8460_v28 = vld [vmem:[#allocation14 + $0x80] sm:$0xf]  ;;  %v10528_v33 = vld [vmem:[#allocation14 + $0x98] sm:$0xf0] }
 0x367   :  { %6515 = vmatpush.bf16.msra.mxu3 %v8681_v13  ;;  %v12054_v47 = vpop.f32.mrf.mxu2  ;;  %v10825_v13 = vld [vmem:[#allocation14 + $0x9e4] sm:$0xf]  ;;  %v8461_v27 = vor.u32 %v10528_v33, %v8460_v28  ;;  %v9468_v28 = vld [vmem:[#allocation14 + $0x860] sm:$0xf]  ;;  %v10780_v33 = vld [vmem:[#allocation14 + $0x878] sm:$0xf0] }
 0x369   :  { %6554 = vmatpush.bf16.msrb.mxu2 %v9353_v19  ;;  %v9658_v19 = vld [vmem:[#allocation14 + $0x9fc] sm:$0xf0] }
 0x36a   :  { %6438 = vmatpush.bf16.msrb.mxu1 %v9097_v57  ;;  %6477 = vmatpush.bf16.msra.mxu0 %v9769_v10  ;;  %v9661_v18 = vor.u32 %v10825_v13, %v9658_v19  ;;  %v10650_v57 = vld [vmem:[#allocation14 + $0x46c] sm:$0xf]  ;;  %v8958_v10 = vld [vmem:[#allocation14 + $0x484] sm:$0xf0]  ;;  %v10521_v19 = vld [vmem:[#allocation14 + $0x60] sm:$0xf0] }
 0x36b   :  { %6516 = vmatpush.bf16.msra.mxu3 %v8653_v17  ;;  %v8516_v17 = vld [vmem:[#allocation14 + $0xf0] sm:$0xf]  ;;  %v8961_v9 = vor.u32 %v10650_v57, %v8958_v10  ;;  %v8432_v13 = vld [vmem:[#allocation14 + $0x48] sm:$0xf]  ;;  %v10790_v10 = vld [vmem:[#allocation14 + $0x8cc] sm:$0xf] }
 0x36c   :  { %v8433_v57 = vor.u32 %v10521_v19, %v8432_v13  ;;  %v9440_v13 = vld [vmem:[#allocation14 + $0x828] sm:$0xf]  ;;  %v10773_v19 = vld [vmem:[#allocation14 + $0x840] sm:$0xf0] }
 0x36d   :  { %6555 = vmatpush.bf16.msrb.mxu2 %v9325_v20  ;;  %v10542_v20 = vld [vmem:[#allocation14 + $0x108] sm:$0xf0] }
 0x36e   :  { %6439 = vmatpush.bf16.msrb.mxu1 %v9069_v1  ;;  %6478 = vmatpush.bf16.msra.mxu0 %v9741_v43  ;;  %v8517_v14 = vor.u32 %v10542_v20, %v8516_v17  ;;  %v9602_v1 = vld [vmem:[#allocation14 + $0x98c] sm:$0xf0]  ;;  %v8488_v43 = vld [vmem:[#allocation14 + $0xb8] sm:$0xf]  ;;  %v10514_v17 = vld [vmem:[#allocation14 + $0x28] sm:$0xf0] }
 0x36f   :  { %6517 = vmatpush.bf16.msra.mxu3 %v8625_v36  ;;  %v6300_v24 = vpop.f32.mrf.mxu2  ;;  %v8933_v36 = vor.u32 %v10643_v23, %v8930_v6  ;;  %v8489_v38 = vor.u32 %v10535_v31, %v8488_v43  ;;  %v10727_v20 = vld [vmem:[#allocation14 + $0x6d4] sm:$0xf]  ;;  %v9496_v6 = vld [vmem:[#allocation14 + $0x898] sm:$0xf] }
 0x370   :  { %v8404_v24 = vld [vmem:[#allocation14 + $0x10] sm:$0xf]  ;;  %v10619_v23 = vld [vmem:[#allocation14 + $0x370] sm:$0xf0] }
 0x371   :  { %6556 = vmatpush.bf16.msrb.mxu2 %v9297_v30  ;;  %6440 = vmatmul.bf16.vlgmr.msrb.gmra.mxu1 %v11886_v39  ;;  %v10020_v30 = vld [vmem:[#allocation14 + $0xcb8] sm:$0xf]  ;;  %v8405_v43 = vor.u32 %v10514_v17, %v8404_v24  ;;  %v10598_v24 = vld [vmem:[#allocation14 + $0x2c8] sm:$0xf0] }
 0x372   :  { %6484 = vmatpush.bf16.msra.mxu1 %v10161_v15  ;;  %6523 = vmatpush.bf16.msrb.mxu0 %v9045_v29  ;;  %v10919_v15 = vld [vmem:[#allocation14 + $0xcd0] sm:$0xf0]  ;;  %v9605_v29 = vor.u32 %v10811_v55, %v9602_v1  ;;  %v9521_v1 = vor.u32 %v10790_v10, %v9518_v0  ;;  %v9854_v10 = vld [vmem:[#allocation14 + $0xb84] sm:$0xf0]  ;;  %v8740_v0 = vld [vmem:[#allocation14 + $0x2b0] sm:$0xf] }
 0x373   :  { %6562 = vmatpush.bf16.msrb.mxu3 %v9717_v42  ;;  %6479 = vmatmul.bf16.vlgmr.msra.gmra.mxu0 %v12015_v11  ;;  %v8902_v42 = vld [vmem:[#allocation14 + $0x414] sm:$0xf0]  ;;  %v10021_v48 = vor.u32 %v10919_v15, %v10020_v30  ;;  %v10787_v55 = vld [vmem:[#allocation14 + $0x8b0] sm:$0xf0]  ;;  %v8825_v15 = vor.u32 %v10619_v23, %v8824_v37  ;;  %v10766_v17 = vld [vmem:[#allocation14 + $0x808] sm:$0xf0]  ;;  %v8741_v37 = vor.u32 %v10598_v24, %v8740_v0 }
 0x374   :  { %6518 = vmatmul.bf16.vlgmr.msra.gmra.mxu3 %v11833_v2  ;;  %6557 = vmatmul.bf16.vlgmr.msrb.gmra.mxu2 %v11922_v7  ;;  %v12060_v21 = vpop.f32.mrf.mxu3  ;;  %v8905_v50 = vor.u32 %v10636_v63, %v8902_v42  ;;  %v9238_v30 = vld [vmem:[#allocation14 + $0x6b4] sm:$0xf0]  ;;  %v10888_v63 = vld [vmem:[#allocation14 + $0xbdc] sm:$0xf]  ;;  %v9826_v23 = vld [vmem:[#allocation14 + $0xb4c] sm:$0xf0] }
 0x375   :  { %6601 = vmatpush.bf16.msra.mxu2 %v8601_v5  ;;  %v10804_v5 = vld [vmem:[#allocation14 + $0x93c] sm:$0xf]  ;;  %v9910_v42 = vld [vmem:[#allocation14 + $0xbf4] sm:$0xf0] }
 0x376   :  { %6485 = vmatpush.bf16.msra.mxu1 %v10133_v49  ;;  %6524 = vmatpush.bf16.msrb.mxu0 %v9017_v61  ;;  %v9992_v49 = vld [vmem:[#allocation14 + $0xc80] sm:$0xf]  ;;  %v10912_v61 = vld [vmem:[#allocation14 + $0xc98] sm:$0xf0]  ;;  %v9577_v45 = vor.u32 %v10804_v5, %v9574_v44 }
 0x377   :  { %6563 = vmatpush.bf16.msrb.mxu3 %v9689_v52  ;;  %v12062_v25 = vpop.f32.mrf.mxu2  ;;  %v10629_v52 = vld [vmem:[#allocation14 + $0x3c4] sm:$0xf]  ;;  %v8796_v5 = vld [vmem:[#allocation14 + $0x320] sm:$0xf]  ;;  %v10612_v44 = vld [vmem:[#allocation14 + $0x338] sm:$0xf0] }
 0x379   :  { %6602 = vmatpush.bf16.msra.mxu2 %v8573_v54  ;;  %v8874_v54 = vld [vmem:[#allocation14 + $0x3dc] sm:$0xf0] }
 0x37a   :  { %6486 = vmatpush.bf16.msra.mxu1 %v10105_v41  ;;  %6525 = vmatpush.bf16.msrb.mxu0 %v8989_v56  ;;  %v9993_v41 = vor.u32 %v10912_v61, %v9992_v49  ;;  %v8877_v56 = vor.u32 %v10629_v52, %v8874_v54  ;;  %v10713_v49 = vld [vmem:[#allocation14 + $0x664] sm:$0xf]  ;;  %v9210_v61 = vld [vmem:[#allocation14 + $0x67c] sm:$0xf0] }
 0x37b   :  { %6564 = vmatpush.bf16.msrb.mxu3 %v9661_v18  ;;  %v8846_v18 = vld [vmem:[#allocation14 + $0x3a4] sm:$0xf0]  ;;  %v10881_v52 = vld [vmem:[#allocation14 + $0xba4] sm:$0xf]  ;;  %v9882_v54 = vld [vmem:[#allocation14 + $0xbbc] sm:$0xf0] }
 0x37c   :  { %v6261_v26 = vpop.f32.mrf.mxu3 }
 0x37d   :  { %6603 = vmatpush.bf16.msra.mxu2 %v8545_v32  ;;  %v9549_v32 = vor.u32 %v10797_v51, %v9546_v8  ;;  %v8768_v51 = vld [vmem:[#allocation14 + $0x2e8] sm:$0xf]  ;;  %v10605_v8 = vld [vmem:[#allocation14 + $0x300] sm:$0xf0]  ;;  %v9213_v26 = vor.u32 %v10713_v49, %v9210_v61  ;;  %v10752_v49 = vld [vmem:[#allocation14 + $0x798] sm:$0xf0] }
 0x37e   :  { %6487 = vmatpush.bf16.msra.mxu1 %v10077_v34  ;;  %6526 = vmatpush.bf16.msrb.mxu0 %v8961_v9  ;;  %v9266_v34 = vld [vmem:[#allocation14 + $0x6ec] sm:$0xf0]  ;;  %v10895_v9 = vld [vmem:[#allocation14 + $0xc14] sm:$0xf] }
 0x37f   :  { %6565 = vmatpush.bf16.msrb.mxu3 %v9633_v12  ;;  %v6352_v46 = vpop.f32.mrf.mxu2  ;;  %v9965_v12 = vor.u32 %v10905_v3, %v9964_v58  ;;  %v9269_v31 = vor.u32 %v10727_v20, %v9266_v34  ;;  %v9885_v58 = vor.u32 %v10881_v52, %v9882_v54  ;;  %v8769_v3 = vor.u32 %v10605_v8, %v8768_v51  ;;  %v9098_v52 = vld [vmem:[#allocation14 + $0x59c] sm:$0xf0]  ;;  %v10853_v8 = vld [vmem:[#allocation14 + $0xac4] sm:$0xf] }
 0x380   :  { %v9412_v46 = vld [vmem:[#allocation14 + $0x7f0] sm:$0xf] }
 0x381   :  { %6604 = vmatpush.bf16.msra.mxu2 %v8517_v14  ;;  %v8849_v14 = vor.u32 %v10622_v4, %v8846_v18  ;;  %v9441_v4 = vor.u32 %v10773_v19, %v9440_v13  ;;  %v9770_v13 = vld [vmem:[#allocation14 + $0xadc] sm:$0xf0]  ;;  %v8656_v19 = vld [vmem:[#allocation14 + $0x208] sm:$0xf] }
 0x382   :  { %6488 = vmatpush.bf16.msra.mxu1 %v10049_v40  ;;  %6527 = vmatpush.bf16.msrb.mxu0 %v8933_v36  ;;  %v9941_v40 = vor.u32 %v10895_v9, %v9938_v60  ;;  %v10720_v36 = vld [vmem:[#allocation14 + $0x69c] sm:$0xf]  ;;  %v10699_v9 = vld [vmem:[#allocation14 + $0x5f4] sm:$0xf]  ;;  %v9154_v60 = vld [vmem:[#allocation14 + $0x60c] sm:$0xf0] }
 0x383   :  { %6566 = vmatpush.bf16.msrb.mxu3 %v9605_v29  ;;  %v9497_v29 = vor.u32 %v10787_v55, %v9496_v6  ;;  %v8712_v6 = vld [vmem:[#allocation14 + $0x278] sm:$0xf]  ;;  %v10591_v55 = vld [vmem:[#allocation14 + $0x290] sm:$0xf0] }
 0x385   :  { %6605 = vmatpush.bf16.msra.mxu2 %v8489_v38  ;;  %v12064_v38 = vpop.f32.mrf.mxu3 }
 0x386   :  { %6489 = vmatpush.bf16.msra.mxu1 %v10021_v48  ;;  %6528 = vmatpush.bf16.msrb.mxu0 %v8905_v50  ;;  %v9241_v48 = vor.u32 %v10720_v36, %v9238_v30  ;;  %v9913_v50 = vor.u32 %v10888_v63, %v9910_v42  ;;  %v10692_v36 = vld [vmem:[#allocation14 + $0x5bc] sm:$0xf]  ;;  %v9126_v30 = vld [vmem:[#allocation14 + $0x5d4] sm:$0xf0] }
 0x387   :  { %6567 = vmatpush.bf16.msrb.mxu3 %v9577_v45  ;;  %v8797_v45 = vor.u32 %v10612_v44, %v8796_v5  ;;  %v10860_v5 = vld [vmem:[#allocation14 + $0xafc] sm:$0xf]  ;;  %v9798_v44 = vld [vmem:[#allocation14 + $0xb14] sm:$0xf0]  ;;  %v9129_v61 = vor.u32 %v10692_v36, %v9126_v30 }
 0x388   :  { %v8602_v36 = vld [vmem:[#allocation14 + $0x1b4] sm:$0xf0] }
 0x389   :  { %6606 = vmatpush.bf16.msra.mxu2 %v8461_v27  ;;  %v9469_v27 = vor.u32 %v10780_v33, %v9468_v28  ;;  %v8684_v28 = vld [vmem:[#allocation14 + $0x240] sm:$0xf] }
 0x38a   :  { %6490 = vmatpush.bf16.msra.mxu1 %v9993_v41  ;;  %6529 = vmatpush.bf16.msrb.mxu0 %v8877_v56  ;;  %v10706_v41 = vld [vmem:[#allocation14 + $0x62c] sm:$0xf]  ;;  %v9182_v56 = vld [vmem:[#allocation14 + $0x644] sm:$0xf0] }
 0x38b   :  { %6568 = vmatpush.bf16.msrb.mxu3 %v9549_v32  ;;  %v9185_v20 = vor.u32 %v10706_v41, %v9182_v56  ;;  %v10745_v41 = vld [vmem:[#allocation14 + $0x760] sm:$0xf0]  ;;  %v10678_v56 = vld [vmem:[#allocation14 + $0x54c] sm:$0xf] }
 0x38d   :  { %6607 = vmatpush.bf16.msra.mxu2 %v8433_v57  ;;  %v6313_v32 = vpop.f32.mrf.mxu3  ;;  %v10874_v57 = vld [vmem:[#allocation14 + $0xb6c] sm:$0xf] }
 0x38e   :  { %6491 = vmatpush.bf16.msra.mxu1 %v9965_v12  ;;  %6530 = vmatpush.bf16.msrb.mxu0 %v8849_v14  ;;  %v12070_v18 = vpop.f32.mrf.mxu0  ;;  %v9857_v34 = vor.u32 %v10874_v57, %v9854_v10  ;;  %v9413_v12 = vor.u32 %v10766_v17, %v9412_v46  ;;  %v10867_v14 = vld [vmem:[#allocation14 + $0xb34] sm:$0xf]  ;;  %v9070_v32 = vld [vmem:[#allocation14 + $0x564] sm:$0xf0]  ;;  %v10846_v57 = vld [vmem:[#allocation14 + $0xa8c] sm:$0xf] }
 0x38f   :  { %6569 = vmatpush.bf16.msrb.mxu3 %v9521_v1  ;;  %v9384_v1 = vld [vmem:[#allocation14 + $0x7b8] sm:$0xf]  ;;  %v9742_v10 = vld [vmem:[#allocation14 + $0xaa4] sm:$0xf0] }
 0x391   :  { %6608 = vmatpush.bf16.msra.mxu2 %v8405_v43  ;;  %6492 = vmatmul.bf16.vlgmr.msra.gmra.mxu1 %v12037_v22  ;;  %v10759_v43 = vld [vmem:[#allocation14 + $0x7d0] sm:$0xf0] }
 0x392   :  { %6536 = vmatpush.bf16.msrb.mxu1 %v9269_v31  ;;  %6575 = vmatpush.bf16.msra.mxu0 %v9941_v40  ;;  %v9157_v31 = vor.u32 %v10699_v9, %v9154_v60  ;;  %v9829_v40 = vor.u32 %v10867_v14, %v9826_v23  ;;  %v9300_v9 = vld [vmem:[#allocation14 + $0x710] sm:$0xf]  ;;  %v9048_v23 = vld [vmem:[#allocation14 + $0x518] sm:$0xf] }
 0x393   :  { %6614 = vmatpush.bf16.msra.mxu3 %v8825_v15  ;;  %6531 = vmatmul.bf16.vlgmr.msrb.gmra.mxu0 %v11850_v53  ;;  %v8713_v15 = vor.u32 %v10591_v55, %v8712_v6  ;;  %v10162_v14 = vld [vmem:[#allocation14 + $0xdec] sm:$0xf0]  ;;  %v10675_v6 = vld [vmem:[#allocation14 + $0x530] sm:$0xf0]  ;;  %v9720_v55 = vld [vmem:[#allocation14 + $0xa58] sm:$0xf] }
 0x394   :  { %6570 = vmatmul.bf16.vlgmr.msrb.gmra.mxu3 %v11971_v16  ;;  %6609 = vmatmul.bf16.vlgmr.msra.gmra.mxu2 %v11796_v62 }
 0x395   :  { %6653 = vmatpush.bf16.msrb.mxu2 %v9497_v29  ;;  %v9385_v29 = vor.u32 %v10759_v43, %v9384_v1  ;;  %v9073_v1 = vor.u32 %v10678_v56, %v9070_v32  ;;  %v9745_v43 = vor.u32 %v10846_v57, %v9742_v10  ;;  %v8992_v56 = vld [vmem:[#allocation14 + $0x4a8] sm:$0xf]  ;;  %v3861_v10 = vperm.slane %v11995_v59, 2 }
 0x396   :  { %6537 = vmatpush.bf16.msrb.mxu1 %v9241_v48  ;;  %6576 = vmatpush.bf16.msra.mxu0 %v9913_v50  ;;  %v6274_v63 = vpop.f32.mrf.mxu0  ;;  %v12074_v33 = vpop.f32.mrf.mxu3  ;;  %v10584_v48 = vld [vmem:[#allocation14 + $0x258] sm:$0xf0]  ;;  %v9356_v50 = vld [vmem:[#allocation14 + $0x780] sm:$0xf]  ;;  %v8546_v57 = vld [vmem:[#allocation14 + $0x144] sm:$0xf0] }
 0x397   :  { %6615 = vmatpush.bf16.msra.mxu3 %v8797_v45  ;;  %v12072_v42 = vpop.f32.mrf.mxu2  ;;  %v9801_v45 = vor.u32 %v10860_v5, %v9798_v44  ;;  %v8685_v54 = vor.u32 %v10584_v48, %v8684_v28  ;;  %v9357_v51 = vor.u32 %v10752_v49, %v9356_v50  ;;  %v9049_v63 = vor.u32 %v10675_v6, %v9048_v23  ;;  %v10944_v5 = vld [vmem:[#allocation14 + $0xd9c] sm:$0xf]  ;;  %v10134_v44 = vld [vmem:[#allocation14 + $0xdb4] sm:$0xf0]  ;;  %v9020_v50 = vld [vmem:[#allocation14 + $0x4e0] sm:$0xf] }
 0x398   :  { %v10668_v49 = vld [vmem:[#allocation14 + $0x4f8] sm:$0xf0]  ;;  %v9636_v23 = vld [vmem:[#allocation14 + $0x9b0] sm:$0xf]  ;;  %v10822_v6 = vld [vmem:[#allocation14 + $0x9c8] sm:$0xf0] }
 0x399   :  { %6654 = vmatpush.bf16.msrb.mxu2 %v9469_v27  ;;  %v10685_v27 = vld [vmem:[#allocation14 + $0x584] sm:$0xf] }
 0x39a   :  { %6538 = vmatpush.bf16.msrb.mxu1 %v9213_v26  ;;  %6577 = vmatpush.bf16.msra.mxu0 %v9885_v58  ;;  %v10577_v26 = vld [vmem:[#allocation14 + $0x220] sm:$0xf0]  ;;  %v9328_v58 = vld [vmem:[#allocation14 + $0x748] sm:$0xf] }
 0x39b   :  { %6616 = vmatpush.bf16.msra.mxu3 %v8769_v3  ;;  %v9101_v3 = vor.u32 %v10685_v27, %v9098_v52  ;;  %v8657_v0 = vor.u32 %v10577_v26, %v8656_v19  ;;  %v9329_v24 = vor.u32 %v10745_v41, %v9328_v58  ;;  %v10553_v27 = vld [vmem:[#allocation14 + $0x164] sm:$0xf]  ;;  %v8574_v52 = vld [vmem:[#allocation14 + $0x17c] sm:$0xf0] }
 0x39c   :  { %v10937_v19 = vld [vmem:[#allocation14 + $0xd64] sm:$0xf]  ;;  %v10106_v26 = vld [vmem:[#allocation14 + $0xd7c] sm:$0xf0]  ;;  %v8577_v41 = vor.u32 %v10553_v27, %v8574_v52 }
 0x39d   :  { %6655 = vmatpush.bf16.msrb.mxu2 %v9441_v4  ;;  %v9773_v4 = vor.u32 %v10853_v8, %v9770_v13  ;;  %v10137_v8 = vor.u32 %v10944_v5, %v10134_v44  ;;  %v9021_v13 = vor.u32 %v10668_v49, %v9020_v50  ;;  %v9637_v5 = vor.u32 %v10822_v6, %v9636_v23  ;;  %v9608_v50 = vld [vmem:[#allocation14 + $0x978] sm:$0xf]  ;;  %v10815_v49 = vld [vmem:[#allocation14 + $0x990] sm:$0xf0]  ;;  %v10801_v6 = vld [vmem:[#allocation14 + $0x920] sm:$0xf0] }
 0x39e   :  { %6539 = vmatpush.bf16.msrb.mxu1 %v9185_v20  ;;  %6578 = vmatpush.bf16.msra.mxu0 %v9857_v34  ;;  %v12076_v46 = vpop.f32.mrf.mxu0  ;;  %v8628_v20 = vld [vmem:[#allocation14 + $0x1d0] sm:$0xf]  ;;  %v10570_v34 = vld [vmem:[#allocation14 + $0x1e8] sm:$0xf0]  ;;  %v6365_v60 = vpop.f32.mrf.mxu3 }
 0x39f   :  { %6617 = vmatpush.bf16.msra.mxu3 %v8741_v37  ;;  %v6404_v17 = vpop.f32.mrf.mxu2  ;;  %v10738_v37 = vld [vmem:[#allocation14 + $0x728] sm:$0xf0]  ;;  %v8629_v30 = vor.u32 %v10570_v34, %v8628_v20  ;;  %v8964_v60 = vld [vmem:[#allocation14 + $0x470] sm:$0xf] }
 0x3a0   :  { %v10109_v17 = vor.u32 %v10937_v19, %v10106_v26  ;;  %v10930_v34 = vld [vmem:[#allocation14 + $0xd2c] sm:$0xf]  ;;  %v9609_v19 = vor.u32 %v10815_v49, %v9608_v50  ;;  %v10511_v49 = vld [vmem:[#allocation14 + $0x14] sm:$0xf] }
 0x3a1   :  { %6656 = vmatpush.bf16.msrb.mxu2 %v9413_v12  ;;  %v10951_v12 = vld [vmem:[#allocation14 + $0xdd4] sm:$0xf]  ;;  %v10794_v50 = vld [vmem:[#allocation14 + $0x8e8] sm:$0xf0] }
 0x3a2   :  { %6540 = vmatpush.bf16.msrb.mxu1 %v9157_v31  ;;  %6579 = vmatpush.bf16.msra.mxu0 %v9829_v40  ;;  %v10843_v31 = vld [vmem:[#allocation14 + $0xa70] sm:$0xf0]  ;;  %v10560_v40 = vld [vmem:[#allocation14 + $0x19c] sm:$0xf] }
 0x3a3   :  { %6618 = vmatpush.bf16.msra.mxu3 %v8713_v15  ;;  %v9301_v15 = vor.u32 %v10738_v37, %v9300_v9  ;;  %v9721_v28 = vor.u32 %v10843_v31, %v9720_v55  ;;  %v8605_v48 = vor.u32 %v10560_v40, %v8602_v36  ;;  %v10078_v9 = vld [vmem:[#allocation14 + $0xd44] sm:$0xf0]  ;;  %v3875_v31 = vperm.slane %v3861_v10, 0  ;;  %v8462_v10 = vld [vmem:[#allocation14 + $0x9c] sm:$0xf0] }
 0x3a5   :  { %6657 = vmatpush.bf16.msrb.mxu2 %v9385_v29  ;;  %v10165_v29 = vor.u32 %v10951_v12, %v10162_v14  ;;  %v10654_v14 = vld [vmem:[#allocation14 + $0x488] sm:$0xf0] }
 0x3a6   :  { %6541 = vmatpush.bf16.msrb.mxu1 %v9129_v61  ;;  %6580 = vmatpush.bf16.msra.mxu0 %v9801_v45  ;;  %v9692_v61 = vld [vmem:[#allocation14 + $0xa20] sm:$0xf]  ;;  %v10836_v45 = vld [vmem:[#allocation14 + $0xa38] sm:$0xf0] }
 0x3a7   :  { %6619 = vmatpush.bf16.msra.mxu3 %v8685_v54  ;;  %v6326_v54 = vpop.f32.mrf.mxu0  ;;  %v9693_v58 = vor.u32 %v10836_v45, %v9692_v61  ;;  %v10532_v61 = vld [vmem:[#allocation14 + $0xbc] sm:$0xf]  ;;  %v8490_v45 = vld [vmem:[#allocation14 + $0xd4] sm:$0xf0] }
 0x3a8   :  { %v8493_v26 = vor.u32 %v10532_v61, %v8490_v45  ;;  %v8406_v45 = vld [vmem:[#allocation14 + $0x2c] sm:$0xf0] }
 0x3a9   :  { %6658 = vmatpush.bf16.msrb.mxu2 %v9357_v51  ;;  %v6260_v51 = vadd.f32 %v12060_v21, %v12052_v35  ;;  %v10829_v35 = vld [vmem:[#allocation14 + $0xa00] sm:$0xf0]  ;;  %v10546_v21 = vld [vmem:[#allocation14 + $0x12c] sm:$0xf] }
 0x3aa   :  { %6542 = vmatpush.bf16.msrb.mxu1 %v9101_v3  ;;  %6581 = vmatpush.bf16.msra.mxu0 %v9773_v4  ;;  %v10661_v3 = vld [vmem:[#allocation14 + $0x4c0] sm:$0xf0]  ;;  %v9664_v4 = vld [vmem:[#allocation14 + $0x9e8] sm:$0xf]  ;;  %v8549_v12 = vor.u32 %v10546_v21, %v8546_v57  ;;  %v10808_v21 = vld [vmem:[#allocation14 + $0x958] sm:$0xf0] }
 0x3ab   :  { %6620 = vmatpush.bf16.msra.mxu3 %v8657_v0  ;;  %v6273_v32 = vadd.f32 %v12070_v18, %v6260_v51  ;;  %v3862_v0 = vperm.slane %v11995_v59, 4  ;;  %v8993_v18 = vor.u32 %v10661_v3, %v8992_v56  ;;  %v9665_v37 = vor.u32 %v10829_v35, %v9664_v4  ;;  %v8908_v56 = vld [vmem:[#allocation14 + $0x400] sm:$0xf]  ;;  %v10640_v3 = vld [vmem:[#allocation14 + $0x418] sm:$0xf0] }
 0x3ac   :  { %v9580_v4 = vld [vmem:[#allocation14 + $0x940] sm:$0xf]  ;;  %v6299_v35 = vadd.f32 %v12054_v47, %v3875_v31  ;;  %v10525_v57 = vld [vmem:[#allocation14 + $0x84] sm:$0xf] }
 0x3ad   :  { %6659 = vmatpush.bf16.msrb.mxu2 %v9329_v24  ;;  %v3876_v40 = vperm.slane %v3862_v0, 0  ;;  %v9581_v47 = vor.u32 %v10808_v21, %v9580_v4  ;;  %v9498_v4 = vld [vmem:[#allocation14 + $0x8b4] sm:$0xf0]  ;;  %v10724_v21 = vld [vmem:[#allocation14 + $0x6b8] sm:$0xf0] }
 0x3ae   :  { %6543 = vmatpush.bf16.msrb.mxu1 %v9073_v1  ;;  %6582 = vmatpush.bf16.msra.mxu0 %v9745_v43  ;;  %v6285_v24 = vpop.f32.mrf.mxu1  ;;  %v10539_v1 = vld [vmem:[#allocation14 + $0xf4] sm:$0xf]  ;;  %v8518_v43 = vld [vmem:[#allocation14 + $0x10c] sm:$0xf0] }
 0x3af   :  { %6621 = vmatpush.bf16.msra.mxu3 %v8629_v30  ;;  %v6286_v20 = vadd.f32 %v6285_v24, %v6273_v32  ;;  %v10081_v30 = vor.u32 %v10930_v34, %v10078_v9  ;;  %v8521_v44 = vor.u32 %v10539_v1, %v8518_v43  ;;  %v6403_v52 = vadd.f32 %v12072_v42, %v3876_v40  ;;  %v10909_v34 = vld [vmem:[#allocation14 + $0xc84] sm:$0xf]  ;;  %v9994_v9 = vld [vmem:[#allocation14 + $0xc9c] sm:$0xf0]  ;;  %v10902_v43 = vld [vmem:[#allocation14 + $0xc4c] sm:$0xf] }
 0x3b0   :  { %v12087_v36 = vpop.f32.mrf.mxu0  ;;  %v6312_v24 = vadd.f32 %v12064_v38, %v6299_v35  ;;  %v10518_v38 = vld [vmem:[#allocation14 + $0x4c] sm:$0xf]  ;;  %v9997_v31 = vor.u32 %v10909_v34, %v9994_v9  ;;  %v9244_v35 = vld [vmem:[#allocation14 + $0x6a0] sm:$0xf] }
 0x3b1   :  { %6660 = vmatpush.bf16.msrb.mxu2 %v9301_v15  ;;  %6544 = vmatmul.bf16.vlgmr.msrb.gmra.mxu1 %v11886_v39  ;;  %v10178_v55 = vmul.f32 -1.442695, %v6286_v20  ;;  %v8965_v15 = vor.u32 %v10654_v14, %v8964_v60  ;;  %v8909_v20 = vor.u32 %v10640_v3, %v8908_v56  ;;  %v8465_v60 = vor.u32 %v10525_v57, %v8462_v10  ;;  %v9552_v14 = vld [vmem:[#allocation14 + $0x908] sm:$0xf]  ;;  %v8826_v56 = vld [vmem:[#allocation14 + $0x374] sm:$0xf0] }
 0x3b2   :  { %6588 = vmatpush.bf16.msra.mxu1 %v10165_v29  ;;  %6627 = vmatpush.bf16.msrb.mxu0 %v9049_v63  ;;  %v10923_v29 = vld [vmem:[#allocation14 + $0xcf4] sm:$0xf]  ;;  %v10050_v63 = vld [vmem:[#allocation14 + $0xd0c] sm:$0xf0]  ;;  %v6325_v23 = vadd.f32 %v12076_v46, %v6312_v24  ;;  %v10784_v3 = vld [vmem:[#allocation14 + $0x89c] sm:$0xf] }
 0x3b3   :  { %6666 = vmatpush.bf16.msrb.mxu3 %v9721_v28  ;;  %6583 = vmatmul.bf16.vlgmr.msra.gmra.mxu0 %v12015_v11  ;;  %11003 = vpow2.f32 %v10178_v55  ;;  %v8936_v28 = vld [vmem:[#allocation14 + $0x438] sm:$0xf]  ;;  %v10053_v54 = vor.u32 %v10923_v29, %v10050_v63  ;;  %v8434_v55 = vld [vmem:[#allocation14 + $0x64] sm:$0xf0]  ;;  %v8852_v29 = vld [vmem:[#allocation14 + $0x390] sm:$0xf]  ;;  %v9501_v9 = vor.u32 %v10784_v3, %v9498_v4 }
 0x3b4   :  { %6622 = vmatmul.bf16.vlgmr.msra.gmra.mxu3 %v11833_v2  ;;  %6661 = vmatmul.bf16.vlgmr.msrb.gmra.mxu2 %v11922_v7  ;;  %v10626_v63 = vld [vmem:[#allocation14 + $0x3a8] sm:$0xf0]  ;;  %v9524_v46 = vld [vmem:[#allocation14 + $0x8d0] sm:$0xf] }
 0x3b5   :  { %6705 = vmatpush.bf16.msra.mxu2 %v8605_v48  ;;  %v10647_v48 = vld [vmem:[#allocation14 + $0x450] sm:$0xf0] }
 0x3b6   :  { %6589 = vmatpush.bf16.msra.mxu1 %v10137_v8  ;;  %6628 = vmatpush.bf16.msrb.mxu0 %v9021_v13  ;;  %v6287_v27 = vpop.f32.mrf.mxu1  ;;  %v8937_v51 = vor.u32 %v10647_v48, %v8936_v28  ;;  %v10916_v8 = vld [vmem:[#allocation14 + $0xcbc] sm:$0xf]  ;;  %v10022_v13 = vld [vmem:[#allocation14 + $0xcd4] sm:$0xf0] }
 0x3b7   :  { %6667 = vmatpush.bf16.msrb.mxu3 %v9693_v58  ;;  %v6415_v58 = vpop.f32.mrf.mxu3  ;;  %v9272_v27 = vld [vmem:[#allocation14 + $0x6d8] sm:$0xf] }
 0x3b8   :  { %v12093_v42 = vadd.f32 %v6415_v58, %v6403_v52  ;;  %v10731_v52 = vld [vmem:[#allocation14 + $0x6f0] sm:$0xf0]  ;;  %v8853_v58 = vor.u32 %v10626_v63, %v8852_v29 }
 0x3b9   :  { %6706 = vmatpush.bf16.msra.mxu2 %v8577_v41  ;;  %v12090_v41 = vpop.f32.mrf.mxu2  ;;  %v11004_v32 = vpop.eup %11003  ;;  %v9273_v10 = vor.u32 %v10731_v52, %v9272_v27  ;;  %v9188_v27 = vld [vmem:[#allocation14 + $0x630] sm:$0xf]  ;;  %v10710_v52 = vld [vmem:[#allocation14 + $0x648] sm:$0xf0] }
 0x3ba   :  { %6590 = vmatpush.bf16.msra.mxu1 %v10109_v17  ;;  %6629 = vmatpush.bf16.msrb.mxu0 %v8993_v18  ;;  %v12095_v0 = vadd.f32 1.0, %v11004_v32  ;;  %v6378_v17 = vpop.f32.mrf.mxu0  ;;  %v10025_v18 = vor.u32 %v10916_v8, %v10022_v13  ;;  %v10899_v8 = vld [vmem:[#allocation14 + $0xc30] sm:$0xf0]  ;;  %v10616_v13 = vld [vmem:[#allocation14 + $0x35c] sm:$0xf]  ;;  %v8409_v32 = vor.u32 %v10511_v49, %v8406_v45  ;;  %v9189_v4 = vor.u32 %v10710_v52, %v9188_v27 }
 0x3bb   :  { %6668 = vmatpush.bf16.msrb.mxu3 %v9665_v37  ;;  %v8880_v37 = vld [vmem:[#allocation14 + $0x3c8] sm:$0xf]  ;;  %v9916_v17 = vld [vmem:[#allocation14 + $0xbe0] sm:$0xf]  ;;  %v8829_v34 = vor.u32 %v10616_v13, %v8826_v56  ;;  %v10878_v13 = vld [vmem:[#allocation14 + $0xb88] sm:$0xf0] }
 0x3bc   :  { %11005 = vrcp.f32 %v12095_v0  ;;  %vm6946_vm10 = vweird.f32 %v12095_v0  ;;  %v9414_v56 = vld [vmem:[#allocation14 + $0x80c] sm:$0xf0]  ;;  %v10742_v27 = vld [vmem:[#allocation14 + $0x74c] sm:$0xf]  ;;  %v9330_v52 = vld [vmem:[#allocation14 + $0x764] sm:$0xf0] }
 0x3bd   :  { %6707 = vmatpush.bf16.msra.mxu2 %v8549_v12  ;;  %v10633_v12 = vld [vmem:[#allocation14 + $0x3e0] sm:$0xf0] }
 0x3be   :  { %6591 = vmatpush.bf16.msra.mxu1 %v10081_v30  ;;  %6630 = vmatpush.bf16.msrb.mxu0 %v8965_v15  ;;  %v6337_v1 = vpop.f32.mrf.mxu1  ;;  %v8881_v40 = vor.u32 %v10633_v12, %v8880_v37  ;;  %v9966_v15 = vld [vmem:[#allocation14 + $0xc64] sm:$0xf0]  ;;  %v8798_v37 = vld [vmem:[#allocation14 + $0x33c] sm:$0xf0] }
 0x3bf   :  { %6669 = vmatpush.bf16.msrb.mxu3 %v9637_v5  ;;  %v6338_v30 = vadd.f32 %v6337_v1, %v6325_v23  ;;  %v9553_v5 = vor.u32 %v10801_v6, %v9552_v14  ;;  %v6417_v28 = vpop.f32.mrf.mxu3  ;;  %v6950_v14 = vand.u32 2147483647, %v12095_v0  ;;  %v10777_v23 = vld [vmem:[#allocation14 + $0x864] sm:$0xf]  ;;  %v9470_v6 = vld [vmem:[#allocation14 + $0x87c] sm:$0xf0]  ;;  %v9245_v1 = vor.u32 %v10724_v21, %v9244_v35 }
 0x3c0   :  { %v9473_v63 = vor.u32 %v10777_v23, %v9470_v6  ;;  %v10703_v35 = vld [vmem:[#allocation14 + $0x610] sm:$0xf0] }
 0x3c1   :  { %6708 = vmatpush.bf16.msra.mxu2 %v8521_v44  ;;  %v8437_v44 = vor.u32 %v10518_v38, %v8434_v55  ;;  %v6456_v48 = vpop.f32.mrf.mxu2  ;;  %v12101_v61 = vadd.f32 %v12062_v25, %v6338_v30  ;;  %v9525_v25 = vor.u32 %v10794_v50, %v9524_v46  ;;  %v9216_v38 = vld [vmem:[#allocation14 + $0x668] sm:$0xf]  ;;  %v10885_v30 = vld [vmem:[#allocation14 + $0xbc0] sm:$0xf0]  ;;  %vm6951_vm12 = vcmp.eq.f32.partialorder %v6950_v14, 8.507059e+37 }
 0x3c2   :  { %6592 = vmatpush.bf16.msra.mxu1 %v10053_v54  ;;  %6631 = vmatpush.bf16.msrb.mxu0 %v8937_v51  ;;  %v12103_v54 = vpop.eup %11005  ;;  %v9944_v51 = vld [vmem:[#allocation14 + $0xc18] sm:$0xf]  ;;  %v9442_v48 = vld [vmem:[#allocation14 + $0x844] sm:$0xf0] }
 0x3c3   :  { %6670 = vmatpush.bf16.msrb.mxu3 %v9609_v19  ;;  %v6942_v19 = vmul.f32 %v12103_v54, %v12095_v0  ;;  %v9945_v24 = vor.u32 %v10899_v8, %v9944_v51  ;;  %vm6947_vm9 = vweird.f32 %v12103_v54  ;;  %v6364_v50 = vadd.f32 %v12074_v33, %v12101_v61  ;;  %v9860_v8 = vld [vmem:[#allocation14 + $0xb70] sm:$0xf] }
 0x3c4   :  { %vm6948_vm11 = vmor %vm6946_vm10, %vm6947_vm9 }
 0x3c5   :  { %6709 = vmatpush.bf16.msra.mxu2 %v8493_v26  ;;  %v9969_v26 = vor.u32 %v10902_v43, %v9966_v15  ;;  %v6943_v57 = vsub.f32 1.0, %v6942_v19  ;;  %v10595_v19 = vld [vmem:[#allocation14 + $0x2b4] sm:$0xf]  ;;  %v6377_v33 = vadd.f32 %v12087_v36, %v6364_v50  ;;  %v10857_v50 = vld [vmem:[#allocation14 + $0xae0] sm:$0xf0] }
 0x3c6   :  { %6593 = vmatpush.bf16.msra.mxu1 %v10025_v18  ;;  %6632 = vmatpush.bf16.msrb.mxu0 %v8909_v20  ;;  %v10892_v18 = vld [vmem:[#allocation14 + $0xbf8] sm:$0xf0]  ;;  %v6952_v20 = vand.u32 2147483648, %v12095_v0  ;;  %v10770_v0 = vld [vmem:[#allocation14 + $0x82c] sm:$0xf] }
 0x3c7   :  { %6671 = vmatpush.bf16.msrb.mxu3 %v9581_v47  ;;  %v6339_v47 = vpop.f32.mrf.mxu1  ;;  %v6944_v12 = vmul.f32 %v12103_v54, %v6943_v57  ;;  %v9917_v43 = vor.u32 %v10892_v18, %v9916_v17  ;;  %v9445_v51 = vor.u32 %v10770_v0, %v9442_v48  ;;  %v10871_v17 = vld [vmem:[#allocation14 + $0xb50] sm:$0xf0]  ;;  %v10588_v18 = vld [vmem:[#allocation14 + $0x27c] sm:$0xf] }
 0x3c8   :  { %v6953_v15 = vor.u32 1.1754944e-38, %v6952_v20  ;;  %v8714_v20 = vld [vmem:[#allocation14 + $0x294] sm:$0xf0] }
 0x3c9   :  { %6710 = vmatpush.bf16.msra.mxu2 %v8465_v60  ;;  %v10609_v60 = vld [vmem:[#allocation14 + $0x324] sm:$0xf]  ;;  %v6945_v55 = vadd.f32 %v12103_v54, %v6944_v12  ;;  %v10696_v12 = vld [vmem:[#allocation14 + $0x5d8] sm:$0xf0]  ;;  %v8717_v14 = vor.u32 %v10588_v18, %v8714_v20  ;;  %v9050_v18 = vld [vmem:[#allocation14 + $0x534] sm:$0xf0] }
 0x3ca   :  { %6594 = vmatpush.bf16.msra.mxu1 %v9997_v31  ;;  %6633 = vmatpush.bf16.msrb.mxu0 %v8881_v40  ;;  %v10717_v31 = vld [vmem:[#allocation14 + $0x680] sm:$0xf0]  ;;  %v9888_v40 = vld [vmem:[#allocation14 + $0xba8] sm:$0xf]  ;;  %v8801_v29 = vor.u32 %v10609_v60, %v8798_v37  ;;  %v9132_v37 = vld [vmem:[#allocation14 + $0x5c0] sm:$0xf] }
 0x3cb   :  { %6672 = vmatpush.bf16.msrb.mxu3 %v9553_v5  ;;  %v10602_v5 = vld [vmem:[#allocation14 + $0x2ec] sm:$0xf]  ;;  %v6949_v28 = vsel %vm6948_vm11, %v12103_v54, %v6945_v55  ;;  %v9217_v49 = vor.u32 %v10717_v31, %v9216_v38  ;;  %v9889_v45 = vor.u32 %v10885_v30, %v9888_v40  ;;  %v9804_v38 = vld [vmem:[#allocation14 + $0xb00] sm:$0xf]  ;;  %v10864_v55 = vld [vmem:[#allocation14 + $0xb18] sm:$0xf0] }
 0x3cc   :  { %v6954_v46 = vsel %vm6951_vm12, %v6953_v15, %v6949_v28  ;;  %v8686_v31 = vld [vmem:[#allocation14 + $0x25c] sm:$0xf0]  ;;  %v10749_v40 = vld [vmem:[#allocation14 + $0x784] sm:$0xf]  ;;  %v10840_v20 = vld [vmem:[#allocation14 + $0xa5c] sm:$0xf] }
 0x3cd   :  { %6711 = vmatpush.bf16.msra.mxu2 %v8437_v44  ;;  %v8770_v44 = vld [vmem:[#allocation14 + $0x304] sm:$0xf0]  ;;  %7046 = vst [vmem:[#allocation17] sm:$0xff] %v6954_v46  ;;  %v9358_v30 = vld [vmem:[#allocation14 + $0x79c] sm:$0xf0] }
 0x3ce   :  { %6595 = vmatpush.bf16.msra.mxu1 %v9969_v26  ;;  %6634 = vmatpush.bf16.msrb.mxu0 %v8853_v58  ;;  %v8773_v54 = vor.u32 %v10602_v5, %v8770_v44  ;;  %v8742_v26 = vld [vmem:[#allocation14 + $0x2cc] sm:$0xf0]  ;;  %v10763_v58 = vld [vmem:[#allocation14 + $0x7f4] sm:$0xf]  ;;  %v12122_v3 = vpop.f32.mrf.mxu0  ;;  %v9805_v5 = vor.u32 %v10864_v55, %v9804_v38  ;;  %v9104_v44 = vld [vmem:[#allocation14 + $0x588] sm:$0xf]  ;;  %v9361_v48 = vor.u32 %v10749_v40, %v9358_v30 }
 0x3cf   :  { %6673 = vmatpush.bf16.msrb.mxu3 %v9525_v25  ;;  %v9861_v25 = vor.u32 %v10878_v13, %v9860_v8  ;;  %v8745_v57 = vor.u32 %v10595_v19, %v8742_v26  ;;  %v10689_v28 = vld [vmem:[#allocation14 + $0x5a0] sm:$0xf0]  ;;  %v9776_v46 = vld [vmem:[#allocation14 + $0xac8] sm:$0xf]  ;;  %v10682_v8 = vld [vmem:[#allocation14 + $0x568] sm:$0xf0] }
 0x3d0   :  { %v6389_v61 = vpop.f32.mrf.mxu1  ;;  %v9105_v19 = vor.u32 %v10689_v28, %v9104_v44  ;;  %v9777_v26 = vor.u32 %v10857_v50, %v9776_v46  ;;  %v10140_v38 = vld [vmem:[#allocation14 + $0xda0] sm:$0xf]  ;;  %v10948_v55 = vld [vmem:[#allocation14 + $0xdb8] sm:$0xf0]  ;;  %v10665_v40 = vld [vmem:[#allocation14 + $0x4e4] sm:$0xf] }
 0x3d1   :  { %6712 = vmatpush.bf16.msra.mxu2 %v8409_v32  ;;  %6596 = vmatmul.bf16.vlgmr.msra.gmra.mxu1 %v12037_v22  ;;  %v9160_v32 = vld [vmem:[#allocation14 + $0x5f8] sm:$0xf]  ;;  %v6390_v21 = vadd.f32 %v6389_v61, %v6377_v33  ;;  %v9333_v61 = vor.u32 %v10742_v27, %v9330_v52  ;;  %v9022_v30 = vld [vmem:[#allocation14 + $0x4fc] sm:$0xf0]  ;;  %v10557_v44 = vld [vmem:[#allocation14 + $0x180] sm:$0xf0] }
 0x3d2   :  { %6640 = vmatpush.bf16.msrb.mxu1 %v9273_v10  ;;  %6679 = vmatpush.bf16.msra.mxu0 %v9945_v24  ;;  %v9417_v10 = vor.u32 %v10763_v58, %v9414_v56  ;;  %v9832_v24 = vld [vmem:[#allocation14 + $0xb38] sm:$0xf]  ;;  %v9161_v36 = vor.u32 %v10703_v35, %v9160_v32  ;;  %v9748_v58 = vld [vmem:[#allocation14 + $0xa90] sm:$0xf]  ;;  %v10850_v56 = vld [vmem:[#allocation14 + $0xaa8] sm:$0xf0]  ;;  %v9025_v46 = vor.u32 %v10665_v40, %v9022_v30 }
 0x3d3   :  { %6718 = vmatpush.bf16.msra.mxu3 %v8829_v34  ;;  %6635 = vmatmul.bf16.vlgmr.msrb.gmra.mxu0 %v11850_v53  ;;  %v10756_v34 = vld [vmem:[#allocation14 + $0x7bc] sm:$0xf]  ;;  %v10179_v47 = vmul.f32 -1.442695, %v6390_v21  ;;  %v9833_v60 = vor.u32 %v10871_v17, %v9832_v24  ;;  %v8630_v32 = vld [vmem:[#allocation14 + $0x1ec] sm:$0xf0] }
 0x3d4   :  { %6674 = vmatmul.bf16.vlgmr.msrb.gmra.mxu3 %v11971_v16  ;;  %6713 = vmatmul.bf16.vlgmr.msra.gmra.mxu2 %v11796_v62  ;;  %v10735_v35 = vld [vmem:[#allocation14 + $0x714] sm:$0xf]  ;;  %v10672_v17 = vld [vmem:[#allocation14 + $0x51c] sm:$0xf]  ;;  %v10941_v50 = vld [vmem:[#allocation14 + $0xd80] sm:$0xf0] }
 0x3d5   :  { %6757 = vmatpush.bf16.msrb.mxu2 %v9501_v9  ;;  %v9386_v9 = vld [vmem:[#allocation14 + $0x7d4] sm:$0xf0]  ;;  %11007 = vpow2.f32 %v10179_v47  ;;  %v10955_v24 = vld [vmem:[#allocation14 + $0xdf0] sm:$0xf0]  ;;  %v10812_v30 = vld [vmem:[#allocation14 + $0x97c] sm:$0xf] }
 0x3d6   :  { %6641 = vmatpush.bf16.msrb.mxu1 %v9245_v1  ;;  %6680 = vmatpush.bf16.msra.mxu0 %v9917_v43  ;;  %v9389_v23 = vor.u32 %v10756_v34, %v9386_v9  ;;  %v10581_v1 = vld [vmem:[#allocation14 + $0x244] sm:$0xf]  ;;  %v6430_v15 = vpop.f32.mrf.mxu0  ;;  %v9749_v9 = vor.u32 %v10850_v56, %v9748_v58  ;;  %v9722_v47 = vld [vmem:[#allocation14 + $0xa74] sm:$0xf0]  ;;  %v10550_v58 = vld [vmem:[#allocation14 + $0x148] sm:$0xf0] }
 0x3d7   :  { %6719 = vmatpush.bf16.msra.mxu3 %v8801_v29  ;;  %v12125_v6 = vpop.f32.mrf.mxu3  ;;  %v12127_v43 = vpop.f32.mrf.mxu2  ;;  %v8689_v0 = vor.u32 %v10581_v1, %v8686_v31  ;;  %v9725_v1 = vor.u32 %v10840_v20, %v9722_v47  ;;  %v10833_v15 = vld [vmem:[#allocation14 + $0xa24] sm:$0xf]  ;;  %v6429_v20 = vadd.f32 %v12122_v3, %v12093_v42  ;;  %v10543_v47 = vld [vmem:[#allocation14 + $0x110] sm:$0xf0]  ;;  %v10644_v3 = vld [vmem:[#allocation14 + $0x43c] sm:$0xf] }
 0x3d8   :  { %v6391_v29 = vpop.f32.mrf.mxu1  ;;  %v10927_v42 = vld [vmem:[#allocation14 + $0xd10] sm:$0xf0]  ;;  %v8938_v40 = vld [vmem:[#allocation14 + $0x454] sm:$0xf0] }
 0x3d9   :  { %6758 = vmatpush.bf16.msrb.mxu2 %v9473_v63  ;;  %v9133_v63 = vor.u32 %v10696_v12, %v9132_v37 }
 0x3da   :  { %6642 = vmatpush.bf16.msrb.mxu1 %v9217_v49  ;;  %6681 = vmatpush.bf16.msra.mxu0 %v9889_v45  ;;  %v10574_v49 = vld [vmem:[#allocation14 + $0x20c] sm:$0xf]  ;;  %v8658_v45 = vld [vmem:[#allocation14 + $0x224] sm:$0xf0] }
 0x3db   :  { %6720 = vmatpush.bf16.msra.mxu3 %v8773_v54  ;;  %v11008_v54 = vpop.eup %11007  ;;  %v8661_v33 = vor.u32 %v10574_v49, %v8658_v45  ;;  %v10658_v49 = vld [vmem:[#allocation14 + $0x4ac] sm:$0xf]  ;;  %v8994_v45 = vld [vmem:[#allocation14 + $0x4c4] sm:$0xf0] }
 0x3dc   :  { %v12129_v13 = vadd.f32 1.0, %v11008_v54 }
 0x3dd   :  { %6759 = vmatpush.bf16.msrb.mxu2 %v9445_v51  ;;  %v9076_v51 = vld [vmem:[#allocation14 + $0x550] sm:$0xf] }
 0x3de   :  { %6643 = vmatpush.bf16.msrb.mxu1 %v9189_v4  ;;  %6682 = vmatpush.bf16.msra.mxu0 %v9861_v25  ;;  %v10567_v25 = vld [vmem:[#allocation14 + $0x1d4] sm:$0xf]  ;;  %11009 = vrcp.f32 %v12129_v13  ;;  %v9077_v34 = vor.u32 %v10682_v8, %v9076_v51  ;;  %v10826_v51 = vld [vmem:[#allocation14 + $0x9ec] sm:$0xf]  ;;  %v9666_v8 = vld [vmem:[#allocation14 + $0xa04] sm:$0xf0]  ;;  %vm6961_vm14 = vweird.f32 %v12129_v13 }
 0x3df   :  { %6721 = vmatpush.bf16.msra.mxu3 %v8745_v57  ;;  %v6469_v4 = vpop.f32.mrf.mxu3  ;;  %v6508_v21 = vpop.f32.mrf.mxu2  ;;  %v9302_v57 = vld [vmem:[#allocation14 + $0x72c] sm:$0xf0]  ;;  %v8633_v37 = vor.u32 %v10567_v25, %v8630_v32  ;;  %v8997_v25 = vor.u32 %v10658_v49, %v8994_v45  ;;  %v10637_v45 = vld [vmem:[#allocation14 + $0x404] sm:$0xf] }
 0x3e0   :  { %v9305_v12 = vor.u32 %v10735_v35, %v9302_v57  ;;  %v10084_v32 = vld [vmem:[#allocation14 + $0xd30] sm:$0xf]  ;;  %v10934_v35 = vld [vmem:[#allocation14 + $0xd48] sm:$0xf0]  ;;  %v10651_v21 = vld [vmem:[#allocation14 + $0x474] sm:$0xf] }
 0x3e1   :  { %6760 = vmatpush.bf16.msrb.mxu2 %v9417_v10  ;;  %v10168_v10 = vld [vmem:[#allocation14 + $0xdd8] sm:$0xf] }
 0x3e2   :  { %6644 = vmatpush.bf16.msrb.mxu1 %v9161_v36  ;;  %6683 = vmatpush.bf16.msra.mxu0 %v9833_v60  ;;  %v8608_v36 = vld [vmem:[#allocation14 + $0x1a0] sm:$0xf]  ;;  %v10564_v60 = vld [vmem:[#allocation14 + $0x1b8] sm:$0xf0] }
 0x3e3   :  { %6722 = vmatpush.bf16.msra.mxu3 %v8717_v14  ;;  %v10169_v14 = vor.u32 %v10955_v24, %v10168_v10  ;;  %v8609_v31 = vor.u32 %v10564_v60, %v8608_v36  ;;  %v9669_v10 = vor.u32 %v10826_v51, %v9666_v8  ;;  %v9582_v51 = vld [vmem:[#allocation14 + $0x95c] sm:$0xf0]  ;;  %v8468_v8 = vld [vmem:[#allocation14 + $0x88] sm:$0xf] }
 0x3e4   :  { %v12132_v29 = vpop.eup %11009 }
 0x3e5   :  { %6761 = vmatpush.bf16.msrb.mxu2 %v9389_v23  ;;  %v9053_v23 = vor.u32 %v10672_v17, %v9050_v18  ;;  %v6957_v28 = vmul.f32 %v12132_v29, %v12129_v13  ;;  %vm6962_vm13 = vweird.f32 %v12132_v29  ;;  %v10819_v17 = vld [vmem:[#allocation14 + $0x9b4] sm:$0xf]  ;;  %v9638_v18 = vld [vmem:[#allocation14 + $0x9cc] sm:$0xf0] }
 0x3e6   :  { %6645 = vmatpush.bf16.msrb.mxu1 %v9133_v63  ;;  %6684 = vmatpush.bf16.msra.mxu0 %v9805_v5  ;;  %v9694_v63 = vld [vmem:[#allocation14 + $0xa3c] sm:$0xf0]  ;;  %v8580_v5 = vld [vmem:[#allocation14 + $0x168] sm:$0xf]  ;;  %vm6963_vm15 = vmor %vm6961_vm14, %vm6962_vm13 }
 0x3e7   :  { %6723 = vmatpush.bf16.msra.mxu3 %v8689_v0  ;;  %v10112_v0 = vld [vmem:[#allocation14 + $0xd68] sm:$0xf]  ;;  %v6958_v27 = vsub.f32 1.0, %v6957_v28  ;;  %v9697_v52 = vor.u32 %v10833_v15, %v9694_v63  ;;  %v8581_v54 = vor.u32 %v10557_v44, %v8580_v5  ;;  %v8496_v63 = vld [vmem:[#allocation14 + $0xc0] sm:$0xf]  ;;  %v8941_v28 = vor.u32 %v10644_v3, %v8938_v40 }
 0x3e8   :  { %v10113_v4 = vor.u32 %v10941_v50, %v10112_v0  ;;  %v10536_v5 = vld [vmem:[#allocation14 + $0xd8] sm:$0xf0]  ;;  %v10028_v0 = vld [vmem:[#allocation14 + $0xcc0] sm:$0xf] }
 0x3e9   :  { %6762 = vmatpush.bf16.msrb.mxu2 %v9361_v48  ;;  %v10141_v48 = vor.u32 %v10948_v55, %v10140_v38  ;;  %v6959_v56 = vmul.f32 %v12132_v29, %v6958_v27  ;;  %v10056_v38 = vld [vmem:[#allocation14 + $0xcf8] sm:$0xf]  ;;  %v8497_v49 = vor.u32 %v10536_v5, %v8496_v63  ;;  %v8910_v27 = vld [vmem:[#allocation14 + $0x41c] sm:$0xf0]  ;;  %v10728_v3 = vld [vmem:[#allocation14 + $0x6dc] sm:$0xf] }
 0x3ea   :  { %6646 = vmatpush.bf16.msrb.mxu1 %v9105_v19  ;;  %6685 = vmatpush.bf16.msra.mxu0 %v9777_v26  ;;  %v6967_v19 = vand.u32 2147483648, %v12129_v13  ;;  %v8552_v26 = vld [vmem:[#allocation14 + $0x130] sm:$0xf]  ;;  %v10057_v44 = vor.u32 %v10927_v42, %v10056_v38  ;;  %v10515_v42 = vld [vmem:[#allocation14 + $0x30] sm:$0xf0] }
 0x3eb   :  { %6724 = vmatpush.bf16.msra.mxu3 %v8661_v33  ;;  %v6965_v33 = vand.u32 2147483647, %v12129_v13  ;;  %v6960_v57 = vadd.f32 %v12132_v29, %v6959_v56  ;;  %v8553_v24 = vor.u32 %v10550_v58, %v8552_v26  ;;  %v8832_v40 = vld [vmem:[#allocation14 + $0x360] sm:$0xf]  ;;  %v10620_v63 = vld [vmem:[#allocation14 + $0x378] sm:$0xf0] }
 0x3ec   :  { %v9504_v5 = vld [vmem:[#allocation14 + $0x8a0] sm:$0xf] }
 0x3ed   :  { %6763 = vmatpush.bf16.msrb.mxu2 %v9333_v61  ;;  %v3863_v61 = vperm.slane %v11995_v59, 6  ;;  %v8966_v59 = vld [vmem:[#allocation14 + $0x48c] sm:$0xf0]  ;;  %v6964_v36 = vsel %vm6963_vm15, %v12132_v29, %v6960_v57  ;;  %vm6966_vm0 = vcmp.eq.f32.partialorder %v6965_v33, 8.507059e+37  ;;  %v9610_v29 = vld [vmem:[#allocation14 + $0x994] sm:$0xf0]  ;;  %v8913_v33 = vor.u32 %v10637_v45, %v8910_v27 }
 0x3ee   :  { %6647 = vmatpush.bf16.msrb.mxu1 %v9077_v34  ;;  %6686 = vmatpush.bf16.msra.mxu0 %v9749_v9  ;;  %v6968_v34 = vor.u32 1.1754944e-38, %v6967_v19  ;;  %v8524_v9 = vld [vmem:[#allocation14 + $0xf8] sm:$0xf]  ;;  %v6441_v13 = vpop.f32.mrf.mxu1  ;;  %v9613_v50 = vor.u32 %v10812_v30, %v9610_v29  ;;  %v10529_v19 = vld [vmem:[#allocation14 + $0xa0] sm:$0xf0]  ;;  %v8833_v45 = vor.u32 %v10620_v63, %v8832_v40 }
 0x3ef   :  { %6725 = vmatpush.bf16.msra.mxu3 %v8633_v37  ;;  %v10085_v37 = vor.u32 %v10934_v35, %v10084_v32  ;;  %v3877_v55 = vperm.slane %v3863_v61, 0  ;;  %v10000_v61 = vld [vmem:[#allocation14 + $0xc88] sm:$0xf]  ;;  %v8469_v32 = vor.u32 %v10529_v19, %v8468_v8  ;;  %v10630_v35 = vld [vmem:[#allocation14 + $0x3cc] sm:$0xf] }
 0x3f0   :  { %v12152_v60 = vpop.f32.mrf.mxu0  ;;  %v10798_v57 = vld [vmem:[#allocation14 + $0x90c] sm:$0xf]  ;;  %v10613_v8 = vld [vmem:[#allocation14 + $0x340] sm:$0xf0]  ;;  %v9476_v19 = vld [vmem:[#allocation14 + $0x868] sm:$0xf] }
 0x3f1   :  { %6764 = vmatpush.bf16.msrb.mxu2 %v9305_v12  ;;  %6648 = vmatmul.bf16.vlgmr.msrb.gmra.mxu1 %v11886_v39  ;;  %v6969_v12 = vsel %vm6966_vm0, %v6968_v34, %v6964_v36  ;;  %v10906_v34 = vld [vmem:[#allocation14 + $0xc68] sm:$0xf0]  ;;  %v10592_v63 = vld [vmem:[#allocation14 + $0x298] sm:$0xf0] }
 0x3f2   :  { %6692 = vmatpush.bf16.msra.mxu1 %v10169_v14  ;;  %6731 = vmatpush.bf16.msrb.mxu0 %v9053_v23  ;;  %v6442_v14 = vadd.f32 %v6441_v13, %v6429_v20  ;;  %v8969_v23 = vor.u32 %v10651_v21, %v8966_v59  ;;  %7047 = vst [vmem:[#allocation17 + $0x8] sm:$0xff] %v6969_v12  ;;  %v8882_v21 = vld [vmem:[#allocation14 + $0x3e4] sm:$0xf0]  ;;  %v10522_v59 = vld [vmem:[#allocation14 + $0x68] sm:$0xf0] }
 0x3f3   :  { %6770 = vmatpush.bf16.msrb.mxu3 %v9725_v1  ;;  %6687 = vmatmul.bf16.vlgmr.msra.gmra.mxu0 %v12015_v11  ;;  %v9641_v1 = vor.u32 %v10819_v17, %v9638_v18  ;;  %v9972_v17 = vld [vmem:[#allocation14 + $0xc50] sm:$0xf]  ;;  %v8885_v20 = vor.u32 %v10630_v35, %v8882_v21  ;;  %v9890_v35 = vld [vmem:[#allocation14 + $0xbc4] sm:$0xf0] }
 0x3f4   :  { %6726 = vmatmul.bf16.vlgmr.msra.gmra.mxu3 %v11833_v2  ;;  %6765 = vmatmul.bf16.vlgmr.msrb.gmra.mxu2 %v11922_v7  ;;  %v12155_v15 = vadd.f32 %v12090_v41, %v6442_v14  ;;  %v9526_v12 = vld [vmem:[#allocation14 + $0x8ec] sm:$0xf0]  ;;  %v8412_v14 = vld [vmem:[#allocation14 + $0x18] sm:$0xf]  ;;  %v9973_v30 = vor.u32 %v10906_v34, %v9972_v17 }
 0x3f5   :  { %6809 = vmatpush.bf16.msra.mxu2 %v8609_v31  ;;  %v8525_v31 = vor.u32 %v10543_v47, %v8524_v9  ;;  %v10623_v9 = vld [vmem:[#allocation14 + $0x394] sm:$0xf]  ;;  %v8854_v47 = vld [vmem:[#allocation14 + $0x3ac] sm:$0xf0] }
 0x3f6   :  { %6693 = vmatpush.bf16.msra.mxu1 %v10141_v48  ;;  %6732 = vmatpush.bf16.msrb.mxu0 %v9025_v46  ;;  %v10920_v48 = vld [vmem:[#allocation14 + $0xcd8] sm:$0xf0]  ;;  %v6507_v46 = vadd.f32 %v12127_v43, %v3877_v55  ;;  %v6443_v58 = vpop.f32.mrf.mxu1  ;;  %v9274_v55 = vld [vmem:[#allocation14 + $0x6f4] sm:$0xf0]  ;;  %v8857_v29 = vor.u32 %v10623_v9, %v8854_v47  ;;  %v8776_v21 = vld [vmem:[#allocation14 + $0x2f0] sm:$0xf] }
 0x3f7   :  { %6771 = vmatpush.bf16.msrb.mxu3 %v9697_v52  ;;  %v10805_v52 = vld [vmem:[#allocation14 + $0x944] sm:$0xf]  ;;  %v6519_v41 = vpop.f32.mrf.mxu3  ;;  %v10029_v43 = vor.u32 %v10920_v48, %v10028_v0  ;;  %v8413_v0 = vor.u32 %v10515_v42, %v8412_v14  ;;  %v9277_v48 = vor.u32 %v10728_v3, %v9274_v55  ;;  %v9190_v34 = vld [vmem:[#allocation14 + $0x64c] sm:$0xf0]  ;;  %v10875_v9 = vld [vmem:[#allocation14 + $0xb74] sm:$0xf] }
 0x3f8   :  { %v12160_v26 = vadd.f32 %v6519_v41, %v6507_v46  ;;  %v6482_v56 = vpop.f32.mrf.mxu0  ;;  %v9918_v41 = vld [vmem:[#allocation14 + $0xbfc] sm:$0xf0]  ;;  %v10781_v58 = vld [vmem:[#allocation14 + $0x880] sm:$0xf0]  ;;  %v9862_v47 = vld [vmem:[#allocation14 + $0xb8c] sm:$0xf0] }
 0x3f9   :  { %6810 = vmatpush.bf16.msra.mxu2 %v8581_v54  ;;  %v12158_v54 = vpop.f32.mrf.mxu2  ;;  %v10767_v14 = vld [vmem:[#allocation14 + $0x810] sm:$0xf0]  ;;  %v9865_v3 = vor.u32 %v10875_v9, %v9862_v47  ;;  %v10700_v55 = vld [vmem:[#allocation14 + $0x5fc] sm:$0xf]  ;;  %v9078_v47 = vld [vmem:[#allocation14 + $0x56c] sm:$0xf0] }
 0x3fa   :  { %6694 = vmatpush.bf16.msra.mxu1 %v10113_v4  ;;  %6733 = vmatpush.bf16.msrb.mxu0 %v8997_v25  ;;  %v10913_v4 = vld [vmem:[#allocation14 + $0xca0] sm:$0xf0]  ;;  %v9585_v25 = vor.u32 %v10805_v52, %v9582_v51  ;;  %v8804_v51 = vld [vmem:[#allocation14 + $0x328] sm:$0xf]  ;;  %v10679_v9 = vld [vmem:[#allocation14 + $0x554] sm:$0xf] }
 0x3fb   :  { %6772 = vmatpush.bf16.msrb.mxu3 %v9669_v10  ;;  %v9554_v10 = vld [vmem:[#allocation14 + $0x924] sm:$0xf0]  ;;  %v10001_v18 = vor.u32 %v10913_v4, %v10000_v61  ;;  %v10889_v52 = vld [vmem:[#allocation14 + $0xbe4] sm:$0xf]  ;;  %v8805_v4 = vor.u32 %v10613_v8, %v8804_v51 }
 0x3fc   :  { %v9557_v36 = vor.u32 %v10798_v57, %v9554_v10  ;;  %v9218_v61 = vld [vmem:[#allocation14 + $0x684] sm:$0xf0]  ;;  %v6468_v57 = vadd.f32 %v12125_v6, %v12155_v15  ;;  %v10606_v10 = vld [vmem:[#allocation14 + $0x308] sm:$0xf0] }
 0x3fd   :  { %6811 = vmatpush.bf16.msra.mxu2 %v8553_v24  ;;  %v8440_v24 = vld [vmem:[#allocation14 + $0x50] sm:$0xf]  ;;  %v8777_v6 = vor.u32 %v10606_v10, %v8776_v21  ;;  %v9778_v10 = vld [vmem:[#allocation14 + $0xae4] sm:$0xf0] }
 0x3fe   :  { %6695 = vmatpush.bf16.msra.mxu1 %v10085_v37  ;;  %6734 = vmatpush.bf16.msrb.mxu0 %v8969_v23  ;;  %v8441_v13 = vor.u32 %v10522_v59, %v8440_v24  ;;  %v10791_v37 = vld [vmem:[#allocation14 + $0x8d4] sm:$0xf]  ;;  %v9448_v24 = vld [vmem:[#allocation14 + $0x830] sm:$0xf]  ;;  %v10774_v59 = vld [vmem:[#allocation14 + $0x848] sm:$0xf0] }
 0x3ff   :  { %6773 = vmatpush.bf16.msrb.mxu3 %v9641_v1  ;;  %v6521_v23 = vpop.f32.mrf.mxu3  ;;  %v10896_v1 = vld [vmem:[#allocation14 + $0xc1c] sm:$0xf]  ;;  %v9449_v15 = vor.u32 %v10774_v59, %v9448_v24  ;;  %v8664_v24 = vld [vmem:[#allocation14 + $0x210] sm:$0xf] }
 0x401   :  { %6812 = vmatpush.bf16.msra.mxu2 %v8525_v31  ;;  %v6560_v38 = vpop.f32.mrf.mxu2  ;;  %v9946_v31 = vld [vmem:[#allocation14 + $0xc34] sm:$0xf0] }
 0x402   :  { %6696 = vmatpush.bf16.msra.mxu1 %v10057_v44  ;;  %6735 = vmatpush.bf16.msrb.mxu0 %v8941_v28  ;;  %v10788_v44 = vld [vmem:[#allocation14 + $0x8b8] sm:$0xf0]  ;;  %v9529_v28 = vor.u32 %v10791_v37, %v9526_v12  ;;  %v9949_v46 = vor.u32 %v10896_v1, %v9946_v31  ;;  %v10599_v37 = vld [vmem:[#allocation14 + $0x2d0] sm:$0xf0]  ;;  %v9420_v12 = vld [vmem:[#allocation14 + $0x7f8] sm:$0xf] }
 0x403   :  { %6774 = vmatpush.bf16.msrb.mxu3 %v9613_v50  ;;  %v10721_v50 = vld [vmem:[#allocation14 + $0x6a4] sm:$0xf]  ;;  %v9505_v27 = vor.u32 %v10788_v44, %v9504_v5  ;;  %v9162_v1 = vld [vmem:[#allocation14 + $0x614] sm:$0xf0]  ;;  %v10868_v31 = vld [vmem:[#allocation14 + $0xb3c] sm:$0xf] }
 0x404   :  { %v9392_v44 = vld [vmem:[#allocation14 + $0x7c0] sm:$0xf] }
 0x405   :  { %6813 = vmatpush.bf16.msra.mxu2 %v8497_v49  ;;  %v9246_v49 = vld [vmem:[#allocation14 + $0x6bc] sm:$0xf0] }
 0x406   :  { %6697 = vmatpush.bf16.msra.mxu1 %v10029_v43  ;;  %6736 = vmatpush.bf16.msrb.mxu0 %v8913_v33  ;;  %v9249_v56 = vor.u32 %v10721_v50, %v9246_v49  ;;  %v9921_v43 = vor.u32 %v10889_v52, %v9918_v41  ;;  %v10714_v33 = vld [vmem:[#allocation14 + $0x66c] sm:$0xf]  ;;  %v9134_v50 = vld [vmem:[#allocation14 + $0x5dc] sm:$0xf0]  ;;  %v8692_v41 = vld [vmem:[#allocation14 + $0x248] sm:$0xf] }
 0x407   :  { %6775 = vmatpush.bf16.msrb.mxu3 %v9585_v25  ;;  %v9477_v25 = vor.u32 %v10781_v58, %v9476_v19  ;;  %v9221_v17 = vor.u32 %v10714_v33, %v9218_v61  ;;  %v9806_v52 = vld [vmem:[#allocation14 + $0xb1c] sm:$0xf0]  ;;  %v10585_v19 = vld [vmem:[#allocation14 + $0x260] sm:$0xf0]  ;;  %v9364_v58 = vld [vmem:[#allocation14 + $0x788] sm:$0xf] }
 0x409   :  { %6814 = vmatpush.bf16.msra.mxu2 %v8469_v32  ;;  %v10882_v32 = vld [vmem:[#allocation14 + $0xbac] sm:$0xf] }
 0x40a   :  { %6698 = vmatpush.bf16.msra.mxu1 %v10001_v18  ;;  %6737 = vmatpush.bf16.msrb.mxu0 %v8885_v20  ;;  %v9893_v18 = vor.u32 %v10882_v32, %v9890_v35  ;;  %v10707_v20 = vld [vmem:[#allocation14 + $0x634] sm:$0xf]  ;;  %v9106_v32 = vld [vmem:[#allocation14 + $0x5a4] sm:$0xf0]  ;;  %v8693_v35 = vor.u32 %v10585_v19, %v8692_v41 }
 0x40b   :  { %6776 = vmatpush.bf16.msrb.mxu3 %v9557_v36  ;;  %v8748_v36 = vld [vmem:[#allocation14 + $0x2b8] sm:$0xf]  ;;  %v9193_v42 = vor.u32 %v10707_v20, %v9190_v34  ;;  %v10746_v20 = vld [vmem:[#allocation14 + $0x768] sm:$0xf0]  ;;  %v9700_v19 = vld [vmem:[#allocation14 + $0xa28] sm:$0xf] }
 0x40c   :  { %v8749_v40 = vor.u32 %v10599_v37, %v8748_v36  ;;  %v10847_v36 = vld [vmem:[#allocation14 + $0xa94] sm:$0xf] }
 0x40d   :  { %6815 = vmatpush.bf16.msra.mxu2 %v8441_v13  ;;  %v6481_v13 = vadd.f32 %v12152_v60, %v6468_v57  ;;  %v8720_v60 = vld [vmem:[#allocation14 + $0x280] sm:$0xf]  ;;  %v10854_v57 = vld [vmem:[#allocation14 + $0xacc] sm:$0xf] }
 0x40e   :  { %6699 = vmatpush.bf16.msra.mxu1 %v9973_v30  ;;  %6738 = vmatpush.bf16.msrb.mxu0 %v8857_v29  ;;  %v6493_v23 = vpop.f32.mrf.mxu1  ;;  %v9421_v30 = vor.u32 %v10767_v14, %v9420_v12  ;;  %v9834_v29 = vld [vmem:[#allocation14 + $0xb54] sm:$0xf0]  ;;  %v8721_v49 = vor.u32 %v10592_v63, %v8720_v60  ;;  %v9750_v12 = vld [vmem:[#allocation14 + $0xaac] sm:$0xf0]  ;;  %v9728_v63 = vld [vmem:[#allocation14 + $0xa60] sm:$0xf] }
 0x40f   :  { %6777 = vmatpush.bf16.msrb.mxu3 %v9529_v28  ;;  %v6494_v38 = vadd.f32 %v6493_v23, %v6481_v13  ;;  %v10760_v28 = vld [vmem:[#allocation14 + $0x7d8] sm:$0xf0]  ;;  %v8636_v14 = vld [vmem:[#allocation14 + $0x1d8] sm:$0xf]  ;;  %v10571_v23 = vld [vmem:[#allocation14 + $0x1f0] sm:$0xf0]  ;;  %v9753_v60 = vor.u32 %v10847_v36, %v9750_v12 }
 0x410   :  { %v10086_v36 = vld [vmem:[#allocation14 + $0xd4c] sm:$0xf0]  ;;  %v10655_v12 = vld [vmem:[#allocation14 + $0x490] sm:$0xf0] }
 0x411   :  { %6816 = vmatpush.bf16.msra.mxu2 %v8413_v0  ;;  %6700 = vmatmul.bf16.vlgmr.msra.gmra.mxu1 %v12037_v22  ;;  %v10180_v5 = vmul.f32 -1.442695, %v6494_v38  ;;  %v9165_v0 = vor.u32 %v10700_v55, %v9162_v1  ;;  %v10739_v55 = vld [vmem:[#allocation14 + $0x730] sm:$0xf0]  ;;  %v10952_v1 = vld [vmem:[#allocation14 + $0xddc] sm:$0xf] }
 0x412   :  { %6744 = vmatpush.bf16.msrb.mxu1 %v9277_v48  ;;  %6783 = vmatpush.bf16.msra.mxu0 %v9949_v46  ;;  %v9837_v48 = vor.u32 %v10868_v31, %v9834_v29  ;;  %v10693_v46 = vld [vmem:[#allocation14 + $0x5c4] sm:$0xf]  ;;  %v10170_v31 = vld [vmem:[#allocation14 + $0xdf4] sm:$0xf0]  ;;  %v9081_v29 = vor.u32 %v10679_v9, %v9078_v47  ;;  %v10931_v47 = vld [vmem:[#allocation14 + $0xd34] sm:$0xf] }
 0x413   :  { %6822 = vmatpush.bf16.msra.mxu3 %v8833_v45  ;;  %6739 = vmatmul.bf16.vlgmr.msrb.gmra.mxu0 %v11850_v53  ;;  %11011 = vpow2.f32 %v10180_v5  ;;  %v9393_v45 = vor.u32 %v10760_v28, %v9392_v44  ;;  %v9137_v61 = vor.u32 %v10693_v46, %v9134_v50  ;;  %v10844_v5 = vld [vmem:[#allocation14 + $0xa78] sm:$0xf0]  ;;  %v8637_v44 = vor.u32 %v10571_v23, %v8636_v14  ;;  %v10945_v46 = vld [vmem:[#allocation14 + $0xda4] sm:$0xf]  ;;  %v9644_v23 = vld [vmem:[#allocation14 + $0x9b8] sm:$0xf] }
 0x414   :  { %6778 = vmatmul.bf16.vlgmr.msrb.gmra.mxu3 %v11971_v16  ;;  %6817 = vmatmul.bf16.vlgmr.msra.gmra.mxu2 %v11796_v62  ;;  %v12169_v62 = vpop.f32.mrf.mxu0 }
 0x415   :  { %6861 = vmatpush.bf16.msrb.mxu2 %v9505_v27  ;;  %v10861_v27 = vld [vmem:[#allocation14 + $0xb04] sm:$0xf] }
 0x416   :  { %6745 = vmatpush.bf16.msrb.mxu1 %v9249_v56  ;;  %6784 = vmatpush.bf16.msra.mxu0 %v9921_v43  ;;  %v10753_v56 = vld [vmem:[#allocation14 + $0x7a0] sm:$0xf0]  ;;  %v6495_v43 = vpop.f32.mrf.mxu1 }
 0x417   :  { %6823 = vmatpush.bf16.msra.mxu3 %v8805_v4  ;;  %v12171_v51 = vpop.f32.mrf.mxu3  ;;  %v12173_v8 = vpop.f32.mrf.mxu2  ;;  %v9809_v4 = vor.u32 %v10861_v27, %v9806_v52  ;;  %v9365_v21 = vor.u32 %v10753_v56, %v9364_v58  ;;  %v9028_v27 = vld [vmem:[#allocation14 + $0x4e8] sm:$0xf]  ;;  %v10669_v52 = vld [vmem:[#allocation14 + $0x500] sm:$0xf0] }
 0x418   :  { %v10837_v58 = vld [vmem:[#allocation14 + $0xa40] sm:$0xf0] }
 0x419   :  { %6862 = vmatpush.bf16.msrb.mxu2 %v9477_v25  ;;  %v10686_v25 = vld [vmem:[#allocation14 + $0x58c] sm:$0xf]  ;;  %v11012_v59 = vpop.eup %11011  ;;  %v11032_v56 = vld [vmem:[#allocation16] sm:$0x7f] }
 0x41a   :  { %6746 = vmatpush.bf16.msrb.mxu1 %v9221_v17  ;;  %6785 = vmatpush.bf16.msra.mxu0 %v9893_v18  ;;  %v10578_v17 = vld [vmem:[#allocation14 + $0x228] sm:$0xf0]  ;;  %v9336_v18 = vld [vmem:[#allocation14 + $0x750] sm:$0xf]  ;;  %v12175_v34 = vadd.f32 1.0, %v11012_v59  ;;  %v12179_v43 = vunpack.c.h.bf16 %v11032_v56 }
 0x41b   :  { %6824 = vmatpush.bf16.msra.mxu3 %v8777_v6  ;;  %v9109_v6 = vor.u32 %v10686_v25, %v9106_v32  ;;  %v8665_v13 = vor.u32 %v10578_v17, %v8664_v24  ;;  %v9337_v37 = vor.u32 %v10746_v20, %v9336_v18  ;;  %v10938_v25 = vld [vmem:[#allocation14 + $0xd6c] sm:$0xf]  ;;  %v10114_v32 = vld [vmem:[#allocation14 + $0xd84] sm:$0xf0]  ;;  %v9672_v17 = vld [vmem:[#allocation14 + $0x9f0] sm:$0xf] }
 0x41c   :  { %v6534_v33 = vpop.f32.mrf.mxu0  ;;  %11013 = vrcp.f32 %v12175_v34  ;;  %v6980_v59 = vand.u32 2147483647, %v12175_v34  ;;  %v10830_v18 = vld [vmem:[#allocation14 + $0xa08] sm:$0xf0]  ;;  %v3864_v20 = vperm.slane %v12179_v43, 0  ;;  %vm6976_vm2 = vweird.f32 %v12175_v34 }
 0x41d   :  { %6863 = vmatpush.bf16.msrb.mxu2 %v9449_v15  ;;  %v9781_v15 = vor.u32 %v10854_v57, %v9778_v10  ;;  %v9000_v57 = vld [vmem:[#allocation14 + $0x4b0] sm:$0xf]  ;;  %v10662_v10 = vld [vmem:[#allocation14 + $0x4c8] sm:$0xf0] }
 0x41e   :  { %6747 = vmatpush.bf16.msrb.mxu1 %v9193_v42  ;;  %6786 = vmatpush.bf16.msra.mxu0 %v9865_v3  ;;  %v9308_v3 = vld [vmem:[#allocation14 + $0x718] sm:$0xf]  ;;  %v9001_v9 = vor.u32 %v10662_v10, %v9000_v57  ;;  %vm6981_vm4 = vcmp.eq.f32.partialorder %v6980_v59, 8.507059e+37  ;;  %v9560_v57 = vld [vmem:[#allocation14 + $0x910] sm:$0xf] }
 0x41f   :  { %6825 = vmatpush.bf16.msra.mxu3 %v8749_v40  ;;  %v6573_v38 = vpop.f32.mrf.mxu3  ;;  %v6612_v42 = vpop.f32.mrf.mxu2  ;;  %v9056_v40 = vld [vmem:[#allocation14 + $0x520] sm:$0xf]  ;;  %v9309_v28 = vor.u32 %v10739_v55, %v9308_v3  ;;  %v10802_v10 = vld [vmem:[#allocation14 + $0x928] sm:$0xf0] }
 0x420   :  { %v3878_v42 = vperm.slane %v3864_v20, 0  ;;  %v9561_v20 = vor.u32 %v10802_v10, %v9560_v57 }
 0x421   :  { %6864 = vmatpush.bf16.msrb.mxu2 %v9421_v30  ;;  %v10676_v30 = vld [vmem:[#allocation14 + $0x538] sm:$0xf0] }
 0x422   :  { %6748 = vmatpush.bf16.msrb.mxu1 %v9165_v0  ;;  %6787 = vmatpush.bf16.msra.mxu0 %v9837_v48  ;;  %v10173_v0 = vor.u32 %v10952_v1, %v10170_v31  ;;  %v9057_v48 = vor.u32 %v10676_v30, %v9056_v40  ;;  %v11014_v50 = vpop.eup %11013  ;;  %v10089_v31 = vor.u32 %v10931_v47, %v10086_v36  ;;  %v10924_v30 = vld [vmem:[#allocation14 + $0xcfc] sm:$0xf] }
 0x423   :  { %6826 = vmatpush.bf16.msra.mxu3 %v8721_v49  ;;  %v9729_v49 = vor.u32 %v10844_v5, %v9728_v63  ;;  %v6972_v41 = vmul.f32 %v11014_v50, %v12175_v34  ;;  %vm6977_vm1 = vweird.f32 %v11014_v50  ;;  %v8944_v63 = vld [vmem:[#allocation14 + $0x440] sm:$0xf]  ;;  %v10648_v5 = vld [vmem:[#allocation14 + $0x458] sm:$0xf0] }
 0x424   :  { %vm6978_vm3 = vmor %vm6976_vm2, %vm6977_vm1 }
 0x425   :  { %6865 = vmatpush.bf16.msrb.mxu2 %v9393_v45  ;;  %v10142_v45 = vld [vmem:[#allocation14 + $0xdbc] sm:$0xf0]  ;;  %v6973_v33 = vsub.f32 1.0, %v6972_v41 }
 0x426   :  { %6749 = vmatpush.bf16.msrb.mxu1 %v9137_v61  ;;  %6788 = vmatpush.bf16.msra.mxu0 %v9809_v4  ;;  %v10145_v61 = vor.u32 %v10945_v46, %v10142_v45  ;;  %v9029_v4 = vor.u32 %v10669_v52, %v9028_v27  ;;  %v6611_v46 = vadd.f32 %v12173_v8, %v3878_v42  ;;  %v8916_v45 = vld [vmem:[#allocation14 + $0x408] sm:$0xf]  ;;  %v10641_v27 = vld [vmem:[#allocation14 + $0x420] sm:$0xf0] }
 0x427   :  { %6827 = vmatpush.bf16.msra.mxu3 %v8693_v35  ;;  %v6982_v35 = vand.u32 2147483648, %v12175_v34  ;;  %v6974_v24 = vmul.f32 %v11014_v50, %v6973_v33  ;;  %v10823_v34 = vld [vmem:[#allocation14 + $0x9d0] sm:$0xf0] }
 0x429   :  { %6866 = vmatpush.bf16.msrb.mxu2 %v9365_v21  ;;  %v9701_v21 = vor.u32 %v10837_v58, %v9700_v19  ;;  %v9588_v19 = vld [vmem:[#allocation14 + $0x948] sm:$0xf] }
 0x42a   :  { %6750 = vmatpush.bf16.msrb.mxu1 %v9109_v6  ;;  %6789 = vmatpush.bf16.msra.mxu0 %v9781_v15  ;;  %v6975_v6 = vadd.f32 %v11014_v50, %v6974_v24  ;;  %v10117_v15 = vor.u32 %v10938_v25, %v10114_v32  ;;  %v10910_v25 = vld [vmem:[#allocation14 + $0xc8c] sm:$0xf]  ;;  %v10002_v32 = vld [vmem:[#allocation14 + $0xca4] sm:$0xf0] }
 0x42b   :  { %6828 = vmatpush.bf16.msra.mxu3 %v8665_v13  ;;  %v6983_v13 = vor.u32 1.1754944e-38, %v6982_v35  ;;  %v8888_v35 = vld [vmem:[#allocation14 + $0x3d0] sm:$0xf]  ;;  %v10005_v24 = vor.u32 %v10910_v25, %v10002_v32  ;;  %v9140_v25 = vld [vmem:[#allocation14 + $0x5c8] sm:$0xf] }
 0x42c   :  { %v6979_v14 = vsel %vm6978_vm3, %v11014_v50, %v6975_v6  ;;  %v8860_v6 = vld [vmem:[#allocation14 + $0x398] sm:$0xf]  ;;  %v10865_v32 = vld [vmem:[#allocation14 + $0xb20] sm:$0xf0] }
 0x42d   :  { %6867 = vmatpush.bf16.msrb.mxu2 %v9337_v37  ;;  %v8972_v37 = vld [vmem:[#allocation14 + $0x478] sm:$0xf]  ;;  %v6984_v38 = vsel %vm6981_vm4, %v6983_v13, %v6979_v14  ;;  %v10795_v13 = vld [vmem:[#allocation14 + $0x8f0] sm:$0xf0]  ;;  %v10900_v14 = vld [vmem:[#allocation14 + $0xc38] sm:$0xf0] }
 0x42e   :  { %6751 = vmatpush.bf16.msrb.mxu1 %v9081_v29  ;;  %6790 = vmatpush.bf16.msra.mxu0 %v9753_v60  ;;  %v6545_v3 = vpop.f32.mrf.mxu1  ;;  %7048 = vst [vmem:[#allocation17 + $0x10] sm:$0xff] %v6984_v38  ;;  %v8973_v40 = vor.u32 %v10655_v12, %v8972_v37  ;;  %v9645_v29 = vor.u32 %v10823_v34, %v9644_v23  ;;  %v10058_v60 = vld [vmem:[#allocation14 + $0xd14] sm:$0xf0]  ;;  %v10732_v37 = vld [vmem:[#allocation14 + $0x6f8] sm:$0xf0] }
 0x42f   :  { %6829 = vmatpush.bf16.msra.mxu3 %v8637_v44  ;;  %v10816_v44 = vld [vmem:[#allocation14 + $0x998] sm:$0xf0]  ;;  %v9952_v12 = vld [vmem:[#allocation14 + $0xc20] sm:$0xf] }
 0x430   :  { %v12192_v55 = vpop.f32.mrf.mxu0  ;;  %v9953_v42 = vor.u32 %v10900_v14, %v9952_v12  ;;  %v10851_v12 = vld [vmem:[#allocation14 + $0xab0] sm:$0xf0]  ;;  %v10176_v14 = vld [vmem:[#allocation14 + $0xde0] sm:$0xf] }
 0x431   :  { %6868 = vmatpush.bf16.msrb.mxu2 %v9309_v28  ;;  %6752 = vmatmul.bf16.vlgmr.msrb.gmra.mxu1 %v11886_v39  ;;  %v10061_v28 = vor.u32 %v10924_v30, %v10058_v60  ;;  %v9224_v60 = vld [vmem:[#allocation14 + $0x670] sm:$0xf] }
 0x432   :  { %6796 = vmatpush.bf16.msra.mxu1 %v10173_v0  ;;  %6835 = vmatpush.bf16.msrb.mxu0 %v9057_v48  ;;  %v8945_v0 = vor.u32 %v10648_v5, %v8944_v63  ;;  %v10917_v48 = vld [vmem:[#allocation14 + $0xcc4] sm:$0xf]  ;;  %v10718_v63 = vld [vmem:[#allocation14 + $0x688] sm:$0xf0]  ;;  %v9896_v5 = vld [vmem:[#allocation14 + $0xbb0] sm:$0xf] }
 0x433   :  { %6874 = vmatpush.bf16.msrb.mxu3 %v9729_v49  ;;  %6791 = vmatmul.bf16.vlgmr.msra.gmra.mxu0 %v12015_v11  ;;  %v10030_v49 = vld [vmem:[#allocation14 + $0xcdc] sm:$0xf0] }
 0x434   :  { %6830 = vmatmul.bf16.vlgmr.msra.gmra.mxu3 %v11833_v2  ;;  %6869 = vmatmul.bf16.vlgmr.msrb.gmra.mxu2 %v11922_v7  ;;  %v9673_v2 = vor.u32 %v10830_v18, %v9672_v17  ;;  %v6533_v7 = vadd.f32 %v12169_v62, %v12160_v26  ;;  %v9616_v62 = vld [vmem:[#allocation14 + $0x980] sm:$0xf]  ;;  %v10903_v17 = vld [vmem:[#allocation14 + $0xc54] sm:$0xf]  ;;  %v9974_v18 = vld [vmem:[#allocation14 + $0xc6c] sm:$0xf0] }
 0x435   :  { %v9617_v50 = vor.u32 %v10816_v44, %v9616_v62  ;;  %v10886_v62 = vld [vmem:[#allocation14 + $0xbc8] sm:$0xf0] }
 0x436   :  { %6797 = vmatpush.bf16.msra.mxu1 %v10145_v61  ;;  %6836 = vmatpush.bf16.msrb.mxu0 %v9029_v4  ;;  %v6546_v1 = vadd.f32 %v6545_v3, %v6533_v7  ;;  %v6547_v56 = vpop.f32.mrf.mxu1  ;;  %v10033_v61 = vor.u32 %v10917_v48, %v10030_v49  ;;  %v8917_v4 = vor.u32 %v10641_v27, %v8916_v45  ;;  %v9252_v3 = vld [vmem:[#allocation14 + $0x6a8] sm:$0xf]  ;;  %v9196_v48 = vld [vmem:[#allocation14 + $0x638] sm:$0xf]  ;;  %v10879_v49 = vld [vmem:[#allocation14 + $0xb90] sm:$0xf0] }
 0x437   :  { %6875 = vmatpush.bf16.msrb.mxu3 %v9701_v21  ;;  %v6623_v52 = vpop.f32.mrf.mxu3  ;;  %v12198_v41 = vpop.f32.mrf.mxu2  ;;  %v10634_v21 = vld [vmem:[#allocation14 + $0x3e8] sm:$0xf0]  ;;  %v9977_v7 = vor.u32 %v10903_v17, %v9974_v18  ;;  %v10872_v56 = vld [vmem:[#allocation14 + $0xb58] sm:$0xf0]  ;;  %v9112_v17 = vld [vmem:[#allocation14 + $0x590] sm:$0xf] }
 0x438   :  { %v12195_v26 = vadd.f32 %v12158_v54, %v6546_v1  ;;  %v10809_v54 = vld [vmem:[#allocation14 + $0x960] sm:$0xf0]  ;;  %v12200_v58 = vadd.f32 %v6623_v52, %v6611_v46  ;;  %v6586_v33 = vpop.f32.mrf.mxu0  ;;  %v8889_v59 = vor.u32 %v10634_v21, %v8888_v35  ;;  %v10711_v46 = vld [vmem:[#allocation14 + $0x650] sm:$0xf0]  ;;  %v10690_v18 = vld [vmem:[#allocation14 + $0x5a8] sm:$0xf0] }
 0x439   :  { %v9589_v8 = vor.u32 %v10809_v54, %v9588_v19  ;;  %v10725_v1 = vld [vmem:[#allocation14 + $0x6c0] sm:$0xf0]  ;;  %v9197_v52 = vor.u32 %v10711_v46, %v9196_v48  ;;  %v9840_v54 = vld [vmem:[#allocation14 + $0xb40] sm:$0xf]  ;;  %v10092_v48 = vld [vmem:[#allocation14 + $0xd38] sm:$0xf] }
 0x43a   :  { %6798 = vmatpush.bf16.msra.mxu1 %v10117_v15  ;;  %6837 = vmatpush.bf16.msrb.mxu0 %v9001_v9  ;;  %v10627_v15 = vld [vmem:[#allocation14 + $0x3b0] sm:$0xf0]  ;;  %v9532_v9 = vld [vmem:[#allocation14 + $0x8d8] sm:$0xf]  ;;  %v9253_v30 = vor.u32 %v10725_v1, %v9252_v3  ;;  %v6572_v44 = vadd.f32 %v12171_v51, %v12195_v26  ;;  %v9168_v26 = vld [vmem:[#allocation14 + $0x600] sm:$0xf] }
 0x43b   :  { %6876 = vmatpush.bf16.msrb.mxu3 %v9673_v2  ;;  %v9280_v2 = vld [vmem:[#allocation14 + $0x6e0] sm:$0xf]  ;;  %v8861_v23 = vor.u32 %v10627_v15, %v8860_v6  ;;  %v9533_v34 = vor.u32 %v10795_v13, %v9532_v9  ;;  %v10858_v6 = vld [vmem:[#allocation14 + $0xae8] sm:$0xf0]  ;;  %v9084_v13 = vld [vmem:[#allocation14 + $0x558] sm:$0xf] }
 0x43c   :  { %v9281_v38 = vor.u32 %v10732_v37, %v9280_v2  ;;  %v6585_v45 = vadd.f32 %v12192_v55, %v6572_v44  ;;  %v10697_v55 = vld [vmem:[#allocation14 + $0x5e0] sm:$0xf0]  ;;  %v10683_v2 = vld [vmem:[#allocation14 + $0x570] sm:$0xf0]  ;;  %v9756_v37 = vld [vmem:[#allocation14 + $0xa98] sm:$0xf] }
 0x43d   :  { %v10148_v1 = vld [vmem:[#allocation14 + $0xda8] sm:$0xf]  ;;  %v10935_v46 = vld [vmem:[#allocation14 + $0xd50] sm:$0xf0] }
 0x43e   :  { %6799 = vmatpush.bf16.msra.mxu1 %v10089_v31  ;;  %6838 = vmatpush.bf16.msrb.mxu0 %v8973_v40  ;;  %v9924_v31 = vld [vmem:[#allocation14 + $0xbe8] sm:$0xf]  ;;  %v10893_v40 = vld [vmem:[#allocation14 + $0xc00] sm:$0xf0] }
 0x43f   :  { %6877 = vmatpush.bf16.msrb.mxu3 %v9645_v29  ;;  %v6625_v47 = vpop.f32.mrf.mxu3  ;;  %v6664_v36 = vpop.f32.mrf.mxu2  ;;  %v9925_v29 = vor.u32 %v10893_v40, %v9924_v31  ;;  %v10949_v31 = vld [vmem:[#allocation14 + $0xdc0] sm:$0xf0] }
 0x440   :  { %v9113_v47 = vor.u32 %v10690_v18, %v9112_v17  ;;  %v9980_v18 = vld [vmem:[#allocation14 + $0xc58] sm:$0xf] }
 0x442   :  { %6800 = vmatpush.bf16.msra.mxu1 %v10061_v28  ;;  %6839 = vmatpush.bf16.msrb.mxu0 %v8945_v0  ;;  %v9225_v28 = vor.u32 %v10718_v63, %v9224_v60  ;;  %v9897_v0 = vor.u32 %v10886_v62, %v9896_v5  ;;  %v10120_v60 = vld [vmem:[#allocation14 + $0xd70] sm:$0xf]  ;;  %v10942_v63 = vld [vmem:[#allocation14 + $0xd88] sm:$0xf0] }
 0x443   :  { %6878 = vmatpush.bf16.msrb.mxu3 %v9617_v50  ;;  %v9868_v50 = vld [vmem:[#allocation14 + $0xb78] sm:$0xf] }
 0x444   :  { %v9869_v51 = vor.u32 %v10879_v49, %v9868_v50 }
 0x446   :  { %6801 = vmatpush.bf16.msra.mxu1 %v10033_v61  ;;  %6840 = vmatpush.bf16.msrb.mxu0 %v8917_v4  ;;  %v9841_v4 = vor.u32 %v10872_v56, %v9840_v54 }
 0x447   :  { %6879 = vmatpush.bf16.msrb.mxu3 %v9589_v8  ;;  %v9812_v8 = vld [vmem:[#allocation14 + $0xb08] sm:$0xf] }
 0x44a   :  { %6802 = vmatpush.bf16.msra.mxu1 %v10005_v24  ;;  %6841 = vmatpush.bf16.msrb.mxu0 %v8889_v59  ;;  %v9141_v24 = vor.u32 %v10697_v55, %v9140_v25  ;;  %v9813_v59 = vor.u32 %v10865_v32, %v9812_v8  ;;  %v10921_v25 = vld [vmem:[#allocation14 + $0xce0] sm:$0xf0] }
 0x44b   :  { %6880 = vmatpush.bf16.msrb.mxu3 %v9561_v20  ;;  %v9784_v20 = vld [vmem:[#allocation14 + $0xad0] sm:$0xf] }
 0x44c   :  { %v9785_v36 = vor.u32 %v10858_v6, %v9784_v20  ;;  %v10907_v20 = vld [vmem:[#allocation14 + $0xc70] sm:$0xf0] }
 0x44e   :  { %6803 = vmatpush.bf16.msra.mxu1 %v9977_v7  ;;  %6842 = vmatpush.bf16.msrb.mxu0 %v8861_v23  ;;  %v6597_v27 = vpop.f32.mrf.mxu1  ;;  %v10956_v7 = vld [vmem:[#allocation14 + $0xdf8] sm:$0xf0] }
 0x44f   :  { %6881 = vmatpush.bf16.msrb.mxu3 %v9533_v34  ;;  %v6598_v19 = vadd.f32 %v6597_v27, %v6585_v45  ;;  %v10177_v3 = vor.u32 %v10956_v7, %v10176_v14  ;;  %v3865_v45 = vperm.slane %v12179_v43, 2 }
 0x451   :  { %6804 = vmatmul.bf16.vlgmr.msra.gmra.mxu1 %v12037_v22  ;;  %6843 = vmatmul.bf16.vlgmr.msrb.gmra.mxu0 %v11850_v53  ;;  %v12208_v53 = vpop.f32.mrf.mxu0  ;;  %v10181_v33 = vmul.f32 -1.442695, %v6598_v19  ;;  %v3879_v56 = vperm.slane %v3865_v45, 0 }
 0x452   :  { %6848 = vmatpush.bf16.msrb.mxu1 %v9281_v38  ;;  %6887 = vmatpush.bf16.msra.mxu0 %v9953_v42  ;;  %v9085_v38 = vor.u32 %v10683_v2, %v9084_v13  ;;  %v9757_v42 = vor.u32 %v10851_v12, %v9756_v37 }
 0x453   :  { %6882 = vmatmul.bf16.vlgmr.msrb.gmra.mxu3 %v11971_v16  ;;  %v10704_v16 = vld [vmem:[#allocation14 + $0x618] sm:$0xf0]  ;;  %11015 = vpow2.f32 %v10181_v33 }
 0x454   :  { %v9169_v61 = vor.u32 %v10704_v16, %v9168_v26  ;;  %v10064_v26 = vld [vmem:[#allocation14 + $0xd00] sm:$0xf]  ;;  %v10928_v16 = vld [vmem:[#allocation14 + $0xd18] sm:$0xf0] }
 0x456   :  { %6849 = vmatpush.bf16.msrb.mxu1 %v9253_v30  ;;  %6888 = vmatpush.bf16.msra.mxu0 %v9925_v29  ;;  %v6599_v57 = vpop.f32.mrf.mxu1  ;;  %v10149_v29 = vor.u32 %v10949_v31, %v10148_v1 }
 0x457   :  { %v12210_v35 = vpop.f32.mrf.mxu3  ;;  %v12212_v21 = vpop.f32.mrf.mxu2 }
 0x458   :  { %v6715_v55 = vadd.f32 %v12212_v21, %v3879_v56 }
 0x459   :  { %v6638_v10 = vpop.f32.mrf.mxu0  ;;  %v11016_v15 = vpop.eup %11015 }
 0x45a   :  { %6850 = vmatpush.bf16.msrb.mxu1 %v9225_v28  ;;  %6889 = vmatpush.bf16.msra.mxu0 %v9897_v0  ;;  %v6937_v9 = vadd.f32 1.0, %v11016_v15  ;;  %v10121_v0 = vor.u32 %v10942_v63, %v10120_v60  ;;  %v9981_v15 = vor.u32 %v10907_v20, %v9980_v18 }
 0x45c   :  { %11017 = vrcp.f32 %v6937_v9  ;;  %v6997_v62 = vand.u32 2147483648, %v6937_v9  ;;  %v6995_v28 = vand.u32 2147483647, %v6937_v9  ;;  %vm6991_vm6 = vweird.f32 %v6937_v9 }
 0x45e   :  { %6851 = vmatpush.bf16.msrb.mxu1 %v9197_v52  ;;  %6890 = vmatpush.bf16.msra.mxu0 %v9869_v51  ;;  %v6998_v49 = vor.u32 1.1754944e-38, %v6997_v62  ;;  %vm6996_vm8 = vcmp.eq.f32.partialorder %v6995_v28, 8.507059e+37 }
 0x45f   :  { %v6677_v23 = vpop.f32.mrf.mxu3  ;;  %v6716_v34 = vpop.f32.mrf.mxu2 }
 0x462   :  { %6852 = vmatpush.bf16.msrb.mxu1 %v9169_v61  ;;  %6891 = vmatpush.bf16.msra.mxu0 %v9841_v4  ;;  %v11018_v40 = vpop.eup %11017  ;;  %v10065_v61 = vor.u32 %v10928_v16, %v10064_v26  ;;  %v10036_v4 = vld [vmem:[#allocation14 + $0xcc8] sm:$0xf] }
 0x463   :  { %v6987_v30 = vmul.f32 %v11018_v40, %v6937_v9  ;;  %vm6992_vm5 = vweird.f32 %v11018_v40  ;;  %v10037_v8 = vor.u32 %v10921_v25, %v10036_v4 }
 0x464   :  { %vm6993_vm7 = vmor %vm6991_vm6, %vm6992_vm5 }
 0x465   :  { %v6988_v5 = vsub.f32 1.0, %v6987_v30 }
 0x466   :  { %6853 = vmatpush.bf16.msrb.mxu1 %v9141_v24  ;;  %6892 = vmatpush.bf16.msra.mxu0 %v9813_v59  ;;  %v10008_v24 = vld [vmem:[#allocation14 + $0xc90] sm:$0xf]  ;;  %v10914_v59 = vld [vmem:[#allocation14 + $0xca8] sm:$0xf0] }
 0x467   :  { %v6989_v44 = vmul.f32 %v11018_v40, %v6988_v5  ;;  %v10009_v17 = vor.u32 %v10914_v59, %v10008_v24 }
 0x469   :  { %v6990_v50 = vadd.f32 %v11018_v40, %v6989_v44 }
 0x46a   :  { %6854 = vmatpush.bf16.msrb.mxu1 %v9113_v47  ;;  %6893 = vmatpush.bf16.msra.mxu0 %v9785_v36 }
 0x46b   :  { %v6994_v27 = vsel %vm6993_vm7, %v11018_v40, %v6990_v50 }
 0x46c   :  { %v6999_v52 = vsel %vm6996_vm8, %v6998_v49, %v6994_v27 }
 0x46d   :  { %7049 = vst [vmem:[#allocation17 + $0x18] sm:$0xff] %v6999_v52 }
 0x46e   :  { %6855 = vmatpush.bf16.msrb.mxu1 %v9085_v38  ;;  %6894 = vmatpush.bf16.msra.mxu0 %v9757_v42  ;;  %v6649_v19 = vpop.f32.mrf.mxu1 }
 0x470   :  { %v6688_v51 = vpop.f32.mrf.mxu0 }
 0x471   :  { %6856 = vmatmul.bf16.vlgmr.msrb.gmra.mxu1 %v11886_v39  ;;  %6895 = vmatmul.bf16.vlgmr.msra.gmra.mxu0 %v12015_v11  ;;  %v6637_v39 = vadd.f32 %v12208_v53, %v12200_v58  ;;  %v10093_v11 = vor.u32 %v10935_v46, %v10092_v48 }
 0x472   :  { %6900 = vmatpush.bf16.msra.mxu1 %v10177_v3 }
 0x473   :  { %v6650_v54 = vadd.f32 %v6649_v19, %v6637_v39 }
 0x475   :  { %v6663_v33 = vadd.f32 %v12198_v41, %v6650_v54 }
 0x476   :  { %6901 = vmatpush.bf16.msra.mxu1 %v10149_v29  ;;  %v6651_v57 = vpop.f32.mrf.mxu1  ;;  %v3866_v29 = vperm.slane %v12179_v43, 4 }
 0x477   :  { %v6727_v58 = vpop.f32.mrf.mxu3  ;;  %v6766_v53 = vpop.f32.mrf.mxu2  ;;  %v6676_v21 = vadd.f32 %v12210_v35, %v6663_v33 }
 0x478   :  { %v6728_v32 = vadd.f32 %v6727_v58, %v6715_v55  ;;  %v6690_v10 = vpop.f32.mrf.mxu0  ;;  %v3880_v48 = vperm.slane %v3866_v29, 0 }
 0x479   :  { %v6689_v9 = vadd.f32 %v6688_v51, %v6676_v21 }
 0x47a   :  { %6902 = vmatpush.bf16.msra.mxu1 %v10121_v0 }
 0x47e   :  { %6903 = vmatpush.bf16.msra.mxu1 %v10093_v11 }
 0x47f   :  { %v6729_v41 = vpop.f32.mrf.mxu3  ;;  %v6768_v6 = vpop.f32.mrf.mxu2 }
 0x482   :  { %6904 = vmatpush.bf16.msra.mxu1 %v10065_v61 }
 0x486   :  { %6905 = vmatpush.bf16.msra.mxu1 %v10037_v8 }
 0x48a   :  { %6906 = vmatpush.bf16.msra.mxu1 %v10009_v17 }
 0x48e   :  { %6907 = vmatpush.bf16.msra.mxu1 %v9981_v15  ;;  %v6701_v47 = vpop.f32.mrf.mxu1 }
 0x48f   :  { %v6702_v13 = vadd.f32 %v6701_v47, %v6689_v9 }
 0x490   :  { %v6740_v36 = vpop.f32.mrf.mxu0 }
 0x491   :  { %6908 = vmatmul.bf16.vlgmr.msra.gmra.mxu1 %v12037_v22  ;;  %v10182_v2 = vmul.f32 -1.442695, %v6702_v13  ;;  %v6741_v63 = vadd.f32 %v6740_v36, %v6728_v32 }
 0x493   :  { %11019 = vpow2.f32 %v10182_v2 }
 0x496   :  { %v6703_v14 = vpop.f32.mrf.mxu1 }
 0x497   :  { %v6779_v37 = vpop.f32.mrf.mxu3  ;;  %v6818_v12 = vpop.f32.mrf.mxu2 }
 0x498   :  { %v6742_v7 = vpop.f32.mrf.mxu0  ;;  %v6819_v50 = vadd.f32 %v6818_v12, %v3880_v48 }
 0x499   :  { %v11020_v23 = vpop.eup %11019 }
 0x49a   :  { %v6938_v34 = vadd.f32 1.0, %v11020_v23 }
 0x49c   :  { %11021 = vrcp.f32 %v6938_v34  ;;  %v7012_v31 = vand.u32 2147483648, %v6938_v34  ;;  %v7010_v40 = vand.u32 2147483647, %v6938_v34  ;;  %vm7006_vm10 = vweird.f32 %v6938_v34 }
 0x49e   :  { %v7013_v60 = vor.u32 1.1754944e-38, %v7012_v31  ;;  %vm7011_vm12 = vcmp.eq.f32.partialorder %v7010_v40, 8.507059e+37 }
 0x49f   :  { %v6781_v38 = vpop.f32.mrf.mxu3  ;;  %v6820_v42 = vpop.f32.mrf.mxu2 }
 0x4a2   :  { %v11022_v3 = vpop.eup %11021 }
 0x4a3   :  { %v7002_v1 = vmul.f32 %v11022_v3, %v6938_v34  ;;  %vm7007_vm9 = vweird.f32 %v11022_v3 }
 0x4a4   :  { %vm7008_vm11 = vmor %vm7006_vm10, %vm7007_vm9 }
 0x4a5   :  { %v7003_v22 = vsub.f32 1.0, %v7002_v1 }
 0x4a7   :  { %v7004_v35 = vmul.f32 %v11022_v3, %v7003_v22 }
 0x4a9   :  { %v7005_v30 = vadd.f32 %v11022_v3, %v7004_v35 }
 0x4ab   :  { %v7009_v5 = vsel %vm7008_vm11, %v11022_v3, %v7005_v30 }
 0x4ac   :  { %v7014_v44 = vsel %vm7011_vm12, %v7013_v60, %v7009_v5 }
 0x4ad   :  { %7050 = vst [vmem:[#allocation17 + $0x20] sm:$0xff] %v7014_v44 }
 0x4ae   :  { %v6753_v62 = vpop.f32.mrf.mxu1 }
 0x4af   :  { %v6754_v28 = vadd.f32 %v6753_v62, %v6741_v63 }
 0x4b0   :  { %v6792_v0 = vpop.f32.mrf.mxu0 }
 0x4b1   :  { %v6767_v46 = vadd.f32 %v6766_v53, %v6754_v28 }
 0x4b3   :  { %v6780_v19 = vadd.f32 %v6779_v37, %v6767_v46 }
 0x4b5   :  { %v6793_v51 = vadd.f32 %v6792_v0, %v6780_v19 }
 0x4b6   :  { %v6755_v39 = vpop.f32.mrf.mxu1 }
 0x4b7   :  { %v6831_v49 = vpop.f32.mrf.mxu3  ;;  %v6870_v27 = vpop.f32.mrf.mxu2 }
 0x4b8   :  { %v6832_v45 = vadd.f32 %v6831_v49, %v6819_v50  ;;  %v6794_v11 = vpop.f32.mrf.mxu0 }
 0x4bf   :  { %v6833_v52 = vpop.f32.mrf.mxu3  ;;  %v6872_v43 = vpop.f32.mrf.mxu2 }
 0x4ce   :  { %v6805_v26 = vpop.f32.mrf.mxu1  ;;  %v6844_v16 = vpop.f32.mrf.mxu0 }
 0x4cf   :  { %v6806_v54 = vadd.f32 %v6805_v26, %v6793_v51  ;;  %v6845_v18 = vadd.f32 %v6844_v16, %v6832_v45 }
 0x4d1   :  { %v10183_v56 = vmul.f32 -1.442695, %v6806_v54 }
 0x4d3   :  { %11023 = vpow2.f32 %v10183_v56 }
 0x4d6   :  { %v6883_v33 = vpop.f32.mrf.mxu3  ;;  %v6807_v61 = vpop.f32.mrf.mxu1 }
 0x4d7   :  { %v6846_v4 = vpop.f32.mrf.mxu0 }
 0x4d9   :  { %v11024_v25 = vpop.eup %11023 }
 0x4da   :  { %v6939_v55 = vadd.f32 1.0, %v11024_v25 }
 0x4dc   :  { %11025 = vrcp.f32 %v6939_v55  ;;  %v7027_v57 = vand.u32 2147483648, %v6939_v55  ;;  %v7025_v24 = vand.u32 2147483647, %v6939_v55  ;;  %vm7021_vm14 = vweird.f32 %v6939_v55 }
 0x4de   :  { %v6885_v58 = vpop.f32.mrf.mxu3  ;;  %v7028_v17 = vor.u32 1.1754944e-38, %v7027_v57  ;;  %vm7026_vm0 = vcmp.eq.f32.partialorder %v7025_v24, 8.507059e+37 }
 0x4e2   :  { %v11026_v53 = vpop.eup %11025 }
 0x4e3   :  { %v7017_v8 = vmul.f32 %v11026_v53, %v6939_v55  ;;  %vm7022_vm13 = vweird.f32 %v11026_v53 }
 0x4e4   :  { %vm7023_vm15 = vmor %vm7021_vm14, %vm7022_vm13 }
 0x4e5   :  { %v7018_v32 = vsub.f32 1.0, %v7017_v8 }
 0x4e7   :  { %v7019_v10 = vmul.f32 %v11026_v53, %v7018_v32 }
 0x4e9   :  { %v7020_v59 = vadd.f32 %v11026_v53, %v7019_v10 }
 0x4eb   :  { %v7024_v20 = vsel %vm7023_vm15, %v11026_v53, %v7020_v59 }
 0x4ec   :  { %v7029_v6 = vsel %vm7026_vm0, %v7028_v17, %v7024_v20 }
 0x4ed   :  { %7051 = vst [vmem:[#allocation17 + $0x28] sm:$0xff] %v7029_v6 }
 0x4ee   :  { %v6857_v41 = vpop.f32.mrf.mxu1  ;;  %v6896_v21 = vpop.f32.mrf.mxu0 }
 0x4ef   :  { %v6858_v15 = vadd.f32 %v6857_v41, %v6845_v18 }
 0x4f1   :  { %v6871_v9 = vadd.f32 %v6870_v27, %v6858_v15 }
 0x4f3   :  { %v6884_v13 = vadd.f32 %v6883_v33, %v6871_v9 }
 0x4f5   :  { %v6897_v2 = vadd.f32 %v6896_v21, %v6884_v13 }
 0x4f6   :  { %v6859_v47 = vpop.f32.mrf.mxu1  ;;  %v6898_v36 = vpop.f32.mrf.mxu0 }
 0x50e   :  { %v6909_v37 = vpop.f32.mrf.mxu1 }
 0x50f   :  { %v6910_v12 = vadd.f32 %v6909_v37, %v6897_v2 }
 0x511   :  { %v10184_v14 = vmul.f32 -1.442695, %v6910_v12 }
 0x513   :  { %11027 = vpow2.f32 %v10184_v14 }
 0x516   :  { %v6911_v7 = vpop.f32.mrf.mxu1 }
 0x519   :  { %v11028_v23 = vpop.eup %11027 }
 0x51a   :  { %v6940_v34 = vadd.f32 1.0, %v11028_v23 }
 0x51c   :  { %11029 = vrcp.f32 %v6940_v34  ;;  %v7042_v1 = vand.u32 2147483648, %v6940_v34  ;;  %v7040_v31 = vand.u32 2147483647, %v6940_v34  ;;  %vm7036_vm2 = vweird.f32 %v6940_v34 }
 0x51e   :  { %v7043_v40 = vor.u32 1.1754944e-38, %v7042_v1  ;;  %vm7041_vm4 = vcmp.eq.f32.partialorder %v7040_v31, 8.507059e+37 }
 0x522   :  { %v11030_v38 = vpop.eup %11029 }
 0x523   :  { %v7032_v42 = vmul.f32 %v11030_v38, %v6940_v34  ;;  %vm7037_vm1 = vweird.f32 %v11030_v38 }
 0x524   :  { %vm7038_vm3 = vmor %vm7036_vm2, %vm7037_vm1 }
 0x525   :  { %v7033_v3 = vsub.f32 1.0, %v7032_v42 }
 0x527   :  { %v7034_v22 = vmul.f32 %v11030_v38, %v7033_v3 }
 0x529   :  { %v7035_v35 = vadd.f32 %v11030_v38, %v7034_v22 }
 0x52b   :  { %v7039_v30 = vsel %vm7038_vm3, %v11030_v38, %v7035_v35 }
 0x52c   :  { %v7044_v29 = vsel %vm7041_vm4, %v7043_v40, %v7039_v30 }
 0x52d   :  { %7052 = vst [vmem:[#allocation17 + $0x30] sm:$0xff] %v7044_v29 }
 0x52e   :  { %7063 = dma.vmem_to_hbm [thread:$0]  %s7059_s8, 896, %s7061_s13, [#allocation4]  }
 0x52f   :  { %11283 = dma.done.wait [#allocation4], 896  }
 0x530   :  { %11284 = vsyncadd [#allocation4], 4294966400 }
 0x531   :  { %7068 = vsyncpa [#allocation3], 1 }
 0x532   :  { %7069 = vsyncpa [#allocation6], 1 }
 0x533   :  { %7070 = vsyncpa [#allocation9], 1 }
 0x534   :  { %7071 = vsyncpa [#allocation12], 1 }
 0x535   :  { %7072 = vsyncpa [#allocation15], 1 }
 0x536   :  { %7073 = vsyncpa [#allocation4], 1 }

</bundles_post_ra>
